<compile_context>
chip_gen: v5e
topology: v5e:2x2
jax: 0.10.0
libtpu: 0.0.40
codegen_flags: <defaults>
</compile_context>

<pallas_src>
import numpy as np
import jax
import jax.numpy as jnp
from jax.experimental import pallas as pl
from jax.experimental.pallas import tpu as pltpu


# ---------------------------------------------------------------------------
# ConvAutoencoder2(bottle=16) architecture
# (kind, cin, cout, k, stride, padding, output_padding, relu_after)
# ---------------------------------------------------------------------------
LAYER_CFG = [
    ("conv",   1,  4, 3, 2, 1, 0, False),
    ("conv",   4,  4, 3, 1, 1, 0, True),
    ("conv",   4,  8, 5, 2, 2, 0, False),
    ("conv",   8,  8, 5, 1, 2, 0, True),
    ("conv",   8, 16, 5, 2, 2, 0, False),   # encoder output -> latent
    ("convT", 16,  8, 5, 2, 2, 1, False),
    ("conv",   8,  8, 5, 1, 2, 0, True),
    ("convT",  8,  4, 5, 2, 2, 1, False),
    ("conv",   4,  4, 3, 1, 1, 0, True),
    ("convT",  4,  1, 3, 2, 1, 1, False),
]
LATENT_IDX = 4
GROUP0 = 8          # net H downsampling of the encoder (three stride-2 convs)


def _round_up(x, m):
    return (x + m - 1) // m * m


def _out_hw(kind, hin, win, k, s, p, op):
    if kind == "conv":
        return (hin + 2 * p - k) // s + 1, (win + 2 * p - k) // s + 1
    return (hin - 1) * s - 2 * p + k + op, (win - 1) * s - 2 * p + k + op


def _make_plan(H, W):
    assert H % GROUP0 == 0, "H must be divisible by 8 for this kernel"
    plan = []
    h, w, g = H, W, GROUP0
    for (kind, cin, cout, k, s, p, op, relu) in LAYER_CFG:
        ho, wo = _out_hw(kind, h, w, k, s, p, op)
        g_in = g
        g_out = g // s if kind == "conv" else g * s
        assert h % g_in == 0 and ho % g_out == 0
        assert h // g_in == ho // g_out          # invariant grouped-row count R
        plan.append(dict(kind=kind, cin=cin, cout=cout, k=k, s=s, p=p, op=op,
                         relu=relu, hin=h, win=w, hout=ho, wout=wo,
                         g_in=g_in, g_out=g_out))
        h, w, g = ho, wo, g_out
    assert g == GROUP0
    return plan


def _tap_pairs(lay):
    """(j_out, kh, d, j_in): H-direction tap placements in grouped coordinates."""
    kind, k, s, p = lay["kind"], lay["k"], lay["s"], lay["p"]
    g_in, g_out = lay["g_in"], lay["g_out"]
    pairs = []
    for j_out in range(g_out):
        for kh in range(k):
            if kind == "conv":
                q = j_out * s + kh - p           # input row offset within group a
            else:
                num = j_out + p - kh
                if num % s != 0:
                    continue
                q = num // s
            d, j_in = q // g_in, q % g_in        # Python floor div/mod (q may be <0)
            pairs.append((j_out, kh, d, j_in))
    return pairs


def _geometry(H, W):
    """Static per-layer packing geometry shared by pack_params and build_forward."""
    plan = _make_plan(H, W)
    R = H // GROUP0
    geo, k_off, guard, n_max = [], 0, 1, 0
    for lay in plan:
        pairs = _tap_pairs(lay)
        d_min = min(d for (_, _, d, _) in pairs)
        d_max = max(d for (_, _, d, _) in pairs)
        guard = max(guard, -d_min, d_max)
        lin = lay["g_in"] * lay["win"] * lay["cin"]
        lout = lay["g_out"] * lay["wout"] * lay["cout"]
        K = (d_max - d_min + 1) * lin
        geo.append(dict(d_min=d_min, d_max=d_max, lin=lin, lout=lout,
                        K=K, k_off=k_off))
        k_off += _round_up(K, 8)
        n_max = max(n_max, lout)
    meta = dict(R=R, guard=guard, K_total=_round_up(k_off, 8),
                n_store=_round_up(n_max, 128))
    return plan, geo, meta


# ---------------------------------------------------------------------------
# Weight packing (pure layout glue, done once outside jit on concrete params)
# ---------------------------------------------------------------------------
def _pack_layer(lay, gi, w, b):
    kind, k, s, p = lay["kind"], lay["k"], lay["s"], lay["p"]
    cin, cout = lay["cin"], lay["cout"]
    win, wout = lay["win"], lay["wout"]
    lin, lout = gi["lin"], gi["lout"]
    d_min = gi["d_min"]

    wnp = np.asarray(w, np.float32)
    M = np.zeros((gi["K"], lout), np.float32)
    for (j_out, kh, d, j_in) in _tap_pairs(lay):
        for wo_ in range(wout):
            for wi_ in range(win):
                if kind == "conv":
                    kw = wi_ - wo_ * s + p       # wi = wo*s + kw - p
                else:
                    kw = wo_ - wi_ * s + p       # wo = wi*s - p + kw
                if not (0 <= kw < k):
                    continue
                r0 = (d - d_min) * lin + j_in * (win * cin) + wi_ * cin
                c0 = j_out * (wout * cout) + wo_ * cout
                if kind == "conv":               # weight (cout, cin, kh, kw)
                    M[r0:r0 + cin, c0:c0 + cout] += wnp[:, :, kh, kw].T
                else:                            # weight (cin, cout, kh, kw)
                    M[r0:r0 + cin, c0:c0 + cout] += wnp[:, :, kh, kw]
    b_row = np.tile(np.asarray(b, np.float32), lay["g_out"] * wout)
    return M, b_row


def pack_params(params, H, W):
    plan, geo, meta = _geometry(H, W)
    w_cat = np.zeros((meta["K_total"], meta["n_store"]), np.float32)
    b_cat = np.zeros((len(plan), meta["n_store"]), np.float32)
    for i, (lay, gi, (w, b)) in enumerate(zip(plan, geo, params)):
        M, brow = _pack_layer(lay, gi, w, b)
        assert M.shape == (gi["K"], gi["lout"])
        w_cat[gi["k_off"]:gi["k_off"] + gi["K"], :gi["lout"]] = M
        b_cat[i, :gi["lout"]] = brow
    return jnp.asarray(w_cat), jnp.asarray(b_cat)


# ---------------------------------------------------------------------------
# Fused forward: one pallas_call, block_b examples per grid step
# ---------------------------------------------------------------------------
def build_forward(H, W, block_b=8):
    plan, geo, meta = _geometry(H, W)
    R, guard = meta["R"], meta["guard"]
    slot = R + 2 * guard
    while (block_b * slot) % 8 != 0:             # keep row block (8,128)-friendly
        slot += 1
    rows_blk = block_b * slot
    cin0 = plan[0]["cin"]
    L0 = geo[0]["lin"]
    L_out = geo[-1]["lout"]
    L_lat = geo[LATENT_IDX]["lout"]

    def kernel(x_ref, w_ref, b_ref, m_ref, out_ref, lat_ref):
        mask = m_ref[...]                        # (rows_blk, 1) guard-row mask
        x = x_ref[...]                           # (rows_blk, L0)
        for li, (lay, gi) in enumerate(zip(plan, geo)):
            assert x.shape == (rows_blk, gi["lin"])
            # static stride-1 row windows (conv taps / convT gather are folded
            # into the grouped-row layout + the packed weight matrix)
            zpad = jnp.zeros((guard, gi["lin"]), jnp.float32)
            xp = jnp.concatenate([zpad, x, zpad], axis=0)
            xg = jnp.concatenate(
                [xp[guard + d:guard + d + rows_blk, :]
                 for d in range(gi["d_min"], gi["d_max"] + 1)],
                axis=-1)                          # (rows_blk, nw*lin)
            w = w_ref[gi["k_off"]:gi["k_off"] + gi["K"], 0:gi["lout"]]
            y = jnp.dot(xg, w,
                        preferred_element_type=jnp.float32,
                        precision=jax.lax.Precision.HIGHEST)
            y = y + b_ref[li:li + 1, 0:gi["lout"]]
            if lay["relu"]:
                y = jnp.maximum(y, 0.0)
            y = y * mask                          # re-zero guard rows
            if li == LATENT_IDX:
                lat_ref[...] = y
            x = y
        out_ref[...] = x

    def forward(x_nchw, w_cat, b_cat):
        N, C, Hi, Wi = x_nchw.shape
        assert (C, Hi, Wi) == (cin0, H, W)
        nb = -(-N // block_b) * block_b          # pad batch to a block multiple

        # NCHW -> grouped rows (N, R, GROUP0*W*C) with zero guard rows per slot
        xg = jnp.transpose(x_nchw.astype(jnp.float32), (0, 2, 3, 1))
        xg = xg.reshape(N, H, W * cin0).reshape(N, R, L0)
        xg = jnp.pad(xg, ((0, nb - N), (guard, slot - R - guard), (0, 0)))
        x_tall = xg.reshape(nb * slot, L0)

        mask_np = np.zeros((rows_blk, 1), np.float32)
        for bb in range(block_b):
            mask_np[bb * slot + guard: bb * slot + guard + R, 0] = 1.0
        mask = jnp.asarray(mask_np)

        out_tall, lat_tall = pl.pallas_call(
            kernel,
            out_shape=(
                jax.ShapeDtypeStruct((nb * slot, L_out), jnp.float32),
                jax.ShapeDtypeStruct((nb * slot, L_lat), jnp.float32),
            ),
            grid=(nb // block_b,),
            in_specs=[
                pl.BlockSpec((rows_blk, L0), lambda i: (i, 0)),
                pl.BlockSpec(w_cat.shape, lambda i: (0, 0)),   # resident weights
                pl.BlockSpec(b_cat.shape, lambda i: (0, 0)),
                pl.BlockSpec((rows_blk, 1), lambda i: (0, 0)),
            ],
            out_specs=(
                pl.BlockSpec((rows_blk, L_out), lambda i: (i, 0)),
                pl.BlockSpec((rows_blk, L_lat), lambda i: (i, 0)),
            ),
            compiler_params=pltpu.CompilerParams(
                dimension_semantics=("parallel",),   # batch blocks -> both TCs on v7x
            ),
        )(x_tall, w_cat, b_cat, mask)

        last, lat = plan[-1], plan[LATENT_IDX]
        out = out_tall.reshape(nb, slot, L_out)[:N, guard:guard + R, :]
        out = out.reshape(N, R, last["g_out"], last["wout"], last["cout"])
        out = out.reshape(N, R * last["g_out"], last["wout"], last["cout"])
        out = jnp.transpose(out, (0, 3, 1, 2))

        latent = lat_tall.reshape(nb, slot, L_lat)[:N, guard:guard + R, :]
        latent = latent.reshape(N, R, lat["g_out"], lat["wout"], lat["cout"])
        latent = latent.reshape(N, R * lat["g_out"], lat["wout"], lat["cout"])
        latent = jnp.transpose(latent, (0, 3, 1, 2))
        return out, latent

    return forward


# ---------------------------------------------------------------------------
# Parameter init (PyTorch-style kaiming-uniform-ish)
# ---------------------------------------------------------------------------
def init_params(key):
    params = []
    for (kind, cin, cout, k, *_rest) in LAYER_CFG:
        key, wk, bk = jax.random.split(key, 3)
        if kind == "conv":
            wshape, fan_in = (cout, cin, k, k), cin * k * k
        else:  # ConvTranspose2d weight layout (Cin, Cout, KH, KW)
            wshape, fan_in = (cin, cout, k, k), cout * k * k
        bound = float(1.0 / np.sqrt(fan_in))
        w = jax.random.uniform(wk, wshape, jnp.float32, -bound, bound)
        b = jax.random.uniform(bk, (cout,), jnp.float32, -bound, bound)
        params.append((w, b))
    return params


# ---------------------------------------------------------------------------
# Pure-JAX (XLA conv) reference for correctness checking
# ---------------------------------------------------------------------------
def _ref_forward(x_nchw, params):
    dn = ("NCHW", "OIHW", "NCHW")
    h = x_nchw
    latent = None
    for i, (cfg, (w, b)) in enumerate(zip(LAYER_CFG, params)):
        kind, _cin, _cout, k, stride, padding, out_pad, relu = cfg
        if kind == "conv":
            h = jax.lax.conv_general_dilated(
                h, w, (stride, stride), [(padding, padding)] * 2,
                dimension_numbers=dn,
                precision=jax.lax.Precision.HIGHEST) + b.reshape(1, -1, 1, 1)
        else:
            w_eq = jnp.transpose(jnp.flip(w, axis=(2, 3)), (1, 0, 2, 3))
            pad = k - 1 - padding
            h = jax.lax.conv_general_dilated(
                h, w_eq, (1, 1), [(pad, pad + out_pad)] * 2,
                lhs_dilation=(stride, stride),
                dimension_numbers=dn,
                precision=jax.lax.Precision.HIGHEST) + b.reshape(1, -1, 1, 1)
        if relu:
            h = jnp.maximum(h, 0.0)
        if i == LATENT_IDX:
            latent = h
    return h, latent


if __name__ == "__main__":
    key = jax.random.PRNGKey(0)
    kx, kp = jax.random.split(key)
    params = init_params(kp)

    # Small input consistent with the module (original was (N, 1, 200, 16) NCHW).
    N, H, W = 8, 16, 16
    x = jax.random.normal(kx, (N, 1, H, W), jnp.float32)

    w_cat, b_cat = pack_params(params, H, W)          # one-time weight repack
    forward = build_forward(H, W, block_b=4)          # 4 examples/step -> grid of 2
    fwd = jax.jit(forward)

    out, latent = fwd(x, w_cat, b_cat)
    jax.block_until_ready((out, latent))

    assert out.shape == (N, 1, H, W), out.shape
    assert latent.shape == (N, 16, H // 8, W // 8), latent.shape

    ref_out, ref_lat = _ref_forward(x, params)
    np.testing.assert_allclose(np.asarray(out), np.asarray(ref_out),
                               rtol=2e-3, atol=2e-3)
    np.testing.assert_allclose(np.asarray(latent), np.asarray(ref_lat),
                               rtol=2e-3, atol=2e-3)

    print("KERNEL_OK")
</pallas_src>

<mosaic_0001>
module attributes {stable_mosaic.version = 11 : i64} {
  func.func @kernel(%arg0: i32, %arg1: memref<16x128xf32, #tpu.memory_space<vmem>>, %arg2: memref<2528x128xf32, #tpu.memory_space<vmem>>, %arg3: memref<10x128xf32, #tpu.memory_space<vmem>>, %arg4: memref<16x1xf32, #tpu.memory_space<vmem>>, %arg5: memref<16x128xf32, #tpu.memory_space<vmem>>, %arg6: memref<16x32xf32, #tpu.memory_space<vmem>>) attributes {dimension_semantics = [#tpu.dimension_semantics<parallel>], iteration_bounds = array<i64: 2>, scalar_prefetch = 0 : i64, scratch_operands = 0 : i64, tpu.core_type = #tpu.core_type<tc>, window_params = [{transform_indices = @transform_0, window_bounds = array<i64: 16, 128>}, {pipeline_mode = #tpu.pipeline_mode<synchronous>, transform_indices = @transform_1, window_bounds = array<i64: 2528, 128>}, {pipeline_mode = #tpu.pipeline_mode<synchronous>, transform_indices = @transform_2, window_bounds = array<i64: 10, 128>}, {pipeline_mode = #tpu.pipeline_mode<synchronous>, transform_indices = @transform_3, window_bounds = array<i64: 16, 1>}, {transform_indices = @transform_4, window_bounds = array<i64: 16, 128>}, {transform_indices = @transform_5, window_bounds = array<i64: 16, 32>}]} {
    %c0 = arith.constant 0 : index
    %c0_0 = arith.constant 0 : index
    %0 = vector.load %arg4[%c0, %c0_0] : memref<16x1xf32, #tpu.memory_space<vmem>>, vector<16x1xf32>
    %c0_1 = arith.constant 0 : index
    %c0_2 = arith.constant 0 : index
    %1 = vector.load %arg1[%c0_1, %c0_2] : memref<16x128xf32, #tpu.memory_space<vmem>>, vector<16x128xf32>
    %cst = arith.constant 0.000000e+00 : f32
    %2 = vector.broadcast %cst : f32 to vector<1x128xf32>
    %3 = tpu.concatenate %2, %1, %2 in 0 : vector<1x128xf32>, vector<16x128xf32>, vector<1x128xf32> -> vector<18x128xf32>
    %4 = vector.extract_strided_slice %3 {offsets = [0, 0], sizes = [16, 128], strides = [1, 1]} : vector<18x128xf32> to vector<16x128xf32>
    %5 = vector.extract_strided_slice %3 {offsets = [1, 0], sizes = [16, 128], strides = [1, 1]} : vector<18x128xf32> to vector<16x128xf32>
    %6 = tpu.concatenate %4, %5 in 1 : vector<16x128xf32>, vector<16x128xf32> -> vector<16x256xf32>
    %c0_3 = arith.constant 0 : index
    %c0_4 = arith.constant 0 : index
    %7 = vector.load %arg2[%c0_3, %c0_4] : memref<2528x128xf32, #tpu.memory_space<vmem>>, vector<256x128xf32>
    %cst_5 = arith.constant dense<0.000000e+00> : vector<16x128xf32>
    %8 = tpu.matmul %6, %7, %cst_5 {dimension_numbers = #tpu.dot_dimension_numbers<[1], [0], [0], [1], [0, 0, 1, 1], [], []>, precision = #tpu.contract_precision<fp32>} : vector<16x256xf32>, vector<256x128xf32>, vector<16x128xf32> -> vector<16x128xf32>
    %c0_6 = arith.constant 0 : index
    %c0_7 = arith.constant 0 : index
    %9 = vector.load %arg3[%c0_6, %c0_7] : memref<10x128xf32, #tpu.memory_space<vmem>>, vector<1x128xf32>
    %10 = vector.broadcast %9 : vector<1x128xf32> to vector<16x128xf32>
    %11 = arith.addf %8, %10 : vector<16x128xf32>
    %12 = vector.broadcast %0 : vector<16x1xf32> to vector<16x128xf32>
    %13 = arith.mulf %11, %12 : vector<16x128xf32>
    %cst_8 = arith.constant 0.000000e+00 : f32
    %14 = vector.broadcast %cst_8 : f32 to vector<1x128xf32>
    %15 = tpu.concatenate %14, %13, %14 in 0 : vector<1x128xf32>, vector<16x128xf32>, vector<1x128xf32> -> vector<18x128xf32>
    %16 = vector.extract_strided_slice %15 {offsets = [0, 0], sizes = [16, 128], strides = [1, 1]} : vector<18x128xf32> to vector<16x128xf32>
    %17 = vector.extract_strided_slice %15 {offsets = [1, 0], sizes = [16, 128], strides = [1, 1]} : vector<18x128xf32> to vector<16x128xf32>
    %18 = vector.extract_strided_slice %15 {offsets = [2, 0], sizes = [16, 128], strides = [1, 1]} : vector<18x128xf32> to vector<16x128xf32>
    %19 = tpu.concatenate %16, %17, %18 in 1 : vector<16x128xf32>, vector<16x128xf32>, vector<16x128xf32> -> vector<16x384xf32>
    %c256 = arith.constant 256 : index
    %c0_9 = arith.constant 0 : index
    %20 = vector.load %arg2[%c256, %c0_9] : memref<2528x128xf32, #tpu.memory_space<vmem>>, vector<384x128xf32>
    %cst_10 = arith.constant dense<0.000000e+00> : vector<16x128xf32>
    %21 = tpu.matmul %19, %20, %cst_10 {dimension_numbers = #tpu.dot_dimension_numbers<[1], [0], [0], [1], [0, 0, 1, 1], [], []>, precision = #tpu.contract_precision<fp32>} : vector<16x384xf32>, vector<384x128xf32>, vector<16x128xf32> -> vector<16x128xf32>
    %c1 = arith.constant 1 : index
    %c0_11 = arith.constant 0 : index
    %22 = vector.load %arg3[%c1, %c0_11] : memref<10x128xf32, #tpu.memory_space<vmem>>, vector<1x128xf32>
    %23 = vector.broadcast %22 : vector<1x128xf32> to vector<16x128xf32>
    %24 = arith.addf %21, %23 : vector<16x128xf32>
    %cst_12 = arith.constant 0.000000e+00 : f32
    %25 = vector.broadcast %cst_12 : f32 to vector<16x128xf32>
    %26 = arith.maximumf %24, %25 : vector<16x128xf32>
    %27 = vector.broadcast %0 : vector<16x1xf32> to vector<16x128xf32>
    %28 = arith.mulf %26, %27 : vector<16x128xf32>
    %cst_13 = arith.constant 0.000000e+00 : f32
    %29 = vector.broadcast %cst_13 : f32 to vector<1x128xf32>
    %30 = tpu.concatenate %29, %28, %29 in 0 : vector<1x128xf32>, vector<16x128xf32>, vector<1x128xf32> -> vector<18x128xf32>
    %31 = vector.extract_strided_slice %30 {offsets = [0, 0], sizes = [16, 128], strides = [1, 1]} : vector<18x128xf32> to vector<16x128xf32>
    %32 = vector.extract_strided_slice %30 {offsets = [1, 0], sizes = [16, 128], strides = [1, 1]} : vector<18x128xf32> to vector<16x128xf32>
    %33 = vector.extract_strided_slice %30 {offsets = [2, 0], sizes = [16, 128], strides = [1, 1]} : vector<18x128xf32> to vector<16x128xf32>
    %34 = tpu.concatenate %31, %32, %33 in 1 : vector<16x128xf32>, vector<16x128xf32>, vector<16x128xf32> -> vector<16x384xf32>
    %c640 = arith.constant 640 : index
    %c0_14 = arith.constant 0 : index
    %35 = vector.load %arg2[%c640, %c0_14] : memref<2528x128xf32, #tpu.memory_space<vmem>>, vector<384x64xf32>
    %cst_15 = arith.constant dense<0.000000e+00> : vector<16x64xf32>
    %36 = tpu.matmul %34, %35, %cst_15 {dimension_numbers = #tpu.dot_dimension_numbers<[1], [0], [0], [1], [0, 0, 1, 1], [], []>, precision = #tpu.contract_precision<fp32>} : vector<16x384xf32>, vector<384x64xf32>, vector<16x64xf32> -> vector<16x64xf32>
    %c2 = arith.constant 2 : index
    %c0_16 = arith.constant 0 : index
    %37 = vector.load %arg3[%c2, %c0_16] : memref<10x128xf32, #tpu.memory_space<vmem>>, vector<1x64xf32>
    %38 = vector.broadcast %37 : vector<1x64xf32> to vector<16x64xf32>
    %39 = arith.addf %36, %38 : vector<16x64xf32>
    %40 = vector.broadcast %0 : vector<16x1xf32> to vector<16x64xf32>
    %41 = arith.mulf %39, %40 : vector<16x64xf32>
    %cst_17 = arith.constant 0.000000e+00 : f32
    %42 = vector.broadcast %cst_17 : f32 to vector<1x64xf32>
    %43 = tpu.concatenate %42, %41, %42 in 0 : vector<1x64xf32>, vector<16x64xf32>, vector<1x64xf32> -> vector<18x64xf32>
    %44 = vector.extract_strided_slice %43 {offsets = [0, 0], sizes = [16, 64], strides = [1, 1]} : vector<18x64xf32> to vector<16x64xf32>
    %45 = vector.extract_strided_slice %43 {offsets = [1, 0], sizes = [16, 64], strides = [1, 1]} : vector<18x64xf32> to vector<16x64xf32>
    %46 = vector.extract_strided_slice %43 {offsets = [2, 0], sizes = [16, 64], strides = [1, 1]} : vector<18x64xf32> to vector<16x64xf32>
    %47 = tpu.concatenate %44, %45, %46 in 1 : vector<16x64xf32>, vector<16x64xf32>, vector<16x64xf32> -> vector<16x192xf32>
    %c1024 = arith.constant 1024 : index
    %c0_18 = arith.constant 0 : index
    %48 = vector.load %arg2[%c1024, %c0_18] : memref<2528x128xf32, #tpu.memory_space<vmem>>, vector<192x64xf32>
    %cst_19 = arith.constant dense<0.000000e+00> : vector<16x64xf32>
    %49 = tpu.matmul %47, %48, %cst_19 {dimension_numbers = #tpu.dot_dimension_numbers<[1], [0], [0], [1], [0, 0, 1, 1], [], []>, precision = #tpu.contract_precision<fp32>} : vector<16x192xf32>, vector<192x64xf32>, vector<16x64xf32> -> vector<16x64xf32>
    %c3 = arith.constant 3 : index
    %c0_20 = arith.constant 0 : index
    %50 = vector.load %arg3[%c3, %c0_20] : memref<10x128xf32, #tpu.memory_space<vmem>>, vector<1x64xf32>
    %51 = vector.broadcast %50 : vector<1x64xf32> to vector<16x64xf32>
    %52 = arith.addf %49, %51 : vector<16x64xf32>
    %cst_21 = arith.constant 0.000000e+00 : f32
    %53 = vector.broadcast %cst_21 : f32 to vector<16x64xf32>
    %54 = arith.maximumf %52, %53 : vector<16x64xf32>
    %55 = vector.broadcast %0 : vector<16x1xf32> to vector<16x64xf32>
    %56 = arith.mulf %54, %55 : vector<16x64xf32>
    %cst_22 = arith.constant 0.000000e+00 : f32
    %57 = vector.broadcast %cst_22 : f32 to vector<1x64xf32>
    %58 = tpu.concatenate %57, %56, %57 in 0 : vector<1x64xf32>, vector<16x64xf32>, vector<1x64xf32> -> vector<18x64xf32>
    %59 = vector.extract_strided_slice %58 {offsets = [0, 0], sizes = [16, 64], strides = [1, 1]} : vector<18x64xf32> to vector<16x64xf32>
    %60 = vector.extract_strided_slice %58 {offsets = [1, 0], sizes = [16, 64], strides = [1, 1]} : vector<18x64xf32> to vector<16x64xf32>
    %61 = vector.extract_strided_slice %58 {offsets = [2, 0], sizes = [16, 64], strides = [1, 1]} : vector<18x64xf32> to vector<16x64xf32>
    %62 = tpu.concatenate %59, %60, %61 in 1 : vector<16x64xf32>, vector<16x64xf32>, vector<16x64xf32> -> vector<16x192xf32>
    %c1216 = arith.constant 1216 : index
    %c0_23 = arith.constant 0 : index
    %63 = vector.load %arg2[%c1216, %c0_23] : memref<2528x128xf32, #tpu.memory_space<vmem>>, vector<192x32xf32>
    %cst_24 = arith.constant dense<0.000000e+00> : vector<16x32xf32>
    %64 = tpu.matmul %62, %63, %cst_24 {dimension_numbers = #tpu.dot_dimension_numbers<[1], [0], [0], [1], [0, 0, 1, 1], [], []>, precision = #tpu.contract_precision<fp32>} : vector<16x192xf32>, vector<192x32xf32>, vector<16x32xf32> -> vector<16x32xf32>
    %c4 = arith.constant 4 : index
    %c0_25 = arith.constant 0 : index
    %65 = vector.load %arg3[%c4, %c0_25] : memref<10x128xf32, #tpu.memory_space<vmem>>, vector<1x32xf32>
    %66 = vector.broadcast %65 : vector<1x32xf32> to vector<16x32xf32>
    %67 = arith.addf %64, %66 : vector<16x32xf32>
    %68 = vector.broadcast %0 : vector<16x1xf32> to vector<16x32xf32>
    %69 = arith.mulf %67, %68 : vector<16x32xf32>
    %c0_26 = arith.constant 0 : index
    %c0_27 = arith.constant 0 : index
    %70 = vector.load %arg6[%c0_26, %c0_27] : memref<16x32xf32, #tpu.memory_space<vmem>>, vector<16x32xf32>
    tpu.vector_store %arg6[%c0_26, %c0_27], %69 {strides = array<i32>} : memref<16x32xf32, #tpu.memory_space<vmem>>, vector<16x32xf32>,
    %cst_28 = arith.constant 0.000000e+00 : f32
    %71 = vector.broadcast %cst_28 : f32 to vector<1x32xf32>
    %72 = tpu.concatenate %71, %69, %71 in 0 : vector<1x32xf32>, vector<16x32xf32>, vector<1x32xf32> -> vector<18x32xf32>
    %73 = vector.extract_strided_slice %72 {offsets = [0, 0], sizes = [16, 32], strides = [1, 1]} : vector<18x32xf32> to vector<16x32xf32>
    %74 = vector.extract_strided_slice %72 {offsets = [1, 0], sizes = [16, 32], strides = [1, 1]} : vector<18x32xf32> to vector<16x32xf32>
    %75 = vector.extract_strided_slice %72 {offsets = [2, 0], sizes = [16, 32], strides = [1, 1]} : vector<18x32xf32> to vector<16x32xf32>
    %76 = tpu.concatenate %73, %74, %75 in 1 : vector<16x32xf32>, vector<16x32xf32>, vector<16x32xf32> -> vector<16x96xf32>
    %c1408 = arith.constant 1408 : index
    %c0_29 = arith.constant 0 : index
    %77 = vector.load %arg2[%c1408, %c0_29] : memref<2528x128xf32, #tpu.memory_space<vmem>>, vector<96x64xf32>
    %cst_30 = arith.constant dense<0.000000e+00> : vector<16x64xf32>
    %78 = tpu.matmul %76, %77, %cst_30 {dimension_numbers = #tpu.dot_dimension_numbers<[1], [0], [0], [1], [0, 0, 1, 1], [], []>, precision = #tpu.contract_precision<fp32>} : vector<16x96xf32>, vector<96x64xf32>, vector<16x64xf32> -> vector<16x64xf32>
    %c5 = arith.constant 5 : index
    %c0_31 = arith.constant 0 : index
    %79 = vector.load %arg3[%c5, %c0_31] : memref<10x128xf32, #tpu.memory_space<vmem>>, vector<1x64xf32>
    %80 = vector.broadcast %79 : vector<1x64xf32> to vector<16x64xf32>
    %81 = arith.addf %78, %80 : vector<16x64xf32>
    %82 = vector.broadcast %0 : vector<16x1xf32> to vector<16x64xf32>
    %83 = arith.mulf %81, %82 : vector<16x64xf32>
    %cst_32 = arith.constant 0.000000e+00 : f32
    %84 = vector.broadcast %cst_32 : f32 to vector<1x64xf32>
    %85 = tpu.concatenate %84, %83, %84 in 0 : vector<1x64xf32>, vector<16x64xf32>, vector<1x64xf32> -> vector<18x64xf32>
    %86 = vector.extract_strided_slice %85 {offsets = [0, 0], sizes = [16, 64], strides = [1, 1]} : vector<18x64xf32> to vector<16x64xf32>
    %87 = vector.extract_strided_slice %85 {offsets = [1, 0], sizes = [16, 64], strides = [1, 1]} : vector<18x64xf32> to vector<16x64xf32>
    %88 = vector.extract_strided_slice %85 {offsets = [2, 0], sizes = [16, 64], strides = [1, 1]} : vector<18x64xf32> to vector<16x64xf32>
    %89 = tpu.concatenate %86, %87, %88 in 1 : vector<16x64xf32>, vector<16x64xf32>, vector<16x64xf32> -> vector<16x192xf32>
    %c1504 = arith.constant 1504 : index
    %c0_33 = arith.constant 0 : index
    %90 = vector.load %arg2[%c1504, %c0_33] : memref<2528x128xf32, #tpu.memory_space<vmem>>, vector<192x64xf32>
    %cst_34 = arith.constant dense<0.000000e+00> : vector<16x64xf32>
    %91 = tpu.matmul %89, %90, %cst_34 {dimension_numbers = #tpu.dot_dimension_numbers<[1], [0], [0], [1], [0, 0, 1, 1], [], []>, precision = #tpu.contract_precision<fp32>} : vector<16x192xf32>, vector<192x64xf32>, vector<16x64xf32> -> vector<16x64xf32>
    %c6 = arith.constant 6 : index
    %c0_35 = arith.constant 0 : index
    %92 = vector.load %arg3[%c6, %c0_35] : memref<10x128xf32, #tpu.memory_space<vmem>>, vector<1x64xf32>
    %93 = vector.broadcast %92 : vector<1x64xf32> to vector<16x64xf32>
    %94 = arith.addf %91, %93 : vector<16x64xf32>
    %cst_36 = arith.constant 0.000000e+00 : f32
    %95 = vector.broadcast %cst_36 : f32 to vector<16x64xf32>
    %96 = arith.maximumf %94, %95 : vector<16x64xf32>
    %97 = vector.broadcast %0 : vector<16x1xf32> to vector<16x64xf32>
    %98 = arith.mulf %96, %97 : vector<16x64xf32>
    %cst_37 = arith.constant 0.000000e+00 : f32
    %99 = vector.broadcast %cst_37 : f32 to vector<1x64xf32>
    %100 = tpu.concatenate %99, %98, %99 in 0 : vector<1x64xf32>, vector<16x64xf32>, vector<1x64xf32> -> vector<18x64xf32>
    %101 = vector.extract_strided_slice %100 {offsets = [0, 0], sizes = [16, 64], strides = [1, 1]} : vector<18x64xf32> to vector<16x64xf32>
    %102 = vector.extract_strided_slice %100 {offsets = [1, 0], sizes = [16, 64], strides = [1, 1]} : vector<18x64xf32> to vector<16x64xf32>
    %103 = vector.extract_strided_slice %100 {offsets = [2, 0], sizes = [16, 64], strides = [1, 1]} : vector<18x64xf32> to vector<16x64xf32>
    %104 = tpu.concatenate %101, %102, %103 in 1 : vector<16x64xf32>, vector<16x64xf32>, vector<16x64xf32> -> vector<16x192xf32>
    %c1696 = arith.constant 1696 : index
    %c0_38 = arith.constant 0 : index
    %105 = vector.load %arg2[%c1696, %c0_38] : memref<2528x128xf32, #tpu.memory_space<vmem>>, vector<192x128xf32>
    %cst_39 = arith.constant dense<0.000000e+00> : vector<16x128xf32>
    %106 = tpu.matmul %104, %105, %cst_39 {dimension_numbers = #tpu.dot_dimension_numbers<[1], [0], [0], [1], [0, 0, 1, 1], [], []>, precision = #tpu.contract_precision<fp32>} : vector<16x192xf32>, vector<192x128xf32>, vector<16x128xf32> -> vector<16x128xf32>
    %c7 = arith.constant 7 : index
    %c0_40 = arith.constant 0 : index
    %107 = vector.load %arg3[%c7, %c0_40] : memref<10x128xf32, #tpu.memory_space<vmem>>, vector<1x128xf32>
    %108 = vector.broadcast %107 : vector<1x128xf32> to vector<16x128xf32>
    %109 = arith.addf %106, %108 : vector<16x128xf32>
    %110 = vector.broadcast %0 : vector<16x1xf32> to vector<16x128xf32>
    %111 = arith.mulf %109, %110 : vector<16x128xf32>
    %cst_41 = arith.constant 0.000000e+00 : f32
    %112 = vector.broadcast %cst_41 : f32 to vector<1x128xf32>
    %113 = tpu.concatenate %112, %111, %112 in 0 : vector<1x128xf32>, vector<16x128xf32>, vector<1x128xf32> -> vector<18x128xf32>
    %114 = vector.extract_strided_slice %113 {offsets = [0, 0], sizes = [16, 128], strides = [1, 1]} : vector<18x128xf32> to vector<16x128xf32>
    %115 = vector.extract_strided_slice %113 {offsets = [1, 0], sizes = [16, 128], strides = [1, 1]} : vector<18x128xf32> to vector<16x128xf32>
    %116 = vector.extract_strided_slice %113 {offsets = [2, 0], sizes = [16, 128], strides = [1, 1]} : vector<18x128xf32> to vector<16x128xf32>
    %117 = tpu.concatenate %114, %115, %116 in 1 : vector<16x128xf32>, vector<16x128xf32>, vector<16x128xf32> -> vector<16x384xf32>
    %c1888 = arith.constant 1888 : index
    %c0_42 = arith.constant 0 : index
    %118 = vector.load %arg2[%c1888, %c0_42] : memref<2528x128xf32, #tpu.memory_space<vmem>>, vector<384x128xf32>
    %cst_43 = arith.constant dense<0.000000e+00> : vector<16x128xf32>
    %119 = tpu.matmul %117, %118, %cst_43 {dimension_numbers = #tpu.dot_dimension_numbers<[1], [0], [0], [1], [0, 0, 1, 1], [], []>, precision = #tpu.contract_precision<fp32>} : vector<16x384xf32>, vector<384x128xf32>, vector<16x128xf32> -> vector<16x128xf32>
    %c8 = arith.constant 8 : index
    %c0_44 = arith.constant 0 : index
    %120 = vector.load %arg3[%c8, %c0_44] : memref<10x128xf32, #tpu.memory_space<vmem>>, vector<1x128xf32>
    %121 = vector.broadcast %120 : vector<1x128xf32> to vector<16x128xf32>
    %122 = arith.addf %119, %121 : vector<16x128xf32>
    %cst_45 = arith.constant 0.000000e+00 : f32
    %123 = vector.broadcast %cst_45 : f32 to vector<16x128xf32>
    %124 = arith.maximumf %122, %123 : vector<16x128xf32>
    %125 = vector.broadcast %0 : vector<16x1xf32> to vector<16x128xf32>
    %126 = arith.mulf %124, %125 : vector<16x128xf32>
    %cst_46 = arith.constant 0.000000e+00 : f32
    %127 = vector.broadcast %cst_46 : f32 to vector<1x128xf32>
    %128 = tpu.concatenate %127, %126, %127 in 0 : vector<1x128xf32>, vector<16x128xf32>, vector<1x128xf32> -> vector<18x128xf32>
    %129 = vector.extract_strided_slice %128 {offsets = [1, 0], sizes = [16, 128], strides = [1, 1]} : vector<18x128xf32> to vector<16x128xf32>
    %130 = vector.extract_strided_slice %128 {offsets = [2, 0], sizes = [16, 128], strides = [1, 1]} : vector<18x128xf32> to vector<16x128xf32>
    %131 = tpu.concatenate %129, %130 in 1 : vector<16x128xf32>, vector<16x128xf32> -> vector<16x256xf32>
    %c2272 = arith.constant 2272 : index
    %c0_47 = arith.constant 0 : index
    %132 = vector.load %arg2[%c2272, %c0_47] : memref<2528x128xf32, #tpu.memory_space<vmem>>, vector<256x128xf32>
    %cst_48 = arith.constant dense<0.000000e+00> : vector<16x128xf32>
    %133 = tpu.matmul %131, %132, %cst_48 {dimension_numbers = #tpu.dot_dimension_numbers<[1], [0], [0], [1], [0, 0, 1, 1], [], []>, precision = #tpu.contract_precision<fp32>} : vector<16x256xf32>, vector<256x128xf32>, vector<16x128xf32> -> vector<16x128xf32>
    %c9 = arith.constant 9 : index
    %c0_49 = arith.constant 0 : index
    %134 = vector.load %arg3[%c9, %c0_49] : memref<10x128xf32, #tpu.memory_space<vmem>>, vector<1x128xf32>
    %135 = vector.broadcast %134 : vector<1x128xf32> to vector<16x128xf32>
    %136 = arith.addf %133, %135 : vector<16x128xf32>
    %137 = vector.broadcast %0 : vector<16x1xf32> to vector<16x128xf32>
    %138 = arith.mulf %136, %137 : vector<16x128xf32>
    %c0_50 = arith.constant 0 : index
    %c0_51 = arith.constant 0 : index
    %139 = vector.load %arg5[%c0_50, %c0_51] : memref<16x128xf32, #tpu.memory_space<vmem>>, vector<16x128xf32>
    tpu.vector_store %arg5[%c0_50, %c0_51], %138 {strides = array<i32>} : memref<16x128xf32, #tpu.memory_space<vmem>>, vector<16x128xf32>,
    return
  }
  func.func @transform_0(%arg0: i32) -> (i32, i32) {
    %c0_i32 = arith.constant 0 : i32
    %c0_i32_0 = arith.constant 0 : i32
    return %arg0, %c0_i32 : i32, i32
  }
  func.func @transform_1(%arg0: i32) -> (i32, i32) {
    %c0_i32 = arith.constant 0 : i32
    %c0_i32_0 = arith.constant 0 : i32
    %c0_i32_1 = arith.constant 0 : i32
    return %c0_i32, %c0_i32_0 : i32, i32
  }
  func.func @transform_2(%arg0: i32) -> (i32, i32) {
    %c0_i32 = arith.constant 0 : i32
    %c0_i32_0 = arith.constant 0 : i32
    %c0_i32_1 = arith.constant 0 : i32
    return %c0_i32, %c0_i32_0 : i32, i32
  }
  func.func @transform_3(%arg0: i32) -> (i32, i32) {
    %c0_i32 = arith.constant 0 : i32
    %c0_i32_0 = arith.constant 0 : i32
    %c0_i32_1 = arith.constant 0 : i32
    return %c0_i32, %c0_i32_0 : i32, i32
  }
  func.func @transform_4(%arg0: i32) -> (i32, i32) {
    %c0_i32 = arith.constant 0 : i32
    %c0_i32_0 = arith.constant 0 : i32
    return %arg0, %c0_i32 : i32, i32
  }
  func.func @transform_5(%arg0: i32) -> (i32, i32) {
    %c0_i32 = arith.constant 0 : i32
    %c0_i32_0 = arith.constant 0 : i32
    return %arg0, %c0_i32 : i32, i32
  }
}

</mosaic_0001>

<bundles_post_ra>
// kernel: forward.1
= control target key start
LH: loop header
LB: loop body
LE: loop exit
PB: predicated region body
PF: predicated region fallthrough
CT: control target
= control target key end

     0   :  { %11 = vsyncpa [#allocation3], 0  ;;  %s14480_s0 = inlined_call_operand.vmem [shape: f32[32,128], index: 0, kind: input, shape index: {}]   ;;  %s14481_s1 = inlined_call_operand.hbm [shape: f32[2528,128], index: 1, kind: input, shape index: {}]   ;;  %s14482_s2 = inlined_call_operand.hbm [shape: f32[10,128], index: 2, kind: input, shape index: {}]   ;;  %s14483_s3 = inlined_call_operand.hbm [shape: f32[16,1], index: 3, kind: input, shape index: {}]   ;;  %s14484_s4 = inlined_call_operand.vmem [shape: f32[32,128], index: 4, kind: output, shape index: {0}]   ;;  %s14485_s5 = inlined_call_operand.vmem [shape: f32[32,32], index: 5, kind: output, shape index: {1}]  }
   0x1   :  { %12 = vsyncpa [#allocation5], 0  ;;  %s9037_s18 = smov 0  }
   0x2 LB: > { %s8819_s19 = sadd.s32 4294967295, %s8997_s18   ;;  %p8821_p0 = scmp.ge.s32.totalorder %s8997_s18, 1  ;;  %s8997_s18 = sphi %s9037_s18, %s18_s18  }
   0x3   : > { %p164_p1 = scmp.lt.s32.totalorder %s8997_s18, 3  ;;  %p9047_p2 = scmp.eq.s32.totalorder %s8819_s19, 0 }
   0x4   : > { %s189_s23 = sshll.u32 %s14482_s2, 4  ;;  %s175_s27 = sshll.u32 %s14481_s1, 4  ;;  %s190_s23 = int_to_ptr.hbm [resolvable:$true] %s189_s23  ;;  %s176_s27 = int_to_ptr.hbm [resolvable:$true] %s175_s27 }
   0x5   : > { %p9054_p3 = pnand %p8821_p0, %p164_p1  ;;  %s8999_s28 = smov [#allocation4]  }
   0x6   : > { %s191_s29 = sshll.u32 %s8999_s28, 4  ;;  %s9000_s30 = smov [#allocation2]   ;;  %s192_s29 = int_to_ptr.vmem [resolvable:$true] %s191_s29 }
   0x7   : > { %p8850_p4 = pneg %p9054_p3  ;;  %s177_s6 = sshll.u32 %s9000_s30, 4  ;;  %s178_s6 = int_to_ptr.vmem [resolvable:$true] %s177_s6 }
   0x8   : > { %s203_s9 = sshll.u32 %s14483_s3, 4  ;;  %s9001_s10 = smov 128   ;;  %s204_s9 = int_to_ptr.hbm [resolvable:$true] %s203_s9 }
   0x9   : > { %p8851_p5 = pnand %p9047_p2, %p8850_p4  ;;  %s9002_s11 = smov 8  }
   0xa   : > { %s9003_s12 = smov [#allocation6]   ;;  %230 = sbr.rel (%p9054_p3) target bundleno = 2772 (0xad4), region = 36 }
   0xb   : > { %8856 = dma.hbm_to_vmem [thread:$0]  (!%p8851_p5), %s190_s23, 256, %s192_s29, [#allocation5], %s9001_s10, %s9001_s10, %s9002_s11  }
   0xc   : > { %8853 = dma.hbm_to_vmem [thread:$0]  (!%p8851_p5), %s176_s27, 40448, %s178_s6, [#allocation3], %s9001_s10, %s9001_s10, %s9002_s11  }
   0xd   : > { %s205_s13 = sshll.u32 %s9003_s12, 4  ;;  %s206_s13 = int_to_ptr.vmem [resolvable:$true] %s205_s13 }
   0xe   : > { %8859 = dma.hbm_to_vmem [thread:$0]  (!%p8851_p5), %s204_s9, 256, %s206_s13, [#allocation5], %s9001_s10, %s9001_s10, %s9002_s11  }
   0xf   : > { %8988 = dma.done.wait (%p9047_p2), [#allocation3], 40448  }
  0x10   : > { %8990 = vsyncadd (%p9047_p2), [#allocation3], 4294926848 }
  0x11   : > { %8992 = dma.done.wait (%p9047_p2), [#allocation5], 512  }
  0x12   : > { %8994 = vsyncadd (%p9047_p2), [#allocation5], 4294966784  ;;  %v332_v0 = vld [vmem:[#allocation2 + $0x78] sm:$0xff]  ;;  %v331_v1 = vld [vmem:[#allocation2 + $0x70] sm:$0xff]  ;;  %s9177_s14 = sshll.u32 %s8819_s19, 1  ;;  %vm298_vm0 = vcmask 1040384  }
  0x13   : > { %v330_v2 = vld [vmem:[#allocation2 + $0x68] sm:$0xff]  ;;  %v9078_v3 = vand.u32 4294901760, %v332_v0  ;;  %v9080_v4 = vand.u32 4294901760, %v331_v1  ;;  %v329_v6 = vld [vmem:[#allocation2 + $0x60] sm:$0xff]  ;;  %v328_v7 = vld [vmem:[#allocation2 + $0x58] sm:$0xff]  ;;  %p275_p6 = scmp.lt.s32.totalorder %s9177_s14, 3 }
  0x14   : > { %v9082_v5 = vand.u32 4294901760, %v330_v2  ;;  %v327_v8 = vld [vmem:[#allocation2 + $0x50] sm:$0xff]  ;;  %v9084_v9 = vand.u32 4294901760, %v329_v6  ;;  %v9086_v10 = vand.u32 4294901760, %v328_v7  ;;  %v326_v12 = vld [vmem:[#allocation2 + $0x48] sm:$0xff]  ;;  %v325_v13 = vld [vmem:[#allocation2 + $0x40] sm:$0xff] }
  0x15   : > { %v9088_v11 = vand.u32 4294901760, %v327_v8  ;;  %352 = vmatpush.msra.mxu0 %v9078_v3  ;;  %v9092_v14 = vsub.f32 %v332_v0, %v9078_v3  ;;  %v9095_v15 = vsub.f32 %v331_v1, %v9080_v4  ;;  %565 = vmatpush.msra.mxu3 %v9078_v3  ;;  %v9101_v17 = vand.u32 4294901760, %v326_v12  ;;  %v324_v21 = vld [vmem:[#allocation2 + $0x38] sm:$0xff]  ;;  %v323_v26 = vld [vmem:[#allocation2 + $0x30] sm:$0xff]  ;;  %v322_v34 = vld [vmem:[#allocation2 + $0x28] sm:$0xff]  ;;  %s14685_s14 = smov (!%p275_p6, %s9177_s14), 3 }
  0x16   : > { %v9099_v16 = vsub.f32 %v330_v2, %v9082_v5  ;;  %v9104_v18 = vsub.f32 %v329_v6, %v9084_v9  ;;  %v9107_v19 = vsub.f32 %v328_v7, %v9086_v10  ;;  %v9117_v25 = vand.u32 4294901760, %v325_v13  ;;  %v321_v42 = vld [vmem:[#allocation2 + $0x20] sm:$0xff]  ;;  %v320_v48 = vld [vmem:[#allocation2 + $0x18] sm:$0xff]  ;;  %v319_v54 = vld [vmem:[#allocation2 + $0x10] sm:$0xff]  ;;  %s9263_s15 = sshll.u32 %s14685_s14, 3  ;;  %s9005_s20 = smov 64  }
  0x17   : > { %v9110_v20 = vsub.f32 %v327_v8, %v9088_v11  ;;  %354 = vmatpush.msra.mxu0 %v9080_v4  ;;  %507 = vmatpush.msra.mxu2 %v9092_v14  ;;  %v402_v22 = vand.u32 4294901760, %v9092_v14  ;;  %v14500_v23 = vand.u32 4294901760, %v9095_v15  ;;  %v9123_v29 = vsub.f32 %v326_v12, %v9101_v17  ;;  %v318_v59 = vld [vmem:[#allocation2 + $0x8] sm:$0xff]  ;;  %v348_v60 = vld [vmem:[#allocation2 + $0xf8] sm:$0xff]  ;;  %v347_v2 = vld [vmem:[#allocation2 + $0xf0] sm:$0xff]  ;;  %s9287_s19 = scalar_lea.vmem %s14480_s0, %s9263_s15  ;;  %s290_s23 = scalar_lea.vmem %s14485_s5, %s9263_s15 }
  0x18   : > { %v14499_v24 = vand.u32 4294901760, %v9099_v16  ;;  %567 = vmatpush.msra.mxu3 %v9080_v4  ;;  %v14496_v27 = vand.u32 4294901760, %v9104_v18  ;;  %v14495_v28 = vand.u32 4294901760, %v9107_v19  ;;  %v9136_v33 = vand.u32 4294901760, %v324_v21  ;;  %v317_v7 = vld [vmem:[#allocation2] sm:$0xff]  ;;  %s9006_s24 = smov 32   ;;  %s284_s27 = scalar_lea.vmem %s14484_s4, %s9263_s15 }
  0x19   : > { %356 = vmatpush.msra.mxu0 %v9082_v5  ;;  %510 = vmatpush.msra.mxu2 %v9095_v15  ;;  %v403_v30 = vsub.f32 %v9092_v14, %v402_v22  ;;  %v409_v31 = vsub.f32 %v9095_v15, %v14500_v23  ;;  %v9139_v35 = vand.u32 4294901760, %v323_v26  ;;  %v14494_v36 = vand.u32 4294901760, %v9110_v20 }
  0x1a   : > { %v415_v32 = vsub.f32 %v9099_v16, %v14499_v24  ;;  %569 = vmatpush.msra.mxu3 %v9082_v5  ;;  %v421_v39 = vsub.f32 %v9104_v18, %v14496_v27  ;;  %v9148_v40 = vsub.f32 %v325_v13, %v9117_v25  ;;  %v427_v41 = vsub.f32 %v9107_v19, %v14495_v28  ;;  %v9313_v27 = vld [vmem:[%s9287_s19] sm:$0xff] }
  0x1b   : > { %358 = vmatpush.msra.mxu0 %v9084_v9  ;;  %v404_v37 = vand.u32 4294901760, %v403_v30  ;;  %513 = vmatpush.msra.mxu2 %v9099_v16  ;;  %v410_v38 = vand.u32 4294901760, %v409_v31  ;;  %v9155_v44 = vand.u32 4294901760, %v322_v34  ;;  %v14492_v45 = vand.u32 4294901760, %v9123_v29  ;;  %v346_v30 = vld [vmem:[#allocation2 + $0xe8] sm:$0xff] }
  0x1c   : > { %571 = vmatpush.msra.mxu3 %v9084_v9  ;;  %v416_v43 = vand.u32 4294901760, %v415_v32  ;;  %v9159_v46 = vsub.f32 %v324_v21, %v9136_v33  ;;  %v9164_v47 = vsub.f32 %v323_v26, %v9139_v35  ;;  %v422_v49 = vand.u32 4294901760, %v421_v39 }
  0x1d   : > { %360 = vmatpush.msra.mxu0 %v9086_v10  ;;  %405 = vmatpush.msra.mxu1 %v404_v37  ;;  %v433_v50 = vsub.f32 %v9110_v20, %v14494_v36  ;;  %v9170_v51 = vand.u32 4294901760, %v321_v42  ;;  %v14491_v52 = vand.u32 4294901760, %v9148_v40  ;;  %v428_v53 = vand.u32 4294901760, %v427_v41 }
  0x1e   : > { %516 = vmatpush.msra.mxu2 %v9104_v18  ;;  %573 = vmatpush.msra.mxu3 %v9086_v10  ;;  %v439_v55 = vsub.f32 %v9123_v29, %v14492_v45  ;;  %v9183_v56 = vand.u32 4294901760, %v320_v48  ;;  %v14489_v57 = vand.u32 4294901760, %v9159_v46  ;;  %v9187_v58 = vsub.f32 %v322_v34, %v9155_v44 }
  0x1f   : > { %362 = vmatpush.msra.mxu0 %v9088_v11  ;;  %411 = vmatpush.msra.mxu1 %v410_v38  ;;  %v14488_v61 = vand.u32 4294901760, %v9164_v47  ;;  %v434_v62 = vand.u32 4294901760, %v433_v50  ;;  %v445_v63 = vsub.f32 %v9148_v40, %v14491_v52  ;;  %v9196_v0 = vand.u32 4294901760, %v319_v54 }
  0x20   : > { %519 = vmatpush.msra.mxu2 %v9107_v19  ;;  %575 = vmatpush.msra.mxu3 %v9088_v11  ;;  %v9199_v1 = vsub.f32 %v321_v42, %v9170_v51  ;;  %v9204_v6 = vand.u32 4294901760, %v318_v59  ;;  %v9206_v8 = vand.u32 4294901760, %v348_v60  ;;  %v440_v12 = vand.u32 4294901760, %v439_v55 }
  0x21   : > { %364 = vmatpush.msra.mxu0 %v9101_v17  ;;  %417 = vmatpush.msra.mxu1 %v416_v43  ;;  %v451_v13 = vsub.f32 %v9159_v46, %v14489_v57  ;;  %v14487_v21 = vand.u32 4294901760, %v9187_v58  ;;  %v9214_v26 = vsub.f32 %v320_v48, %v9183_v56  ;;  %v457_v31 = vsub.f32 %v9164_v47, %v14488_v61  ;;  %v345_v48 = vld [vmem:[#allocation2 + $0xe0] sm:$0xff] }
  0x22   : > { %522 = vmatpush.msra.mxu2 %v9110_v20  ;;  %577 = vmatpush.msra.mxu3 %v9101_v17  ;;  %14578 = vst [vmem:[#allocation9_spill] sm:$0xff] %v9204_v6  ;;  %v9221_v32 = vand.u32 4294901760, %v347_v2  ;;  %v446_v34 = vand.u32 4294901760, %v445_v63  ;;  %v9224_v37 = vand.u32 4294901760, %v317_v7  ;;  %v14486_v38 = vand.u32 4294901760, %v9199_v1 }
  0x23   : > { %366 = vmatpush.msra.mxu0 %v9117_v25  ;;  %423 = vmatpush.msra.mxu1 %v422_v49  ;;  %v9228_v39 = vsub.f32 %v319_v54, %v9196_v0  ;;  %v9236_v41 = vsub.f32 %v318_v59, %v9204_v6  ;;  %v9239_v42 = vsub.f32 %v348_v60, %v9206_v8  ;;  %v9241_v43 = vand.u32 4294901760, %v346_v30  ;;  %v344_v59 = vld [vmem:[#allocation2 + $0xd8] sm:$0xff] }
  0x24   : > { %525 = vmatpush.msra.mxu2 %v9123_v29  ;;  %579 = vmatpush.msra.mxu3 %v9117_v25  ;;  %14579 = vst [vmem:[#allocation10_spill] sm:$0xff] %v9224_v37  ;;  %v452_v49 = vand.u32 4294901760, %v451_v13  ;;  %v463_v50 = vsub.f32 %v9187_v58, %v14487_v21  ;;  %v458_v54 = vand.u32 4294901760, %v457_v31  ;;  %v9251_v55 = vsub.f32 %v347_v2, %v9221_v32  ;;  %v343_v13 = vld [vmem:[#allocation2 + $0xd0] sm:$0xff] }
  0x25   : > { %368 = vmatpush.msra.mxu0 %v9136_v33  ;;  %429 = vmatpush.msra.mxu1 %v428_v53  ;;  %v14490_v53 = vand.u32 4294901760, %v9214_v26  ;;  %v469_v60 = vsub.f32 %v9199_v1, %v14486_v38  ;;  %v9259_v63 = vsub.f32 %v317_v7, %v9224_v37  ;;  %v14498_v2 = vand.u32 4294901760, %v9236_v41 }
  0x26   : > { %528 = vmatpush.msra.mxu2 %v9148_v40  ;;  %581 = vmatpush.msra.mxu3 %v9136_v33  ;;  %v14497_v31 = vand.u32 4294901760, %v9239_v42  ;;  %v464_v7 = vand.u32 4294901760, %v463_v50  ;;  %v9276_v21 = vand.u32 4294901760, %v344_v59  ;;  %v14501_v61 = vand.u32 4294901760, %v9251_v55 }
  0x27   : > { %370 = vmatpush.msra.mxu0 %v9139_v35  ;;  %435 = vmatpush.msra.mxu1 %v434_v62  ;;  %v14493_v62 = vand.u32 4294901760, %v9228_v39  ;;  %v475_v38 = vsub.f32 %v9214_v26, %v14490_v53  ;;  %v9281_v57 = vand.u32 4294901760, %v343_v13  ;;  %v14503_v53 = vand.u32 4294901760, %v9259_v63 }
  0x28   : > { %531 = vmatpush.msra.mxu2 %v9159_v46  ;;  %583 = vmatpush.msra.mxu3 %v9139_v35  ;;  %14580 = vst [vmem:[#allocation11_spill] sm:$0xff] %v9276_v21  ;;  %v487_v45 = vsub.f32 %v9236_v41, %v14498_v2  ;;  %v9308_v36 = vsub.f32 %v344_v59, %v9276_v21  ;;  %vm309_vm1 = vcmask 1046528   ;;  %vm1126_vm2 = vcmask 1045504  }
  0x29   : > { %372 = vmatpush.msra.mxu0 %v9155_v44  ;;  %441 = vmatpush.msra.mxu1 %v440_v12  ;;  %v9261_v12 = vand.u32 4294901760, %v345_v48  ;;  %v481_v50 = vsub.f32 %v9228_v39, %v14493_v62  ;;  %v341_v62 = vld [vmem:[#allocation2 + $0xc0] sm:$0xff]  ;;  %v9321_v2 = vsub.f32 %v343_v13, %v9281_v57  ;;  %v493_v59 = vsub.f32 %v9259_v63, %v14503_v53 }
  0x2a   : > { %534 = vmatpush.msra.mxu2 %v9164_v47  ;;  %585 = vmatpush.msra.mxu3 %v9155_v44  ;;  %v9328_v23 = vand.u32 4294901760, %v341_v62  ;;  %v488_v13 = vand.u32 4294901760, %v487_v45  ;;  %vm3526_vm3 = vcmask 523264   ;;  %vm4905_vm4 = vcmask 261120  }
  0x2b   : > { %374 = vmatpush.msra.mxu0 %v9170_v51  ;;  %447 = vmatpush.msra.mxu1 %v446_v34  ;;  %v9270_v34 = vsub.f32 %v346_v30, %v9241_v43  ;;  %v342_v30 = vld [vmem:[#allocation2 + $0xc8] sm:$0xff]  ;;  %v9295_v52 = vsub.f32 %v345_v48, %v9261_v12  ;;  %v476_v48 = vand.u32 4294901760, %v475_v38  ;;  %v482_v38 = vand.u32 4294901760, %v481_v50  ;;  %v339_v50 = vld [vmem:[#allocation2 + $0xb0] sm:$0xff] }
  0x2c   : > { %537 = vmatpush.msra.mxu2 %v9187_v58  ;;  %587 = vmatpush.msra.mxu3 %v9170_v51  ;;  %v9310_v28 = vand.u32 4294901760, %v342_v30  ;;  %vm4960_vm5 = vcmask 785408  }
  0x2d   : > { %376 = vmatpush.msra.mxu0 %v9183_v56  ;;  %453 = vmatpush.msra.mxu1 %v452_v49  ;;  %v470_v49 = vand.u32 4294901760, %v469_v60  ;;  %v14504_v60 = vand.u32 4294901760, %v9270_v34  ;;  %v14582_v53 = vand.u32 4294901760, %v9295_v52 }
  0x2e   : > { %540 = vmatpush.msra.mxu2 %v9199_v1  ;;  %589 = vmatpush.msra.mxu3 %v9183_v56  ;;  %v9340_v24 = vsub.f32 %v342_v30, %v9310_v28 }
  0x2f   : > { %378 = vmatpush.msra.mxu0 %v9196_v0  ;;  %459 = vmatpush.msra.mxu1 %v458_v54  ;;  %v775_v54 = vsub.f32 %v9239_v42, %v14497_v31  ;;  %v781_v31 = vsub.f32 %v9251_v55, %v14501_v61  ;;  %v793_v30 = vsub.f32 %v9295_v52, %v14582_v53  ;;  %v14585_v53 = vand.u32 4294901760, %v9308_v36 }
  0x30   : > { %543 = vmatpush.msra.mxu2 %v9214_v26  ;;  %591 = vmatpush.msra.mxu3 %v9196_v0 }
  0x31   : > { %380 = vmatpush.msra.mxu0 %v9204_v6  ;;  %465 = vmatpush.msra.mxu1 %v464_v7  ;;  %v340_v7 = vld [vmem:[#allocation2 + $0xb8] sm:$0xff]  ;;  %v776_v61 = vand.u32 4294901760, %v775_v54  ;;  %v782_v45 = vand.u32 4294901760, %v781_v31  ;;  %v14506_v54 = vand.u32 4294901760, %v9321_v2 }
  0x32   : > { %546 = vmatpush.msra.mxu2 %v9228_v39  ;;  %593 = vmatpush.msra.mxu3 %v9204_v6  ;;  %v9342_v14 = vand.u32 4294901760, %v340_v7  ;;  %v9353_v6 = vsub.f32 %v341_v62, %v9328_v23  ;;  %v799_v62 = vsub.f32 %v9308_v36, %v14585_v53 }
  0x33   : > { %382 = vmatpush.msra.mxu0 %v9224_v37  ;;  %471 = vmatpush.msra.mxu1 %v470_v49  ;;  %v787_v49 = vsub.f32 %v9270_v34, %v14504_v60  ;;  %v338_v60 = vld [vmem:[#allocation2 + $0xa8] sm:$0xff] }
  0x34   : > { %549 = vmatpush.msra.mxu2 %v9236_v41  ;;  %595 = vmatpush.msra.mxu3 %v9224_v37  ;;  %v9355_v37 = vand.u32 4294901760, %v339_v50 }
  0x35   : > { %612 = vmatpush.msrb.mxu0 %v402_v22  ;;  %477 = vmatpush.msra.mxu1 %v476_v48  ;;  %v14581_v22 = vand.u32 4294901760, %v9095_v15  ;;  %v494_v48 = vand.u32 4294901760, %v493_v59  ;;  %v14583_v15 = vand.u32 4294901760, %v9099_v16  ;;  %v788_v31 = vand.u32 4294901760, %v787_v49  ;;  %v337_v59 = vld [vmem:[#allocation2 + $0xa0] sm:$0xff] }
  0x36   : > { %552 = vmatpush.msra.mxu2 %v9259_v63  ;;  %777 = vmatpush.msrb.mxu3 %v776_v61  ;;  %v9370_v16 = vsub.f32 %v340_v7, %v9342_v14  ;;  %v9372_v61 = vand.u32 4294901760, %v338_v60  ;;  %v14586_v49 = vand.u32 4294901760, %v9104_v18  ;;  %v9382_v53 = vsub.f32 %v339_v50, %v9355_v37 }
  0x37   : > { %616 = vmatpush.msrb.mxu0 %v14581_v22  ;;  %483 = vmatpush.msra.mxu1 %v482_v38  ;;  %v14584_v22 = vrot.slane %v9313_v27, 7  ;;  %v14587_v18 = vand.u32 4294901760, %v9107_v19  ;;  %v14589_v19 = vand.u32 4294901760, %v9110_v20  ;;  %v335_v20 = vld [vmem:[#allocation2 + $0x90] sm:$0xff] }
  0x38   : > { %724 = vmatpush.msrb.mxu2 %v9206_v8  ;;  %783 = vmatpush.msrb.mxu3 %v782_v45  ;;  %v9391_v45 = vld [vmem:[%s9287_s19 + $0x8] sm:$0xff] }
  0x39   : > { %620 = vmatpush.msrb.mxu0 %v14583_v15  ;;  %v9362_v38 = vsel %vm298_vm0, 0.0, %v14584_v22  ;;  %489 = vmatpush.msra.mxu1 %v488_v13  ;;  %v805_v13 = vsub.f32 %v9321_v2, %v14506_v54  ;;  %v794_v15 = vand.u32 4294901760, %v793_v30  ;;  %v14588_v30 = vand.u32 4294901760, %v9340_v24  ;;  %v336_v22 = vld [vmem:[#allocation2 + $0x98] sm:$0xff] }
  0x3a   : > { %726 = vmatpush.msrb.mxu2 %v9221_v32  ;;  %v9385_v7 = vand.u32 4294901760, %v9362_v38  ;;  %789 = vmatpush.msrb.mxu3 %v788_v31  ;;  %v9399_v54 = vsub.f32 %v338_v60, %v9372_v61  ;;  %v14590_v31 = vand.u32 4294901760, %v9353_v6 }
  0x3b   : > { %624 = vmatpush.msrb.mxu0 %v14586_v49  ;;  %495 = vmatpush.msra.mxu1 %v494_v48  ;;  %v800_v48 = vand.u32 4294901760, %v799_v62  ;;  %v811_v50 = vsub.f32 %v9340_v24, %v14588_v30  ;;  %v14509_v49 = vand.u32 4294901760, %v9370_v16 }
  0x3c   : > { %728 = vmatpush.msrb.mxu2 %v9241_v43  ;;  %795 = vmatpush.msrb.mxu3 %v794_v15  ;;  %v817_v62 = vsub.f32 %v9353_v6, %v14590_v31  ;;  %v9413_v60 = vsub.f32 %v9362_v38, %v9385_v7 }
  0x3d   : > { %628 = vmatpush.msrb.mxu0 %v14587_v18  ;;  %683 = vmatpush.msrb.mxu1 %v9078_v3  ;;  %v806_v3 = vand.u32 4294901760, %v805_v13  ;;  %v9404_v18 = vand.u32 4294901760, %v337_v59  ;;  %v9419_v13 = vand.u32 4294901760, %v336_v22  ;;  %v812_v15 = vand.u32 4294901760, %v811_v50 }
  0x3e   : > { %730 = vmatpush.msrb.mxu2 %v9261_v12  ;;  %801 = vmatpush.msrb.mxu3 %v800_v48  ;;  %v823_v31 = vsub.f32 %v9370_v16, %v14509_v49  ;;  %v818_v48 = vand.u32 4294901760, %v817_v62  ;;  %v14593_v50 = vand.u32 4294901760, %v9382_v53  ;;  %v385_v30 = vand.u32 4294901760, %v9413_v60 }
  0x3f   : > { %632 = vmatpush.msrb.mxu0 %v14589_v19  ;;  %685 = vmatpush.msrb.mxu1 %v9080_v4  ;;  %v14510_v19 = vrot.slane %v9391_v45, 7  ;;  %v14591_v4 = vand.u32 4294901760, %v9123_v29  ;;  %v9430_v29 = vsub.f32 %v337_v59, %v9404_v18  ;;  %v9450_v59 = vsub.f32 %v336_v22, %v9419_v13 }
  0x40   : > { %732 = vmatpush.msrb.mxu2 %v9276_v21  ;;  %v14592_v21 = vand.u32 4294901760, %v9148_v40  ;;  %807 = vmatpush.msrb.mxu3 %v806_v3  ;;  %v829_v49 = vsub.f32 %v9382_v53, %v14593_v50  ;;  %v824_v3 = vand.u32 4294901760, %v823_v31  ;;  %v14596_v62 = vand.u32 4294901760, %v9399_v54 }
  0x41   : > { %636 = vmatpush.msrb.mxu0 %v14591_v4  ;;  %687 = vmatpush.msrb.mxu1 %v9082_v5  ;;  %v9432_v5 = vand.u32 4294901760, %v335_v20  ;;  %v334_v4 = vld [vmem:[#allocation2 + $0x88] sm:$0xff]  ;;  %v386_v31 = vsub.f32 %v9413_v60, %v385_v30 }
  0x42   : > { %734 = vmatpush.msrb.mxu2 %v9281_v57  ;;  %813 = vmatpush.msrb.mxu3 %v812_v15  ;;  %v835_v50 = vsub.f32 %v9399_v54, %v14596_v62  ;;  %v830_v15 = vand.u32 4294901760, %v829_v49 }
  0x43   : > { %640 = vmatpush.msrb.mxu0 %v14592_v21  ;;  %689 = vmatpush.msrb.mxu1 %v9084_v9  ;;  %v14594_v9 = vrot.slane %v9313_v27, 7  ;;  %v14595_v21 = vand.u32 4294901760, %v9159_v46  ;;  %v9456_v27 = vand.u32 4294901760, %v334_v4  ;;  %v9463_v46 = vsub.f32 %v335_v20, %v9432_v5 }
  0x44   : > { %736 = vmatpush.msrb.mxu2 %v9310_v28  ;;  %819 = vmatpush.msrb.mxu3 %v818_v48  ;;  %v836_v48 = vand.u32 4294901760, %v835_v50 }
  0x45   : > { %v9444_v40 = vsel %vm298_vm0, %v14594_v9, %v14510_v19  ;;  %644 = vmatpush.msrb.mxu0 %v14595_v21  ;;  %691 = vmatpush.msrb.mxu1 %v9086_v10  ;;  %v333_v9 = vld [vmem:[#allocation2 + $0x80] sm:$0xff]  ;;  %v14597_v19 = vand.u32 4294901760, %v9164_v47  ;;  %v840_v10 = vand.u32 4294901760, %v9430_v29  ;;  %v14598_v21 = vand.u32 4294901760, %v9187_v58 }
  0x46   : > { %738 = vmatpush.msrb.mxu2 %v9328_v23  ;;  %v9466_v22 = vand.u32 4294901760, %v9444_v40  ;;  %v846_v47 = vand.u32 4294901760, %v9450_v59  ;;  %v311_v20 = vrot.slane %v9444_v40, 1  ;;  %825 = vmatpush.msrb.mxu3 %v824_v3  ;;  %v9480_v49 = vsub.f32 %v334_v4, %v9456_v27 }
  0x47   : > { %648 = vmatpush.msrb.mxu0 %v14597_v19  ;;  %693 = vmatpush.msrb.mxu1 %v9088_v11  ;;  %v310_v11 = vrot.slane %v9362_v38, 1  ;;  %v9476_v19 = vand.u32 4294901760, %v333_v9  ;;  %v14599_v58 = vand.u32 4294901760, %v9199_v1  ;;  %v852_v38 = vand.u32 4294901760, %v9463_v46 }
  0x48   : > { %740 = vmatpush.msrb.mxu2 %v9342_v14  ;;  %v392_v62 = vsub.f32 %v9444_v40, %v9466_v22  ;;  %831 = vmatpush.msrb.mxu3 %v830_v15  ;;  %v387_v4 = vand.u32 4294901760, %v386_v31  ;;  %v14600_v3 = vand.u32 4294901760, %v9214_v26  ;;  %v858_v40 = vand.u32 4294901760, %v9480_v49 }
  0x49   : > { %652 = vmatpush.msrb.mxu0 %v14598_v21  ;;  %695 = vmatpush.msrb.mxu1 %v9101_v17  ;;  %v841_v17 = vsub.f32 %v9430_v29, %v840_v10  ;;  %v9499_v1 = vsub.f32 %v333_v9, %v9476_v19  ;;  %v312_v50 = vsel %vm309_vm1, %v310_v11, %v311_v20  ;;  %v14601_v15 = vand.u32 4294901760, %v9228_v39 }
  0x4a   : > { %742 = vmatpush.msrb.mxu2 %v9355_v37  ;;  %837 = vmatpush.msrb.mxu3 %v836_v48  ;;  %v853_v26 = vsub.f32 %v9463_v46, %v852_v38  ;;  %v393_v31 = vand.u32 4294901760, %v392_v62  ;;  %v9511_v9 = vand.u32 4294901760, %v312_v50  ;;  %v14603_v39 = vand.u32 4294901760, %v9236_v41 }
  0x4b   : > { %656 = vmatpush.msrb.mxu0 %v14599_v58  ;;  %697 = vmatpush.msrb.mxu1 %v9117_v25  ;;  %v847_v25 = vsub.f32 %v9450_v59, %v846_v47  ;;  %v864_v11 = vand.u32 4294901760, %v9499_v1  ;;  %v859_v48 = vsub.f32 %v9480_v49, %v858_v40  ;;  %v14604_v41 = vand.u32 4294901760, %v9259_v63 }
  0x4c   : > { %744 = vmatpush.msrb.mxu2 %v9372_v61  ;;  %388 = vmatmul.f32.vlgmr.msra.gmra.mxu0 %v387_v4  ;;  %v394_v58 = vsub.f32 %v392_v62, %v393_v31 }
  0x4d   : > { %660 = vmatpush.msrb.mxu0 %v14600_v3  ;;  %699 = vmatpush.msrb.mxu1 %v9136_v33  ;;  %v842_v33 = vand.u32 4294901760, %v841_v17  ;;  %v9529_v17 = vsub.f32 %v312_v50, %v9511_v9  ;;  %v860_v4 = vand.u32 4294901760, %v859_v48  ;;  %v14605_v50 = vand.u32 4294901760, %v9239_v42 }
  0x4e   : > { %555 = vmatmul.f32.vlgmr.msra.gmra.mxu2 %v9413_v60  ;;  %v14602_v60 = vrot.slane %v9391_v45, 7  ;;  %599 = vmatmul.f32.vlgmr.msra.gmra.mxu3 %v385_v30  ;;  %v854_v45 = vand.u32 4294901760, %v853_v26  ;;  %v395_v63 = vand.u32 4294901760, %v394_v58 }
  0x4f   : > { %664 = vmatpush.msrb.mxu0 %v14601_v15  ;;  %701 = vmatpush.msrb.mxu1 %v9139_v35  ;;  %v848_v35 = vand.u32 4294901760, %v847_v25  ;;  %v757_v3 = vand.u32 4294901760, %v9529_v17 }
  0x50   : > { %746 = vmatpush.msrb.mxu2 %v9404_v18  ;;  %v306_v21 = vsel %vm298_vm0, %v14602_v60, 0.0  ;;  %843 = vmatpush.msrb.mxu3 %v842_v33  ;;  %v14609_v33 = vand.u32 4294901760, %v9270_v34  ;;  %v14617_v60 = vand.u32 4294901760, %v9382_v53 }
  0x51   : > { %668 = vmatpush.msrb.mxu0 %v14603_v39  ;;  %703 = vmatpush.msrb.mxu1 %v9155_v44  ;;  %v313_v30 = vrot.slane %v306_v21, 1  ;;  %v865_v44 = vsub.f32 %v9499_v1, %v864_v11 }
  0x52   : > { %748 = vmatpush.msrb.mxu2 %v9419_v13  ;;  %497 = vmatmul.f32.vlgmr.msra.gmra.mxu1 %v9385_v7 }
  0x53   : > { %672 = vmatpush.msrb.mxu0 %v14604_v41  ;;  %705 = vmatpush.msrb.mxu1 %v9170_v51  ;;  %v314_v51 = vsel %vm309_vm1, %v311_v20, %v313_v30  ;;  %v866_v25 = vand.u32 4294901760, %v865_v44  ;;  %v14606_v20 = vld [vmem:[#allocation9_spill] sm:$0xff] }
  0x54   : > { %750 = vmatpush.msrb.mxu2 %v9432_v5  ;;  %849 = vmatpush.msrb.mxu3 %v848_v35  ;;  %v1142_v41 = vld [vmem:[#allocation2 + $0x140] sm:$0xff] }
  0x55   : > { %879 = vmatpush.msra.mxu0 %v9239_v42  ;;  %707 = vmatpush.msrb.mxu1 %v9183_v56  ;;  %v9544_v56 = vand.u32 4294901760, %v314_v51  ;;  %v14608_v42 = vld [vmem:[#allocation10_spill] sm:$0xff] }
  0x56   : > { %752 = vmatpush.msrb.mxu2 %v9456_v27  ;;  %855 = vmatpush.msrb.mxu3 %v854_v45 }
  0x57   : > { %882 = vmatpush.msra.mxu0 %v9251_v55  ;;  %560 = vmatmul.f32.gmra.mxu2 %v392_v62  ;;  %v758_v62 = vsub.f32 %v9529_v17, %v757_v3  ;;  %v9557_v15 = vsub.f32 %v314_v51, %v9544_v56  ;;  %v9727_v51 = vand.u32 4294901760, %v1142_v41 }
  0x58   : > { %709 = vmatpush.msrb.mxu1 %v9196_v0  ;;  %754 = vmatpush.msrb.mxu2 %v9476_v19  ;;  %v14607_v0 = vand.u32 4294901760, %v9251_v55  ;;  %v14610_v55 = vand.u32 4294901760, %v9295_v52 }
  0x59   : > { %861 = vmatpush.msrb.mxu3 %v860_v4  ;;  %885 = vmatpush.msra.mxu0 %v9270_v34  ;;  %v759_v26 = vand.u32 4294901760, %v758_v62  ;;  %v14614_v34 = vand.u32 4294901760, %v9340_v24  ;;  %v9738_v62 = vsub.f32 %v1142_v41, %v9727_v51 }
  0x5a   : > { %984 = vmatpush.msra.mxu2 %v14605_v50  ;;  %396 = vmatmul.f32.gmra.mxu0 %v395_v63 }
  0x5b   : > { %605 = vmatmul.f32.gmra.mxu3 %v393_v31  ;;  %711 = vmatpush.msrb.mxu1 %v14606_v20  ;;  %v765_v31 = vand.u32 4294901760, %v9557_v15 }
  0x5c   : > { %867 = vmatpush.msrb.mxu3 %v866_v25  ;;  %888 = vmatpush.msra.mxu0 %v9295_v52 }
  0x5d   : > { %988 = vmatpush.msra.mxu2 %v14607_v0  ;;  %501 = vmatmul.f32.gmra.mxu1 %v9466_v22  ;;  %v766_v52 = vsub.f32 %v9557_v15, %v765_v31  ;;  %v1140_v0 = vld [vmem:[#allocation2 + $0x130] sm:$0xff] }
  0x5e   : > { %1055 = vmatpush.msra.mxu3 %v9206_v8  ;;  %891 = vmatpush.msra.mxu0 %v9308_v36 }
  0x5f   : > { %713 = vmatpush.msrb.mxu1 %v14608_v42  ;;  %992 = vmatpush.msra.mxu2 %v14609_v33 }
  0x60   : > { %1057 = vmatpush.msra.mxu3 %v9221_v32  ;;  %894 = vmatpush.msra.mxu0 %v9321_v2 }
  0x61   : > { %937 = vmatpush.msra.mxu1 %v9206_v8  ;;  %996 = vmatpush.msra.mxu2 %v14610_v55  ;;  %v14611_v8 = vand.u32 4294901760, %v9308_v36  ;;  %v767_v36 = vand.u32 4294901760, %v766_v52  ;;  %v1277_v55 = vand.u32 4294901760, %v9738_v62 }
  0x62   : > { %1059 = vmatpush.msra.mxu3 %v9241_v43  ;;  %760 = vmatmul.f32.vlgmr.msrb.gmra.mxu2 %v759_v26  ;;  %v9748_v26 = vand.u32 4294901760, %v1140_v0 }
  0x63   : > { %939 = vmatpush.msra.mxu1 %v9221_v32  ;;  %897 = vmatpush.msra.mxu0 %v9340_v24  ;;  %v14612_v32 = vand.u32 4294901760, %v9321_v2  ;;  %v1149_v2 = vld [vmem:[#allocation2 + $0x178] sm:$0xff]  ;;  %v14616_v24 = vand.u32 4294901760, %v9370_v16 }
  0x64   : > { %1000 = vmatpush.msra.mxu2 %v14611_v8  ;;  %1061 = vmatpush.msra.mxu3 %v9261_v12 }
  0x65   : > { %941 = vmatpush.msra.mxu1 %v9241_v43  ;;  %674 = vmatmul.f32.vlgmr.msrb.gmra.mxu0 %v9385_v7  ;;  %v14613_v43 = vld [vmem:[#allocation11_spill] sm:$0xff] }
  0x66   : > { %869 = vmatmul.f32.vlgmr.msrb.gmra.mxu3 %v9511_v9  ;;  %900 = vmatpush.msra.mxu0 %v9353_v6 }
  0x67   : > { %943 = vmatpush.msra.mxu1 %v9261_v12  ;;  %1004 = vmatpush.msra.mxu2 %v14612_v32  ;;  %v14615_v12 = vand.u32 4294901760, %v9353_v6  ;;  %v1147_v6 = vld [vmem:[#allocation2 + $0x168] sm:$0xff]  ;;  %v9755_v32 = vsub.f32 %v1140_v0, %v9748_v26 }
  0x68   : > { %1063 = vmatpush.msra.mxu3 %v14613_v43  ;;  %715 = vmatmul.f32.vlgmr.msrb.gmra.mxu1 %v9385_v7  ;;  %v1148_v7 = vld [vmem:[#allocation2 + $0x170] sm:$0xff]  ;;  %v9620_v21 = vand.u32 4294901760, %v1147_v6 }
  0x69   : > { %903 = vmatpush.msra.mxu0 %v9370_v16  ;;  %945 = vmatpush.msra.mxu1 %v14613_v43 }
  0x6a   : > { %1008 = vmatpush.msra.mxu2 %v14614_v34  ;;  %1065 = vmatpush.msra.mxu3 %v9281_v57  ;;  %v1138_v34 = vld [vmem:[#allocation2 + $0x120] sm:$0xff] }
  0x6b   : > { %906 = vmatpush.msra.mxu0 %v9382_v53  ;;  %947 = vmatpush.msra.mxu1 %v9281_v57  ;;  %v9604_v57 = vand.u32 4294901760, %v1149_v2 }
  0x6c   : > { %1012 = vmatpush.msra.mxu2 %v14615_v12  ;;  %1067 = vmatpush.msra.mxu3 %v9310_v28 }
  0x6d   : > { %768 = vmatmul.f32.gmra.mxu2 %v767_v36  ;;  %909 = vmatpush.msra.mxu0 %v9399_v54  ;;  %v9618_v16 = vsub.f32 %v1149_v2, %v9604_v57  ;;  %v1278_v36 = vsub.f32 %v9738_v62, %v1277_v55  ;;  %v1289_v2 = vand.u32 4294901760, %v9755_v32 }
  0x6e   : > { %949 = vmatpush.msra.mxu1 %v9310_v28  ;;  %1016 = vmatpush.msra.mxu2 %v14616_v24  ;;  %v9611_v28 = vand.u32 4294901760, %v1148_v7 }
  0x6f   : > { %1069 = vmatpush.msra.mxu3 %v9328_v23  ;;  %678 = vmatmul.f32.gmra.mxu0 %v9466_v22 }
  0x70   : > { %873 = vmatmul.f32.gmra.mxu3 %v9544_v56  ;;  %912 = vmatpush.msra.mxu0 %v9430_v29  ;;  %v9628_v53 = vsub.f32 %v1148_v7, %v9611_v28  ;;  %v9772_v7 = vand.u32 4294901760, %v1138_v34 }
  0x71   : > { %951 = vmatpush.msra.mxu1 %v9328_v23  ;;  %1020 = vmatpush.msra.mxu2 %v14617_v60  ;;  %v14618_v23 = vand.u32 4294901760, %v9399_v54  ;;  %v9637_v54 = vsub.f32 %v1147_v6, %v9620_v21  ;;  %v1279_v6 = vand.u32 4294901760, %v1278_v36  ;;  %v1137_v60 = vld [vmem:[#allocation2 + $0x118] sm:$0xff] }
  0x72   : > { %1071 = vmatpush.msra.mxu3 %v9342_v14  ;;  %719 = vmatmul.f32.gmra.mxu1 %v9466_v22  ;;  %v293_v22 = vld [vmem:[#allocation6 + $0x8] sm:$0xff] }
  0x73   : > { %915 = vmatpush.msra.mxu0 %v9450_v59  ;;  %953 = vmatpush.msra.mxu1 %v9342_v14  ;;  %v1235_v14 = vand.u32 4294901760, %v9618_v16  ;;  %v1247_v29 = vand.u32 4294901760, %v9637_v54  ;;  %v292_v59 = vld [vmem:[#allocation6] sm:$0xff] }
  0x74   : > { %1024 = vmatpush.msra.mxu2 %v14618_v23  ;;  %1073 = vmatpush.msra.mxu3 %v9355_v37 }
  0x75   : > { %918 = vmatpush.msra.mxu0 %v9463_v46  ;;  %955 = vmatpush.msra.mxu1 %v9355_v37  ;;  %v1241_v37 = vand.u32 4294901760, %v9628_v53 }
  0x76   : > { %1028 = vmatpush.msra.mxu2 %v840_v10  ;;  %1075 = vmatpush.msra.mxu3 %v9372_v61 }
  0x77   : > { %921 = vmatpush.msra.mxu0 %v9480_v49  ;;  %957 = vmatpush.msra.mxu1 %v9372_v61  ;;  %v1236_v61 = vsub.f32 %v9618_v16, %v1235_v14  ;;  %v1145_v49 = vld [vmem:[#allocation2 + $0x158] sm:$0xff] }
  0x78   : > { %1032 = vmatpush.msra.mxu2 %v846_v47  ;;  %1077 = vmatpush.msra.mxu3 %v9404_v18  ;;  %v1146_v47 = vld [vmem:[#allocation2 + $0x160] sm:$0xff] }
  0x79   : > { %924 = vmatpush.msra.mxu0 %v9499_v1  ;;  %959 = vmatpush.msra.mxu1 %v9404_v18  ;;  %v9004_v18 = vmov 0   ;;  %v1237_v10 = vand.u32 4294901760, %v1236_v61  ;;  %v9693_v1 = vand.u32 4294901760, %v1145_v49  ;;  %v1290_v61 = vsub.f32 %v9755_v32, %v1289_v2 }
  0x7a   : > { %1036 = vmatpush.msra.mxu2 %v852_v38  ;;  %1079 = vmatpush.msra.mxu3 %v9419_v13 }
  0x7b   : > { %927 = vmatmul.f32.vlgmr.msra.gmra.mxu0 %v9529_v17  ;;  %961 = vmatpush.msra.mxu1 %v9419_v13  ;;  %v1242_v13 = vsub.f32 %v9628_v53, %v1241_v37  ;;  %v9699_v39 = vsub.f32 %v1145_v49, %v9693_v1  ;;  %v1135_v49 = vld [vmem:[#allocation2 + $0x108] sm:$0xff] }
  0x7c   : > { %1040 = vmatpush.msra.mxu2 %v858_v40  ;;  %1081 = vmatpush.msra.mxu3 %v9432_v5  ;;  %v1144_v40 = vld [vmem:[#allocation2 + $0x150] sm:$0xff]  ;;  %v9806_v41 = vand.u32 4294901760, %v1135_v49 }
  0x7d   : > { %963 = vmatpush.msra.mxu1 %v9432_v5  ;;  %8882 = vset.pattern.permute.xlu0 %v9004_v18  ;;  %v1248_v5 = vsub.f32 %v9637_v54, %v1247_v29  ;;  %v1243_v46 = vand.u32 4294901760, %v1242_v13  ;;  %v9702_v35 = vand.u32 4294901760, %v1144_v40  ;;  %v1259_v45 = vand.u32 4294901760, %v9699_v39 }
  0x7e   : > { %1044 = vmatpush.msra.mxu2 %v864_v11  ;;  %1083 = vmatpush.msra.mxu3 %v9456_v27  ;;  %v1143_v11 = vld [vmem:[#allocation2 + $0x148] sm:$0xff]  ;;  %v9786_v13 = vand.u32 4294901760, %v1137_v60 }
  0x7f   : > { %1046 = vmatmul.f32.vlgmr.msra.gmra.mxu2 %v9511_v9  ;;  %965 = vmatpush.msra.mxu1 %v9456_v27  ;;  %v1249_v27 = vand.u32 4294901760, %v1248_v5  ;;  %v9711_v58 = vsub.f32 %v1144_v40, %v9702_v35  ;;  %v9714_v30 = vand.u32 4294901760, %v1143_v11  ;;  %v1260_v44 = vsub.f32 %v9699_v39, %v1259_v45 }
  0x80   : > { %1085 = vmatpush.msra.mxu3 %v9476_v19  ;;  %1097 = vperm.xlu0 %8882, %v292_v59   ;;  %v9782_v59 = vsub.f32 %v1138_v34, %v9772_v7  ;;  %v1291_v5 = vand.u32 4294901760, %v1290_v61 }
  0x81   : > { %1087 = vmatmul.f32.vlgmr.msra.gmra.mxu3 %v9511_v9  ;;  %967 = vmatpush.msra.mxu1 %v9476_v19  ;;  %v9688_v19 = vand.u32 4294901760, %v1146_v47  ;;  %v1265_v4 = vand.u32 4294901760, %v9711_v58  ;;  %v9723_v63 = vsub.f32 %v1143_v11, %v9714_v30  ;;  %v1261_v25 = vand.u32 4294901760, %v1260_v44  ;;  %v1134_v44 = vld [vmem:[#allocation2 + $0x100] sm:$0xff] }
  0x82   : > { %971 = vmatmul.f32.vlgmr.msra.gmra.mxu1 %v757_v3  ;;  %1340 = vmatpush.msrb.mxu2 %v9618_v16  ;;  %v1141_v3 = vld [vmem:[#allocation2 + $0x138] sm:$0xff]  ;;  %v9816_v0 = vand.u32 4294901760, %v1134_v44 }
  0x83   : > { %932 = vmatmul.f32.gmra.mxu0 %v9557_v15  ;;  %1238 = vmatpush.msrb.mxu1 %v1237_v10  ;;  %v9691_v38 = vsub.f32 %v1146_v47, %v9688_v19  ;;  %v1271_v50 = vand.u32 4294901760, %v9723_v63  ;;  %v9735_v20 = vand.u32 4294901760, %v1141_v3  ;;  %v1136_v10 = vld [vmem:[#allocation2 + $0x110] sm:$0xff]  ;;  %v9797_v47 = vsub.f32 %v1137_v60, %v9786_v13  ;;  %v1165_v60 = vld [vmem:[#allocation2 + $0x1f8] sm:$0xff] }
  0x84   : > { %1343 = vmatpush.msrb.mxu2 %v9628_v53  ;;  %1398 = vmatpush.msrb.mxu3 %v9604_v57 }
  0x85   : > { %1244 = vmatpush.msrb.mxu1 %v1243_v46  ;;  %1185 = vmatpush.msrb.mxu0 %v9604_v57  ;;  %v1253_v9 = vand.u32 4294901760, %v9691_v38  ;;  %v1272_v42 = vsub.f32 %v9723_v63, %v1271_v50  ;;  %v9746_v33 = vsub.f32 %v1141_v3, %v9735_v20 }
  0x86   : > { %1346 = vmatpush.msrb.mxu2 %v9637_v54  ;;  %1400 = vmatpush.msrb.mxu3 %v9611_v28 }
  0x87   : > { %1050 = vmatmul.f32.gmra.mxu2 %v9544_v56  ;;  %1250 = vmatpush.msrb.mxu1 %v1249_v27  ;;  %v1254_v48 = vsub.f32 %v9691_v38, %v1253_v9  ;;  %v1273_v8 = vand.u32 4294901760, %v1272_v42  ;;  %v1283_v52 = vand.u32 4294901760, %v9746_v33  ;;  %v1301_v27 = vand.u32 4294901760, %v9782_v59 }
  0x88   : > { %1102 = vperm.xlu0 %8882, %v293_v22   ;;  %1402 = vmatpush.msrb.mxu3 %v9620_v21  ;;  %v9792_v22 = vand.u32 4294901760, %v1136_v10 }
  0x89   : > { %1091 = vmatmul.f32.gmra.mxu3 %v9544_v56  ;;  %1187 = vmatpush.msrb.mxu0 %v9611_v28  ;;  %v1255_v17 = vand.u32 4294901760, %v1254_v48  ;;  %v1266_v56 = vsub.f32 %v9711_v58, %v1265_v4  ;;  %v1284_v12 = vsub.f32 %v9746_v33, %v1283_v52  ;;  %v1302_v11 = vsub.f32 %v9782_v59, %v1301_v27 }
  0x8a   : > { %977 = vmatmul.f32.gmra.mxu1 %v765_v31  ;;  %1404 = vmatpush.msrb.mxu3 %v9688_v19  ;;  %v1139_v31 = vld [vmem:[#allocation2 + $0x128] sm:$0xff]  ;;  %v9804_v48 = vsub.f32 %v1136_v10, %v9792_v22 }
  0x8b   : > { %1189 = vmatpush.msrb.mxu0 %v9620_v21  ;;  %1349 = vmatpush.msrb.mxu2 %v9691_v38  ;;  %v1267_v15 = vand.u32 4294901760, %v1266_v56  ;;  %v9757_v43 = vand.u32 4294901760, %v1139_v31  ;;  %v1285_v23 = vand.u32 4294901760, %v1284_v12  ;;  %v1303_v3 = vand.u32 4294901760, %v1302_v11  ;;  %v1163_v11 = vld [vmem:[#allocation2 + $0x1e8] sm:$0xff] }
  0x8c   : > { %1406 = vmatpush.msrb.mxu3 %v9693_v1  ;;  %1256 = vmatpush.msrb.mxu1 %v1255_v17  ;;  %v1307_v17 = vand.u32 4294901760, %v9797_v47  ;;  %v9814_v56 = vsub.f32 %v1135_v49, %v9806_v41  ;;  %v9858_v16 = vand.u32 4294901760, %v1163_v11 }
  0x8d   : > { %1191 = vmatpush.msrb.mxu0 %v9688_v19  ;;  %1352 = vmatpush.msrb.mxu2 %v9699_v39  ;;  %v9770_v24 = vsub.f32 %v1139_v31, %v9757_v43  ;;  %v1159_v39 = vld [vmem:[#allocation2 + $0x1c8] sm:$0xff] }
  0x8e   : > { %1408 = vmatpush.msrb.mxu3 %v9702_v35  ;;  %1262 = vmatpush.msrb.mxu1 %v1261_v25  ;;  %v1313_v25 = vand.u32 4294901760, %v9804_v48  ;;  %v1319_v31 = vand.u32 4294901760, %v9814_v56 }
  0x8f   : > { %1193 = vmatpush.msrb.mxu0 %v9693_v1  ;;  %1355 = vmatpush.msrb.mxu2 %v9711_v58  ;;  %v1295_v18 = vand.u32 4294901760, %v9770_v24 }
  0x90   : > { %1410 = vmatpush.msrb.mxu3 %v9714_v30  ;;  %1268 = vmatpush.msrb.mxu1 %v1267_v15  ;;  %v1308_v15 = vsub.f32 %v9797_v47, %v1307_v17  ;;  %v1314_v42 = vsub.f32 %v9804_v48, %v1313_v25  ;;  %v1320_v12 = vsub.f32 %v9814_v56, %v1319_v31 }
  0x91   : > { %1195 = vmatpush.msrb.mxu0 %v9702_v35  ;;  %1358 = vmatpush.msrb.mxu2 %v9723_v63  ;;  %v1296_v46 = vsub.f32 %v9770_v24, %v1295_v18 }
  0x92   : > { %1412 = vmatpush.msrb.mxu3 %v9727_v51  ;;  %1274 = vmatpush.msrb.mxu1 %v1273_v8  ;;  %v9829_v8 = vsub.f32 %v1134_v44, %v9816_v0  ;;  %v1309_v36 = vand.u32 4294901760, %v1308_v15  ;;  %v1315_v34 = vand.u32 4294901760, %v1314_v42  ;;  %v1321_v61 = vand.u32 4294901760, %v1320_v12 }
  0x93   : > { %1197 = vmatpush.msrb.mxu0 %v9714_v30  ;;  %1361 = vmatpush.msrb.mxu2 %v9738_v62  ;;  %v1297_v40 = vand.u32 4294901760, %v1296_v46  ;;  %v9873_v42 = vsub.f32 %v1163_v11, %v9858_v16  ;;  %v9906_v11 = vand.u32 4294901760, %v1159_v39  ;;  %v1156_v62 = vld [vmem:[#allocation2 + $0x1b0] sm:$0xff] }
  0x94   : > { %1414 = vmatpush.msrb.mxu3 %v9735_v20  ;;  %1280 = vmatpush.msrb.mxu1 %v1279_v6  ;;  %v1325_v6 = vand.u32 4294901760, %v9829_v8 }
  0x95   : > { %1199 = vmatpush.msrb.mxu0 %v9727_v51  ;;  %1364 = vmatpush.msrb.mxu2 %v9746_v33 }
  0x96   : > { %1416 = vmatpush.msrb.mxu3 %v9748_v26  ;;  %1286 = vmatpush.msrb.mxu1 %v1285_v23  ;;  %v9841_v23 = vand.u32 4294901760, %v1165_v60  ;;  %v1326_v10 = vsub.f32 %v9829_v8, %v1325_v6 }
  0x97   : > { %1201 = vmatpush.msrb.mxu0 %v9735_v20  ;;  %1367 = vmatpush.msrb.mxu2 %v9755_v32 }
  0x98   : > { %1418 = vmatpush.msrb.mxu3 %v9757_v43  ;;  %1292 = vmatpush.msrb.mxu1 %v1291_v5  ;;  %v1164_v5 = vld [vmem:[#allocation2 + $0x1f0] sm:$0xff]  ;;  %v9850_v46 = vsub.f32 %v1165_v60, %v9841_v23 }
  0x99   : > { %1203 = vmatpush.msrb.mxu0 %v9748_v26  ;;  %1370 = vmatpush.msrb.mxu2 %v9770_v24  ;;  %v9852_v49 = vand.u32 4294901760, %v1164_v5  ;;  %v1152_v24 = vld [vmem:[#allocation2 + $0x190] sm:$0xff] }
  0x9a   : > { %1420 = vmatpush.msrb.mxu3 %v9772_v7  ;;  %1298 = vmatpush.msrb.mxu1 %v1297_v40  ;;  %v1327_v40 = vand.u32 4294901760, %v1326_v10  ;;  %v1607_v44 = vand.u32 4294901760, %v9850_v46 }
  0x9b   : > { %1205 = vmatpush.msrb.mxu0 %v9757_v43  ;;  %1373 = vmatpush.msrb.mxu2 %v9782_v59 }
  0x9c   : > { %1422 = vmatpush.msrb.mxu3 %v9786_v13  ;;  %1304 = vmatpush.msrb.mxu1 %v1303_v3  ;;  %v1162_v3 = vld [vmem:[#allocation2 + $0x1e0] sm:$0xff]  ;;  %v1608_v53 = vsub.f32 %v9850_v46, %v1607_v44 }
  0x9d   : > { %1207 = vmatpush.msrb.mxu0 %v9772_v7  ;;  %1376 = vmatpush.msrb.mxu2 %v9797_v47  ;;  %v9870_v15 = vand.u32 4294901760, %v1162_v3 }
  0x9e   : > { %1424 = vmatpush.msrb.mxu3 %v9792_v22  ;;  %1310 = vmatpush.msrb.mxu1 %v1309_v36  ;;  %v1161_v36 = vld [vmem:[#allocation2 + $0x1d8] sm:$0xff]  ;;  %v1609_v54 = vand.u32 4294901760, %v1608_v53  ;;  %v1158_v53 = vld [vmem:[#allocation2 + $0x1c0] sm:$0xff] }
  0x9f   : > { %1209 = vmatpush.msrb.mxu0 %v9786_v13  ;;  %1379 = vmatpush.msrb.mxu2 %v9804_v48  ;;  %v9883_v12 = vand.u32 4294901760, %v1161_v36  ;;  %v9887_v60 = vsub.f32 %v1162_v3, %v9870_v15 }
  0xa0   : > { %1426 = vmatpush.msrb.mxu3 %v9806_v41  ;;  %1316 = vmatpush.msrb.mxu1 %v1315_v34  ;;  %v1619_v34 = vand.u32 4294901760, %v9873_v42 }
  0xa1   : > { %1211 = vmatpush.msrb.mxu0 %v9792_v22  ;;  %1382 = vmatpush.msrb.mxu2 %v9814_v56 }
  0xa2   : > { %1428 = vmatpush.msrb.mxu3 %v9816_v0  ;;  %1322 = vmatpush.msrb.mxu1 %v1321_v61  ;;  %v1620_v61 = vsub.f32 %v9873_v42, %v1619_v34 }
  0xa3   : > { %1213 = vmatpush.msrb.mxu0 %v9806_v41  ;;  %1385 = vmatpush.msrb.mxu2 %v9829_v8 }
  0xa4   : > { %1328 = vmatpush.msrb.mxu1 %v1327_v40  ;;  %1610 = vmatpush.msra.mxu3 %v1609_v54 }
  0xa5   : > { %1215 = vmatpush.msrb.mxu0 %v9816_v0  ;;  %1557 = vmatpush.msra.mxu2 %v9841_v23 }
  0xa6   : > { %1516 = vmatpush.msra.mxu1 %v9604_v57  ;;  %v1160_v57 = vld [vmem:[#allocation2 + $0x1d0] sm:$0xff] }
  0xa7   : > { %1445 = vmatpush.msra.mxu0 %v1235_v14  ;;  %1559 = vmatpush.msra.mxu2 %v9852_v49  ;;  %v9861_v14 = vsub.f32 %v1164_v5, %v9852_v49  ;;  %v9895_v10 = vand.u32 4294901760, %v1160_v57  ;;  %v14516_v5 = vand.u32 4294901760, %v9887_v60 }
  0xa8   : > { %1518 = vmatpush.msra.mxu1 %v9611_v28  ;;  %v9898_v28 = vsub.f32 %v1161_v36, %v9883_v12  ;;  %v9922_v36 = vand.u32 4294901760, %v1158_v53 }
  0xa9   : > { %1449 = vmatpush.msra.mxu0 %v1241_v37  ;;  %1561 = vmatpush.msra.mxu2 %v9858_v16  ;;  %v1613_v37 = vand.u32 4294901760, %v9861_v14  ;;  %v9909_v3 = vsub.f32 %v1160_v57, %v9895_v10 }
  0xaa   : > { %1520 = vmatpush.msra.mxu1 %v9620_v21  ;;  %v14513_v40 = vand.u32 4294901760, %v9898_v28  ;;  %v1626_v21 = vsub.f32 %v9887_v60, %v14516_v5 }
  0xab   : > { %1453 = vmatpush.msra.mxu0 %v1247_v29  ;;  %v1614_v29 = vsub.f32 %v9861_v14, %v1613_v37  ;;  %1563 = vmatpush.msra.mxu2 %v9870_v15 }
  0xac   : > { %1522 = vmatpush.msra.mxu1 %v9688_v19  ;;  %v1632_v58 = vsub.f32 %v9898_v28, %v14513_v40  ;;  %v9925_v19 = vsub.f32 %v1159_v39, %v9906_v11  ;;  %v1627_v54 = vand.u32 4294901760, %v1626_v21  ;;  %v9937_v39 = vld [vmem:[#allocation4] ss:$0 sm:$0xff]  ;;  %v9947_v21 = vand.u32 4294901760, %v1156_v62 }
  0xad   : > { %1457 = vmatpush.msra.mxu0 %v1253_v9  ;;  %v1615_v9 = vand.u32 4294901760, %v1614_v29  ;;  %1565 = vmatpush.msra.mxu2 %v9883_v12  ;;  %v1157_v29 = vld [vmem:[#allocation2 + $0x1b8] sm:$0xff] }
  0xae   : > { %1524 = vmatpush.msra.mxu1 %v9693_v1  ;;  %v9941_v1 = vsub.f32 %v1158_v53, %v9922_v36 }
  0xaf   : > { %1461 = vmatpush.msra.mxu0 %v1259_v45  ;;  %1616 = vmatpush.msra.mxu3 %v1615_v9  ;;  %v1621_v45 = vand.u32 4294901760, %v1620_v61  ;;  %v14512_v9 = vand.u32 4294901760, %v9925_v19  ;;  %v9935_v61 = vand.u32 4294901760, %v1157_v29 }
  0xb0   : > { %1567 = vmatpush.msra.mxu2 %v9895_v10  ;;  %1526 = vmatpush.msra.mxu1 %v9702_v35  ;;  %v14515_v53 = vand.u32 4294901760, %v9941_v1 }
  0xb1   : > { %1465 = vmatpush.msra.mxu0 %v1265_v4  ;;  %1622 = vmatpush.msra.mxu3 %v1621_v45  ;;  %v14511_v4 = vand.u32 4294901760, %v9909_v3  ;;  %v1644_v45 = vsub.f32 %v9925_v19, %v14512_v9 }
  0xb2   : > { %1569 = vmatpush.msra.mxu2 %v9906_v11  ;;  %1528 = vmatpush.msra.mxu1 %v9714_v30 }
  0xb3   : > { %1469 = vmatpush.msra.mxu0 %v1271_v50  ;;  %v1633_v50 = vand.u32 4294901760, %v1632_v58  ;;  %v1638_v57 = vsub.f32 %v9909_v3, %v14511_v4  ;;  %1628 = vmatpush.msra.mxu3 %v1627_v54  ;;  %v9950_v58 = vsub.f32 %v1157_v29, %v9935_v61  ;;  %v1155_v54 = vld [vmem:[#allocation2 + $0x1a8] sm:$0xff]  ;;  %v1645_v4 = vand.u32 4294901760, %v1644_v45 }
  0xb4   : > { %1571 = vmatpush.msra.mxu2 %v9922_v36  ;;  %v9958_v40 = vand.u32 4294901760, %v1155_v54  ;;  %v9961_v29 = vsub.f32 %v1156_v62, %v9947_v21  ;;  %1530 = vmatpush.msra.mxu1 %v9727_v51 }
  0xb5   : > { %1473 = vmatpush.msra.mxu0 %v1277_v55  ;;  %v1639_v55 = vand.u32 4294901760, %v1638_v57  ;;  %1634 = vmatpush.msra.mxu3 %v1633_v50  ;;  %v14514_v9 = vand.u32 4294901760, %v9950_v58  ;;  %v1154_v50 = vld [vmem:[#allocation2 + $0x1a0] sm:$0xff] }
  0xb6   : > { %1573 = vmatpush.msra.mxu2 %v9935_v61  ;;  %v1661_v32 = vand.u32 4294901760, %v9961_v29  ;;  %1532 = vmatpush.msra.mxu1 %v9735_v20 }
  0xb7   : > { %1477 = vmatpush.msra.mxu0 %v1283_v52  ;;  %1640 = vmatpush.msra.mxu3 %v1639_v55  ;;  %v1650_v52 = vsub.f32 %v9941_v1, %v14515_v53  ;;  %v1656_v62 = vsub.f32 %v9950_v58, %v14514_v9  ;;  %v1153_v55 = vld [vmem:[#allocation2 + $0x198] sm:$0xff] }
  0xb8   : > { %1575 = vmatpush.msra.mxu2 %v9947_v21  ;;  %v1662_v9 = vsub.f32 %v9961_v29, %v1661_v32  ;;  %v9990_v5 = vand.u32 4294901760, %v1153_v55  ;;  %1534 = vmatpush.msra.mxu1 %v9748_v26 }
  0xb9   : > { %1481 = vmatpush.msra.mxu0 %v1289_v2  ;;  %v9977_v2 = vand.u32 4294901760, %v1154_v50  ;;  %1646 = vmatpush.msra.mxu3 %v1645_v4  ;;  %v1651_v51 = vand.u32 4294901760, %v1650_v52  ;;  %v1657_v45 = vand.u32 4294901760, %v1656_v62  ;;  %v10002_v62 = vand.u32 4294901760, %v1152_v24 }
  0xba   : > { %1577 = vmatpush.msra.mxu2 %v9958_v40  ;;  %1536 = vmatpush.msra.mxu1 %v9757_v43  ;;  %v10009_v59 = vsub.f32 %v1153_v55, %v9990_v5 }
  0xbb   : > { %1485 = vmatpush.msra.mxu0 %v1295_v18  ;;  %1652 = vmatpush.msra.mxu3 %v1651_v51  ;;  %v9996_v20 = vsub.f32 %v1154_v50, %v9977_v2 }
  0xbc   : > { %1579 = vmatpush.msra.mxu2 %v9977_v2  ;;  %1538 = vmatpush.msra.mxu1 %v9772_v7 }
  0xbd   : > { %1489 = vmatpush.msra.mxu0 %v1301_v27  ;;  %1658 = vmatpush.msra.mxu3 %v1657_v45  ;;  %v14521_v26 = vand.u32 4294901760, %v9996_v20  ;;  %v1151_v27 = vld [vmem:[#allocation2 + $0x188] sm:$0xff]  ;;  %v1150_v45 = vld [vmem:[#allocation2 + $0x180] sm:$0xff] }
  0xbe   : > { %1581 = vmatpush.msra.mxu2 %v9990_v5  ;;  %1540 = vmatpush.msra.mxu1 %v9786_v13 }
  0xbf   : > { %1493 = vmatpush.msra.mxu0 %v1307_v17  ;;  %v1674_v43 = vsub.f32 %v9996_v20, %v14521_v26  ;;  %v14519_v17 = vand.u32 4294901760, %v10009_v59 }
  0xc0   : > { %1583 = vmatpush.msra.mxu2 %v10002_v62  ;;  %1542 = vmatpush.msra.mxu1 %v9792_v22 }
  0xc1   : > { %1497 = vmatpush.msra.mxu0 %v1313_v25  ;;  %v1675_v25 = vand.u32 4294901760, %v1674_v43 }
  0xc2   : > { %1544 = vmatpush.msra.mxu1 %v9806_v41 }
  0xc3   : > { %1501 = vmatpush.msra.mxu0 %v1319_v31 }
  0xc4   : > { %1546 = vmatpush.msra.mxu1 %v9816_v0 }
  0xc5   : > { %1505 = vmatpush.msra.mxu0 %v1325_v6 }
  0xc9   : > { %v389_v38 = vpop.f32.mrf.mxu0 }
  0xca   : > { %v390_v30 = vadd.f32 %v9937_v39, %v389_v38  ;;  %v9980_v38 = vsub.f32 %v1155_v54, %v9958_v40  ;;  %v1663_v54 = vand.u32 4294901760, %v1662_v9  ;;  %v10012_v9 = vand.u32 4294901760, %v1151_v27 }
  0xcc   : > { %v1667_v53 = vand.u32 4294901760, %v9980_v38  ;;  %1664 = vmatpush.msra.mxu3 %v1663_v54  ;;  %1585 = vmatpush.msra.mxu2 %v10012_v9  ;;  %v10039_v56 = vsub.f32 %v1151_v27, %v10012_v9 }
  0xce   : > { %v1668_v52 = vsub.f32 %v9980_v38, %v1667_v53 }
  0xcf   : > { %v498_v63 = vpop.f32.mrf.mxu1 }
  0xd0   : > { %v499_v18 = vadd.f32 %v498_v63, %v390_v30  ;;  %v1669_v63 = vand.u32 4294901760, %v1668_v52  ;;  %v10015_v30 = vsub.f32 %v1152_v24, %v10002_v62  ;;  %v10033_v24 = vand.u32 4294901760, %v1150_v45 }
  0xd1   : > { %v556_v35 = vpop.f32.mrf.mxu2  ;;  %v9966_v33 = vpop.f32.mrf.mxu3 }
  0xd2   : > { %v557_v50 = vadd.f32 %v556_v35, %v499_v18  ;;  %v14518_v55 = vand.u32 4294901760, %v10015_v30  ;;  %1670 = vmatpush.msra.mxu3 %v1669_v63  ;;  %v1680_v35 = vsub.f32 %v10009_v59, %v14519_v17  ;;  %v10045_v31 = vsub.f32 %v1150_v45, %v10033_v24  ;;  %1587 = vmatpush.msra.mxu2 %v10033_v24 }
  0xd4   : > { %v1686_v18 = vsub.f32 %v10015_v30, %v14518_v55  ;;  %1676 = vmatpush.msra.mxu3 %v1675_v25  ;;  %v1681_v13 = vand.u32 4294901760, %v1680_v35  ;;  %v601_v54 = vadd.f32 %v9966_v33, %v557_v50  ;;  %v14520_v8 = vand.u32 4294901760, %v10045_v31 }
  0xd6   : > { %1682 = vmatpush.msra.mxu3 %v1681_v13  ;;  %v1698_v27 = vsub.f32 %v10045_v31, %v14520_v8 }
  0xd7   : > { %v397_v57 = vpop.f32.mrf.mxu0 }
  0xd8   : > { %v398_v48 = vadd.f32 %v9937_v39, %v397_v57  ;;  %v1687_v39 = vand.u32 4294901760, %v1686_v18  ;;  %v14517_v57 = vand.u32 4294901760, %v10039_v56  ;;  %v1699_v41 = vand.u32 4294901760, %v1698_v27 }
  0xda   : > { %v502_v4 = vpop.f32.mrf.mxu1  ;;  %v561_v47 = vpop.f32.mrf.mxu2  ;;  %v1692_v22 = vsub.f32 %v10039_v56, %v14517_v57  ;;  %1688 = vmatpush.msra.mxu3 %v1687_v39 }
  0xdb   : > { %v503_v52 = vadd.f32 %v502_v4, %v398_v48 }
  0xdc   : > { %v1693_v63 = vand.u32 4294901760, %v1692_v22 }
  0xdd   : > { %v562_v33 = vadd.f32 %v561_v47, %v503_v52 }
  0xde   : > { %v606_v7 = vpop.f32.mrf.mxu3  ;;  %1694 = vmatpush.msra.mxu3 %v1693_v63 }
  0xdf   : > { %v607_v48 = vadd.f32 %v606_v7, %v562_v33 }
  0xe0   : > { %1700 = vmatpush.msra.mxu3 %v1699_v41 }
  0xe2   : > { %v675_v51 = vpop.f32.mrf.mxu0 }
  0xe3   : > { %v676_v4 = vadd.f32 %v675_v51, %v601_v54 }
  0xe5   : > { %v716_v6 = vpop.f32.mrf.mxu1  ;;  %v761_v43 = vpop.f32.mrf.mxu2 }
  0xe6   : > { %v717_v25 = vadd.f32 %v716_v6, %v676_v4 }
  0xe8   : > { %v762_v18 = vadd.f32 %v761_v43, %v717_v25 }
  0xe9   : > { %v870_v45 = vpop.f32.mrf.mxu3 }
  0xea   : > { %v871_v57 = vadd.f32 %v870_v45, %v762_v18 }
  0xec   : > { %v679_v50 = vpop.f32.mrf.mxu0 }
  0xed   : > { %v680_v13 = vadd.f32 %v679_v50, %v607_v48 }
  0xef   : > { %v720_v35 = vpop.f32.mrf.mxu1 }
  0xf0   : > { %v769_v39 = vpop.f32.mrf.mxu2  ;;  %v721_v55 = vadd.f32 %v720_v35, %v680_v13 }
  0xf2   : > { %v770_v47 = vadd.f32 %v769_v39, %v721_v55  ;;  %v10059_v26 = vpop.permute.xlu0 %1097 }
  0xf3   : > { %v874_v17 = vpop.f32.mrf.mxu3 }
  0xf4   : > { %v875_v63 = vadd.f32 %v874_v17, %v770_v47 }
  0xf8   : > { %v928_v0 = vpop.f32.mrf.mxu0 }
  0xf9   : > { %v929_v8 = vadd.f32 %v928_v0, %v871_v57 }
  0xfa   : > { %v10068_v25 = vpop.permute.xlu0 %1102 }
  0xff   : > { %v972_v22 = vpop.f32.mrf.mxu1 }
 0x100   : > { %v973_v51 = vadd.f32 %v972_v22, %v929_v8  ;;  %v933_v52 = vpop.f32.mrf.mxu0 }
 0x101   : > { %v934_v33 = vadd.f32 %v933_v52, %v875_v63 }
 0x102   : > { %v1047_v54 = vpop.f32.mrf.mxu2 }
 0x103   : > { %v1048_v27 = vadd.f32 %v1047_v54, %v973_v51 }
 0x104   : > { %v1088_v7 = vpop.f32.mrf.mxu3 }
 0x105   : > { %v1089_v6 = vadd.f32 %v1088_v7, %v1048_v27 }
 0x107   : > { %v1105_v4 = vmul.f32 %v10059_v26, %v1089_v6  ;;  %v978_v43 = vpop.f32.mrf.mxu1  ;;  %v14620_v6 = vand.u32 4294901760, %v9898_v28 }
 0x108   : > { %v979_v41 = vadd.f32 %v978_v43, %v934_v33 }
 0x109   : > { %v1109_v50 = vrot.slane %v1105_v4, 7 }
 0x10a   : > { %v1051_v45 = vpop.f32.mrf.mxu2 }
 0x10b   : > { %v10063_v57 = vsel %vm298_vm0, 0.0, %v1109_v50  ;;  %v1052_v55 = vadd.f32 %v1051_v45, %v979_v41 }
 0x10c   : > { %v1092_v8 = vpop.f32.mrf.mxu3  ;;  %v10066_v48 = vand.u32 4294901760, %v10063_v57  ;;  %v1119_v47 = vrot.slane %v10063_v57, 1 }
 0x10d   : > { %v1093_v17 = vadd.f32 %v1092_v8, %v1052_v55  ;;  %v14623_v55 = vand.u32 4294901760, %v9941_v1 }
 0x10e   : > { %1330 = vmatmul.f32.vlgmr.msrb.gmra.mxu1 %v10066_v48  ;;  %v1217_v35 = vsub.f32 %v10063_v57, %v10066_v48 }
 0x10f   : > { %v1106_v18 = vmul.f32 %v10068_v25, %v1093_v17  ;;  %1770 = vmatpush.msrb.mxu1 %v9841_v23 }
 0x110   : > { %1388 = vmatmul.f32.vlgmr.msrb.gmra.mxu2 %v1217_v35  ;;  %v1218_v13 = vand.u32 4294901760, %v1217_v35 }
 0x111   : > { %v1110_v0 = vrot.slane %v1106_v18, 7  ;;  %1772 = vmatpush.msrb.mxu1 %v9852_v49  ;;  %1817 = vmatpush.msrb.mxu2 %v1607_v44  ;;  %v1177_v18 = vld [vmem:[#allocation2 + $0x258] sm:$0xff] }
 0x112   : > { %1432 = vmatmul.f32.vlgmr.msrb.gmra.mxu3 %v1218_v13  ;;  %v1219_v39 = vsub.f32 %v1217_v35, %v1218_v13 }
 0x113   : > { %v10079_v22 = vsel %vm298_vm0, %v1109_v50, %v1110_v0  ;;  %1774 = vmatpush.msrb.mxu1 %v9858_v16  ;;  %1821 = vmatpush.msrb.mxu2 %v1613_v37  ;;  %v10086_v51 = vsel %vm298_vm0, %v1110_v0, 0.0  ;;  %v1181_v50 = vld [vmem:[#allocation2 + $0x278] sm:$0xff] }
 0x114   : > { %v1120_v54 = vrot.slane %v10079_v22, 1  ;;  %1888 = vmatpush.msrb.mxu3 %v9841_v23  ;;  %v1220_v44 = vand.u32 4294901760, %v1219_v39  ;;  %v10094_v52 = vand.u32 4294901760, %v10079_v22  ;;  %v1122_v27 = vrot.slane %v10086_v51, 1 }
 0x115   : > { %1776 = vmatpush.msrb.mxu1 %v9870_v15  ;;  %1825 = vmatpush.msrb.mxu2 %v1619_v34  ;;  %v14619_v34 = vand.u32 4294901760, %v9887_v60 }
 0x116   : > { %1890 = vmatpush.msrb.mxu3 %v9852_v49  ;;  %v1121_v37 = vsel %vm309_vm1, %v1119_v47, %v1120_v54  ;;  %1221 = vmatmul.f32.vlgmr.msrb.gmra.mxu0 %v1220_v44  ;;  %v1225_v23 = vsub.f32 %v10079_v22, %v10094_v52  ;;  %v1123_v4 = vsel %vm309_vm1, %v1120_v54, %v1122_v27  ;;  %v1175_v47 = vld [vmem:[#allocation2 + $0x248] sm:$0xff]  ;;  %v1174_v27 = vld [vmem:[#allocation2 + $0x240] sm:$0xff] }
 0x117   : > { %1334 = vmatmul.f32.gmra.mxu1 %v10094_v52  ;;  %v10102_v63 = vand.u32 4294901760, %v1121_v37  ;;  %1712 = vmatpush.msrb.mxu0 %v9850_v46  ;;  %v10127_v41 = vand.u32 4294901760, %v1123_v4 }
 0x118   : > { %1778 = vmatpush.msrb.mxu1 %v9883_v12  ;;  %1829 = vmatpush.msrb.mxu2 %v14619_v34  ;;  %v1226_v49 = vand.u32 4294901760, %v1225_v23 }
 0x119   : > { %1892 = vmatpush.msrb.mxu3 %v9858_v16  ;;  %v10110_v7 = vsub.f32 %v1121_v37, %v10102_v63  ;;  %1393 = vmatmul.f32.gmra.mxu2 %v1225_v23  ;;  %v14626_v37 = vand.u32 4294901760, %v10009_v59 }
 0x11a   : > { %1715 = vmatpush.msrb.mxu0 %v9861_v14  ;;  %1780 = vmatpush.msrb.mxu1 %v9895_v10  ;;  %v1227_v46 = vsub.f32 %v1225_v23, %v1226_v49  ;;  %v14621_v14 = vand.u32 4294901760, %v9909_v3  ;;  %v10212_v23 = vand.u32 4294901760, %v1175_v47 }
 0x11b   : > { %1833 = vmatpush.msrb.mxu2 %v14620_v6  ;;  %v1590_v33 = vand.u32 4294901760, %v10110_v7  ;;  %1894 = vmatpush.msrb.mxu3 %v9870_v15  ;;  %v14622_v15 = vand.u32 4294901760, %v9925_v19 }
 0x11c   : > { %1718 = vmatpush.msrb.mxu0 %v9873_v42  ;;  %1438 = vmatmul.f32.gmra.mxu3 %v1226_v49  ;;  %v1228_v16 = vand.u32 4294901760, %v1227_v46  ;;  %v10135_v42 = vand.u32 4294901760, %v1181_v50  ;;  %v14627_v49 = vand.u32 4294901760, %v10015_v30 }
 0x11d   : > { %1782 = vmatpush.msrb.mxu1 %v9906_v11  ;;  %1837 = vmatpush.msrb.mxu2 %v14621_v14  ;;  %v1591_v43 = vsub.f32 %v10110_v7, %v1590_v33  ;;  %v14628_v14 = vand.u32 4294901760, %v10039_v56 }
 0x11e   : > { %1896 = vmatpush.msrb.mxu3 %v9883_v12  ;;  %1721 = vmatpush.msrb.mxu0 %v9887_v60  ;;  %v1180_v12 = vld [vmem:[#allocation2 + $0x270] sm:$0xff]  ;;  %v10140_v60 = vsub.f32 %v1123_v4, %v10127_v41  ;;  %v10153_v17 = vsub.f32 %v1181_v50, %v10135_v42  ;;  %v10226_v4 = vand.u32 4294901760, %v1174_v27 }
 0x11f   : > { %1784 = vmatpush.msrb.mxu1 %v9922_v36  ;;  %1841 = vmatpush.msrb.mxu2 %v14622_v15  ;;  %v1592_v45 = vand.u32 4294901760, %v1591_v43  ;;  %v10147_v8 = vand.u32 4294901760, %v1180_v12  ;;  %v10235_v43 = vsub.f32 %v1175_v47, %v10212_v23  ;;  %v1172_v50 = vld [vmem:[#allocation2 + $0x230] sm:$0xff] }
 0x120   : > { %1898 = vmatpush.msrb.mxu3 %v9895_v10  ;;  %1229 = vmatmul.f32.gmra.mxu0 %v1228_v16  ;;  %v1179_v10 = vld [vmem:[#allocation2 + $0x268] sm:$0xff]  ;;  %v1979_v13 = vand.u32 4294901760, %v10153_v17 }
 0x121   : > { %1548 = vmatmul.f32.vlgmr.msra.gmra.mxu1 %v10066_v48  ;;  %1724 = vmatpush.msrb.mxu0 %v9898_v28  ;;  %v14624_v28 = vand.u32 4294901760, %v9950_v58  ;;  %v10157_v35 = vand.u32 4294901760, %v1179_v10 }
 0x122   : > { %1786 = vmatpush.msrb.mxu1 %v9935_v61  ;;  %1845 = vmatpush.msrb.mxu2 %v14623_v55  ;;  %v1171_v55 = vld [vmem:[#allocation2 + $0x228] sm:$0xff] }
 0x123   : > { %1900 = vmatpush.msrb.mxu3 %v9906_v11  ;;  %1727 = vmatpush.msrb.mxu0 %v9909_v3  ;;  %v1598_v11 = vand.u32 4294901760, %v10140_v60  ;;  %v1178_v3 = vld [vmem:[#allocation2 + $0x260] sm:$0xff] }
 0x124   : > { %1788 = vmatpush.msrb.mxu1 %v9947_v21  ;;  %1849 = vmatpush.msrb.mxu2 %v14624_v28  ;;  %v10170_v0 = vand.u32 4294901760, %v1178_v3  ;;  %v1170_v28 = vld [vmem:[#allocation2 + $0x220] sm:$0xff] }
 0x125   : > { %1902 = vmatpush.msrb.mxu3 %v9922_v36  ;;  %1593 = vmatmul.f32.vlgmr.msra.gmra.mxu2 %v1592_v45  ;;  %v10165_v36 = vsub.f32 %v1180_v12, %v10147_v8  ;;  %v10248_v45 = vsub.f32 %v1174_v27, %v10226_v4 }
 0x126   : > { %1702 = vmatmul.f32.vlgmr.msra.gmra.mxu3 %v10102_v63  ;;  %1730 = vmatpush.msrb.mxu0 %v9925_v19  ;;  %v1599_v19 = vsub.f32 %v10140_v60, %v1598_v11  ;;  %v10195_v39 = vsub.f32 %v1178_v3, %v10170_v0 }
 0x127   : > { %1790 = vmatpush.msrb.mxu1 %v9958_v40  ;;  %1853 = vmatpush.msrb.mxu2 %v1661_v32  ;;  %v1176_v32 = vld [vmem:[#allocation2 + $0x250] sm:$0xff] }
 0x128   : > { %1904 = vmatpush.msrb.mxu3 %v9935_v61  ;;  %1733 = vmatpush.msrb.mxu0 %v9941_v1  ;;  %v10179_v61 = vsub.f32 %v1179_v10, %v10157_v35  ;;  %v10183_v1 = vand.u32 4294901760, %v1177_v18  ;;  %v10200_v44 = vand.u32 4294901760, %v1176_v32 }
 0x129   : > { %1792 = vmatpush.msrb.mxu1 %v9977_v2  ;;  %1857 = vmatpush.msrb.mxu2 %v1667_v53  ;;  %v14625_v53 = vand.u32 4294901760, %v9996_v20 }
 0x12a   : > { %1906 = vmatpush.msrb.mxu3 %v9947_v21  ;;  %1507 = vmatmul.f32.vlgmr.msra.gmra.mxu0 %v10066_v48  ;;  %v1985_v21 = vand.u32 4294901760, %v10165_v36  ;;  %v1980_v48 = vsub.f32 %v10153_v17, %v1979_v13  ;;  %v1991_v54 = vand.u32 4294901760, %v10179_v61  ;;  %v10224_v46 = vsub.f32 %v1176_v32, %v10200_v44 }
 0x12b   : > { %1552 = vmatmul.f32.gmra.mxu1 %v10094_v52  ;;  %1736 = vmatpush.msrb.mxu0 %v9950_v58  ;;  %v1600_v58 = vand.u32 4294901760, %v1599_v19  ;;  %v2021_v32 = vand.u32 4294901760, %v10248_v45 }
 0x12c   : > { %1794 = vmatpush.msrb.mxu1 %v9990_v5  ;;  %1861 = vmatpush.msrb.mxu2 %v14625_v53  ;;  %v1981_v34 = vand.u32 4294901760, %v1980_v48  ;;  %v1992_v6 = vsub.f32 %v10179_v61, %v1991_v54  ;;  %v2009_v12 = vand.u32 4294901760, %v10224_v46  ;;  %v1169_v53 = vld [vmem:[#allocation2 + $0x218] sm:$0xff]  ;;  %v10277_v48 = vand.u32 4294901760, %v1170_v28 }
 0x12d   : > { %1908 = vmatpush.msrb.mxu3 %v9958_v40  ;;  %1739 = vmatpush.msrb.mxu0 %v9961_v29  ;;  %v10206_v40 = vsub.f32 %v1177_v18, %v10183_v1  ;;  %v1986_v29 = vsub.f32 %v10165_v36, %v1985_v21 }
 0x12e   : > { %1796 = vmatpush.msrb.mxu1 %v10002_v62  ;;  %1865 = vmatpush.msrb.mxu2 %v14626_v37  ;;  %v2010_v19 = vsub.f32 %v10224_v46, %v2009_v12 }
 0x12f   : > { %1910 = vmatpush.msrb.mxu3 %v9977_v2  ;;  %1601 = vmatmul.f32.gmra.mxu2 %v1600_v58  ;;  %v1997_v2 = vand.u32 4294901760, %v10195_v39  ;;  %v2003_v16 = vand.u32 4294901760, %v10206_v40  ;;  %v1168_v58 = vld [vmem:[#allocation2 + $0x210] sm:$0xff] }
 0x130   : > { %1706 = vmatmul.f32.gmra.mxu3 %v10127_v41  ;;  %1742 = vmatpush.msrb.mxu0 %v9980_v38  ;;  %v1173_v38 = vld [vmem:[#allocation2 + $0x238] sm:$0xff] }
 0x131   : > { %1798 = vmatpush.msrb.mxu1 %v10012_v9  ;;  %1869 = vmatpush.msrb.mxu2 %v14627_v49  ;;  %v10241_v15 = vand.u32 4294901760, %v1173_v38  ;;  %v2004_v10 = vsub.f32 %v10206_v40, %v2003_v16 }
 0x132   : > { %1912 = vmatpush.msrb.mxu3 %v9990_v5  ;;  %1745 = vmatpush.msrb.mxu0 %v9996_v20  ;;  %v1987_v5 = vand.u32 4294901760, %v1986_v29  ;;  %v1998_v20 = vsub.f32 %v10195_v39, %v1997_v2  ;;  %v10289_v29 = vand.u32 4294901760, %v1169_v53 }
 0x133   : > { %1800 = vmatpush.msrb.mxu1 %v10033_v24  ;;  %1873 = vmatpush.msrb.mxu2 %v14628_v14  ;;  %v10263_v18 = vsub.f32 %v1173_v38, %v10241_v15  ;;  %v10301_v38 = vand.u32 4294901760, %v1168_v58  ;;  %v1166_v14 = vld [vmem:[#allocation2 + $0x200] sm:$0xff] }
 0x134   : > { %1914 = vmatpush.msrb.mxu3 %v10002_v62  ;;  %1511 = vmatmul.f32.gmra.mxu0 %v10094_v52  ;;  %v1993_v62 = vand.u32 4294901760, %v1992_v6  ;;  %v14629_v52 = vand.u32 4294901760, %v10045_v31  ;;  %v1999_v3 = vand.u32 4294901760, %v1998_v20  ;;  %v10299_v6 = vsub.f32 %v1170_v28, %v10277_v48 }
 0x135   : > { %1982 = vmatpush.msra.mxu1 %v1981_v34  ;;  %1748 = vmatpush.msrb.mxu0 %v10009_v59  ;;  %v10256_v59 = vand.u32 4294901760, %v1172_v50  ;;  %v2027_v37 = vand.u32 4294901760, %v10263_v18  ;;  %v1167_v34 = vld [vmem:[#allocation2 + $0x208] sm:$0xff]  ;;  %v10313_v20 = vsub.f32 %v1169_v53, %v10289_v29 }
 0x136   : > { %1804 = vmatmul.f32.vlgmr.msrb.gmra.mxu1 %v1590_v33  ;;  %1877 = vmatpush.msrb.mxu2 %v14629_v52  ;;  %v2015_v33 = vand.u32 4294901760, %v10235_v43  ;;  %v10325_v52 = vsub.f32 %v1168_v58, %v10301_v38 }
 0x137   : > { %1916 = vmatpush.msrb.mxu3 %v10012_v9  ;;  %1988 = vmatpush.msra.mxu1 %v1987_v5  ;;  %v10265_v9 = vand.u32 4294901760, %v1171_v55  ;;  %v2028_v5 = vsub.f32 %v10263_v18, %v2027_v37 }
 0x138   : > { %2084 = vmatpush.msra.mxu2 %v10153_v17  ;;  %1751 = vmatpush.msrb.mxu0 %v10015_v30  ;;  %v2005_v30 = vand.u32 4294901760, %v2004_v10  ;;  %v2016_v47 = vsub.f32 %v10235_v43, %v2015_v33  ;;  %v10327_v10 = vand.u32 4294901760, %v1166_v14  ;;  %v2057_v58 = vand.u32 4294901760, %v10325_v52  ;;  %v2345_v17 = vld [vmem:[#allocation2 + $0x2f8] sm:$0xff] }
 0x139   : > { %1918 = vmatpush.msrb.mxu3 %v10033_v24  ;;  %1879 = vmatmul.f32.vlgmr.msrb.gmra.mxu2 %v10102_v63  ;;  %v10275_v24 = vsub.f32 %v1172_v50, %v10256_v59  ;;  %v10287_v27 = vsub.f32 %v1171_v55, %v10265_v9  ;;  %v2029_v28 = vand.u32 4294901760, %v2028_v5 }
 0x13a   : > { %1994 = vmatpush.msra.mxu1 %v1993_v62  ;;  %2087 = vmatpush.msra.mxu2 %v10165_v36  ;;  %v10315_v62 = vand.u32 4294901760, %v1167_v34  ;;  %v2058_v5 = vsub.f32 %v10325_v52, %v2057_v58  ;;  %v10456_v36 = vand.u32 4294901760, %v2345_v17 }
 0x13b   : > { %2142 = vmatpush.msra.mxu3 %v10135_v42  ;;  %1754 = vmatpush.msrb.mxu0 %v10039_v56  ;;  %v2011_v56 = vand.u32 4294901760, %v2010_v19  ;;  %v2033_v49 = vand.u32 4294901760, %v10275_v24  ;;  %v2039_v50 = vand.u32 4294901760, %v10287_v27  ;;  %v2051_v19 = vand.u32 4294901760, %v10313_v20 }
 0x13c   : > { %1920 = vmatmul.f32.vlgmr.msrb.gmra.mxu3 %v10102_v63  ;;  %2000 = vmatpush.msra.mxu1 %v1999_v3  ;;  %v2022_v63 = vsub.f32 %v10248_v45, %v2021_v32  ;;  %v10337_v53 = vsub.f32 %v1167_v34, %v10315_v62 }
 0x13d   : > { %2090 = vmatpush.msra.mxu2 %v10179_v61  ;;  %2144 = vmatpush.msra.mxu3 %v10147_v8  ;;  %v2040_v3 = vsub.f32 %v10287_v27, %v2039_v50  ;;  %v2052_v34 = vsub.f32 %v10313_v20, %v2051_v19 }
 0x13e   : > { %1757 = vmatpush.msrb.mxu0 %v10045_v31  ;;  %2006 = vmatpush.msra.mxu1 %v2005_v30  ;;  %v2017_v31 = vand.u32 4294901760, %v2016_v47  ;;  %v2023_v55 = vand.u32 4294901760, %v2022_v63  ;;  %v1128_v63 = vrot.slane %v10079_v22, 2 }
 0x13f   : > { %2093 = vmatpush.msra.mxu2 %v10195_v39  ;;  %2146 = vmatpush.msra.mxu3 %v10157_v35 }
 0x140   : > { %1929 = vmatpush.msra.mxu0 %v10135_v42  ;;  %1810 = vmatmul.f32.gmra.mxu1 %v1598_v11  ;;  %v2045_v11 = vand.u32 4294901760, %v10299_v6 }
 0x141   : > { %1760 = vmatmul.f32.vlgmr.msrb.gmra.mxu0 %v10110_v7  ;;  %2012 = vmatpush.msra.mxu1 %v2011_v56  ;;  %v2034_v7 = vsub.f32 %v10275_v24, %v2033_v49  ;;  %v10347_v56 = vsub.f32 %v1166_v14, %v10327_v10  ;;  %v1127_v14 = vrot.slane %v10063_v57, 2 }
 0x142   : > { %1931 = vmatpush.msra.mxu0 %v10147_v8  ;;  %2096 = vmatpush.msra.mxu2 %v10206_v40  ;;  %v2046_v47 = vsub.f32 %v10299_v6, %v2045_v11 }
 0x143   : > { %2148 = vmatpush.msra.mxu3 %v10170_v0  ;;  %1883 = vmatmul.f32.gmra.mxu2 %v10127_v41  ;;  %v2035_v30 = vand.u32 4294901760, %v2034_v7  ;;  %v2053_v7 = vand.u32 4294901760, %v2052_v34 }
 0x144   : > { %1933 = vmatpush.msra.mxu0 %v10157_v35  ;;  %2018 = vmatpush.msra.mxu1 %v2017_v31  ;;  %v2063_v31 = vand.u32 4294901760, %v10337_v53  ;;  %v2047_v22 = vand.u32 4294901760, %v2046_v47  ;;  %v1130_v47 = vrot.slane %v10086_v51, 2 }
 0x145   : > { %2099 = vmatpush.msra.mxu2 %v10224_v46  ;;  %2150 = vmatpush.msra.mxu3 %v10183_v1 }
 0x146   : > { %1935 = vmatpush.msra.mxu0 %v10170_v0  ;;  %1924 = vmatmul.f32.gmra.mxu3 %v10127_v41  ;;  %v2041_v41 = vand.u32 4294901760, %v2040_v3  ;;  %v2064_v57 = vsub.f32 %v10337_v53, %v2063_v31  ;;  %v1131_v51 = vsel %vm1126_vm2, %v1128_v63, %v1130_v47 }
 0x147   : > { %2024 = vmatpush.msra.mxu1 %v2023_v55  ;;  %2102 = vmatpush.msra.mxu2 %v10235_v43  ;;  %v2069_v55 = vand.u32 4294901760, %v10347_v56 }
 0x148   : > { %2152 = vmatpush.msra.mxu3 %v10200_v44  ;;  %1937 = vmatpush.msra.mxu0 %v10183_v1 }
 0x149   : > { %2030 = vmatpush.msra.mxu1 %v2029_v28  ;;  %2105 = vmatpush.msra.mxu2 %v10248_v45  ;;  %v2059_v28 = vand.u32 4294901760, %v2058_v5  ;;  %v2070_v3 = vsub.f32 %v10347_v56, %v2069_v55  ;;  %v1968_v5 = vand.u32 4294901760, %v1131_v51 }
 0x14a   : > { %2154 = vmatpush.msra.mxu3 %v10212_v23  ;;  %1765 = vmatmul.f32.gmra.mxu0 %v10140_v60  ;;  %v1129_v60 = vsel %vm1126_vm2, %v1127_v14, %v1128_v63 }
 0x14b   : > { %2036 = vmatpush.msra.mxu1 %v2035_v30  ;;  %1939 = vmatpush.msra.mxu0 %v10200_v44  ;;  %v10380_v30 = vand.u32 4294901760, %v1129_v60  ;;  %v2071_v34 = vand.u32 4294901760, %v2070_v3 }
 0x14c   : > { %2108 = vmatpush.msra.mxu2 %v10263_v18  ;;  %2156 = vmatpush.msra.mxu3 %v10226_v4 }
 0x14d   : > { %2042 = vmatpush.msra.mxu1 %v2041_v41  ;;  %1941 = vmatpush.msra.mxu0 %v10212_v23  ;;  %v2065_v41 = vand.u32 4294901760, %v2064_v57  ;;  %v1961_v14 = vsub.f32 %v1129_v60, %v10380_v30 }
 0x14e   : > { %2111 = vmatpush.msra.mxu2 %v10275_v24  ;;  %2158 = vmatpush.msra.mxu3 %v10241_v15 }
 0x14f   : > { %2048 = vmatpush.msra.mxu1 %v2047_v22  ;;  %1943 = vmatpush.msra.mxu0 %v10226_v4  ;;  %v1962_v22 = vand.u32 4294901760, %v1961_v14 }
 0x150   : > { %2114 = vmatpush.msra.mxu2 %v10287_v27  ;;  %2160 = vmatpush.msra.mxu3 %v10256_v59 }
 0x151   : > { %2054 = vmatpush.msra.mxu1 %v2053_v7  ;;  %1945 = vmatpush.msra.mxu0 %v10241_v15  ;;  %v1963_v63 = vsub.f32 %v1961_v14, %v1962_v22  ;;  %v1969_v7 = vsub.f32 %v1131_v51, %v1968_v5 }
 0x152   : > { %2117 = vmatpush.msra.mxu2 %v10299_v6  ;;  %2162 = vmatpush.msra.mxu3 %v10265_v9 }
 0x153   : > { %2060 = vmatpush.msra.mxu1 %v2059_v28  ;;  %1947 = vmatpush.msra.mxu0 %v10256_v59  ;;  %v1970_v57 = vand.u32 4294901760, %v1969_v7  ;;  %v2336_v28 = vld [vmem:[#allocation2 + $0x2b0] sm:$0xff] }
 0x154   : > { %2120 = vmatpush.msra.mxu2 %v10313_v20  ;;  %2164 = vmatpush.msra.mxu3 %v10277_v48 }
 0x155   : > { %2066 = vmatpush.msra.mxu1 %v2065_v41  ;;  %1949 = vmatpush.msra.mxu0 %v10265_v9 }
 0x156   : > { %2123 = vmatpush.msra.mxu2 %v10325_v52  ;;  %2166 = vmatpush.msra.mxu3 %v10289_v29 }
 0x157   : > { %2072 = vmatpush.msra.mxu1 %v2071_v34  ;;  %1951 = vmatpush.msra.mxu0 %v10277_v48  ;;  %v10558_v34 = vand.u32 4294901760, %v2336_v28 }
 0x158   : > { %2126 = vmatpush.msra.mxu2 %v10337_v53  ;;  %2168 = vmatpush.msra.mxu3 %v10301_v38  ;;  %v2337_v53 = vld [vmem:[#allocation2 + $0x2b8] sm:$0xff] }
 0x159   : > { %2074 = vmatmul.f32.vlgmr.msra.gmra.mxu1 %v10380_v30  ;;  %1953 = vmatpush.msra.mxu0 %v10289_v29  ;;  %v10546_v60 = vand.u32 4294901760, %v2337_v53 }
 0x15a   : > { %2260 = vmatpush.msrb.mxu1 %v10135_v42  ;;  %2129 = vmatpush.msra.mxu2 %v10347_v56  ;;  %v1964_v42 = vand.u32 4294901760, %v1963_v63 }
 0x15b   : > { %2170 = vmatpush.msra.mxu3 %v10315_v62  ;;  %2132 = vmatmul.f32.vlgmr.msra.gmra.mxu2 %v1961_v14  ;;  %v10555_v41 = vsub.f32 %v2337_v53, %v10546_v60  ;;  %v2335_v14 = vld [vmem:[#allocation2 + $0x2a8] sm:$0xff] }
 0x15c   : > { %2262 = vmatpush.msrb.mxu1 %v10147_v8  ;;  %1955 = vmatpush.msra.mxu0 %v10301_v38  ;;  %v1971_v8 = vsub.f32 %v1969_v7, %v1970_v57  ;;  %v2331_v53 = vld [vmem:[#allocation2 + $0x288] sm:$0xff] }
 0x15d   : > { %2172 = vmatpush.msra.mxu3 %v10327_v10  ;;  %2381 = vmatpush.msrb.mxu2 %v10456_v36  ;;  %v14528_v63 = vand.u32 4294901760, %v10555_v41 }
 0x15e   : > { %2176 = vmatmul.f32.vlgmr.msra.gmra.mxu3 %v1962_v22  ;;  %2264 = vmatpush.msrb.mxu1 %v10157_v35  ;;  %v1972_v35 = vand.u32 4294901760, %v1971_v8 }
 0x15f   : > { %1957 = vmatpush.msra.mxu0 %v10315_v62 }
 0x160   : > { %2266 = vmatpush.msrb.mxu1 %v10170_v0  ;;  %v10459_v0 = vsub.f32 %v2345_v17, %v10456_v36 }
 0x161   : > { %1959 = vmatpush.msra.mxu0 %v10327_v10  ;;  %2078 = vmatmul.f32.gmra.mxu1 %v1968_v5 }
 0x162   : > { %1965 = vmatmul.f32.vlgmr.msra.gmra.mxu0 %v1964_v42  ;;  %2268 = vmatpush.msrb.mxu1 %v10183_v1  ;;  %v2343_v1 = vld [vmem:[#allocation2 + $0x2e8] sm:$0xff]  ;;  %v2334_v42 = vld [vmem:[#allocation2 + $0x2a0] sm:$0xff] }
 0x163   : > { %2189 = vmatpush.msrb.mxu0 %v1979_v13  ;;  %2137 = vmatmul.f32.gmra.mxu2 %v1969_v7  ;;  %v2344_v13 = vld [vmem:[#allocation2 + $0x2f0] sm:$0xff]  ;;  %v10569_v7 = vsub.f32 %v2336_v28, %v10558_v34 }
 0x164   : > { %2270 = vmatpush.msrb.mxu1 %v10200_v44  ;;  %v10461_v61 = vand.u32 4294901760, %v2344_v13  ;;  %v2342_v44 = vld [vmem:[#allocation2 + $0x2e0] sm:$0xff] }
 0x165   : > { %2193 = vmatpush.msrb.mxu0 %v1985_v21  ;;  %v2431_v21 = vand.u32 4294901760, %v10459_v0  ;;  %v10483_v46 = vand.u32 4294901760, %v2342_v44 }
 0x166   : > { %2182 = vmatmul.f32.gmra.mxu3 %v1970_v57  ;;  %2272 = vmatpush.msrb.mxu1 %v10212_v23  ;;  %v10467_v39 = vsub.f32 %v2344_v13, %v10461_v61  ;;  %v2480_v13 = vsub.f32 %v10555_v41, %v14528_v63 }
 0x167   : > { %2197 = vmatpush.msrb.mxu0 %v1991_v54  ;;  %v10470_v54 = vand.u32 4294901760, %v2343_v1  ;;  %2383 = vmatpush.msrb.mxu2 %v10461_v61  ;;  %v2432_v40 = vsub.f32 %v10459_v0, %v2431_v21 }
 0x168   : > { %2274 = vmatpush.msrb.mxu1 %v10226_v4  ;;  %v2437_v23 = vand.u32 4294901760, %v10467_v39  ;;  %v2341_v4 = vld [vmem:[#allocation2 + $0x2d8] sm:$0xff] }
 0x169   : > { %2201 = vmatpush.msrb.mxu0 %v1997_v2  ;;  %v10479_v2 = vsub.f32 %v2343_v1, %v10470_v54  ;;  %2385 = vmatpush.msrb.mxu2 %v10470_v54  ;;  %v10494_v45 = vand.u32 4294901760, %v2341_v4  ;;  %v14526_v1 = vand.u32 4294901760, %v10569_v7 }
 0x16a   : > { %1973 = vmatmul.f32.gmra.mxu0 %v1972_v35  ;;  %2276 = vmatpush.msrb.mxu1 %v10241_v15  ;;  %v2438_v43 = vsub.f32 %v10467_v39, %v2437_v23  ;;  %v10575_v35 = vand.u32 4294901760, %v2334_v42 }
 0x16b   : > { %2205 = vmatpush.msrb.mxu0 %v2003_v16  ;;  %v2433_v16 = vand.u32 4294901760, %v2432_v40  ;;  %v2443_v15 = vand.u32 4294901760, %v10479_v2  ;;  %2387 = vmatpush.msrb.mxu2 %v10483_v46  ;;  %v10505_v24 = vsub.f32 %v2341_v4, %v10494_v45 }
 0x16c   : > { %2278 = vmatpush.msrb.mxu1 %v10256_v59  ;;  %v2340_v59 = vld [vmem:[#allocation2 + $0x2d0] sm:$0xff] }
 0x16d   : > { %2209 = vmatpush.msrb.mxu0 %v2009_v12  ;;  %v10492_v12 = vsub.f32 %v2342_v44, %v10483_v46  ;;  %2434 = vmatpush.msrb.mxu3 %v2433_v16  ;;  %v2444_v18 = vsub.f32 %v10479_v2, %v2443_v15  ;;  %v2333_v44 = vld [vmem:[#allocation2 + $0x298] sm:$0xff] }
 0x16e   : > { %2280 = vmatpush.msrb.mxu1 %v10265_v9  ;;  %v10501_v9 = vand.u32 4294901760, %v2340_v59  ;;  %2389 = vmatpush.msrb.mxu2 %v10494_v45 }
 0x16f   : > { %2213 = vmatpush.msrb.mxu0 %v2015_v33  ;;  %v2439_v33 = vand.u32 4294901760, %v2438_v43  ;;  %v10592_v43 = vsub.f32 %v2334_v42, %v10575_v35 }
 0x170   : > { %2282 = vmatpush.msrb.mxu1 %v10277_v48  ;;  %v2339_v48 = vld [vmem:[#allocation2 + $0x2c8] sm:$0xff]  ;;  %v10510_v27 = vsub.f32 %v2340_v59, %v10501_v9  ;;  %2391 = vmatpush.msrb.mxu2 %v10501_v9  ;;  %v10594_v59 = vand.u32 4294901760, %v2333_v44 }
 0x171   : > { %2217 = vmatpush.msrb.mxu0 %v2021_v32  ;;  %v2449_v32 = vand.u32 4294901760, %v10492_v12  ;;  %2440 = vmatpush.msrb.mxu3 %v2439_v33  ;;  %v2481_v33 = vand.u32 4294901760, %v2480_v13 }
 0x172   : > { %2284 = vmatpush.msrb.mxu1 %v10289_v29  ;;  %v10512_v29 = vand.u32 4294901760, %v2339_v48 }
 0x173   : > { %2221 = vmatpush.msrb.mxu0 %v2027_v37  ;;  %v2445_v37 = vand.u32 4294901760, %v2444_v18  ;;  %v2450_v6 = vsub.f32 %v10492_v12, %v2449_v32  ;;  %v2486_v18 = vsub.f32 %v10569_v7, %v14526_v1 }
 0x174   : > { %2286 = vmatpush.msrb.mxu1 %v10301_v38  ;;  %v2455_v38 = vand.u32 4294901760, %v10505_v24  ;;  %2393 = vmatpush.msrb.mxu2 %v10512_v29 }
 0x175   : > { %2225 = vmatpush.msrb.mxu0 %v2033_v49  ;;  %2446 = vmatpush.msrb.mxu3 %v2445_v37 }
 0x176   : > { %2288 = vmatpush.msrb.mxu1 %v10315_v62  ;;  %v2461_v62 = vand.u32 4294901760, %v10510_v27 }
 0x177   : > { %2229 = vmatpush.msrb.mxu0 %v2039_v50  ;;  %v2338_v50 = vld [vmem:[#allocation2 + $0x2c0] sm:$0xff] }
 0x178   : > { %2290 = vmatpush.msrb.mxu1 %v10327_v10  ;;  %v10529_v52 = vand.u32 4294901760, %v2338_v50  ;;  %v2451_v10 = vand.u32 4294901760, %v2450_v6  ;;  %v14524_v6 = vand.u32 4294901760, %v10592_v43 }
 0x179   : > { %2233 = vmatpush.msrb.mxu0 %v2045_v11  ;;  %2292 = vmatmul.f32.vlgmr.msrb.gmra.mxu1 %v10380_v30  ;;  %v10527_v11 = vsub.f32 %v2339_v48, %v10512_v29  ;;  %v2332_v48 = vld [vmem:[#allocation2 + $0x290] sm:$0xff] }
 0x17a   : > { %2594 = vmatpush.msra.mxu1 %v10456_v36  ;;  %2452 = vmatpush.msrb.mxu3 %v2451_v10  ;;  %v2487_v10 = vand.u32 4294901760, %v2486_v18  ;;  %v2498_v28 = vsub.f32 %v10592_v43, %v14524_v6 }
 0x17b   : > { %2237 = vmatpush.msrb.mxu0 %v2051_v19  ;;  %v2456_v19 = vsub.f32 %v10505_v24, %v2455_v38  ;;  %v14530_v56 = vand.u32 4294901760, %v10527_v11  ;;  %2395 = vmatpush.msrb.mxu2 %v10529_v52 }
 0x17c   : > { %2596 = vmatpush.msra.mxu1 %v10461_v61  ;;  %v2499_v42 = vand.u32 4294901760, %v2498_v28 }
 0x17d   : > { %2241 = vmatpush.msrb.mxu0 %v2057_v58  ;;  %v2462_v58 = vsub.f32 %v10510_v27, %v2461_v62  ;;  %2397 = vmatpush.msrb.mxu2 %v10546_v60 }
 0x17e   : > { %2598 = vmatpush.msra.mxu1 %v10470_v54 }
 0x17f   : > { %2245 = vmatpush.msrb.mxu0 %v2063_v31  ;;  %v10542_v31 = vsub.f32 %v2338_v50, %v10529_v52  ;;  %v2463_v3 = vand.u32 4294901760, %v2462_v58  ;;  %2399 = vmatpush.msrb.mxu2 %v10558_v34  ;;  %v10607_v50 = vsub.f32 %v2333_v44, %v10594_v59 }
 0x180   : > { %2600 = vmatpush.msra.mxu1 %v10483_v46 }
 0x181   : > { %2249 = vmatpush.msrb.mxu0 %v2069_v55  ;;  %2296 = vmatmul.f32.gmra.mxu1 %v1968_v5  ;;  %v2457_v55 = vand.u32 4294901760, %v2456_v19  ;;  %v14529_v47 = vand.u32 4294901760, %v10542_v31  ;;  %v10612_v19 = vand.u32 4294901760, %v2332_v48 }
 0x182   : > { %2251 = vmatmul.f32.vlgmr.msrb.gmra.mxu0 %v10380_v30  ;;  %2602 = vmatpush.msra.mxu1 %v10494_v45  ;;  %v2468_v30 = vsub.f32 %v10527_v11, %v14530_v56  ;;  %v2359_v56 = vld [vmem:[#allocation2 + $0x368] sm:$0xff] }
 0x183   : > { %2536 = vmatpush.msra.mxu0 %v10459_v0  ;;  %2458 = vmatpush.msrb.mxu3 %v2457_v55  ;;  %v2474_v22 = vsub.f32 %v10542_v31, %v14529_v47 }
 0x184   : > { %2604 = vmatpush.msra.mxu1 %v10501_v9  ;;  %v2469_v51 = vand.u32 4294901760, %v2468_v30  ;;  %v10623_v30 = vsub.f32 %v2332_v48, %v10612_v19 }
 0x185   : > { %2539 = vmatpush.msra.mxu0 %v10467_v39  ;;  %2464 = vmatpush.msrb.mxu3 %v2463_v3  ;;  %v2475_v57 = vand.u32 4294901760, %v2474_v22  ;;  %v14522_v3 = vand.u32 4294901760, %v10607_v50  ;;  %v8884_v22 = vld [vmem:[#allocation4 + $0x1] ss:$0 sm:$0xff] }
 0x186   : > { %2606 = vmatpush.msra.mxu1 %v10512_v29  ;;  %v14523_v44 = vand.u32 4294901760, %v10623_v30 }
 0x187   : > { %2542 = vmatpush.msra.mxu0 %v10479_v2  ;;  %2470 = vmatpush.msrb.mxu3 %v2469_v51  ;;  %v2330_v51 = vld [vmem:[#allocation2 + $0x280] sm:$0xff]  ;;  %v2357_v2 = vld [vmem:[#allocation2 + $0x358] sm:$0xff] }
 0x188   : > { %2608 = vmatpush.msra.mxu1 %v10529_v52  ;;  %v10631_v13 = vand.u32 4294901760, %v2330_v51 }
 0x189   : > { %2545 = vmatpush.msra.mxu0 %v10492_v12  ;;  %2476 = vmatpush.msrb.mxu3 %v2475_v57  ;;  %v2504_v57 = vsub.f32 %v10607_v50, %v14522_v3  ;;  %v2361_v3 = vld [vmem:[#allocation2 + $0x378] sm:$0xff] }
 0x18a   : > { %2255 = vmatmul.f32.gmra.mxu0 %v1968_v5  ;;  %v10563_v5 = vand.u32 4294901760, %v2335_v14  ;;  %2610 = vmatpush.msra.mxu1 %v10546_v60  ;;  %v10641_v48 = vsub.f32 %v2330_v51, %v10631_v13 }
 0x18b   : > { %v10515_v49 = vpop.f32.mrf.mxu1  ;;  %2548 = vmatpush.msra.mxu0 %v10505_v24  ;;  %2482 = vmatpush.msrb.mxu3 %v2481_v33  ;;  %v2505_v18 = vand.u32 4294901760, %v2504_v57 }
 0x18c   : > { %v10573_v8 = vsub.f32 %v2335_v14, %v10563_v5  ;;  %2612 = vmatpush.msra.mxu1 %v10558_v34  ;;  %2401 = vmatpush.msrb.mxu2 %v10563_v5  ;;  %v10626_v14 = vand.u32 4294901760, %v2331_v53  ;;  %v2521_v57 = vand.u32 4294901760, %v10641_v48 }
 0x18d   : > { %2551 = vmatpush.msra.mxu0 %v10510_v27  ;;  %2488 = vmatpush.msrb.mxu3 %v2487_v10  ;;  %v2510_v10 = vsub.f32 %v10623_v30, %v14523_v44 }
 0x18e   : > { %v14525_v16 = vand.u32 4294901760, %v10573_v8  ;;  %2614 = vmatpush.msra.mxu1 %v10563_v5  ;;  %2403 = vmatpush.msrb.mxu2 %v10575_v35  ;;  %v10637_v33 = vsub.f32 %v2331_v53, %v10626_v14  ;;  %v2522_v6 = vsub.f32 %v10641_v48, %v2521_v57 }
 0x18f   : > { %2554 = vmatpush.msra.mxu0 %v10527_v11 }
 0x190   : > { %v2492_v37 = vsub.f32 %v10573_v8, %v14525_v16  ;;  %2616 = vmatpush.msra.mxu1 %v10575_v35  ;;  %2405 = vmatpush.msrb.mxu2 %v10594_v59  ;;  %v14527_v53 = vand.u32 4294901760, %v10637_v33  ;;  %v2360_v16 = vld [vmem:[#allocation2 + $0x370] sm:$0xff]  ;;  %v2523_v47 = vand.u32 4294901760, %v2522_v6 }
 0x191   : > { %2557 = vmatpush.msra.mxu0 %v10542_v31 }
 0x192   : > { %v2493_v55 = vand.u32 4294901760, %v2492_v37  ;;  %2618 = vmatpush.msra.mxu1 %v10594_v59  ;;  %2407 = vmatpush.msrb.mxu2 %v10612_v19  ;;  %v2516_v44 = vsub.f32 %v10637_v33, %v14527_v53 }
 0x193   : > { %v10523_v20 = vpop.f32.mrf.mxu0  ;;  %2560 = vmatpush.msra.mxu0 %v10555_v41  ;;  %v10586_v40 = vpop.f32.mrf.mxu2 }
 0x194   : > { %v10579_v17 = vpop.f32.mrf.mxu1  ;;  %2620 = vmatpush.msra.mxu1 %v10612_v19  ;;  %2494 = vmatpush.msrb.mxu3 %v2493_v55  ;;  %v1223_v55 = vadd.f32 %v8884_v22, %v10523_v20  ;;  %v10664_v20 = vand.u32 4294901760, %v2361_v3  ;;  %v2517_v1 = vand.u32 4294901760, %v2516_v44  ;;  %v2358_v44 = vld [vmem:[#allocation2 + $0x360] sm:$0xff] }
 0x195   : > { %2563 = vmatpush.msra.mxu0 %v10569_v7  ;;  %v10614_v58 = vpop.f32.mrf.mxu3  ;;  %2409 = vmatpush.msrb.mxu2 %v10626_v14 }
 0x196   : > { %2622 = vmatpush.msra.mxu1 %v10626_v14  ;;  %2500 = vmatpush.msrb.mxu3 %v2499_v42  ;;  %v2511_v42 = vand.u32 4294901760, %v2510_v10  ;;  %v10675_v10 = vand.u32 4294901760, %v2360_v16  ;;  %v1332_v53 = vadd.f32 %v10515_v49, %v1223_v55  ;;  %v10696_v49 = vand.u32 4294901760, %v2358_v44 }
 0x197   : > { %2566 = vmatpush.msra.mxu0 %v10573_v8  ;;  %2411 = vmatpush.msrb.mxu2 %v10631_v13 }
 0x198   : > { %2624 = vmatpush.msra.mxu1 %v10631_v13  ;;  %2506 = vmatpush.msrb.mxu3 %v2505_v18  ;;  %v10673_v18 = vsub.f32 %v2361_v3, %v10664_v20  ;;  %v10687_v3 = vsub.f32 %v2360_v16, %v10675_v10  ;;  %v1390_v16 = vadd.f32 %v10586_v40, %v1332_v53  ;;  %v10713_v40 = vand.u32 4294901760, %v2357_v2 }
 0x199   : > { %2569 = vmatpush.msra.mxu0 %v10592_v43  ;;  %2641 = vmatpush.msra.mxu2 %v2431_v21  ;;  %v10684_v21 = vand.u32 4294901760, %v2359_v56  ;;  %v10721_v12 = vsub.f32 %v2358_v44, %v10696_v49 }
 0x19a   : > { %2512 = vmatpush.msrb.mxu3 %v2511_v42  ;;  %v2803_v0 = vand.u32 4294901760, %v10673_v18 }
 0x19b   : > { %2572 = vmatpush.msra.mxu0 %v10607_v50  ;;  %2645 = vmatpush.msra.mxu2 %v2437_v23  ;;  %v2809_v23 = vand.u32 4294901760, %v10687_v3  ;;  %v14534_v24 = vand.u32 4294901760, %v10721_v12 }
 0x19c   : > { %v10653_v28 = vpop.f32.mrf.mxu2  ;;  %2518 = vmatpush.msrb.mxu3 %v2517_v1  ;;  %v2804_v39 = vsub.f32 %v10673_v18, %v2803_v0  ;;  %v10699_v1 = vsub.f32 %v2359_v56, %v10684_v21 }
 0x19d   : > { %v10588_v4 = vpop.f32.mrf.mxu0  ;;  %2575 = vmatpush.msra.mxu0 %v10623_v30  ;;  %2649 = vmatpush.msra.mxu2 %v2443_v15  ;;  %v2810_v55 = vsub.f32 %v10687_v3, %v2809_v23  ;;  %v2822_v27 = vsub.f32 %v10721_v12, %v14534_v24 }
 0x19e   : > { %v10645_v37 = vpop.f32.mrf.mxu1  ;;  %2524 = vmatpush.msrb.mxu3 %v2523_v47  ;;  %v1231_v6 = vadd.f32 %v8884_v22, %v10588_v4  ;;  %v2805_v47 = vand.u32 4294901760, %v2804_v39  ;;  %v2815_v56 = vand.u32 4294901760, %v10699_v1  ;;  %v10732_v39 = vsub.f32 %v2357_v2, %v10713_v40 }
 0x19f   : > { %2578 = vmatpush.msra.mxu0 %v10637_v33  ;;  %v10678_v63 = vpop.f32.mrf.mxu3  ;;  %2653 = vmatpush.msra.mxu2 %v2449_v32  ;;  %v2356_v32 = vld [vmem:[#allocation2 + $0x350] sm:$0xff]  ;;  %v2811_v22 = vand.u32 4294901760, %v2810_v55 }
 0x1a0   : > { %2712 = vmatpush.msra.mxu3 %v10456_v36  ;;  %2806 = vmatpush.msrb.mxu1 %v2805_v47  ;;  %v2816_v53 = vsub.f32 %v10699_v1, %v2815_v56  ;;  %v10729_v42 = vand.u32 4294901760, %v2356_v32  ;;  %v1336_v44 = vadd.f32 %v10579_v17, %v1231_v6  ;;  %v14531_v55 = vand.u32 4294901760, %v10732_v39 }
 0x1a1   : > { %2581 = vmatpush.msra.mxu0 %v10641_v48  ;;  %2657 = vmatpush.msra.mxu2 %v2455_v38  ;;  %v2355_v38 = vld [vmem:[#allocation2 + $0x348] sm:$0xff] }
 0x1a2   : > { %2714 = vmatpush.msra.mxu3 %v10461_v61  ;;  %v1434_v61 = vadd.f32 %v10614_v58, %v1390_v16  ;;  %2812 = vmatpush.msrb.mxu1 %v2811_v22  ;;  %v2817_v47 = vand.u32 4294901760, %v2816_v53  ;;  %v10742_v2 = vand.u32 4294901760, %v2355_v38  ;;  %v10745_v58 = vsub.f32 %v2356_v32, %v10729_v42  ;;  %v2353_v53 = vld [vmem:[#allocation2 + $0x338] sm:$0xff] }
 0x1a3   : > { %2753 = vmatpush.msrb.mxu0 %v10664_v20  ;;  %2661 = vmatpush.msra.mxu2 %v2461_v62  ;;  %v2354_v62 = vld [vmem:[#allocation2 + $0x340] sm:$0xff]  ;;  %v14630_v16 = vand.u32 4294901760, %v10527_v11  ;;  %v2828_v6 = vsub.f32 %v10732_v39, %v14531_v55  ;;  %v1395_v22 = vadd.f32 %v10653_v28, %v1336_v44  ;;  %v2823_v11 = vand.u32 4294901760, %v2822_v27 }
 0x1a4   : > { %2716 = vmatpush.msra.mxu3 %v10470_v54  ;;  %2818 = vmatpush.msrb.mxu1 %v2817_v47  ;;  %v10761_v32 = vand.u32 4294901760, %v2354_v62 }
 0x1a5   : > { %2755 = vmatpush.msrb.mxu0 %v10675_v10  ;;  %2665 = vmatpush.msra.mxu2 %v14630_v16  ;;  %v2829_v47 = vand.u32 4294901760, %v2828_v6 }
 0x1a6   : > { %2718 = vmatpush.msra.mxu3 %v10483_v46  ;;  %v10764_v46 = vsub.f32 %v2355_v38, %v10742_v2  ;;  %v10775_v38 = vand.u32 4294901760, %v2353_v53  ;;  %2824 = vmatpush.msrb.mxu1 %v2823_v11 }
 0x1a7   : > { %v10655_v51 = vpop.f32.mrf.mxu0  ;;  %2757 = vmatpush.msrb.mxu0 %v10684_v21 }
 0x1a8   : > { %v10706_v15 = vpop.f32.mrf.mxu1  ;;  %v10715_v4 = vpop.f32.mrf.mxu2  ;;  %v1509_v17 = vadd.f32 %v10655_v51, %v1434_v61  ;;  %v14533_v51 = vand.u32 4294901760, %v10745_v58  ;;  %2720 = vmatpush.msra.mxu3 %v10494_v45  ;;  %v14631_v61 = vand.u32 4294901760, %v10542_v31  ;;  %v14532_v55 = vand.u32 4294901760, %v10764_v46  ;;  %v2352_v31 = vld [vmem:[#allocation2 + $0x330] sm:$0xff]  ;;  %2830 = vmatpush.msrb.mxu1 %v2829_v47 }
 0x1a9   : > { %2759 = vmatpush.msrb.mxu0 %v10696_v49  ;;  %v10748_v54 = vpop.f32.mrf.mxu3  ;;  %v10780_v45 = vsub.f32 %v2354_v62, %v10761_v32 }
 0x1aa   : > { %2669 = vmatpush.msra.mxu2 %v14631_v61  ;;  %v2834_v16 = vsub.f32 %v10745_v58, %v14533_v51  ;;  %v1550_v28 = vadd.f32 %v10645_v37, %v1509_v17  ;;  %2722 = vmatpush.msra.mxu3 %v10501_v9  ;;  %v2840_v6 = vsub.f32 %v10764_v46, %v14532_v55  ;;  %v10788_v61 = vand.u32 4294901760, %v2352_v31  ;;  %v2351_v55 = vld [vmem:[#allocation2 + $0x328] sm:$0xff] }
 0x1ab   : > { %2761 = vmatpush.msrb.mxu0 %v10713_v40  ;;  %v10791_v37 = vsub.f32 %v2353_v53, %v10775_v38  ;;  %v14632_v9 = vand.u32 4294901760, %v10555_v41  ;;  %v1440_v17 = vadd.f32 %v10678_v63, %v1395_v22  ;;  %v10802_v24 = vand.u32 4294901760, %v2351_v55 }
 0x1ac   : > { %v2835_v27 = vand.u32 4294901760, %v2834_v16  ;;  %2724 = vmatpush.msra.mxu3 %v10512_v29  ;;  %v14543_v16 = vand.u32 4294901760, %v10780_v45  ;;  %v2841_v51 = vand.u32 4294901760, %v2840_v6  ;;  %v10805_v41 = vsub.f32 %v2352_v31, %v10788_v61  ;;  %v2350_v6 = vld [vmem:[#allocation2 + $0x320] sm:$0xff] }
 0x1ad   : > { %2763 = vmatpush.msrb.mxu0 %v10729_v42  ;;  %2673 = vmatpush.msra.mxu2 %v14632_v9  ;;  %v14535_v53 = vand.u32 4294901760, %v10791_v37  ;;  %v14633_v63 = vand.u32 4294901760, %v10569_v7  ;;  %v1595_v22 = vadd.f32 %v10715_v4, %v1550_v28  ;;  %v10820_v9 = vand.u32 4294901760, %v2350_v6 }
 0x1ae   : > { %2726 = vmatpush.msra.mxu3 %v10529_v52  ;;  %2836 = vmatpush.msrb.mxu1 %v2835_v27  ;;  %v2846_v47 = vsub.f32 %v10780_v45, %v14543_v16  ;;  %v14536_v7 = vand.u32 4294901760, %v10805_v41  ;;  %v10823_v4 = vsub.f32 %v2351_v55, %v10802_v24  ;;  %v14634_v52 = vand.u32 4294901760, %v10573_v8  ;;  %v2349_v27 = vld [vmem:[#allocation2 + $0x318] sm:$0xff] }
 0x1af   : > { %2765 = vmatpush.msrb.mxu0 %v10742_v2  ;;  %2677 = vmatpush.msra.mxu2 %v14633_v63  ;;  %v2852_v31 = vsub.f32 %v10791_v37, %v14535_v53  ;;  %v14635_v55 = vand.u32 4294901760, %v10592_v43  ;;  %v1704_v8 = vadd.f32 %v10748_v54, %v1595_v22  ;;  %v14636_v54 = vand.u32 4294901760, %v10607_v50 }
 0x1b0   : > { %2728 = vmatpush.msra.mxu3 %v10546_v60  ;;  %2842 = vmatpush.msrb.mxu1 %v2841_v51  ;;  %v2847_v28 = vand.u32 4294901760, %v2846_v47  ;;  %v2858_v63 = vsub.f32 %v10805_v41, %v14536_v7  ;;  %v14541_v53 = vand.u32 4294901760, %v10823_v4  ;;  %v10837_v60 = vand.u32 4294901760, %v2349_v27  ;;  %v2348_v47 = vld [vmem:[#allocation2 + $0x310] sm:$0xff] }
 0x1b1   : > { %v10717_v36 = vpop.f32.mrf.mxu0  ;;  %2767 = vmatpush.msrb.mxu0 %v10761_v32  ;;  %2681 = vmatpush.msra.mxu2 %v14634_v52  ;;  %v10840_v51 = vsub.f32 %v2350_v6, %v10820_v9  ;;  %v10846_v43 = vand.u32 4294901760, %v2348_v47  ;;  %v2347_v6 = vld [vmem:[#allocation2 + $0x308] sm:$0xff]  ;;  %v14637_v50 = vand.u32 4294901760, %v10623_v30  ;;  %v14638_v30 = vand.u32 4294901760, %v10637_v33 }
 0x1b2   : > { %v10796_v62 = vpop.f32.mrf.mxu2  ;;  %v1513_v29 = vadd.f32 %v10717_v36, %v1440_v17  ;;  %v2853_v17 = vand.u32 4294901760, %v2852_v31  ;;  %2730 = vmatpush.msra.mxu3 %v10558_v34  ;;  %2848 = vmatpush.msrb.mxu1 %v2847_v28  ;;  %v2859_v52 = vand.u32 4294901760, %v2858_v63  ;;  %v2864_v7 = vsub.f32 %v10823_v4, %v14541_v53 }
 0x1b3   : > { %v10782_v44 = vpop.f32.mrf.mxu1  ;;  %2769 = vmatpush.msrb.mxu0 %v10775_v38  ;;  %v1707_v36 = vpop.f32.mrf.mxu3  ;;  %2685 = vmatpush.msra.mxu2 %v14635_v55  ;;  %v14540_v34 = vand.u32 4294901760, %v10840_v51  ;;  %v10853_v22 = vsub.f32 %v2349_v27, %v10837_v60  ;;  %v10856_v63 = vand.u32 4294901760, %v2347_v6  ;;  %v10859_v55 = vsub.f32 %v2348_v47, %v10846_v43  ;;  %v2346_v47 = vld [vmem:[#allocation2 + $0x300] sm:$0xff] }
 0x1b4   : > { %v1554_v31 = vadd.f32 %v10706_v15, %v1513_v29  ;;  %2732 = vmatpush.msra.mxu3 %v10563_v5  ;;  %2854 = vmatpush.msrb.mxu1 %v2853_v17  ;;  %v2865_v28 = vand.u32 4294901760, %v2864_v7 }
 0x1b5   : > { %2771 = vmatpush.msrb.mxu0 %v10788_v61  ;;  %2689 = vmatpush.msra.mxu2 %v14636_v54  ;;  %v14539_v7 = vand.u32 4294901760, %v10853_v22  ;;  %v10877_v54 = vand.u32 4294901760, %v2346_v47 }
 0x1b6   : > { %2734 = vmatpush.msra.mxu3 %v10575_v35  ;;  %2860 = vmatpush.msrb.mxu1 %v2859_v52  ;;  %v1603_v27 = vadd.f32 %v10796_v62, %v1554_v31  ;;  %v10880_v62 = vsub.f32 %v2347_v6, %v10856_v63 }
 0x1b7   : > { %2773 = vmatpush.msrb.mxu0 %v10802_v24  ;;  %2693 = vmatpush.msra.mxu2 %v14637_v50  ;;  %v2876_v52 = vsub.f32 %v10853_v22, %v14539_v7  ;;  %v10892_v6 = vsub.f32 %v2346_v47, %v10877_v54 }
 0x1b8   : > { %2736 = vmatpush.msra.mxu3 %v10594_v59  ;;  %2866 = vmatpush.msrb.mxu1 %v2865_v28  ;;  %v14537_v50 = vand.u32 4294901760, %v10880_v62 }
 0x1b9   : > { %2775 = vmatpush.msrb.mxu0 %v10820_v9  ;;  %2697 = vmatpush.msra.mxu2 %v14638_v30  ;;  %v2877_v28 = vand.u32 4294901760, %v2876_v52 }
 0x1ba   : > { %2738 = vmatpush.msra.mxu3 %v10612_v19  ;;  %v2888_v48 = vsub.f32 %v10880_v62, %v14537_v50  ;;  %v14542_v19 = vand.u32 4294901760, %v10892_v6 }
 0x1bb   : > { %2777 = vmatpush.msrb.mxu0 %v10837_v60  ;;  %2701 = vmatpush.msra.mxu2 %v2521_v57 }
 0x1bc   : > { %v1880_v5 = vpop.f32.mrf.mxu2  ;;  %2740 = vmatpush.msra.mxu3 %v10626_v14 }
 0x1bd   : > { %v1811_v29 = vpop.f32.mrf.mxu1  ;;  %2779 = vmatpush.msrb.mxu0 %v10846_v43 }
 0x1be   : > { %v1761_v11 = vpop.f32.mrf.mxu0  ;;  %2742 = vmatpush.msra.mxu3 %v10631_v13 }
 0x1bf   : > { %v1762_v15 = vadd.f32 %v1761_v11, %v1704_v8  ;;  %v2870_v11 = vsub.f32 %v10840_v51, %v14540_v34  ;;  %v14538_v8 = vand.u32 4294901760, %v10859_v55  ;;  %2781 = vmatpush.msrb.mxu0 %v10856_v63  ;;  %v1921_v59 = vpop.f32.mrf.mxu3 }
 0x1c1   : > { %v2871_v35 = vand.u32 4294901760, %v2870_v11  ;;  %v1806_v31 = vadd.f32 %v10782_v44, %v1762_v15  ;;  %v2882_v33 = vsub.f32 %v10859_v55, %v14538_v8  ;;  %v1708_v44 = vadd.f32 %v1707_v36, %v1603_v27  ;;  %2783 = vmatpush.msrb.mxu0 %v10877_v54 }
 0x1c2   : > { %v2889_v36 = vand.u32 4294901760, %v2888_v48  ;;  %v2894_v27 = vsub.f32 %v10892_v6, %v14542_v19 }
 0x1c3   : > { %2872 = vmatpush.msrb.mxu1 %v2871_v35  ;;  %v2883_v15 = vand.u32 4294901760, %v2882_v33  ;;  %v1881_v57 = vadd.f32 %v1880_v5, %v1806_v31 }
 0x1c4   : > { %v2895_v47 = vand.u32 4294901760, %v2894_v27 }
 0x1c5   : > { %2878 = vmatpush.msrb.mxu1 %v2877_v28  ;;  %v1922_v52 = vadd.f32 %v1921_v59, %v1881_v57 }
 0x1c6   : > { %v1884_v14 = vpop.f32.mrf.mxu2 }
 0x1c7   : > { %v1766_v17 = vpop.f32.mrf.mxu0  ;;  %2884 = vmatpush.msrb.mxu1 %v2883_v15 }
 0x1c8   : > { %v1767_v11 = vadd.f32 %v1766_v17, %v1708_v44 }
 0x1c9   : > { %2890 = vmatpush.msrb.mxu1 %v2889_v36  ;;  %v1925_v50 = vpop.f32.mrf.mxu3 }
 0x1ca   : > { %v1812_v33 = vadd.f32 %v1811_v29, %v1767_v11 }
 0x1cb   : > { %2896 = vmatpush.msrb.mxu1 %v2895_v47 }
 0x1cc   : > { %v1885_v5 = vadd.f32 %v1884_v14, %v1812_v33 }
 0x1ce   : > { %v1926_v13 = vadd.f32 %v1925_v50, %v1885_v5 }
 0x1d6   : > { %v2075_v30 = vpop.f32.mrf.mxu1 }
 0x1de   : > { %v2079_v17 = vpop.f32.mrf.mxu1  ;;  %v2133_v44 = vpop.f32.mrf.mxu2 }
 0x1df   : > { %v1966_v35 = vpop.f32.mrf.mxu0 }
 0x1e0   : > { %v1967_v28 = vadd.f32 %v1966_v35, %v1922_v52 }
 0x1e1   : > { %v2177_v7 = vpop.f32.mrf.mxu3 }
 0x1e2   : > { %v2076_v31 = vadd.f32 %v2075_v30, %v1967_v28 }
 0x1e4   : > { %v2134_v15 = vadd.f32 %v2133_v44, %v2076_v31 }
 0x1e6   : > { %v2178_v34 = vadd.f32 %v2177_v7, %v2134_v15  ;;  %v2138_v27 = vpop.f32.mrf.mxu2 }
 0x1e7   : > { %v1974_v8 = vpop.f32.mrf.mxu0 }
 0x1e8   : > { %v1975_v48 = vadd.f32 %v1974_v8, %v1926_v13 }
 0x1e9   : > { %v2183_v11 = vpop.f32.mrf.mxu3 }
 0x1ea   : > { %v2080_v53 = vadd.f32 %v2079_v17, %v1975_v48 }
 0x1ec   : > { %v2139_v59 = vadd.f32 %v2138_v27, %v2080_v53 }
 0x1ee   : > { %v2184_v35 = vadd.f32 %v2183_v11, %v2139_v59  ;;  %v14640_v59 = vand.u32 4294901760, %v10732_v39 }
 0x1f6   : > { %v2293_v19 = vpop.f32.mrf.mxu1 }
 0x1fe   : > { %v2297_v50 = vpop.f32.mrf.mxu1 }
 0x1ff   : > { %v2252_v16 = vpop.f32.mrf.mxu0 }
 0x200   : > { %v2253_v36 = vadd.f32 %v2252_v16, %v2178_v34 }
 0x202   : > { %v2294_v29 = vadd.f32 %v2293_v19, %v2253_v36 }
 0x204   : > { %v2300_v57 = vmax.f32 %v2294_v29, 0.0 }
 0x206   : > { %v2302_v14 = vmul.f32 %v2300_v57, %v10059_v26 }
 0x207   : > { %v2256_v30 = vpop.f32.mrf.mxu0 }
 0x208   : > { %v2306_v47 = vrot.slane %v2302_v14, 7  ;;  %v2257_v52 = vadd.f32 %v2256_v30, %v2184_v35  ;;  %v2377_v14 = vld [vmem:[#allocation2 + $0x3f8] sm:$0xff]  ;;  %v2376_v30 = vld [vmem:[#allocation2 + $0x3f0] sm:$0xff] }
 0x20a   : > { %v10906_v8 = vsel %vm298_vm0, 0.0, %v2306_v47  ;;  %v2298_v7 = vadd.f32 %v2297_v50, %v2257_v52  ;;  %v2375_v52 = vld [vmem:[#allocation2 + $0x3e8] sm:$0xff] }
 0x20b   : > { %v10909_v33 = vand.u32 4294901760, %v10906_v8  ;;  %v2316_v44 = vrot.slane %v10906_v8, 1 }
 0x20c   : > { %v2301_v16 = vmax.f32 %v2298_v7, 0.0 }
 0x20d   : > { %2526 = vmatmul.f32.vlgmr.msrb.gmra.mxu3 %v10909_v33  ;;  %v2413_v53 = vsub.f32 %v10906_v8, %v10909_v33 }
 0x20e   : > { %v2303_v34 = vmul.f32 %v2301_v16, %v10068_v25  ;;  %2966 = vmatpush.msrb.mxu3 %v10664_v20  ;;  %v2374_v16 = vld [vmem:[#allocation2 + $0x3e0] sm:$0xff] }
 0x20f   : > { %2584 = vmatmul.f32.vlgmr.msra.gmra.mxu0 %v2413_v53  ;;  %v2414_v19 = vand.u32 4294901760, %v2413_v53 }
 0x210   : > { %v2307_v28 = vrot.slane %v2303_v34, 7  ;;  %2968 = vmatpush.msrb.mxu3 %v10675_v10  ;;  %3013 = vmatpush.msra.mxu0 %v2803_v0  ;;  %v2373_v34 = vld [vmem:[#allocation2 + $0x3d8] sm:$0xff] }
 0x211   : > { %2628 = vmatmul.f32.vlgmr.msra.gmra.mxu1 %v2414_v19  ;;  %v2415_v5 = vsub.f32 %v2413_v53, %v2414_v19  ;;  %v11010_v19 = vand.u32 4294901760, %v2374_v16 }
 0x212   : > { %v10920_v17 = vsel %vm298_vm0, %v2306_v47, %v2307_v28  ;;  %v10923_v31 = vsel %vm298_vm0, %v2307_v28, 0.0  ;;  %2970 = vmatpush.msrb.mxu3 %v10684_v21  ;;  %3017 = vmatpush.msra.mxu0 %v2809_v23 }
 0x213   : > { %v2317_v13 = vrot.slane %v10920_v17, 1  ;;  %3084 = vmatpush.msra.mxu1 %v10664_v20  ;;  %v2416_v0 = vand.u32 4294901760, %v2415_v5  ;;  %v10935_v15 = vand.u32 4294901760, %v10920_v17  ;;  %v2319_v48 = vrot.slane %v10923_v31, 1 }
 0x214   : > { %2972 = vmatpush.msrb.mxu3 %v10696_v49  ;;  %3021 = vmatpush.msra.mxu0 %v2815_v56  ;;  %v14639_v56 = vand.u32 4294901760, %v10721_v12 }
 0x215   : > { %3086 = vmatpush.msra.mxu1 %v10675_v10  ;;  %2417 = vmatmul.f32.vlgmr.msrb.gmra.mxu2 %v2416_v0  ;;  %v2318_v23 = vsel %vm309_vm1, %v2316_v44, %v2317_v13  ;;  %v2421_v20 = vsub.f32 %v10920_v17, %v10935_v15  ;;  %v2372_v44 = vld [vmem:[#allocation2 + $0x3d0] sm:$0xff]  ;;  %v2371_v0 = vld [vmem:[#allocation2 + $0x3c8] sm:$0xff] }
 0x216   : > { %2530 = vmatmul.f32.gmra.mxu3 %v10935_v15  ;;  %2908 = vmatpush.msrb.mxu2 %v10673_v18  ;;  %v10944_v36 = vand.u32 4294901760, %v2318_v23  ;;  %v2320_v18 = vsel %vm309_vm1, %v2317_v13, %v2319_v48  ;;  %v14647_v13 = vand.u32 4294901760, %v10840_v51  ;;  %v14648_v48 = vand.u32 4294901760, %v10853_v22 }
 0x217   : > { %2974 = vmatpush.msrb.mxu3 %v10713_v40  ;;  %3025 = vmatpush.msra.mxu0 %v14639_v56  ;;  %v2422_v10 = vand.u32 4294901760, %v2421_v20  ;;  %v10967_v35 = vand.u32 4294901760, %v2320_v18  ;;  %v11046_v56 = vand.u32 4294901760, %v2372_v44 }
 0x218   : > { %3088 = vmatpush.msra.mxu1 %v10684_v21  ;;  %2589 = vmatmul.f32.gmra.mxu0 %v2421_v20  ;;  %v10951_v27 = vsub.f32 %v2318_v23, %v10944_v36  ;;  %v14641_v21 = vand.u32 4294901760, %v10745_v58 }
 0x219   : > { %2911 = vmatpush.msrb.mxu2 %v10687_v3  ;;  %2976 = vmatpush.msrb.mxu3 %v10729_v42  ;;  %v2423_v29 = vsub.f32 %v2421_v20, %v2422_v10 }
 0x21a   : > { %3029 = vmatpush.msra.mxu0 %v14640_v59  ;;  %3090 = vmatpush.msra.mxu1 %v10696_v49  ;;  %v2786_v57 = vand.u32 4294901760, %v10951_v27  ;;  %v14642_v49 = vand.u32 4294901760, %v10764_v46  ;;  %v11055_v59 = vand.u32 4294901760, %v2371_v0 }
 0x21b   : > { %2634 = vmatmul.f32.gmra.mxu1 %v2422_v10  ;;  %2914 = vmatpush.msrb.mxu2 %v10699_v1  ;;  %v2424_v3 = vand.u32 4294901760, %v2423_v29  ;;  %v10975_v1 = vand.u32 4294901760, %v2377_v14  ;;  %v14649_v29 = vand.u32 4294901760, %v10859_v55 }
 0x21c   : > { %2978 = vmatpush.msrb.mxu3 %v10742_v2  ;;  %3033 = vmatpush.msra.mxu0 %v14641_v21  ;;  %v2787_v11 = vsub.f32 %v10951_v27, %v2786_v57  ;;  %v11067_v21 = vsub.f32 %v2372_v44, %v11046_v56 }
 0x21d   : > { %3092 = vmatpush.msra.mxu1 %v10713_v40  ;;  %2917 = vmatpush.msrb.mxu2 %v10721_v12  ;;  %v10980_v40 = vsub.f32 %v2320_v18, %v10967_v35  ;;  %v14643_v12 = vand.u32 4294901760, %v10780_v45  ;;  %v10993_v50 = vsub.f32 %v2377_v14, %v10975_v1  ;;  %v14650_v14 = vand.u32 4294901760, %v10880_v62 }
 0x21e   : > { %2980 = vmatpush.msrb.mxu3 %v10761_v32  ;;  %3037 = vmatpush.msra.mxu0 %v14642_v49  ;;  %v2788_v47 = vand.u32 4294901760, %v2787_v11  ;;  %v2369_v11 = vld [vmem:[#allocation2 + $0x3b8] sm:$0xff]  ;;  %v11079_v49 = vsub.f32 %v2371_v0, %v11055_v59  ;;  %v2364_v0 = vld [vmem:[#allocation2 + $0x390] sm:$0xff] }
 0x21f   : > { %3094 = vmatpush.msra.mxu1 %v10729_v42  ;;  %2425 = vmatmul.f32.gmra.mxu2 %v2424_v3  ;;  %v10987_v42 = vand.u32 4294901760, %v2376_v30  ;;  %v2794_v7 = vand.u32 4294901760, %v10980_v40 }
 0x220   : > { %2744 = vmatmul.f32.vlgmr.msra.gmra.mxu3 %v10909_v33  ;;  %2920 = vmatpush.msrb.mxu2 %v10732_v39  ;;  %v14644_v39 = vand.u32 4294901760, %v10791_v37 }
 0x221   : > { %2982 = vmatpush.msrb.mxu3 %v10775_v38  ;;  %3041 = vmatpush.msra.mxu0 %v14643_v12  ;;  %v11005_v53 = vsub.f32 %v2376_v30, %v10987_v42  ;;  %v2795_v28 = vsub.f32 %v10980_v40, %v2794_v7  ;;  %v2368_v30 = vld [vmem:[#allocation2 + $0x3b0] sm:$0xff] }
 0x222   : > { %3096 = vmatpush.msra.mxu1 %v10742_v2  ;;  %2923 = vmatpush.msrb.mxu2 %v10745_v58  ;;  %v10999_v2 = vand.u32 4294901760, %v2375_v52  ;;  %v14645_v58 = vand.u32 4294901760, %v10805_v41 }
 0x223   : > { %2984 = vmatpush.msrb.mxu3 %v10788_v61  ;;  %3045 = vmatpush.msra.mxu0 %v14644_v39  ;;  %v3181_v5 = vand.u32 4294901760, %v11005_v53  ;;  %v3205_v39 = vand.u32 4294901760, %v11067_v21 }
 0x224   : > { %3098 = vmatpush.msra.mxu1 %v10761_v32  ;;  %2789 = vmatmul.f32.vlgmr.msrb.gmra.mxu0 %v2788_v47  ;;  %v3175_v32 = vand.u32 4294901760, %v10993_v50  ;;  %v11084_v47 = vand.u32 4294901760, %v2369_v11 }
 0x225   : > { %2898 = vmatmul.f32.vlgmr.msrb.gmra.mxu1 %v10944_v36  ;;  %2926 = vmatpush.msrb.mxu2 %v10764_v46  ;;  %v14646_v46 = vand.u32 4294901760, %v10823_v4 }
 0x226   : > { %2986 = vmatpush.msrb.mxu3 %v10802_v24  ;;  %3049 = vmatpush.msra.mxu0 %v14645_v58  ;;  %v3211_v58 = vand.u32 4294901760, %v11079_v49 }
 0x227   : > { %3100 = vmatpush.msra.mxu1 %v10775_v38  ;;  %2929 = vmatpush.msrb.mxu2 %v10780_v45  ;;  %v11021_v38 = vsub.f32 %v2375_v52, %v10999_v2  ;;  %v11023_v45 = vand.u32 4294901760, %v2373_v34 }
 0x228   : > { %2988 = vmatpush.msrb.mxu3 %v10820_v9  ;;  %3053 = vmatpush.msra.mxu0 %v14646_v46  ;;  %v11105_v46 = vsub.f32 %v2369_v11, %v11084_v47  ;;  %v11143_v11 = vand.u32 4294901760, %v2364_v0 }
 0x229   : > { %3102 = vmatpush.msra.mxu1 %v10788_v61  ;;  %2703 = vmatmul.f32.vlgmr.msra.gmra.mxu2 %v10909_v33  ;;  %v3176_v61 = vsub.f32 %v10993_v50, %v3175_v32  ;;  %v11035_v33 = vsub.f32 %v2374_v16, %v11010_v19  ;;  %v3187_v23 = vand.u32 4294901760, %v11021_v38  ;;  %v11044_v20 = vsub.f32 %v2373_v34, %v11023_v45  ;;  %v2366_v34 = vld [vmem:[#allocation2 + $0x3a0] sm:$0xff] }
 0x22a   : > { %2748 = vmatmul.f32.gmra.mxu3 %v10935_v15  ;;  %2932 = vmatpush.msrb.mxu2 %v10791_v37  ;;  %v2796_v37 = vand.u32 4294901760, %v2795_v28 }
 0x22b   : > { %2990 = vmatpush.msrb.mxu3 %v10837_v60  ;;  %3057 = vmatpush.msra.mxu0 %v14647_v13  ;;  %v3177_v10 = vand.u32 4294901760, %v3176_v61  ;;  %v3193_v18 = vand.u32 4294901760, %v11035_v33  ;;  %v2365_v13 = vld [vmem:[#allocation2 + $0x398] sm:$0xff]  ;;  %v11119_v61 = vand.u32 4294901760, %v2366_v34 }
 0x22c   : > { %3104 = vmatpush.msra.mxu1 %v10802_v24  ;;  %2935 = vmatpush.msrb.mxu2 %v10805_v41  ;;  %v3182_v24 = vsub.f32 %v11005_v53, %v3181_v5  ;;  %v2370_v41 = vld [vmem:[#allocation2 + $0x3c0] sm:$0xff] }
 0x22d   : > { %2992 = vmatpush.msrb.mxu3 %v10846_v43  ;;  %3061 = vmatpush.msra.mxu0 %v14648_v48  ;;  %v11069_v3 = vand.u32 4294901760, %v2370_v41  ;;  %v3223_v48 = vand.u32 4294901760, %v11105_v46 }
 0x22e   : > { %3106 = vmatpush.msra.mxu1 %v10820_v9  ;;  %2797 = vmatmul.f32.gmra.mxu0 %v2796_v37  ;;  %v3188_v9 = vsub.f32 %v11021_v38, %v3187_v23  ;;  %v3212_v37 = vsub.f32 %v11079_v49, %v3211_v58 }
 0x22f   : > { %2902 = vmatmul.f32.gmra.mxu1 %v10967_v35  ;;  %2938 = vmatpush.msrb.mxu2 %v10823_v4  ;;  %v3199_v4 = vand.u32 4294901760, %v11044_v20  ;;  %v11094_v16 = vsub.f32 %v2370_v41, %v11069_v3 }
 0x230   : > { %2994 = vmatpush.msrb.mxu3 %v10856_v63  ;;  %3065 = vmatpush.msra.mxu0 %v14649_v29  ;;  %v3189_v12 = vand.u32 4294901760, %v3188_v9  ;;  %v11141_v9 = vsub.f32 %v2366_v34, %v11119_v61 }
 0x231   : > { %3108 = vmatpush.msra.mxu1 %v10837_v60  ;;  %2941 = vmatpush.msrb.mxu2 %v10840_v51  ;;  %v3183_v60 = vand.u32 4294901760, %v3182_v24  ;;  %v3194_v51 = vsub.f32 %v11035_v33, %v3193_v18  ;;  %v3200_v52 = vsub.f32 %v11044_v20, %v3199_v4  ;;  %v3217_v44 = vand.u32 4294901760, %v11094_v16 }
 0x232   : > { %2996 = vmatpush.msrb.mxu3 %v10877_v54  ;;  %3069 = vmatpush.msra.mxu0 %v14650_v14  ;;  %v11131_v24 = vand.u32 4294901760, %v2365_v13  ;;  %v2362_v14 = vld [vmem:[#allocation2 + $0x380] sm:$0xff] }
 0x233   : > { %3110 = vmatpush.msra.mxu1 %v10846_v43  ;;  %2707 = vmatmul.f32.gmra.mxu2 %v10935_v15  ;;  %v14651_v43 = vand.u32 4294901760, %v10892_v6  ;;  %v2367_v15 = vld [vmem:[#allocation2 + $0x3a8] sm:$0xff]  ;;  %v3218_v41 = vsub.f32 %v11094_v16, %v3217_v44 }
 0x234   : > { %3178 = vmatpush.msra.mxu3 %v3177_v10  ;;  %2944 = vmatpush.msrb.mxu2 %v10853_v22  ;;  %v3195_v22 = vand.u32 4294901760, %v3194_v51  ;;  %v11107_v28 = vand.u32 4294901760, %v2367_v15  ;;  %v2363_v10 = vld [vmem:[#allocation2 + $0x388] sm:$0xff] }
 0x235   : > { %3000 = vmatmul.f32.vlgmr.msrb.gmra.mxu3 %v2786_v57  ;;  %3073 = vmatpush.msra.mxu0 %v14651_v43  ;;  %v11097_v57 = vand.u32 4294901760, %v2368_v30  ;;  %v11157_v43 = vand.u32 4294901760, %v2363_v10 }
 0x236   : > { %3112 = vmatpush.msra.mxu1 %v10856_v63  ;;  %3184 = vmatpush.msra.mxu3 %v3183_v60  ;;  %v3201_v63 = vand.u32 4294901760, %v3200_v52  ;;  %v3224_v60 = vsub.f32 %v11105_v46, %v3223_v48  ;;  %v11167_v52 = vsub.f32 %v2364_v0, %v11143_v11 }
 0x237   : > { %3280 = vmatpush.msrb.mxu0 %v10993_v50  ;;  %2947 = vmatpush.msrb.mxu2 %v10859_v55  ;;  %v3206_v55 = vsub.f32 %v11067_v21, %v3205_v39 }
 0x238   : > { %3114 = vmatpush.msra.mxu1 %v10877_v54  ;;  %3075 = vmatmul.f32.vlgmr.msra.gmra.mxu0 %v10944_v36  ;;  %v11117_v54 = vsub.f32 %v2368_v30, %v11097_v57  ;;  %v11155_v30 = vsub.f32 %v2365_v13, %v11131_v24  ;;  %v3253_v0 = vand.u32 4294901760, %v11167_v52 }
 0x239   : > { %3190 = vmatpush.msra.mxu3 %v3189_v12  ;;  %3283 = vmatpush.msrb.mxu0 %v11005_v53  ;;  %v3241_v12 = vand.u32 4294901760, %v11141_v9 }
 0x23a   : > { %3338 = vmatpush.msrb.mxu1 %v10975_v1  ;;  %2950 = vmatpush.msrb.mxu2 %v10880_v62  ;;  %v11129_v62 = vsub.f32 %v2367_v15, %v11107_v28  ;;  %v3229_v29 = vand.u32 4294901760, %v11117_v54  ;;  %v11169_v15 = vand.u32 4294901760, %v2362_v14 }
 0x23b   : > { %3116 = vmatmul.f32.vlgmr.msra.gmra.mxu1 %v10944_v36  ;;  %3196 = vmatpush.msra.mxu3 %v3195_v22  ;;  %v3207_v36 = vand.u32 4294901760, %v3206_v55  ;;  %v3225_v22 = vand.u32 4294901760, %v3224_v60  ;;  %v11179_v55 = vsub.f32 %v2363_v10, %v11157_v43 }
 0x23c   : > { %3286 = vmatpush.msrb.mxu0 %v11021_v38  ;;  %3340 = vmatpush.msrb.mxu1 %v10987_v42  ;;  %v3235_v51 = vand.u32 4294901760, %v11129_v62 }
 0x23d   : > { %2953 = vmatpush.msrb.mxu2 %v10892_v6  ;;  %3202 = vmatpush.msra.mxu3 %v3201_v63  ;;  %v3213_v6 = vand.u32 4294901760, %v3212_v37  ;;  %v3247_v63 = vand.u32 4294901760, %v11155_v30  ;;  %v3242_v37 = vsub.f32 %v11141_v9, %v3241_v12  ;;  %v3259_v10 = vand.u32 4294901760, %v11179_v55 }
 0x23e   : > { %3289 = vmatpush.msrb.mxu0 %v11035_v33  ;;  %3342 = vmatpush.msrb.mxu1 %v10999_v2  ;;  %v3236_v34 = vsub.f32 %v11129_v62, %v3235_v51 }
 0x23f   : > { %3125 = vmatpush.msra.mxu2 %v10975_v1  ;;  %3006 = vmatmul.f32.gmra.mxu3 %v2794_v7  ;;  %v3230_v7 = vsub.f32 %v11117_v54, %v3229_v29  ;;  %v3243_v60 = vand.u32 4294901760, %v3242_v37  ;;  %v2326_v37 = vrot.slane %v10923_v31, 2 }
 0x240   : > { %2956 = vmatmul.f32.vlgmr.msrb.gmra.mxu2 %v10951_v27  ;;  %3208 = vmatpush.msra.mxu3 %v3207_v36  ;;  %v3219_v27 = vand.u32 4294901760, %v3218_v41  ;;  %v11189_v36 = vsub.f32 %v2362_v14, %v11169_v15  ;;  %v3248_v41 = vsub.f32 %v11155_v30, %v3247_v63  ;;  %v2323_v14 = vrot.slane %v10906_v8, 2 }
 0x241   : > { %3127 = vmatpush.msra.mxu2 %v10987_v42  ;;  %3292 = vmatpush.msrb.mxu0 %v11044_v20  ;;  %v3231_v13 = vand.u32 4294901760, %v3230_v7  ;;  %v3260_v8 = vsub.f32 %v11179_v55, %v3259_v10 }
 0x242   : > { %3344 = vmatpush.msrb.mxu1 %v11010_v19  ;;  %3079 = vmatmul.f32.gmra.mxu0 %v10967_v35  ;;  %v3265_v7 = vand.u32 4294901760, %v11189_v36 }
 0x243   : > { %3129 = vmatpush.msra.mxu2 %v10999_v2  ;;  %3214 = vmatpush.msra.mxu3 %v3213_v6  ;;  %v2324_v6 = vrot.slane %v10920_v17, 2  ;;  %v3249_v17 = vand.u32 4294901760, %v3248_v41 }
 0x244   : > { %3295 = vmatpush.msrb.mxu0 %v11067_v21  ;;  %3346 = vmatpush.msrb.mxu1 %v11023_v45 }
 0x245   : > { %3120 = vmatmul.f32.gmra.mxu1 %v10967_v35  ;;  %3131 = vmatpush.msra.mxu2 %v11010_v19  ;;  %v3237_v35 = vand.u32 4294901760, %v3236_v34  ;;  %v3266_v34 = vsub.f32 %v11189_v36, %v3265_v7  ;;  %v2327_v31 = vsel %vm1126_vm2, %v2324_v6, %v2326_v37 }
 0x246   : > { %3220 = vmatpush.msra.mxu3 %v3219_v27  ;;  %3298 = vmatpush.msrb.mxu0 %v11079_v49  ;;  %v3254_v27 = vsub.f32 %v11167_v52, %v3253_v0 }
 0x247   : > { %3348 = vmatpush.msrb.mxu1 %v11046_v56  ;;  %3133 = vmatpush.msra.mxu2 %v11023_v45  ;;  %v3267_v41 = vand.u32 4294901760, %v3266_v34 }
 0x248   : > { %3226 = vmatpush.msra.mxu3 %v3225_v22  ;;  %3301 = vmatpush.msrb.mxu0 %v11094_v16  ;;  %v3255_v22 = vand.u32 4294901760, %v3254_v27  ;;  %v3164_v27 = vand.u32 4294901760, %v2327_v31 }
 0x249   : > { %3350 = vmatpush.msrb.mxu1 %v11055_v59  ;;  %2961 = vmatmul.f32.gmra.mxu2 %v10980_v40  ;;  %v2325_v40 = vsel %vm1126_vm2, %v2323_v14, %v2324_v6 }
 0x24a   : > { %3135 = vmatpush.msra.mxu2 %v11046_v56  ;;  %3232 = vmatpush.msra.mxu3 %v3231_v13  ;;  %v11222_v13 = vand.u32 4294901760, %v2325_v40 }
 0x24b   : > { %3304 = vmatpush.msrb.mxu0 %v11105_v46  ;;  %3352 = vmatpush.msrb.mxu1 %v11069_v3 }
 0x24c   : > { %3137 = vmatpush.msra.mxu2 %v11055_v59  ;;  %3238 = vmatpush.msra.mxu3 %v3237_v35  ;;  %v3261_v35 = vand.u32 4294901760, %v3260_v8  ;;  %v3157_v14 = vsub.f32 %v2325_v40, %v11222_v13 }
 0x24d   : > { %3307 = vmatpush.msrb.mxu0 %v11117_v54  ;;  %3354 = vmatpush.msrb.mxu1 %v11084_v47 }
 0x24e   : > { %3139 = vmatpush.msra.mxu2 %v11069_v3  ;;  %3244 = vmatpush.msra.mxu3 %v3243_v60  ;;  %v3158_v60 = vand.u32 4294901760, %v3157_v14 }
 0x24f   : > { %3310 = vmatpush.msrb.mxu0 %v11129_v62  ;;  %3356 = vmatpush.msrb.mxu1 %v11097_v57 }
 0x250   : > { %3141 = vmatpush.msra.mxu2 %v11084_v47  ;;  %3250 = vmatpush.msra.mxu3 %v3249_v17  ;;  %v3159_v6 = vsub.f32 %v3157_v14, %v3158_v60  ;;  %v3165_v17 = vsub.f32 %v2327_v31, %v3164_v27 }
 0x251   : > { %3313 = vmatpush.msrb.mxu0 %v11141_v9  ;;  %3358 = vmatpush.msrb.mxu1 %v11107_v28 }
 0x252   : > { %3143 = vmatpush.msra.mxu2 %v11097_v57  ;;  %3256 = vmatpush.msra.mxu3 %v3255_v22  ;;  %v3166_v8 = vand.u32 4294901760, %v3165_v17 }
 0x253   : > { %3316 = vmatpush.msrb.mxu0 %v11155_v30  ;;  %3360 = vmatpush.msrb.mxu1 %v11119_v61 }
 0x254   : > { %3145 = vmatpush.msra.mxu2 %v11107_v28  ;;  %3262 = vmatpush.msra.mxu3 %v3261_v35 }
 0x255   : > { %3319 = vmatpush.msrb.mxu0 %v11167_v52  ;;  %3362 = vmatpush.msrb.mxu1 %v11131_v24 }
 0x256   : > { %3147 = vmatpush.msra.mxu2 %v11119_v61  ;;  %3268 = vmatpush.msra.mxu3 %v3267_v41 }
 0x257   : > { %3322 = vmatpush.msrb.mxu0 %v11179_v55  ;;  %3364 = vmatpush.msrb.mxu1 %v11143_v11 }
 0x258   : > { %3270 = vmatmul.f32.vlgmr.msra.gmra.mxu3 %v11222_v13  ;;  %3149 = vmatpush.msra.mxu2 %v11131_v24 }
 0x259   : > { %3456 = vmatpush.msrb.mxu3 %v10975_v1  ;;  %3325 = vmatpush.msrb.mxu0 %v11189_v36  ;;  %v3160_v1 = vand.u32 4294901760, %v3159_v6 }
 0x25a   : > { %3366 = vmatpush.msrb.mxu1 %v11157_v43  ;;  %3328 = vmatmul.f32.vlgmr.msrb.gmra.mxu0 %v3157_v14 }
 0x25b   : > { %3458 = vmatpush.msrb.mxu3 %v10987_v42  ;;  %3151 = vmatpush.msra.mxu2 %v11143_v11  ;;  %v3167_v42 = vsub.f32 %v3165_v17, %v3166_v8 }
 0x25c   : > { %3368 = vmatpush.msrb.mxu1 %v11169_v15 }
 0x25d   : > { %3372 = vmatmul.f32.vlgmr.msrb.gmra.mxu1 %v3158_v60  ;;  %3460 = vmatpush.msrb.mxu3 %v10999_v2  ;;  %v3168_v2 = vand.u32 4294901760, %v3167_v42  ;;  %v3543_v42 = vld [vmem:[#allocation2 + $0x470] sm:$0xff] }
 0x25e   : > { %3153 = vmatpush.msra.mxu2 %v11157_v43 }
 0x25f   : > { %3462 = vmatpush.msrb.mxu3 %v11010_v19 }
 0x260   : > { %3155 = vmatpush.msra.mxu2 %v11169_v15  ;;  %3274 = vmatmul.f32.gmra.mxu3 %v3164_v27 }
 0x261   : > { %3161 = vmatmul.f32.vlgmr.msra.gmra.mxu2 %v3160_v1  ;;  %3464 = vmatpush.msrb.mxu3 %v11023_v45 }
 0x262   : > { %3385 = vmatpush.msrb.mxu2 %v3175_v32  ;;  %3333 = vmatmul.f32.gmra.mxu0 %v3165_v17 }
 0x263   : > { %3466 = vmatpush.msrb.mxu3 %v11046_v56 }
 0x264   : > { %3389 = vmatpush.msrb.mxu2 %v3181_v5  ;;  %v8885_v5 = vld [vmem:[#allocation4 + $0x2] ss:$0 sm:$0xff] }
 0x265   : > { %3378 = vmatmul.f32.gmra.mxu1 %v3166_v8  ;;  %3468 = vmatpush.msrb.mxu3 %v11055_v59  ;;  %v3544_v8 = vld [vmem:[#allocation2 + $0x478] sm:$0xff] }
 0x266   : > { %3393 = vmatpush.msrb.mxu2 %v3187_v23 }
 0x267   : > { %3470 = vmatpush.msrb.mxu3 %v11069_v3 }
 0x268   : > { %3397 = vmatpush.msrb.mxu2 %v3193_v18 }
 0x269   : > { %3169 = vmatmul.f32.gmra.mxu2 %v3168_v2  ;;  %3472 = vmatpush.msrb.mxu3 %v11084_v47  ;;  %v3542_v2 = vld [vmem:[#allocation2 + $0x468] sm:$0xff] }
 0x26a   : > { %3401 = vmatpush.msrb.mxu2 %v3199_v4 }
 0x26b   : > { %3474 = vmatpush.msrb.mxu3 %v11097_v57 }
 0x26c   : > { %3405 = vmatpush.msrb.mxu2 %v3205_v39 }
 0x26d   : > { %3476 = vmatpush.msrb.mxu3 %v11107_v28 }
 0x26e   : > { %3409 = vmatpush.msrb.mxu2 %v3211_v58 }
 0x26f   : > { %3478 = vmatpush.msrb.mxu3 %v11119_v61 }
 0x270   : > { %3413 = vmatpush.msrb.mxu2 %v3217_v44 }
 0x271   : > { %3480 = vmatpush.msrb.mxu3 %v11131_v24 }
 0x272   : > { %3417 = vmatpush.msrb.mxu2 %v3223_v48 }
 0x273   : > { %3482 = vmatpush.msrb.mxu3 %v11143_v11 }
 0x274   : > { %3421 = vmatpush.msrb.mxu2 %v3229_v29 }
 0x275   : > { %3484 = vmatpush.msrb.mxu3 %v11157_v43 }
 0x276   : > { %3425 = vmatpush.msrb.mxu2 %v3235_v51 }
 0x277   : > { %3486 = vmatpush.msrb.mxu3 %v11169_v15 }
 0x278   : > { %3429 = vmatpush.msrb.mxu2 %v3241_v12  ;;  %3488 = vmatmul.f32.vlgmr.msrb.gmra.mxu3 %v11222_v13 }
 0x27a   : > { %3433 = vmatpush.msrb.mxu2 %v3247_v63 }
 0x27c   : > { %3437 = vmatpush.msrb.mxu2 %v3253_v0 }
 0x27e   : > { %3441 = vmatpush.msrb.mxu2 %v3259_v10 }
 0x280   : > { %3445 = vmatpush.msrb.mxu2 %v3265_v7  ;;  %3492 = vmatmul.f32.gmra.mxu3 %v3164_v27 }
 0x281   : > { %3447 = vmatmul.f32.vlgmr.msrb.gmra.mxu2 %v11222_v13 }
 0x289   : > { %3451 = vmatmul.f32.gmra.mxu2 %v3164_v27 }
 0x28c   : > { %v2585_v32 = vpop.f32.mrf.mxu0 }
 0x28e   : > { %v2629_v45 = vpop.f32.mrf.mxu1 }
 0x290   : > { %v2527_v53 = vpop.f32.mrf.mxu3 }
 0x295   : > { %v2590_v33 = vpop.f32.mrf.mxu0 }
 0x298   : > { %v2418_v50 = vpop.f32.mrf.mxu2  ;;  %v2635_v18 = vpop.f32.mrf.mxu1 }
 0x299   : > { %v2531_v38 = vpop.f32.mrf.mxu3  ;;  %v2419_v56 = vadd.f32 %v8885_v5, %v2418_v50 }
 0x29b   : > { %v2528_v59 = vadd.f32 %v2527_v53, %v2419_v56  ;;  %v11297_v53 = vand.u32 4294901760, %v3544_v8 }
 0x29d   : > { %v2586_v3 = vadd.f32 %v2585_v32, %v2528_v59  ;;  %v11299_v32 = vand.u32 4294901760, %v3543_v42  ;;  %3560 = vmatpush.msra.mxu0 %v11297_v53  ;;  %3773 = vmatpush.msra.mxu3 %v11297_v53 }
 0x29f   : > { %v2630_v16 = vadd.f32 %v2629_v45, %v2586_v3  ;;  %v3540_v45 = vld [vmem:[#allocation2 + $0x458] sm:$0xff]  ;;  %v11313_v3 = vsub.f32 %v3543_v42, %v11299_v32  ;;  %3562 = vmatpush.msra.mxu0 %v11299_v32  ;;  %3775 = vmatpush.msra.mxu3 %v11299_v32 }
 0x2a1   : > { %v2790_v21 = vpop.f32.mrf.mxu0 }
 0x2a2   : > { %v2426_v19 = vpop.f32.mrf.mxu2  ;;  %v2899_v57 = vpop.f32.mrf.mxu1 }
 0x2a3   : > { %v2745_v20 = vpop.f32.mrf.mxu3  ;;  %v2427_v4 = vadd.f32 %v8885_v5, %v2426_v19  ;;  %v11301_v19 = vand.u32 4294901760, %v3542_v2  ;;  %v3539_v5 = vld [vmem:[#allocation2 + $0x450] sm:$0xff] }
 0x2a4   : > { %v11307_v56 = vand.u32 4294901760, %v3539_v5 }
 0x2a5   : > { %v2532_v39 = vadd.f32 %v2531_v38, %v2427_v4  ;;  %v3541_v38 = vld [vmem:[#allocation2 + $0x460] sm:$0xff]  ;;  %3564 = vmatpush.msra.mxu0 %v11301_v19  ;;  %3777 = vmatpush.msra.mxu3 %v11301_v19 }
 0x2a7   : > { %v2591_v46 = vadd.f32 %v2590_v33, %v2532_v39 }
 0x2a9   : > { %v2636_v61 = vadd.f32 %v2635_v18, %v2591_v46  ;;  %v3538_v18 = vld [vmem:[#allocation2 + $0x448] sm:$0xff]  ;;  %v11329_v46 = vsub.f32 %v3539_v5, %v11307_v56 }
 0x2ab   : > { %v2798_v28 = vpop.f32.mrf.mxu0 }
 0x2ac   : > { %v2704_v23 = vpop.f32.mrf.mxu2  ;;  %v2903_v29 = vpop.f32.mrf.mxu1 }
 0x2ad   : > { %v2749_v47 = vpop.f32.mrf.mxu3  ;;  %v2705_v58 = vadd.f32 %v2704_v23, %v2630_v16  ;;  %v11303_v23 = vand.u32 4294901760, %v3541_v38 }
 0x2af   : > { %v2746_v44 = vadd.f32 %v2745_v20, %v2705_v58  ;;  %v11305_v20 = vand.u32 4294901760, %v3540_v45  ;;  %3566 = vmatpush.msra.mxu0 %v11303_v23  ;;  %3779 = vmatpush.msra.mxu3 %v11303_v23 }
 0x2b1   : > { %v2791_v24 = vadd.f32 %v2790_v21, %v2746_v44  ;;  %v11310_v21 = vsub.f32 %v3544_v8, %v11297_v53  ;;  %v11326_v58 = vsub.f32 %v3540_v45, %v11305_v20  ;;  %3568 = vmatpush.msra.mxu0 %v11305_v20  ;;  %3781 = vmatpush.msra.mxu3 %v11305_v20 }
 0x2b3   : > { %v2900_v11 = vadd.f32 %v2899_v57, %v2791_v24  ;;  %v11323_v57 = vsub.f32 %v3541_v38, %v11303_v23  ;;  %v3610_v44 = vand.u32 4294901760, %v11310_v21  ;;  %3715 = vmatpush.msra.mxu2 %v11310_v21  ;;  %v3634_v24 = vand.u32 4294901760, %v11326_v58  ;;  %3570 = vmatpush.msra.mxu0 %v11307_v56 }
 0x2b4   : > { %3783 = vmatpush.msra.mxu3 %v11307_v56 }
 0x2b5   : > { %v3076_v51 = vpop.f32.mrf.mxu0  ;;  %3718 = vmatpush.msra.mxu2 %v11313_v3 }
 0x2b6   : > { %v2708_v49 = vpop.f32.mrf.mxu2 }
 0x2b7   : > { %v2709_v62 = vadd.f32 %v2708_v49, %v2636_v61  ;;  %v11316_v49 = vsub.f32 %v3542_v2, %v11301_v19 }
 0x2b8   : > { %v3001_v48 = vpop.f32.mrf.mxu3  ;;  %v3117_v63 = vpop.f32.mrf.mxu1 }
 0x2b9   : > { %v2750_v9 = vadd.f32 %v2749_v47, %v2709_v62  ;;  %v11319_v47 = vand.u32 4294901760, %v3538_v18  ;;  %v3622_v61 = vand.u32 4294901760, %v11316_v49  ;;  %v3628_v62 = vand.u32 4294901760, %v11323_v57  ;;  %3721 = vmatpush.msra.mxu2 %v11316_v49 }
 0x2bb   : > { %v2799_v52 = vadd.f32 %v2798_v28, %v2750_v9  ;;  %v3611_v9 = vsub.f32 %v11310_v21, %v3610_v44  ;;  %3724 = vmatpush.msra.mxu2 %v11323_v57  ;;  %3572 = vmatpush.msra.mxu0 %v11319_v47 }
 0x2bc   : > { %3785 = vmatpush.msra.mxu3 %v11319_v47 }
 0x2bd   : > { %v2904_v55 = vadd.f32 %v2903_v29, %v2799_v52  ;;  %v11339_v29 = vsub.f32 %v3538_v18, %v11319_v47  ;;  %v3535_v52 = vld [vmem:[#allocation2 + $0x430] sm:$0xff]  ;;  %3727 = vmatpush.msra.mxu2 %v11326_v58 }
 0x2be   : > { %v3531_v18 = vld [vmem:[#allocation2 + $0x410] sm:$0xff] }
 0x2bf   : > { %v3080_v40 = vpop.f32.mrf.mxu0  ;;  %3730 = vmatpush.msra.mxu2 %v11329_v46 }
 0x2c1   : > { %3733 = vmatpush.msra.mxu2 %v11339_v29 }
 0x2c2   : > { %v3007_v12 = vpop.f32.mrf.mxu3  ;;  %v3121_v37 = vpop.f32.mrf.mxu1 }
 0x2c3   : > { %v2957_v54 = vpop.f32.mrf.mxu2 }
 0x2c4   : > { %v2958_v30 = vadd.f32 %v2957_v54, %v2900_v11  ;;  %v3616_v54 = vand.u32 4294901760, %v11313_v3 }
 0x2c6   : > { %v3002_v15 = vadd.f32 %v3001_v48, %v2958_v30  ;;  %v3617_v11 = vsub.f32 %v11313_v3, %v3616_v54  ;;  %v3640_v30 = vand.u32 4294901760, %v11329_v46 }
 0x2c8   : > { %v3077_v36 = vadd.f32 %v3076_v51, %v3002_v15  ;;  %v3623_v51 = vsub.f32 %v11316_v49, %v3622_v61 }
 0x2ca   : > { %v3118_v34 = vadd.f32 %v3117_v63, %v3077_v36  ;;  %v3629_v36 = vsub.f32 %v11323_v57, %v3628_v62 }
 0x2cc   : > { %v2962_v43 = vpop.f32.mrf.mxu2  ;;  %v3630_v42 = vand.u32 4294901760, %v3629_v36 }
 0x2cd   : > { %v2963_v0 = vadd.f32 %v2962_v43, %v2904_v55  ;;  %v3537_v43 = vld [vmem:[#allocation2 + $0x440] sm:$0xff]  ;;  %v3612_v55 = vand.u32 4294901760, %v3611_v9 }
 0x2cf   : > { %v3008_v22 = vadd.f32 %v3007_v12, %v2963_v0  ;;  %v3536_v12 = vld [vmem:[#allocation2 + $0x438] sm:$0xff]  ;;  %v3618_v0 = vand.u32 4294901760, %v3617_v11  ;;  %3613 = vmatpush.msra.mxu1 %v3612_v55  ;;  %v3530_v11 = vld [vmem:[#allocation2 + $0x408] sm:$0xff] }
 0x2d1   : > { %v3081_v35 = vadd.f32 %v3080_v40, %v3008_v22  ;;  %v3635_v22 = vsub.f32 %v11326_v58, %v3634_v24  ;;  %3619 = vmatpush.msra.mxu1 %v3618_v0 }
 0x2d3   : > { %v3122_v27 = vadd.f32 %v3121_v37, %v3081_v35  ;;  %v3624_v37 = vand.u32 4294901760, %v3623_v51  ;;  %v11368_v35 = vand.u32 4294901760, %v3537_v43 }
 0x2d5   : > { %v11386_v2 = vsub.f32 %v3537_v43, %v11368_v35  ;;  %3625 = vmatpush.msra.mxu1 %v3624_v37  ;;  %3574 = vmatpush.msra.mxu0 %v11368_v35 }
 0x2d6   : > { %3787 = vmatpush.msra.mxu3 %v11368_v35 }
 0x2d7   : > { %v3329_v41 = vpop.f32.mrf.mxu0  ;;  %3631 = vmatpush.msra.mxu1 %v3630_v42  ;;  %3736 = vmatpush.msra.mxu2 %v11386_v2 }
 0x2da   : > { %v3373_v1 = vpop.f32.mrf.mxu1 }
 0x2db   : > { %v3271_v7 = vpop.f32.mrf.mxu3 }
 0x2df   : > { %v3334_v39 = vpop.f32.mrf.mxu0 }
 0x2e2   : > { %v3379_v15 = vpop.f32.mrf.mxu1 }
 0x2e3   : > { %v3275_v60 = vpop.f32.mrf.mxu3 }
 0x2e4   : > { %v3162_v10 = vpop.f32.mrf.mxu2 }
 0x2e5   : > { %v3163_v13 = vadd.f32 %v3162_v10, %v3118_v34  ;;  %v3534_v10 = vld [vmem:[#allocation2 + $0x428] sm:$0xff]  ;;  %v3646_v34 = vand.u32 4294901760, %v11339_v29 }
 0x2e7   : > { %v3272_v14 = vadd.f32 %v3271_v7, %v3163_v13  ;;  %v3533_v7 = vld [vmem:[#allocation2 + $0x420] sm:$0xff]  ;;  %v3647_v45 = vsub.f32 %v11339_v29, %v3646_v34 }
 0x2e9   : > { %v3330_v17 = vadd.f32 %v3329_v41, %v3272_v14  ;;  %v11371_v41 = vand.u32 4294901760, %v3536_v12  ;;  %v11373_v14 = vand.u32 4294901760, %v3535_v52  ;;  %v3648_v0 = vand.u32 4294901760, %v3647_v45 }
 0x2eb   : > { %v3374_v33 = vadd.f32 %v3373_v1, %v3330_v17  ;;  %v3532_v17 = vld [vmem:[#allocation2 + $0x418] sm:$0xff]  ;;  %v11396_v5 = vsub.f32 %v3535_v52, %v11373_v14  ;;  %v11421_v52 = vand.u32 4294901760, %v3531_v18  ;;  %3576 = vmatpush.msra.mxu0 %v11371_v41  ;;  %3789 = vmatpush.msra.mxu3 %v11371_v41 }
 0x2ec   : > { %v3170_v31 = vpop.f32.mrf.mxu2 }
 0x2ed   : > { %v3171_v6 = vadd.f32 %v3170_v31, %v3122_v27  ;;  %v11378_v27 = vand.u32 4294901760, %v3534_v10  ;;  %3578 = vmatpush.msra.mxu0 %v11373_v14  ;;  %3791 = vmatpush.msra.mxu3 %v11373_v14 }
 0x2ef   : > { %v3276_v50 = vadd.f32 %v3275_v60, %v3171_v6  ;;  %v3641_v60 = vsub.f32 %v11329_v46, %v3640_v30  ;;  %v11380_v6 = vand.u32 4294901760, %v3533_v7  ;;  %3580 = vmatpush.msra.mxu0 %v11378_v27  ;;  %3793 = vmatpush.msra.mxu3 %v11378_v27 }
 0x2f1   : > { %v3335_v28 = vadd.f32 %v3334_v39, %v3276_v50  ;;  %v11389_v50 = vsub.f32 %v3536_v12, %v11371_v41  ;;  %v11409_v9 = vsub.f32 %v3533_v7, %v11380_v6  ;;  %v3664_v12 = vand.u32 4294901760, %v11396_v5  ;;  %3582 = vmatpush.msra.mxu0 %v11380_v6  ;;  %3795 = vmatpush.msra.mxu3 %v11380_v6 }
 0x2f3   : > { %v3380_v40 = vadd.f32 %v3379_v15, %v3335_v28  ;;  %v3658_v39 = vand.u32 4294901760, %v11389_v50  ;;  %3739 = vmatpush.msra.mxu2 %v11389_v50 }
 0x2f5   : > { %3742 = vmatpush.msra.mxu2 %v11396_v5 }
 0x2fb   : > { %v3489_v59 = vpop.f32.mrf.mxu3 }
 0x303   : > { %v3493_v8 = vpop.f32.mrf.mxu3 }
 0x304   : > { %v3448_v4 = vpop.f32.mrf.mxu2 }
 0x305   : > { %v3449_v16 = vadd.f32 %v3448_v4, %v3374_v33  ;;  %v11399_v33 = vsub.f32 %v3534_v10, %v11378_v27  ;;  %v3652_v4 = vand.u32 4294901760, %v11386_v2  ;;  %v11433_v10 = vand.u32 4294901760, %v3530_v11 }
 0x307   : > { %v3490_v48 = vadd.f32 %v3489_v59, %v3449_v16  ;;  %v3636_v59 = vand.u32 4294901760, %v3635_v22  ;;  %v11405_v16 = vand.u32 4294901760, %v3532_v17  ;;  %v3653_v43 = vsub.f32 %v11386_v2, %v3652_v4  ;;  %3745 = vmatpush.msra.mxu2 %v11399_v33  ;;  %v3546_v2 = vld [vmem:[#allocation2 + $0x488] sm:$0xff] }
 0x308   : > { %v3670_v55 = vand.u32 4294901760, %v11399_v33  ;;  %v3676_v22 = vand.u32 4294901760, %v11409_v9  ;;  %v11459_v45 = vsub.f32 %v3530_v11, %v11433_v10 }
 0x309   : > { %v11356_v63 = vmul.f32 %v3490_v48, %v10059_v26  ;;  %v3642_v48 = vand.u32 4294901760, %v3641_v60  ;;  %3637 = vmatpush.msra.mxu1 %v3636_v59  ;;  %v11431_v36 = vsub.f32 %v3532_v17, %v11405_v16  ;;  %v3665_v60 = vsub.f32 %v11396_v5, %v3664_v12  ;;  %3584 = vmatpush.msra.mxu0 %v11405_v16 }
 0x30a   : > { %v11448_v17 = vsub.f32 %v3531_v18, %v11421_v52  ;;  %3748 = vmatpush.msra.mxu2 %v11409_v9  ;;  %3797 = vmatpush.msra.mxu3 %v11405_v16 }
 0x30b   : > { %v3500_v1 = vrot.slane %v11356_v63, 7  ;;  %v3659_v63 = vsub.f32 %v11389_v50, %v3658_v39  ;;  %3643 = vmatpush.msra.mxu1 %v3642_v48  ;;  %v3677_v48 = vsub.f32 %v11409_v9, %v3676_v22  ;;  %3586 = vmatpush.msra.mxu0 %v11421_v52 }
 0x30c   : > { %v3452_v13 = vpop.f32.mrf.mxu2  ;;  %3751 = vmatpush.msra.mxu2 %v11431_v36  ;;  %3799 = vmatpush.msra.mxu3 %v11421_v52 }
 0x30d   : > { %v3453_v31 = vadd.f32 %v3452_v13, %v3380_v40  ;;  %v11414_v51 = vsel %vm298_vm0, 0.0, %v3500_v1  ;;  %v3529_v13 = vld [vmem:[#allocation2 + $0x400] sm:$0xff]  ;;  %3649 = vmatpush.msra.mxu1 %v3648_v0  ;;  %3588 = vmatpush.msra.mxu0 %v11433_v10 }
 0x30e   : > { %v3510_v40 = vrot.slane %v11414_v51, 1  ;;  %v11461_v18 = vand.u32 4294901760, %v3529_v13  ;;  %3754 = vmatpush.msra.mxu2 %v11448_v17  ;;  %3801 = vmatpush.msra.mxu3 %v11433_v10 }
 0x30f   : > { %v3494_v38 = vadd.f32 %v3493_v8, %v3453_v31  ;;  %v3654_v31 = vand.u32 4294901760, %v3653_v43  ;;  %v3671_v8 = vsub.f32 %v11399_v33, %v3670_v55  ;;  %v3688_v43 = vand.u32 4294901760, %v11448_v17 }
 0x310   : > { %v11474_v11 = vsub.f32 %v3529_v13, %v11461_v18  ;;  %v3678_v13 = vand.u32 4294901760, %v3677_v48  ;;  %3590 = vmatpush.msra.mxu0 %v11461_v18  ;;  %3757 = vmatpush.msra.mxu2 %v11459_v45  ;;  %v11597_v33 = vand.u32 4294901760, %v3546_v2 }
 0x311   : > { %v3497_v28 = vmul.f32 %v3494_v38, %v10068_v25  ;;  %v3682_v38 = vand.u32 4294901760, %v11431_v36  ;;  %3655 = vmatpush.msra.mxu1 %v3654_v31  ;;  %v3689_v31 = vsub.f32 %v11448_v17, %v3688_v43  ;;  %3803 = vmatpush.msra.mxu3 %v11461_v18 }
 0x312   : > { %3820 = vmatpush.msrb.mxu0 %v3610_v44  ;;  %3760 = vmatpush.msra.mxu2 %v11474_v11 }
 0x313   : > { %v3501_v15 = vrot.slane %v3497_v28, 7  ;;  %v3666_v28 = vand.u32 4294901760, %v3665_v60  ;;  %v3683_v0 = vsub.f32 %v11431_v36, %v3682_v38  ;;  %v3700_v60 = vand.u32 4294901760, %v11474_v11 }
 0x314   : > { %3824 = vmatpush.msrb.mxu0 %v3616_v54  ;;  %v3548_v54 = vld [vmem:[#allocation2 + $0x498] sm:$0xff] }
 0x315   : > { %v11436_v7 = vsel %vm298_vm0, %v3500_v1, %v3501_v15  ;;  %v3660_v1 = vand.u32 4294901760, %v3659_v63  ;;  %v11465_v59 = vsel %vm298_vm0, %v3501_v15, 0.0  ;;  %v3672_v63 = vand.u32 4294901760, %v3671_v8 }
 0x316   : > { %v3511_v37 = vrot.slane %v11436_v7, 1  ;;  %v3513_v15 = vrot.slane %v11465_v59, 1  ;;  %v3684_v8 = vand.u32 4294901760, %v3683_v0  ;;  %v3701_v48 = vsub.f32 %v11474_v11, %v3700_v60  ;;  %3828 = vmatpush.msrb.mxu0 %v3622_v61 }
 0x317   : > { %3661 = vmatpush.msra.mxu1 %v3660_v1  ;;  %v11580_v29 = vand.u32 4294901760, %v3548_v54 }
 0x318   : > { %v3512_v42 = vsel %vm309_vm1, %v3510_v40, %v3511_v37  ;;  %v3694_v40 = vand.u32 4294901760, %v11459_v45  ;;  %v3514_v1 = vsel %vm309_vm1, %v3511_v37, %v3513_v15  ;;  %v3702_v15 = vand.u32 4294901760, %v3701_v48  ;;  %3832 = vmatpush.msrb.mxu0 %v3628_v62 }
 0x319   : > { %3515 = vrot.lane.b32.xlu1 %v3512_v42, %s9005_s20  ;;  %3667 = vmatpush.msra.mxu1 %v3666_v28  ;;  %v3690_v28 = vand.u32 4294901760, %v3689_v31 }
 0x31a   : > { %v3695_v42 = vsub.f32 %v11459_v45, %v3694_v40  ;;  %3836 = vmatpush.msrb.mxu0 %v3634_v24 }
 0x31b   : > { %3673 = vmatpush.msra.mxu1 %v3672_v63 }
 0x31c   : > { %v3696_v37 = vand.u32 4294901760, %v3695_v42  ;;  %3840 = vmatpush.msrb.mxu0 %v3640_v30  ;;  %v3524_v42 = vrot.slane %v11465_v59, 2 }
 0x31d   : > { %3679 = vmatpush.msra.mxu1 %v3678_v13  ;;  %v3521_v13 = vrot.slane %v11414_v51, 2 }
 0x31e   : > { %3844 = vmatpush.msrb.mxu0 %v3646_v34  ;;  %v3547_v34 = vld [vmem:[#allocation2 + $0x490] sm:$0xff] }
 0x31f   : > { %3685 = vmatpush.msra.mxu1 %v3684_v8 }
 0x320   : > { %3848 = vmatpush.msrb.mxu0 %v3652_v4 }
 0x321   : > { %3517 = vrot.lane.b32.xlu1 %v3514_v1, %s9005_s20  ;;  %3691 = vmatpush.msra.mxu1 %v3690_v28 }
 0x322   : > { %3852 = vmatpush.msrb.mxu0 %v3658_v39 }
 0x323   : > { %3697 = vmatpush.msra.mxu1 %v3696_v37 }
 0x324   : > { %3856 = vmatpush.msrb.mxu0 %v3664_v12 }
 0x325   : > { %3703 = vmatpush.msra.mxu1 %v3702_v15 }
 0x326   : > { %3860 = vmatpush.msrb.mxu0 %v3670_v55  ;;  %v11613_v55 = vsub.f32 %v3546_v2, %v11597_v33 }
 0x327   : > { %3891 = vmatpush.msrb.mxu1 %v11297_v53  ;;  %v3552_v53 = vld [vmem:[#allocation2 + $0x4b8] sm:$0xff] }
 0x328   : > { %3864 = vmatpush.msrb.mxu0 %v3676_v22  ;;  %v4018_v17 = vand.u32 4294901760, %v11613_v55 }
 0x329   : > { %3893 = vmatpush.msrb.mxu1 %v11299_v32  ;;  %v11550_v32 = vand.u32 4294901760, %v3552_v53 }
 0x32a   : > { %3868 = vmatpush.msrb.mxu0 %v3682_v38 }
 0x32b   : > { %3895 = vmatpush.msrb.mxu1 %v11301_v19  ;;  %v3551_v19 = vld [vmem:[#allocation2 + $0x4b0] sm:$0xff]  ;;  %3940 = vmatpush.msrb.mxu2 %v11550_v32 }
 0x32c   : > { %3872 = vmatpush.msrb.mxu0 %v3688_v43 }
 0x32d   : > { %3897 = vmatpush.msrb.mxu1 %v11303_v23  ;;  %v11554_v23 = vsub.f32 %v3552_v53, %v11550_v32 }
 0x32e   : > { %3876 = vmatpush.msrb.mxu0 %v3694_v40  ;;  %v3522_v40 = vrot.slane %v11436_v7, 2 }
 0x32f   : > { %3899 = vmatpush.msrb.mxu1 %v11305_v20  ;;  %v11556_v20 = vand.u32 4294901760, %v3551_v19  ;;  %v3982_v21 = vand.u32 4294901760, %v11554_v23 }
 0x330   : > { %3880 = vmatpush.msrb.mxu0 %v3700_v60  ;;  %v3523_v31 = vsel %vm1126_vm2, %v3521_v13, %v3522_v40  ;;  %v3525_v53 = vsel %vm1126_vm2, %v3522_v40, %v3524_v42 }
 0x331   : > { %3901 = vmatpush.msrb.mxu1 %v11307_v56  ;;  %v3550_v56 = vld [vmem:[#allocation2 + $0x4a8] sm:$0xff]  ;;  %3942 = vmatpush.msrb.mxu2 %v11556_v20  ;;  %v11563_v49 = vsub.f32 %v3551_v19, %v11556_v20  ;;  %v3983_v57 = vsub.f32 %v11554_v23, %v3982_v21  ;;  %v3555_v1 = vsel %vm3526_vm3, %v3523_v31, 0  ;;  %v3557_v59 = vsel %vm3526_vm3, %v3525_v53, 0 }
 0x332   : > { %v11560_v3 = vand.u32 4294901760, %v3550_v56  ;;  %v11637_v48 = vand.u32 4294901760, %v3555_v1 }
 0x333   : > { %3903 = vmatpush.msrb.mxu1 %v11319_v47  ;;  %v3549_v47 = vld [vmem:[#allocation2 + $0x4a0] sm:$0xff]  ;;  %v3988_v58 = vand.u32 4294901760, %v11563_v49  ;;  %v3984_v61 = vand.u32 4294901760, %v3983_v57 }
 0x334   : > { %3944 = vmatpush.msrb.mxu2 %v11560_v3  ;;  %v11570_v46 = vand.u32 4294901760, %v3549_v47  ;;  %v11573_v44 = vsub.f32 %v3550_v56, %v11560_v3  ;;  %v11642_v19 = vsub.f32 %v3555_v1, %v11637_v48 }
 0x335   : > { %3905 = vmatpush.msrb.mxu1 %v11368_v35  ;;  %v3989_v62 = vsub.f32 %v11563_v49, %v3988_v58  ;;  %3985 = vmatpush.msrb.mxu3 %v3984_v61 }
 0x336   : > { %3946 = vmatpush.msrb.mxu2 %v11570_v46  ;;  %v3994_v24 = vand.u32 4294901760, %v11573_v44  ;;  %v11583_v30 = vsub.f32 %v3549_v47, %v11570_v46 }
 0x337   : > { %3907 = vmatpush.msrb.mxu1 %v11371_v41  ;;  %v3990_v35 = vand.u32 4294901760, %v3989_v62  ;;  %v3957_v62 = vand.u32 4294901760, %v11642_v19 }
 0x338   : > { %v3995_v41 = vsub.f32 %v11573_v44, %v3994_v24  ;;  %3948 = vmatpush.msrb.mxu2 %v11580_v29 }
 0x339   : > { %3909 = vmatpush.msrb.mxu1 %v11373_v14  ;;  %v11589_v14 = vand.u32 4294901760, %v3547_v34  ;;  %3991 = vmatpush.msrb.mxu3 %v3990_v35 }
 0x33a   : > { %v3996_v50 = vand.u32 4294901760, %v3995_v41  ;;  %v3958_v41 = vsub.f32 %v11642_v19, %v3957_v62 }
 0x33b   : > { %3911 = vmatpush.msrb.mxu1 %v11378_v27  ;;  %v11592_v27 = vsub.f32 %v3548_v54, %v11580_v29  ;;  %3950 = vmatpush.msrb.mxu2 %v11589_v14  ;;  %v11600_v4 = vsub.f32 %v3547_v34, %v11589_v14  ;;  %v3963_v34 = vand.u32 4294901760, %v3557_v59 }
 0x33c   : > { %3997 = vmatpush.msrb.mxu3 %v3996_v50 }
 0x33d   : > { %3913 = vmatpush.msrb.mxu1 %v11380_v6  ;;  %v4000_v6 = vand.u32 4294901760, %v11583_v30  ;;  %v4006_v5 = vand.u32 4294901760, %v11592_v27  ;;  %3952 = vmatpush.msrb.mxu2 %v11597_v33  ;;  %v4012_v12 = vand.u32 4294901760, %v11600_v4  ;;  %v3964_v2 = vsub.f32 %v3557_v59, %v3963_v34  ;;  %v4245_v59 = vld [vmem:[#allocation2 + $0x520] sm:$0xff] }
 0x33f   : > { %3915 = vmatpush.msrb.mxu1 %v11405_v16  ;;  %v4001_v39 = vsub.f32 %v11583_v30, %v4000_v6  ;;  %v3545_v16 = vld [vmem:[#allocation2 + $0x480] sm:$0xff]  ;;  %v4007_v9 = vsub.f32 %v11592_v27, %v4006_v5  ;;  %v4013_v22 = vsub.f32 %v11600_v4, %v4012_v12 }
 0x341   : > { %3917 = vmatpush.msrb.mxu1 %v11421_v52  ;;  %v11610_v52 = vand.u32 4294901760, %v3545_v16  ;;  %v4002_v36 = vand.u32 4294901760, %v4001_v39  ;;  %v4014_v45 = vand.u32 4294901760, %v4013_v22  ;;  %v3959_v39 = vand.u32 4294901760, %v3958_v41  ;;  %v4242_v41 = vld [vmem:[#allocation2 + $0x508] sm:$0xff] }
 0x343   : > { %3919 = vmatpush.msrb.mxu1 %v11433_v10  ;;  %v4008_v10 = vand.u32 4294901760, %v4007_v9  ;;  %3954 = vmatpush.msrb.mxu2 %v11610_v52  ;;  %v11621_v38 = vsub.f32 %v3545_v16, %v11610_v52  ;;  %v3965_v16 = vand.u32 4294901760, %v3964_v2 }
 0x344   : > { %4003 = vmatpush.msrb.mxu3 %v4002_v36 }
 0x345   : > { %3921 = vmatpush.msrb.mxu1 %v11461_v18  ;;  %v4019_v18 = vsub.f32 %v11613_v55, %v4018_v17  ;;  %v4024_v43 = vand.u32 4294901760, %v11621_v38  ;;  %v3966_v9 = vsub.f32 %v3964_v2, %v3965_v16 }
 0x346   : > { %4009 = vmatpush.msrb.mxu3 %v4008_v10 }
 0x347   : > { %v4020_v11 = vand.u32 4294901760, %v4019_v18  ;;  %v4025_v63 = vsub.f32 %v11621_v38, %v4024_v43  ;;  %v3967_v36 = vand.u32 4294901760, %v3966_v9 }
 0x348   : > { %4015 = vmatpush.msrb.mxu3 %v4014_v45 }
 0x349   : > { %v4026_v0 = vand.u32 4294901760, %v4025_v63 }
 0x34a   : > { %4021 = vmatpush.msrb.mxu3 %v4020_v11 }
 0x34c   : > { %4027 = vmatpush.msrb.mxu3 %v4026_v0 }
 0x38b   : > { %v3516_v60 = vpop.permute.xlu1 %3515 }
 0x38c   : > { %v3527_v8 = vsel %vm3526_vm3, %v11414_v51, %v3516_v60 }
 0x38d   : > { %v3591_v28 = vand.u32 4294901760, %v3527_v8 }
 0x38f   : > { %v3592_v37 = vsub.f32 %v3527_v8, %v3591_v28  ;;  %3705 = vmatmul.f32.vlgmr.msra.gmra.mxu1 %v3591_v28 }
 0x391   : > { %v3593_v15 = vand.u32 4294901760, %v3592_v37  ;;  %3763 = vmatmul.f32.vlgmr.msra.gmra.mxu2 %v3592_v37 }
 0x392   : > { %4047 = vmatpush.msra.mxu2 %v11554_v23 }
 0x393   : > { %v3594_v56 = vsub.f32 %v3592_v37, %v3593_v15  ;;  %3807 = vmatmul.f32.vlgmr.msra.gmra.mxu3 %v3593_v15  ;;  %v3518_v47 = vpop.permute.xlu1 %3517  ;;  %v4247_v37 = vld [vmem:[#allocation2 + $0x530] sm:$0xff]  ;;  %v4246_v15 = vld [vmem:[#allocation2 + $0x528] sm:$0xff] }
 0x394   : > { %v3528_v51 = vsel %vm3526_vm3, %v11436_v7, %v3518_v47  ;;  %4050 = vmatpush.msra.mxu2 %v11563_v49  ;;  %4089 = vmatpush.msra.mxu3 %v11550_v32  ;;  %v11694_v47 = vand.u32 4294901760, %v4247_v37 }
 0x395   : > { %v3595_v57 = vand.u32 4294901760, %v3594_v56  ;;  %v3599_v54 = vand.u32 4294901760, %v3528_v51 }
 0x396   : > { %4053 = vmatpush.msra.mxu2 %v11573_v44  ;;  %4091 = vmatpush.msra.mxu3 %v11556_v20 }
 0x397   : > { %v3600_v61 = vsub.f32 %v3528_v51, %v3599_v54  ;;  %3596 = vmatmul.f32.vlgmr.msra.gmra.mxu0 %v3595_v57  ;;  %3709 = vmatmul.f32.gmra.mxu1 %v3599_v54  ;;  %v11696_v51 = vand.u32 4294901760, %v4246_v15  ;;  %v4244_v57 = vld [vmem:[#allocation2 + $0x518] sm:$0xff] }
 0x398   : > { %4056 = vmatpush.msra.mxu2 %v11583_v30  ;;  %4093 = vmatpush.msra.mxu3 %v11560_v3 }
 0x399   : > { %3768 = vmatmul.f32.gmra.mxu2 %v3600_v61  ;;  %v3601_v7 = vand.u32 4294901760, %v3600_v61 }
 0x39a   : > { %4059 = vmatpush.msra.mxu2 %v11592_v27  ;;  %4095 = vmatpush.msra.mxu3 %v11570_v46 }
 0x39b   : > { %3813 = vmatmul.f32.gmra.mxu3 %v3601_v7  ;;  %v3602_v35 = vsub.f32 %v3600_v61, %v3601_v7  ;;  %v11700_v7 = vand.u32 4294901760, %v4244_v57 }
 0x39c   : > { %4062 = vmatpush.msra.mxu2 %v11600_v4  ;;  %4097 = vmatpush.msra.mxu3 %v11580_v29 }
 0x39d   : > { %v3603_v50 = vand.u32 4294901760, %v3602_v35 }
 0x39e   : > { %4065 = vmatpush.msra.mxu2 %v11613_v55  ;;  %4099 = vmatpush.msra.mxu3 %v11589_v14 }
 0x39f   : > { %3604 = vmatmul.f32.gmra.mxu0 %v3603_v50  ;;  %3923 = vmatmul.f32.vlgmr.msrb.gmra.mxu1 %v3591_v28  ;;  %v11708_v50 = vsub.f32 %v4247_v37, %v11694_v47 }
 0x3a0   : > { %4068 = vmatpush.msra.mxu2 %v11621_v38  ;;  %4101 = vmatpush.msra.mxu3 %v11597_v33 }
 0x3a1   : > { %3960 = vmatmul.f32.vlgmr.msrb.gmra.mxu2 %v3959_v39  ;;  %v11711_v39 = vsub.f32 %v4246_v15, %v11696_v51 }
 0x3a2   : > { %4103 = vmatpush.msra.mxu3 %v11610_v52  ;;  %4128 = vmatpush.msrb.mxu2 %v3982_v21 }
 0x3a3   : > { %4029 = vmatmul.f32.vlgmr.msrb.gmra.mxu3 %v11637_v48 }
 0x3a4   : > { %4132 = vmatpush.msrb.mxu2 %v3988_v58  ;;  %4175 = vmatpush.msrb.mxu3 %v11550_v32  ;;  %v8886_v58 = vld [vmem:[#allocation4 + $0x3] ss:$0 sm:$0xff] }
 0x3a6   : > { %4136 = vmatpush.msrb.mxu2 %v3994_v24  ;;  %4177 = vmatpush.msrb.mxu3 %v11556_v20 }
 0x3a7   : > { %3882 = vmatmul.f32.vlgmr.msrb.gmra.mxu0 %v3591_v28  ;;  %3927 = vmatmul.f32.gmra.mxu1 %v3599_v54 }
 0x3a8   : > { %4140 = vmatpush.msrb.mxu2 %v4000_v6  ;;  %4179 = vmatpush.msrb.mxu3 %v11560_v3 }
 0x3a9   : > { %3968 = vmatmul.f32.gmra.mxu2 %v3967_v36 }
 0x3aa   : > { %4144 = vmatpush.msrb.mxu2 %v4006_v5  ;;  %4181 = vmatpush.msrb.mxu3 %v11570_v46 }
 0x3ab   : > { %4033 = vmatmul.f32.gmra.mxu3 %v3963_v34 }
 0x3ac   : > { %4148 = vmatpush.msrb.mxu2 %v4012_v12  ;;  %4183 = vmatpush.msrb.mxu3 %v11580_v29 }
 0x3ae   : > { %4152 = vmatpush.msrb.mxu2 %v4018_v17  ;;  %4185 = vmatpush.msrb.mxu3 %v11589_v14 }
 0x3af   : > { %3886 = vmatmul.f32.gmra.mxu0 %v3599_v54  ;;  %v4243_v54 = vld [vmem:[#allocation2 + $0x510] sm:$0xff] }
 0x3b0   : > { %4156 = vmatpush.msrb.mxu2 %v4024_v43  ;;  %4187 = vmatpush.msrb.mxu3 %v11597_v33  ;;  %v11702_v35 = vand.u32 4294901760, %v4243_v54 }
 0x3b1   : > { %4071 = vmatmul.f32.vlgmr.msra.gmra.mxu2 %v11642_v19 }
 0x3b2   : > { %4189 = vmatpush.msrb.mxu3 %v11610_v52 }
 0x3b3   : > { %4107 = vmatmul.f32.vlgmr.msra.gmra.mxu3 %v3957_v62 }
 0x3b9   : > { %4076 = vmatmul.f32.gmra.mxu2 %v3964_v2 }
 0x3bb   : > { %4113 = vmatmul.f32.gmra.mxu3 %v3965_v16  ;;  %v11714_v16 = vand.u32 4294901760, %v4242_v41 }
 0x3c1   : > { %4158 = vmatmul.f32.vlgmr.msrb.gmra.mxu2 %v11637_v48 }
 0x3c3   : > { %4191 = vmatmul.f32.vlgmr.msrb.gmra.mxu3 %v11637_v48  ;;  %v4248_v48 = vld [vmem:[#allocation2 + $0x538] sm:$0xff] }
 0x3c4   : > { %v11692_v56 = vand.u32 4294901760, %v4248_v48 }
 0x3c6   : > { %v11705_v2 = vsub.f32 %v4248_v48, %v11692_v56  ;;  %4264 = vmatpush.msra.mxu2 %v11692_v56  ;;  %4477 = vmatpush.msra.mxu1 %v11692_v56 }
 0x3c8   : > { %4266 = vmatpush.msra.mxu2 %v11694_v47  ;;  %4419 = vmatpush.msra.mxu0 %v11705_v2 }
 0x3c9   : > { %4162 = vmatmul.f32.gmra.mxu2 %v3963_v34  ;;  %4479 = vmatpush.msra.mxu1 %v11694_v47 }
 0x3ca   : > { %4268 = vmatpush.msra.mxu2 %v11696_v51  ;;  %4422 = vmatpush.msra.mxu0 %v11708_v50 }
 0x3cb   : > { %4195 = vmatmul.f32.gmra.mxu3 %v3963_v34  ;;  %v11698_v34 = vand.u32 4294901760, %v4245_v59  ;;  %4481 = vmatpush.msra.mxu1 %v11696_v51 }
 0x3cc   : > { %4425 = vmatpush.msra.mxu0 %v11711_v39 }
 0x3cd   : > { %v11718_v36 = vsub.f32 %v4245_v59, %v11698_v34  ;;  %4270 = vmatpush.msra.mxu2 %v11698_v34  ;;  %4483 = vmatpush.msra.mxu1 %v11698_v34 }
 0x3cf   : > { %4272 = vmatpush.msra.mxu2 %v11700_v7  ;;  %4428 = vmatpush.msra.mxu0 %v11718_v36 }
 0x3d0   : > { %4485 = vmatpush.msra.mxu1 %v11700_v7 }
 0x3d1   : > { %4274 = vmatpush.msra.mxu2 %v11702_v35 }
 0x3d2   : > { %4487 = vmatpush.msra.mxu1 %v11702_v35 }
 0x3d3   : > { %4276 = vmatpush.msra.mxu2 %v11714_v16 }
 0x3d4   : > { %4489 = vmatpush.msra.mxu1 %v11714_v16 }
 0x40c   : > { %v3706_v21 = vpop.f32.mrf.mxu1 }
 0x414   : > { %v3764_v32 = vpop.f32.mrf.mxu2  ;;  %v3597_v23 = vpop.f32.mrf.mxu0 }
 0x415   : > { %v3598_v44 = vadd.f32 %v8886_v58, %v3597_v23  ;;  %v3710_v29 = vpop.f32.mrf.mxu1  ;;  %v11724_v23 = vsub.f32 %v4243_v54, %v11702_v35 }
 0x416   : > { %v3808_v20 = vpop.f32.mrf.mxu3 }
 0x417   : > { %v3707_v14 = vadd.f32 %v3706_v21, %v3598_v44  ;;  %v4320_v21 = vand.u32 4294901760, %v11708_v50 }
 0x419   : > { %v3765_v5 = vadd.f32 %v3764_v32, %v3707_v14  ;;  %v11721_v32 = vsub.f32 %v4244_v57, %v11700_v7  ;;  %v4344_v14 = vand.u32 4294901760, %v11724_v23  ;;  %v4235_v57 = vld [vmem:[#allocation2 + $0x4d0] sm:$0xff] }
 0x41b   : > { %v3809_v52 = vadd.f32 %v3808_v20, %v3765_v5  ;;  %v4314_v20 = vand.u32 4294901760, %v11705_v2  ;;  %v4338_v44 = vand.u32 4294901760, %v11721_v32  ;;  %v4241_v5 = vld [vmem:[#allocation2 + $0x500] sm:$0xff]  ;;  %4431 = vmatpush.msra.mxu0 %v11721_v32 }
 0x41c   : > { %v3769_v3 = vpop.f32.mrf.mxu2  ;;  %v3605_v46 = vpop.f32.mrf.mxu0 }
 0x41d   : > { %v3606_v27 = vadd.f32 %v8886_v58, %v3605_v46  ;;  %v3924_v55 = vpop.f32.mrf.mxu1  ;;  %v4332_v46 = vand.u32 4294901760, %v11718_v36  ;;  %4434 = vmatpush.msra.mxu0 %v11724_v23 }
 0x41e   : > { %v3814_v49 = vpop.f32.mrf.mxu3 }
 0x41f   : > { %v3711_v33 = vadd.f32 %v3710_v29, %v3606_v27  ;;  %v4321_v29 = vsub.f32 %v11708_v50, %v4320_v21 }
 0x421   : > { %v3770_v10 = vadd.f32 %v3769_v3, %v3711_v33  ;;  %v4326_v3 = vand.u32 4294901760, %v11711_v39  ;;  %v4240_v33 = vld [vmem:[#allocation2 + $0x4f8] sm:$0xff] }
 0x423   : > { %v3815_v38 = vadd.f32 %v3814_v49, %v3770_v10  ;;  %v11731_v49 = vsub.f32 %v4242_v41, %v11714_v16  ;;  %v4333_v10 = vsub.f32 %v11718_v36, %v4332_v46 }
 0x424   : > { %v3961_v24 = vpop.f32.mrf.mxu2  ;;  %v3883_v6 = vpop.f32.mrf.mxu0 }
 0x425   : > { %v3884_v22 = vadd.f32 %v3883_v6, %v3809_v52  ;;  %v3928_v63 = vpop.f32.mrf.mxu1  ;;  %v4350_v6 = vand.u32 4294901760, %v11731_v49  ;;  %4437 = vmatpush.msra.mxu0 %v11731_v49 }
 0x426   : > { %v4030_v30 = vpop.f32.mrf.mxu3 }
 0x427   : > { %v3925_v18 = vadd.f32 %v3924_v55, %v3884_v22  ;;  %v4322_v55 = vand.u32 4294901760, %v4321_v29  ;;  %v4239_v22 = vld [vmem:[#allocation2 + $0x4f0] sm:$0xff]  ;;  %v4234_v29 = vld [vmem:[#allocation2 + $0x4c8] sm:$0xff] }
 0x429   : > { %v3962_v0 = vadd.f32 %v3961_v24, %v3925_v18  ;;  %v4315_v24 = vsub.f32 %v11705_v2, %v4314_v20  ;;  %v4339_v18 = vsub.f32 %v11721_v32, %v4338_v44 }
 0x42b   : > { %v4031_v31 = vadd.f32 %v4030_v30, %v3962_v0  ;;  %v4327_v30 = vsub.f32 %v11711_v39, %v4326_v3  ;;  %v4316_v52 = vand.u32 4294901760, %v4315_v24  ;;  %v11769_v0 = vand.u32 4294901760, %v4240_v33 }
 0x42c   : > { %v3969_v4 = vpop.f32.mrf.mxu2  ;;  %v3887_v17 = vpop.f32.mrf.mxu0  ;;  %v4340_v54 = vand.u32 4294901760, %v4339_v18  ;;  %v4233_v18 = vld [vmem:[#allocation2 + $0x4c0] sm:$0xff] }
 0x42d   : > { %v3888_v11 = vadd.f32 %v3887_v17, %v3815_v38  ;;  %v4238_v17 = vld [vmem:[#allocation2 + $0x4e8] sm:$0xff]  ;;  %4317 = vmatpush.msra.mxu3 %v4316_v52  ;;  %v11787_v37 = vsub.f32 %v4240_v33, %v11769_v0  ;;  %v11819_v33 = vand.u32 4294901760, %v4235_v57 }
 0x42e   : > { %v4034_v12 = vpop.f32.mrf.mxu3 }
 0x42f   : > { %v3929_v40 = vadd.f32 %v3928_v63, %v3888_v11  ;;  %v4345_v11 = vsub.f32 %v11724_v23, %v4344_v14  ;;  %v11766_v63 = vand.u32 4294901760, %v4241_v5  ;;  %4323 = vmatpush.msra.mxu3 %v4322_v55 }
 0x431   : > { %v3970_v1 = vadd.f32 %v3969_v4, %v3929_v40  ;;  %v4237_v40 = vld [vmem:[#allocation2 + $0x4e0] sm:$0xff]  ;;  %v11784_v48 = vsub.f32 %v4241_v5, %v11766_v63  ;;  %4278 = vmatpush.msra.mxu2 %v11766_v63  ;;  %4491 = vmatpush.msra.mxu1 %v11766_v63 }
 0x432   : > { %v11796_v59 = vand.u32 4294901760, %v4237_v40 }
 0x433   : > { %v4035_v42 = vadd.f32 %v4034_v12, %v3970_v1  ;;  %v11778_v1 = vand.u32 4294901760, %v4238_v17  ;;  %4280 = vmatpush.msra.mxu2 %v11769_v0  ;;  %4440 = vmatpush.msra.mxu0 %v11784_v48 }
 0x434   : > { %v4072_v45 = vpop.f32.mrf.mxu2  ;;  %v11817_v5 = vsub.f32 %v4237_v40, %v11796_v59  ;;  %4493 = vmatpush.msra.mxu1 %v11769_v0 }
 0x435   : > { %v4073_v8 = vadd.f32 %v4072_v45, %v4031_v31  ;;  %v11774_v31 = vsub.f32 %v11731_v49, %v4350_v6  ;;  %4443 = vmatpush.msra.mxu0 %v11787_v37 }
 0x436   : > { %v4108_v43 = vpop.f32.mrf.mxu3  ;;  %v4380_v40 = vand.u32 4294901760, %v11817_v5 }
 0x437   : > { %v4109_v28 = vadd.f32 %v4108_v43, %v4073_v8  ;;  %v4328_v43 = vand.u32 4294901760, %v4327_v30  ;;  %v4236_v8 = vld [vmem:[#allocation2 + $0x4d8] sm:$0xff]  ;;  %v4352_v55 = vand.u32 4294901760, %v11774_v31 }
 0x438   : > { %v11803_v41 = vand.u32 4294901760, %v4236_v8 }
 0x439   : > { %4329 = vmatpush.msra.mxu3 %v4328_v43 }
 0x43c   : > { %v4077_v13 = vpop.f32.mrf.mxu2 }
 0x43d   : > { %v4078_v53 = vadd.f32 %v4077_v13, %v4035_v42 }
 0x43e   : > { %v4114_v60 = vpop.f32.mrf.mxu3 }
 0x43f   : > { %v4115_v27 = vadd.f32 %v4114_v60, %v4078_v53  ;;  %v11776_v60 = vand.u32 4294901760, %v4239_v22 }
 0x441   : > { %v11791_v53 = vsub.f32 %v4239_v22, %v11776_v60  ;;  %v11832_v22 = vand.u32 4294901760, %v4234_v29  ;;  %4282 = vmatpush.msra.mxu2 %v11776_v60  ;;  %4495 = vmatpush.msra.mxu1 %v11776_v60 }
 0x443   : > { %v4368_v24 = vand.u32 4294901760, %v11791_v53  ;;  %4284 = vmatpush.msra.mxu2 %v11778_v1  ;;  %4446 = vmatpush.msra.mxu0 %v11791_v53 }
 0x444   : > { %v4159_v19 = vpop.f32.mrf.mxu2  ;;  %4497 = vmatpush.msra.mxu1 %v11778_v1 }
 0x445   : > { %v4160_v61 = vadd.f32 %v4159_v19, %v4109_v28  ;;  %v4334_v28 = vand.u32 4294901760, %v4333_v10  ;;  %v11794_v19 = vsub.f32 %v4238_v17, %v11778_v1  ;;  %v11830_v10 = vsub.f32 %v4236_v8, %v11803_v41  ;;  %4286 = vmatpush.msra.mxu2 %v11796_v59 }
 0x446   : > { %v4192_v62 = vpop.f32.mrf.mxu3  ;;  %4499 = vmatpush.msra.mxu1 %v11796_v59 }
 0x447   : > { %v4193_v9 = vadd.f32 %v4192_v62, %v4160_v61  ;;  %v4356_v61 = vand.u32 4294901760, %v11784_v48  ;;  %v4362_v62 = vand.u32 4294901760, %v11787_v37  ;;  %4335 = vmatpush.msra.mxu3 %v4334_v28  ;;  %v4374_v52 = vand.u32 4294901760, %v11794_v19  ;;  %4449 = vmatpush.msra.mxu0 %v11794_v19 }
 0x448   : > { %v4386_v28 = vand.u32 4294901760, %v11830_v10  ;;  %4288 = vmatpush.msra.mxu2 %v11803_v41  ;;  %4501 = vmatpush.msra.mxu1 %v11803_v41 }
 0x449   : > { %v4199_v58 = vmax.f32 %v4193_v9, 0.0  ;;  %4341 = vmatpush.msra.mxu3 %v4340_v54  ;;  %v4375_v8 = vsub.f32 %v11794_v19, %v4374_v52  ;;  %4452 = vmatpush.msra.mxu0 %v11817_v5 }
 0x44a   : > { %4290 = vmatpush.msra.mxu2 %v11819_v33  ;;  %4503 = vmatpush.msra.mxu1 %v11819_v33 }
 0x44b   : > { %v11752_v4 = vmul.f32 %v4199_v58, %v10059_v26  ;;  %v4346_v58 = vand.u32 4294901760, %v4345_v11  ;;  %4455 = vmatpush.msra.mxu0 %v11830_v10 }
 0x44c   : > { %v4163_v12 = vpop.f32.mrf.mxu2  ;;  %4292 = vmatpush.msra.mxu2 %v11832_v22  ;;  %4505 = vmatpush.msra.mxu1 %v11832_v22 }
 0x44d   : > { %v4164_v38 = vadd.f32 %v4163_v12, %v4115_v27  ;;  %v4205_v42 = vrot.slane %v11752_v4, 7  ;;  %v4357_v27 = vsub.f32 %v11784_v48, %v4356_v61  ;;  %v4363_v12 = vsub.f32 %v11787_v37, %v4362_v62  ;;  %4347 = vmatpush.msra.mxu3 %v4346_v58  ;;  %v4250_v37 = vld [vmem:[#allocation2 + $0x548] sm:$0xff] }
 0x44e   : > { %v4196_v45 = vpop.f32.mrf.mxu3  ;;  %v4381_v58 = vsub.f32 %v11817_v5, %v4380_v40 }
 0x44f   : > { %v4197_v13 = vadd.f32 %v4196_v45, %v4164_v38  ;;  %v11810_v30 = vsel %vm298_vm0, 0.0, %v4205_v42  ;;  %v4369_v45 = vsub.f32 %v11791_v53, %v4368_v24  ;;  %v4358_v11 = vand.u32 4294901760, %v4357_v27  ;;  %4353 = vmatpush.msra.mxu3 %v4352_v55 }
 0x450   : > { %v4215_v38 = vrot.slane %v11810_v30, 1  ;;  %v4364_v31 = vand.u32 4294901760, %v4363_v12  ;;  %v4376_v12 = vand.u32 4294901760, %v4375_v8  ;;  %v4387_v55 = vsub.f32 %v11830_v10, %v4386_v28 }
 0x451   : > { %v4200_v15 = vmax.f32 %v4197_v13, 0.0  ;;  %v11847_v13 = vsub.f32 %v4235_v57, %v11819_v33  ;;  %v11860_v57 = vand.u32 4294901760, %v4233_v18  ;;  %4359 = vmatpush.msra.mxu3 %v4358_v11 }
 0x452   : > { %v4388_v8 = vand.u32 4294901760, %v4387_v55 }
 0x453   : > { %v4202_v9 = vmul.f32 %v4200_v15, %v10068_v25  ;;  %v11858_v15 = vsub.f32 %v4234_v29, %v11832_v22  ;;  %v4392_v27 = vand.u32 4294901760, %v11847_v13  ;;  %v11873_v29 = vsub.f32 %v4233_v18, %v11860_v57  ;;  %4365 = vmatpush.msra.mxu3 %v4364_v31  ;;  %4458 = vmatpush.msra.mxu0 %v11847_v13 }
 0x454   : > { %4294 = vmatpush.msra.mxu2 %v11860_v57  ;;  %4507 = vmatpush.msra.mxu1 %v11860_v57 }
 0x455   : > { %v4206_v4 = vrot.slane %v4202_v9, 7  ;;  %v4370_v9 = vand.u32 4294901760, %v4369_v45  ;;  %v4382_v45 = vand.u32 4294901760, %v4381_v58  ;;  %v4393_v18 = vsub.f32 %v11847_v13, %v4392_v27  ;;  %4461 = vmatpush.msra.mxu0 %v11858_v15 }
 0x456   : > { %v4404_v11 = vand.u32 4294901760, %v11873_v29  ;;  %4524 = vmatpush.msrb.mxu2 %v4314_v20 }
 0x457   : > { %v11835_v17 = vsel %vm298_vm0, %v4205_v42, %v4206_v4  ;;  %v11863_v54 = vsel %vm298_vm0, %v4206_v4, 0.0  ;;  %4371 = vmatpush.msra.mxu3 %v4370_v9  ;;  %v4394_v9 = vand.u32 4294901760, %v4393_v18  ;;  %4464 = vmatpush.msra.mxu0 %v11873_v29 }
 0x458   : > { %v4216_v43 = vrot.slane %v11835_v17, 1  ;;  %v4218_v4 = vrot.slane %v11863_v54, 1  ;;  %v4405_v58 = vsub.f32 %v11873_v29, %v4404_v11  ;;  %4528 = vmatpush.msrb.mxu2 %v4320_v21  ;;  %v4252_v21 = vld [vmem:[#allocation2 + $0x558] sm:$0xff] }
 0x459   : > { %4377 = vmatpush.msra.mxu3 %v4376_v12 }
 0x45a   : > { %v4217_v42 = vsel %vm309_vm1, %v4215_v38, %v4216_v43  ;;  %v4398_v38 = vand.u32 4294901760, %v11858_v15  ;;  %v4219_v31 = vsel %vm309_vm1, %v4216_v43, %v4218_v4  ;;  %v4406_v4 = vand.u32 4294901760, %v4405_v58  ;;  %4532 = vmatpush.msrb.mxu2 %v4326_v3 }
 0x45b   : > { %4220 = vrot.lane.b32.xlu2 %v4217_v42, %s9005_s20  ;;  %4383 = vmatpush.msra.mxu3 %v4382_v45  ;;  %v4226_v45 = vrot.slane %v11810_v30, 2 }
 0x45c   : > { %v4399_v42 = vsub.f32 %v11858_v15, %v4398_v38  ;;  %4536 = vmatpush.msrb.mxu2 %v4332_v46 }
 0x45d   : > { %4389 = vmatpush.msra.mxu3 %v4388_v8 }
 0x45e   : > { %v4400_v43 = vand.u32 4294901760, %v4399_v42  ;;  %4540 = vmatpush.msrb.mxu2 %v4338_v44  ;;  %v11978_v44 = vand.u32 4294901760, %v4252_v21  ;;  %v4229_v42 = vrot.slane %v11863_v54, 2 }
 0x45f   : > { %4395 = vmatpush.msra.mxu3 %v4394_v9 }
 0x460   : > { %4544 = vmatpush.msrb.mxu2 %v4344_v14 }
 0x461   : > { %4401 = vmatpush.msra.mxu3 %v4400_v43 }
 0x462   : > { %4548 = vmatpush.msrb.mxu2 %v4350_v6  ;;  %v4251_v6 = vld [vmem:[#allocation2 + $0x550] sm:$0xff] }
 0x463   : > { %4222 = vrot.lane.b32.xlu2 %v4219_v31, %s9005_s20  ;;  %4407 = vmatpush.msra.mxu3 %v4406_v4 }
 0x464   : > { %4552 = vmatpush.msrb.mxu2 %v4356_v61 }
 0x465   : > { %4595 = vmatpush.msrb.mxu3 %v11692_v56  ;;  %v4256_v56 = vld [vmem:[#allocation2 + $0x578] sm:$0xff] }
 0x466   : > { %4556 = vmatpush.msrb.mxu2 %v4362_v62 }
 0x467   : > { %4597 = vmatpush.msrb.mxu3 %v11694_v47  ;;  %v11948_v47 = vand.u32 4294901760, %v4256_v56 }
 0x468   : > { %4560 = vmatpush.msrb.mxu2 %v4368_v24 }
 0x469   : > { %4599 = vmatpush.msrb.mxu3 %v11696_v51  ;;  %v4255_v51 = vld [vmem:[#allocation2 + $0x570] sm:$0xff]  ;;  %4644 = vmatpush.msrb.mxu0 %v11948_v47 }
 0x46a   : > { %4564 = vmatpush.msrb.mxu2 %v4374_v52 }
 0x46b   : > { %4601 = vmatpush.msrb.mxu3 %v11698_v34  ;;  %v11952_v34 = vsub.f32 %v4256_v56, %v11948_v47 }
 0x46c   : > { %4568 = vmatpush.msrb.mxu2 %v4380_v40 }
 0x46d   : > { %4603 = vmatpush.msrb.mxu3 %v11700_v7  ;;  %v11954_v7 = vand.u32 4294901760, %v4255_v51  ;;  %v4686_v2 = vand.u32 4294901760, %v11952_v34 }
 0x46e   : > { %4572 = vmatpush.msrb.mxu2 %v4386_v28 }
 0x46f   : > { %4605 = vmatpush.msrb.mxu3 %v11702_v35  ;;  %v4254_v35 = vld [vmem:[#allocation2 + $0x568] sm:$0xff]  ;;  %4646 = vmatpush.msrb.mxu0 %v11954_v7  ;;  %v11961_v39 = vsub.f32 %v4255_v51, %v11954_v7  ;;  %v4687_v36 = vsub.f32 %v11952_v34, %v4686_v2 }
 0x470   : > { %4576 = vmatpush.msrb.mxu2 %v4392_v27  ;;  %v11958_v50 = vand.u32 4294901760, %v4254_v35 }
 0x471   : > { %4607 = vmatpush.msrb.mxu3 %v11714_v16  ;;  %v4253_v16 = vld [vmem:[#allocation2 + $0x560] sm:$0xff]  ;;  %v4692_v32 = vand.u32 4294901760, %v11961_v39  ;;  %v4688_v3 = vand.u32 4294901760, %v4687_v36 }
 0x472   : > { %4580 = vmatpush.msrb.mxu2 %v4398_v38  ;;  %4648 = vmatpush.msrb.mxu0 %v11958_v50  ;;  %v11968_v23 = vand.u32 4294901760, %v4253_v16  ;;  %v11971_v20 = vsub.f32 %v4254_v35, %v11958_v50  ;;  %v4227_v38 = vrot.slane %v11835_v17, 2 }
 0x473   : > { %4609 = vmatpush.msrb.mxu3 %v11766_v63  ;;  %v4693_v49 = vsub.f32 %v11961_v39, %v4692_v32  ;;  %4689 = vmatpush.msrb.mxu1 %v4688_v3 }
 0x474   : > { %4584 = vmatpush.msrb.mxu2 %v4404_v11  ;;  %4650 = vmatpush.msrb.mxu0 %v11968_v23  ;;  %v4698_v46 = vand.u32 4294901760, %v11971_v20  ;;  %v11981_v14 = vsub.f32 %v4253_v16, %v11968_v23  ;;  %v4228_v18 = vsel %vm1126_vm2, %v4226_v45, %v4227_v38  ;;  %v4230_v56 = vsel %vm1126_vm2, %v4227_v38, %v4229_v42 }
 0x475   : > { %4611 = vmatpush.msrb.mxu3 %v11769_v0  ;;  %v4694_v63 = vand.u32 4294901760, %v4693_v49  ;;  %v4259_v31 = vsel %vm3526_vm3, %v4228_v18, 0  ;;  %v4261_v16 = vsel %vm3526_vm3, %v4230_v56, 0 }
 0x476   : > { %v4699_v0 = vsub.f32 %v11971_v20, %v4698_v46  ;;  %4652 = vmatpush.msrb.mxu0 %v11978_v44  ;;  %v4704_v48 = vand.u32 4294901760, %v11981_v14  ;;  %v12037_v58 = vand.u32 4294901760, %v4259_v31 }
 0x477   : > { %4613 = vmatpush.msrb.mxu3 %v11776_v60  ;;  %v11987_v60 = vand.u32 4294901760, %v4251_v6  ;;  %4695 = vmatpush.msrb.mxu1 %v4694_v63 }
 0x478   : > { %v4700_v53 = vand.u32 4294901760, %v4699_v0  ;;  %v4705_v62 = vsub.f32 %v11981_v14, %v4704_v48 }
 0x479   : > { %4615 = vmatpush.msrb.mxu3 %v11778_v1  ;;  %v11990_v1 = vsub.f32 %v4252_v21, %v11978_v44  ;;  %4654 = vmatpush.msrb.mxu0 %v11987_v60  ;;  %v11998_v61 = vsub.f32 %v4251_v6, %v11987_v60 }
 0x47a   : > { %4701 = vmatpush.msrb.mxu1 %v4700_v53  ;;  %v4706_v10 = vand.u32 4294901760, %v4705_v62 }
 0x47b   : > { %4617 = vmatpush.msrb.mxu3 %v11796_v59  ;;  %v4710_v19 = vand.u32 4294901760, %v11990_v1  ;;  %v11995_v59 = vand.u32 4294901760, %v4250_v37  ;;  %v4716_v5 = vand.u32 4294901760, %v11998_v61 }
 0x47c   : > { %4707 = vmatpush.msrb.mxu1 %v4706_v10 }
 0x47d   : > { %4619 = vmatpush.msrb.mxu3 %v11803_v41  ;;  %v4249_v41 = vld [vmem:[#allocation2 + $0x540] sm:$0xff]  ;;  %v4711_v24 = vsub.f32 %v11990_v1, %v4710_v19  ;;  %4656 = vmatpush.msrb.mxu0 %v11995_v59  ;;  %v12011_v52 = vsub.f32 %v4250_v37, %v11995_v59  ;;  %v4717_v40 = vsub.f32 %v11998_v61, %v4716_v5 }
 0x47f   : > { %4621 = vmatpush.msrb.mxu3 %v11819_v33  ;;  %v12008_v33 = vand.u32 4294901760, %v4249_v41  ;;  %v4722_v13 = vand.u32 4294901760, %v12011_v52  ;;  %v4718_v15 = vand.u32 4294901760, %v4717_v40 }
 0x481   : > { %4623 = vmatpush.msrb.mxu3 %v11832_v22  ;;  %v4712_v22 = vand.u32 4294901760, %v4711_v24  ;;  %4658 = vmatpush.msrb.mxu0 %v12008_v33  ;;  %v12019_v28 = vsub.f32 %v4249_v41, %v12008_v33 }
 0x483   : > { %4625 = vmatpush.msrb.mxu3 %v11860_v57  ;;  %v4723_v57 = vsub.f32 %v12011_v52, %v4722_v13  ;;  %v4728_v27 = vand.u32 4294901760, %v12019_v28  ;;  %4713 = vmatpush.msrb.mxu1 %v4712_v22 }
 0x485   : > { %v4724_v29 = vand.u32 4294901760, %v4723_v57  ;;  %v4729_v12 = vsub.f32 %v12019_v28, %v4728_v27  ;;  %4719 = vmatpush.msrb.mxu1 %v4718_v15 }
 0x487   : > { %v4730_v55 = vand.u32 4294901760, %v4729_v12  ;;  %4725 = vmatpush.msrb.mxu1 %v4724_v29 }
 0x489   : > { %4731 = vmatpush.msrb.mxu1 %v4730_v55 }
 0x4b5   : > { %v4221_v11 = vpop.permute.xlu2 %4220 }
 0x4b6   : > { %v4231_v8 = vsel %vm3526_vm3, %v11810_v30, %v4221_v11  ;;  %v12046_v30 = vsub.f32 %v4259_v31, %v12037_v58  ;;  %v4957_v31 = vld [vmem:[#allocation2 + $0x5d8] sm:$0xff] }
 0x4b7   : > { %v12035_v9 = vand.u32 4294901760, %v4231_v8 }
 0x4b8   : > { %v4661_v49 = vand.u32 4294901760, %v12046_v30 }
 0x4b9   : > { %v4296_v43 = vsub.f32 %v4231_v8, %v12035_v9  ;;  %4409 = vmatmul.f32.vlgmr.msra.gmra.mxu3 %v12035_v9 }
 0x4ba   : > { %4879 = vmatpush.msra.mxu3 %v11948_v47  ;;  %v4662_v6 = vsub.f32 %v12046_v30, %v4661_v49 }
 0x4bb   : > { %v4297_v4 = vand.u32 4294901760, %v4296_v43  ;;  %4467 = vmatmul.f32.vlgmr.msra.gmra.mxu0 %v4296_v43 }
 0x4bc   : > { %4751 = vmatpush.msra.mxu0 %v11952_v34  ;;  %4881 = vmatpush.msra.mxu3 %v11954_v7  ;;  %v4663_v34 = vand.u32 4294901760, %v4662_v6 }
 0x4bd   : > { %v4298_v54 = vsub.f32 %v4296_v43, %v4297_v4  ;;  %4511 = vmatmul.f32.vlgmr.msra.gmra.mxu1 %v4297_v4  ;;  %v4223_v51 = vpop.permute.xlu2 %4222 }
 0x4be   : > { %v4232_v35 = vsel %vm3526_vm3, %v11835_v17, %v4223_v51  ;;  %4754 = vmatpush.msra.mxu0 %v11961_v39  ;;  %4793 = vmatpush.msra.mxu1 %v11948_v47  ;;  %v4667_v17 = vand.u32 4294901760, %v4261_v16 }
 0x4bf   : > { %v4299_v36 = vand.u32 4294901760, %v4298_v54  ;;  %v4303_v21 = vand.u32 4294901760, %v4232_v35  ;;  %4883 = vmatpush.msra.mxu3 %v11958_v50 }
 0x4c0   : > { %4757 = vmatpush.msra.mxu0 %v11971_v20  ;;  %4795 = vmatpush.msra.mxu1 %v11954_v7  ;;  %v4668_v63 = vsub.f32 %v4261_v16, %v4667_v17 }
 0x4c1   : > { %v4304_v3 = vsub.f32 %v4232_v35, %v4303_v21  ;;  %4300 = vmatmul.f32.vlgmr.msra.gmra.mxu2 %v4299_v36  ;;  %4413 = vmatmul.f32.gmra.mxu3 %v4303_v21 }
 0x4c2   : > { %4885 = vmatpush.msra.mxu3 %v11968_v23  ;;  %4760 = vmatpush.msra.mxu0 %v11981_v14  ;;  %v8887_v14 = vld [vmem:[#allocation4 + $0x4] ss:$0 sm:$0xff] }
 0x4c3   : > { %4472 = vmatmul.f32.gmra.mxu0 %v4304_v3  ;;  %v4305_v47 = vand.u32 4294901760, %v4304_v3  ;;  %4797 = vmatpush.msra.mxu1 %v11958_v50 }
 0x4c4   : > { %4832 = vmatpush.msra.mxu2 %v4686_v2  ;;  %4887 = vmatpush.msra.mxu3 %v11978_v44  ;;  %v4669_v2 = vand.u32 4294901760, %v4668_v63 }
 0x4c5   : > { %4517 = vmatmul.f32.gmra.mxu1 %v4305_v47  ;;  %v4306_v7 = vsub.f32 %v4304_v3, %v4305_v47  ;;  %4763 = vmatpush.msra.mxu0 %v11990_v1 }
 0x4c6   : > { %4799 = vmatpush.msra.mxu1 %v11968_v23  ;;  %4836 = vmatpush.msra.mxu2 %v4692_v32  ;;  %v4670_v50 = vsub.f32 %v4668_v63, %v4669_v2 }
 0x4c7   : > { %v4307_v0 = vand.u32 4294901760, %v4306_v7  ;;  %4889 = vmatpush.msra.mxu3 %v11987_v60  ;;  %4766 = vmatpush.msra.mxu0 %v11998_v61 }
 0x4c8   : > { %4801 = vmatpush.msra.mxu1 %v11978_v44  ;;  %4840 = vmatpush.msra.mxu2 %v4698_v46  ;;  %v4671_v39 = vand.u32 4294901760, %v4670_v50 }
 0x4c9   : > { %4308 = vmatmul.f32.gmra.mxu2 %v4307_v0  ;;  %4627 = vmatmul.f32.vlgmr.msrb.gmra.mxu3 %v12035_v9 }
 0x4ca   : > { %4891 = vmatpush.msra.mxu3 %v11995_v59  ;;  %4769 = vmatpush.msra.mxu0 %v12011_v52 }
 0x4cb   : > { %4664 = vmatmul.f32.vlgmr.msrb.gmra.mxu0 %v4663_v34  ;;  %4803 = vmatpush.msra.mxu1 %v11987_v60 }
 0x4cc   : > { %4844 = vmatpush.msra.mxu2 %v4704_v48  ;;  %4893 = vmatpush.msra.mxu3 %v12008_v33 }
 0x4cd   : > { %4733 = vmatmul.f32.vlgmr.msrb.gmra.mxu1 %v12037_v58  ;;  %4772 = vmatpush.msra.mxu0 %v12019_v28 }
 0x4ce   : > { %4805 = vmatpush.msra.mxu1 %v11995_v59  ;;  %4848 = vmatpush.msra.mxu2 %v4710_v19 }
 0x4d0   : > { %4807 = vmatpush.msra.mxu1 %v12008_v33  ;;  %4852 = vmatpush.msra.mxu2 %v4716_v5 }
 0x4d1   : > { %4586 = vmatmul.f32.vlgmr.msrb.gmra.mxu2 %v12035_v9  ;;  %4631 = vmatmul.f32.gmra.mxu3 %v4303_v21  ;;  %v12096_v9 = vand.u32 4294901760, %v4957_v31 }
 0x4d2   : > { %4856 = vmatpush.msra.mxu2 %v4722_v13 }
 0x4d3   : > { %4672 = vmatmul.f32.gmra.mxu0 %v4671_v39  ;;  %v12099_v56 = vsub.f32 %v4957_v31, %v12096_v9  ;;  %5153 = vmatpush.msrb.mxu3 %v12096_v9 }
 0x4d4   : > { %4860 = vmatpush.msra.mxu2 %v4728_v27  ;;  %4972 = vmatpush.msrb.mxu0 %v12096_v9 }
 0x4d5   : > { %4737 = vmatmul.f32.gmra.mxu1 %v4667_v17  ;;  %v5018_v35 = vand.u32 4294901760, %v12099_v56 }
 0x4d6   : > { %5103 = vmatpush.msrb.mxu2 %v12099_v56 }
 0x4d7   : > { %v5019_v36 = vsub.f32 %v12099_v56, %v5018_v35 }
 0x4d9   : > { %4590 = vmatmul.f32.gmra.mxu2 %v4303_v21  ;;  %4895 = vmatmul.f32.vlgmr.msra.gmra.mxu3 %v12037_v58 }
 0x4db   : > { %4775 = vmatmul.f32.vlgmr.msra.gmra.mxu0 %v12046_v30 }
 0x4dd   : > { %4811 = vmatmul.f32.vlgmr.msra.gmra.mxu1 %v4661_v49  ;;  %v5020_v49 = vand.u32 4294901760, %v5019_v36 }
 0x4df   : > { %5021 = vmatpush.msrb.mxu1 %v5020_v49 }
 0x4e1   : > { %4862 = vmatmul.f32.vlgmr.msra.gmra.mxu2 %v12037_v58  ;;  %4899 = vmatmul.f32.gmra.mxu3 %v4667_v17 }
 0x4e3   : > { %4780 = vmatmul.f32.gmra.mxu0 %v4668_v63 }
 0x4e5   : > { %4817 = vmatmul.f32.gmra.mxu1 %v4669_v2 }
 0x4e9   : > { %4866 = vmatmul.f32.gmra.mxu2 %v4667_v17 }
 0x538   : > { %v4468_v32 = vpop.f32.mrf.mxu0 }
 0x53a   : > { %v4512_v23 = vpop.f32.mrf.mxu1 }
 0x53c   : > { %v4410_v20 = vpop.f32.mrf.mxu3 }
 0x540   : > { %v4473_v46 = vpop.f32.mrf.mxu0 }
 0x542   : > { %v4518_v44 = vpop.f32.mrf.mxu1 }
 0x544   : > { %v4301_v60 = vpop.f32.mrf.mxu2  ;;  %v4414_v1 = vpop.f32.mrf.mxu3 }
 0x545   : > { %v4302_v48 = vadd.f32 %v8887_v14, %v4301_v60 }
 0x547   : > { %v4411_v53 = vadd.f32 %v4410_v20, %v4302_v48 }
 0x548   : > { %v4665_v37 = vpop.f32.mrf.mxu0 }
 0x549   : > { %v4469_v62 = vadd.f32 %v4468_v32, %v4411_v53  ;;  %v4956_v53 = vld [vmem:[#allocation2 + $0x5d0] sm:$0xff] }
 0x54a   : > { %v4734_v19 = vpop.f32.mrf.mxu1 }
 0x54b   : > { %v4513_v33 = vadd.f32 %v4512_v23, %v4469_v62 }
 0x54c   : > { %v4309_v59 = vpop.f32.mrf.mxu2  ;;  %v4628_v41 = vpop.f32.mrf.mxu3 }
 0x54d   : > { %v4310_v61 = vadd.f32 %v8887_v14, %v4309_v59  ;;  %v4955_v59 = vld [vmem:[#allocation2 + $0x5c8] sm:$0xff] }
 0x54e   : > { %v12138_v62 = vand.u32 4294901760, %v4955_v59 }
 0x54f   : > { %v4415_v5 = vadd.f32 %v4414_v1, %v4310_v61 }
 0x550   : > { %v4673_v24 = vpop.f32.mrf.mxu0 }
 0x551   : > { %v4474_v13 = vadd.f32 %v4473_v46, %v4415_v5  ;;  %v12144_v5 = vsub.f32 %v4955_v59, %v12138_v62 }
 0x552   : > { %v4738_v22 = vpop.f32.mrf.mxu1 }
 0x553   : > { %v4519_v27 = vadd.f32 %v4518_v44, %v4474_v13 }
 0x554   : > { %v4587_v52 = vpop.f32.mrf.mxu2  ;;  %v4632_v15 = vpop.f32.mrf.mxu3 }
 0x555   : > { %v4588_v10 = vadd.f32 %v4587_v52, %v4513_v33  ;;  %v4953_v52 = vld [vmem:[#allocation2 + $0x5b8] sm:$0xff] }
 0x556   : > { %v12158_v13 = vand.u32 4294901760, %v4953_v52 }
 0x557   : > { %v4629_v40 = vadd.f32 %v4628_v41, %v4588_v10  ;;  %v4954_v41 = vld [vmem:[#allocation2 + $0x5c0] sm:$0xff] }
 0x558   : > { %v4776_v29 = vpop.f32.mrf.mxu0  ;;  %v12146_v33 = vand.u32 4294901760, %v4954_v41 }
 0x559   : > { %v4666_v28 = vadd.f32 %v4665_v37, %v4629_v40 }
 0x55a   : > { %v4812_v18 = vpop.f32.mrf.mxu1  ;;  %v12156_v40 = vsub.f32 %v4954_v41, %v12146_v33 }
 0x55b   : > { %v4735_v57 = vadd.f32 %v4734_v19, %v4666_v28  ;;  %v12133_v19 = vand.u32 4294901760, %v4956_v53  ;;  %v4952_v28 = vld [vmem:[#allocation2 + $0x5b0] sm:$0xff] }
 0x55c   : > { %v4591_v12 = vpop.f32.mrf.mxu2  ;;  %v4896_v58 = vpop.f32.mrf.mxu3 }
 0x55d   : > { %v4592_v55 = vadd.f32 %v4591_v12, %v4519_v27  ;;  %v4777_v38 = vadd.f32 %v4776_v29, %v4735_v57  ;;  %v12136_v61 = vsub.f32 %v4956_v53, %v12133_v19  ;;  %4974 = vmatpush.msrb.mxu0 %v12133_v19  ;;  %5155 = vmatpush.msrb.mxu3 %v12133_v19  ;;  %v4950_v57 = vld [vmem:[#allocation2 + $0x5a0] sm:$0xff]  ;;  %v5036_v12 = vand.u32 4294901760, %v12156_v40 }
 0x55e   : > { %v12176_v31 = vand.u32 4294901760, %v4950_v57 }
 0x55f   : > { %v4633_v45 = vadd.f32 %v4632_v15, %v4592_v55  ;;  %v4813_v8 = vadd.f32 %v4812_v18, %v4777_v38  ;;  %5106 = vmatpush.msrb.mxu2 %v12136_v61  ;;  %4976 = vmatpush.msrb.mxu0 %v12138_v62  ;;  %v4951_v15 = vld [vmem:[#allocation2 + $0x5a8] sm:$0xff]  ;;  %v12168_v55 = vsub.f32 %v4953_v52, %v12158_v13  ;;  %v4949_v38 = vld [vmem:[#allocation2 + $0x598] sm:$0xff]  ;;  %v12172_v18 = vand.u32 4294901760, %v4952_v28 }
 0x560   : > { %v4781_v30 = vpop.f32.mrf.mxu0  ;;  %5157 = vmatpush.msrb.mxu3 %v12138_v62 }
 0x561   : > { %v4674_v11 = vadd.f32 %v4673_v24, %v4633_v45  ;;  %v5024_v24 = vand.u32 4294901760, %v12136_v61  ;;  %5109 = vmatpush.msrb.mxu2 %v12144_v5  ;;  %4978 = vmatpush.msrb.mxu0 %v12146_v33  ;;  %v4948_v45 = vld [vmem:[#allocation2 + $0x590] sm:$0xff] }
 0x562   : > { %v4818_v21 = vpop.f32.mrf.mxu1  ;;  %5159 = vmatpush.msrb.mxu3 %v12146_v33 }
 0x563   : > { %v4739_v42 = vadd.f32 %v4738_v22, %v4674_v11  ;;  %v5025_v10 = vsub.f32 %v12136_v61, %v5024_v24  ;;  %v5030_v22 = vand.u32 4294901760, %v12144_v5  ;;  %5112 = vmatpush.msrb.mxu2 %v12156_v40  ;;  %4980 = vmatpush.msrb.mxu0 %v12158_v13  ;;  %v12174_v11 = vand.u32 4294901760, %v4951_v15 }
 0x564   : > { %v4863_v43 = vpop.f32.mrf.mxu2  ;;  %v4900_v6 = vpop.f32.mrf.mxu3  ;;  %5161 = vmatpush.msrb.mxu3 %v12158_v13 }
 0x565   : > { %v4864_v4 = vadd.f32 %v4863_v43, %v4813_v8  ;;  %v4782_v54 = vadd.f32 %v4781_v30, %v4739_v42  ;;  %v5026_v27 = vand.u32 4294901760, %v5025_v10  ;;  %v5031_v29 = vsub.f32 %v12144_v5, %v5030_v22  ;;  %v4947_v42 = vld [vmem:[#allocation2 + $0x588] sm:$0xff]  ;;  %5115 = vmatpush.msrb.mxu2 %v12168_v55  ;;  %4982 = vmatpush.msrb.mxu0 %v12172_v18 }
 0x566   : > { %v12178_v8 = vand.u32 4294901760, %v4949_v38  ;;  %v5037_v43 = vsub.f32 %v12156_v40, %v5036_v12  ;;  %v12186_v30 = vand.u32 4294901760, %v4948_v45  ;;  %5163 = vmatpush.msrb.mxu3 %v12172_v18 }
 0x567   : > { %v4897_v51 = vadd.f32 %v4896_v58, %v4864_v4  ;;  %v4819_v3 = vadd.f32 %v4818_v21, %v4782_v54  ;;  %5027 = vmatpush.msrb.mxu1 %v5026_v27  ;;  %v5032_v58 = vand.u32 4294901760, %v5031_v29  ;;  %v5042_v4 = vand.u32 4294901760, %v12168_v55  ;;  %v4946_v21 = vld [vmem:[#allocation2 + $0x580] sm:$0xff]  ;;  %4984 = vmatpush.msrb.mxu0 %v12174_v11 }
 0x568   : > { %v12189_v54 = vsub.f32 %v4952_v28, %v12172_v18  ;;  %v12198_v36 = vsub.f32 %v4949_v38, %v12178_v8  ;;  %5165 = vmatpush.msrb.mxu3 %v12174_v11 }
 0x569   : > { %v4903_v16 = vmul.f32 %v4897_v51, %v10059_v26  ;;  %v12192_v51 = vsub.f32 %v4951_v15, %v12174_v11  ;;  %5033 = vmatpush.msrb.mxu1 %v5032_v58  ;;  %v5043_v49 = vsub.f32 %v12168_v55, %v5042_v4  ;;  %4986 = vmatpush.msrb.mxu0 %v12176_v31 }
 0x56a   : > { %5118 = vmatpush.msrb.mxu2 %v12189_v54  ;;  %5167 = vmatpush.msrb.mxu3 %v12176_v31 }
 0x56b   : > { %4906 = vst.msk [vmem:[%s290_s23] sm:$0xff] %vm4905_vm4, %v4903_v16  ;;  %v4910_v7 = vrot.slane %v4903_v16, 7  ;;  %v12195_v16 = vsub.f32 %v4950_v57, %v12176_v31  ;;  %4988 = vmatpush.msrb.mxu0 %v12178_v8 }
 0x56c   : > { %v4867_v17 = vpop.f32.mrf.mxu2  ;;  %5121 = vmatpush.msrb.mxu2 %v12192_v51  ;;  %5169 = vmatpush.msrb.mxu3 %v12178_v8 }
 0x56d   : > { %v4868_v47 = vadd.f32 %v4867_v17, %v4819_v3  ;;  %v12116_v34 = vsel %vm298_vm0, 0.0, %v4910_v7  ;;  %v5038_v3 = vand.u32 4294901760, %v5037_v43  ;;  %v12205_v17 = vsub.f32 %v4948_v45, %v12186_v30  ;;  %4990 = vmatpush.msrb.mxu0 %v12186_v30  ;;  %v5334_v43 = vld [vmem:[#allocation2 + $0x658] sm:$0xff] }
 0x56e   : > { %v4931_v39 = vrot.slane %v12116_v34, 2  ;;  %v4920_v44 = vrot.slane %v12116_v34, 1  ;;  %5124 = vmatpush.msrb.mxu2 %v12195_v16  ;;  %5171 = vmatpush.msrb.mxu3 %v12186_v30 }
 0x56f   : > { %v4901_v63 = vadd.f32 %v4900_v6, %v4868_v47  ;;  %v12207_v47 = vand.u32 4294901760, %v4947_v42  ;;  %v5054_v6 = vand.u32 4294901760, %v12192_v51  ;;  %5039 = vmatpush.msrb.mxu1 %v5038_v3  ;;  %v5331_v3 = vld [vmem:[#allocation2 + $0x640] sm:$0xff] }
 0x570   : > { %5127 = vmatpush.msrb.mxu2 %v12198_v36 }
 0x571   : > { %v4904_v0 = vmul.f32 %v4901_v63, %v10068_v25  ;;  %v5060_v63 = vand.u32 4294901760, %v12195_v16  ;;  %4992 = vmatpush.msrb.mxu0 %v12207_v47  ;;  %5173 = vmatpush.msrb.mxu3 %v12207_v47 }
 0x572   : > { %5130 = vmatpush.msrb.mxu2 %v12205_v17 }
 0x573   : > { %v4911_v2 = vrot.slane %v4904_v0, 7  ;;  %4907 = vst.msk [vmem:[%s290_s23 + $0x8] sm:$0xff] %vm4905_vm4, %v4904_v0  ;;  %v5066_v0 = vand.u32 4294901760, %v12198_v36 }
 0x575   : > { %v12120_v50 = vsel %vm298_vm0, %v4910_v7, %v4911_v2  ;;  %v4917_v32 = vsel %vm298_vm0, %v4911_v2, 0.0  ;;  %v5048_v7 = vand.u32 4294901760, %v12189_v54  ;;  %v5044_v2 = vand.u32 4294901760, %v5043_v49  ;;  %v5330_v49 = vld [vmem:[#allocation2 + $0x638] sm:$0xff] }
 0x576   : > { %v4932_v23 = vrot.slane %v12120_v50, 2  ;;  %v4921_v20 = vrot.slane %v12120_v50, 1  ;;  %v4923_v46 = vrot.slane %v4917_v32, 1  ;;  %v4934_v48 = vrot.slane %v4917_v32, 2 }
 0x577   : > { %v12219_v32 = vand.u32 4294901760, %v4946_v21  ;;  %5045 = vmatpush.msrb.mxu1 %v5044_v2 }
 0x578   : > { %v4933_v14 = vsel %vm1126_vm2, %v4931_v39, %v4932_v23  ;;  %v4924_v60 = vsel %vm309_vm1, %v4921_v20, %v4923_v46  ;;  %v4922_v1 = vsel %vm309_vm1, %v4920_v44, %v4921_v20  ;;  %v4935_v37 = vsel %vm1126_vm2, %v4932_v23, %v4934_v48 }
 0x579   : > { %4936 = vrot.lane.b32.xlu1 %v4933_v14, %s9005_s20  ;;  %4927 = vrot.lane.b32.xlu2 %v4924_v60, %s9006_s24  ;;  %v12217_v39 = vsub.f32 %v4947_v42, %v12207_v47  ;;  %v5049_v23 = vsub.f32 %v12189_v54, %v5048_v7  ;;  %v5055_v20 = vsub.f32 %v12192_v51, %v5054_v6  ;;  %v5072_v44 = vand.u32 4294901760, %v12205_v17 }
 0x57a   : > { %4925 = vrot.lane.b32.xlu0 %v4922_v1, %s9006_s24  ;;  %v5061_v46 = vsub.f32 %v12195_v16, %v5060_v63  ;;  %v5083_v14 = vsub.f32 %v4946_v21, %v12219_v32  ;;  %v5067_v48 = vsub.f32 %v12198_v36, %v5066_v0  ;;  %4994 = vmatpush.msrb.mxu0 %v12219_v32  ;;  %v12278_v16 = vand.u32 4294901760, %v5334_v43 }
 0x57b   : > { %v5050_v60 = vand.u32 4294901760, %v5049_v23  ;;  %v5056_v1 = vand.u32 4294901760, %v5055_v20  ;;  %v5073_v59 = vsub.f32 %v12205_v17, %v5072_v44  ;;  %5133 = vmatpush.msrb.mxu2 %v12217_v39  ;;  %5175 = vmatpush.msrb.mxu3 %v12219_v32  ;;  %v5329_v17 = vld [vmem:[#allocation2 + $0x630] sm:$0xff] }
 0x57c   : > { %v5062_v53 = vand.u32 4294901760, %v5061_v46  ;;  %v5084_v41 = vand.u32 4294901760, %v5083_v14  ;;  %v5068_v52 = vand.u32 4294901760, %v5067_v48  ;;  %5196 = vmatpush.msra.mxu0 %v5018_v35 }
 0x57d   : > { %5051 = vmatpush.msrb.mxu1 %v5050_v60  ;;  %v5074_v28 = vand.u32 4294901760, %v5073_v59  ;;  %5136 = vmatpush.msrb.mxu2 %v5083_v14 }
 0x57e   : > { %v5085_v15 = vsub.f32 %v5083_v14, %v5084_v41  ;;  %5200 = vmatpush.msra.mxu0 %v5024_v24 }
 0x57f   : > { %5057 = vmatpush.msrb.mxu1 %v5056_v1  ;;  %5350 = vmatpush.msra.mxu2 %v12278_v16 }
 0x580   : > { %v5086_v27 = vand.u32 4294901760, %v5085_v15  ;;  %5204 = vmatpush.msra.mxu0 %v5030_v22 }
 0x581   : > { %5063 = vmatpush.msrb.mxu1 %v5062_v53 }
 0x582   : > { %4938 = vrot.lane.b32.xlu0 %v4935_v37, %s9005_s20  ;;  %v5078_v37 = vand.u32 4294901760, %v12217_v39  ;;  %5208 = vmatpush.msra.mxu0 %v5036_v12 }
 0x583   : > { %5069 = vmatpush.msrb.mxu1 %v5068_v52 }
 0x584   : > { %v5079_v10 = vsub.f32 %v12217_v39, %v5078_v37  ;;  %5212 = vmatpush.msra.mxu0 %v5042_v4  ;;  %v5333_v4 = vld [vmem:[#allocation2 + $0x650] sm:$0xff]  ;;  %v12291_v39 = vsub.f32 %v5334_v43, %v12278_v16 }
 0x585   : > { %5075 = vmatpush.msrb.mxu1 %v5074_v28  ;;  %v12280_v36 = vand.u32 4294901760, %v5333_v4 }
 0x586   : > { %v5080_v57 = vand.u32 4294901760, %v5079_v10  ;;  %5216 = vmatpush.msra.mxu0 %v5048_v7  ;;  %v12284_v7 = vand.u32 4294901760, %v5331_v3  ;;  %v5400_v48 = vand.u32 4294901760, %v12291_v39 }
 0x587   : > { %5352 = vmatpush.msra.mxu2 %v12280_v36 }
 0x588   : > { %5081 = vmatpush.msrb.mxu1 %v5080_v57  ;;  %5220 = vmatpush.msra.mxu0 %v5054_v6  ;;  %v12286_v6 = vand.u32 4294901760, %v5330_v49  ;;  %v12301_v20 = vsub.f32 %v5331_v3, %v12284_v7  ;;  %v5401_v10 = vsub.f32 %v12291_v39, %v5400_v48 }
 0x58a   : > { %5087 = vmatpush.msrb.mxu1 %v5086_v27  ;;  %5224 = vmatpush.msra.mxu0 %v5060_v63  ;;  %v12288_v63 = vand.u32 4294901760, %v5329_v17  ;;  %v12304_v46 = vsub.f32 %v5330_v49, %v12286_v6  ;;  %v5418_v59 = vand.u32 4294901760, %v12301_v20 }
 0x58c   : > { %5255 = vmatpush.msra.mxu1 %v12096_v9  ;;  %5228 = vmatpush.msra.mxu0 %v5066_v0  ;;  %v5328_v0 = vld [vmem:[#allocation2 + $0x628] sm:$0xff] }
 0x58d   : > { %v12309_v14 = vand.u32 4294901760, %v5328_v0 }
 0x58e   : > { %5257 = vmatpush.msra.mxu1 %v12133_v19  ;;  %5232 = vmatpush.msra.mxu0 %v5072_v44  ;;  %v12307_v44 = vsub.f32 %v5329_v17, %v12288_v63 }
 0x58f   : > { %v12320_v52 = vsub.f32 %v5328_v0, %v12309_v14 }
 0x590   : > { %5259 = vmatpush.msra.mxu1 %v12138_v62  ;;  %5236 = vmatpush.msra.mxu0 %v5078_v37  ;;  %v5430_v27 = vand.u32 4294901760, %v12307_v44 }
 0x592   : > { %5261 = vmatpush.msra.mxu1 %v12146_v33  ;;  %5240 = vmatpush.msra.mxu0 %v5084_v41  ;;  %v5424_v41 = vand.u32 4294901760, %v12304_v46 }
 0x594   : > { %5263 = vmatpush.msra.mxu1 %v12158_v13 }
 0x596   : > { %5265 = vmatpush.msra.mxu1 %v12172_v18 }
 0x598   : > { %5267 = vmatpush.msra.mxu1 %v12174_v11 }
 0x59a   : > { %5269 = vmatpush.msra.mxu1 %v12176_v31  ;;  %v8888_v31 = vld [vmem:[#allocation4 + $0x5] ss:$0 sm:$0xff] }
 0x59c   : > { %5271 = vmatpush.msra.mxu1 %v12178_v8 }
 0x59e   : > { %5273 = vmatpush.msra.mxu1 %v12186_v30  ;;  %v5332_v30 = vld [vmem:[#allocation2 + $0x648] sm:$0xff] }
 0x59f   : > { %v12282_v21 = vand.u32 4294901760, %v5332_v30 }
 0x5a0   : > { %5275 = vmatpush.msra.mxu1 %v12207_v47 }
 0x5a1   : > { %v12297_v23 = vsub.f32 %v5332_v30, %v12282_v21  ;;  %5354 = vmatpush.msra.mxu2 %v12282_v21 }
 0x5a2   : > { %5277 = vmatpush.msra.mxu1 %v12219_v32  ;;  %v12294_v32 = vsub.f32 %v5333_v4, %v12280_v36 }
 0x5a3   : > { %v5412_v53 = vand.u32 4294901760, %v12297_v23  ;;  %5356 = vmatpush.msra.mxu2 %v12284_v7 }
 0x5a4   : > { %v5406_v37 = vand.u32 4294901760, %v12294_v32 }
 0x5a5   : > { %v5413_v15 = vsub.f32 %v12297_v23, %v5412_v53  ;;  %5358 = vmatpush.msra.mxu2 %v12286_v6 }
 0x5a6   : > { %v5407_v28 = vsub.f32 %v12294_v32, %v5406_v37 }
 0x5a7   : > { %5360 = vmatpush.msra.mxu2 %v12288_v63 }
 0x5a9   : > { %5362 = vmatpush.msra.mxu2 %v12309_v14 }
 0x5d3   : > { %v4928_v24 = vpop.permute.xlu2 %4927 }
 0x5d4   : > { %v4943_v33 = vsel %vm4905_vm4, %v12120_v50, %v4928_v24  ;;  %v5419_v24 = vsub.f32 %v12301_v20, %v5418_v59 }
 0x5eb   : > { %v4937_v9 = vpop.permute.xlu1 %4936 }
 0x5ec   : > { %v4926_v56 = vpop.permute.xlu0 %4925 }
 0x5ed   : > { %v4942_v35 = vsel %vm4905_vm4, %v12116_v34, %v4926_v56  ;;  %v5326_v56 = vld [vmem:[#allocation2 + $0x618] sm:$0xff] }
 0x5ee   : > { %v4944_v19 = vsel %vm3526_vm3, %v4942_v35, %v4937_v9  ;;  %v5327_v9 = vld [vmem:[#allocation2 + $0x620] sm:$0xff]  ;;  %v5325_v35 = vld [vmem:[#allocation2 + $0x610] sm:$0xff] }
 0x5ef   : > { %v4962_v61 = vsel %vm4960_vm5, %v4944_v19, 0 }
 0x5f0   : > { %v4995_v62 = vand.u32 4294901760, %v4962_v61 }
 0x5f2   : > { %v4996_v5 = vsub.f32 %v4962_v61, %v4995_v62  ;;  %5089 = vmatmul.f32.vlgmr.msrb.gmra.mxu1 %v4995_v62  ;;  %v5402_v61 = vand.u32 4294901760, %v5401_v10 }
 0x5f3   : > { %5563 = vmatpush.msrb.mxu1 %v12278_v16 }
 0x5f4   : > { %v4997_v22 = vand.u32 4294901760, %v4996_v5  ;;  %5139 = vmatmul.f32.vlgmr.msrb.gmra.mxu2 %v4996_v5  ;;  %v4939_v40 = vpop.permute.xlu0 %4938  ;;  %5403 = vmatpush.msra.mxu3 %v5402_v61 }
 0x5f5   : > { %v4945_v13 = vsel %vm3526_vm3, %v4943_v33, %v4939_v40  ;;  %5565 = vmatpush.msrb.mxu1 %v12280_v36  ;;  %v5425_v40 = vsub.f32 %v12304_v46, %v5424_v41 }
 0x5f6   : > { %v4998_v29 = vsub.f32 %v4996_v5, %v4997_v22  ;;  %v4965_v12 = vsel %vm4960_vm5, %v4945_v13, 0  ;;  %5179 = vmatmul.f32.vlgmr.msrb.gmra.mxu3 %v4997_v22  ;;  %v5414_v22 = vand.u32 4294901760, %v5413_v15  ;;  %v5436_v13 = vand.u32 4294901760, %v12320_v52 }
 0x5f7   : > { %v5003_v55 = vand.u32 4294901760, %v4965_v12  ;;  %5567 = vmatpush.msrb.mxu1 %v12282_v21  ;;  %v5426_v43 = vand.u32 4294901760, %v5425_v40 }
 0x5f8   : > { %v4999_v34 = vand.u32 4294901760, %v4998_v29  ;;  %v5437_v4 = vsub.f32 %v12320_v52, %v5436_v13 }
 0x5f9   : > { %v5004_v38 = vsub.f32 %v4965_v12, %v5003_v55  ;;  %5569 = vmatpush.msrb.mxu1 %v12284_v7 }
 0x5fa   : > { %5000 = vmatmul.f32.vlgmr.msrb.gmra.mxu0 %v4999_v34  ;;  %5093 = vmatmul.f32.gmra.mxu1 %v5003_v55  ;;  %v12349_v34 = vand.u32 4294901760, %v5326_v56 }
 0x5fb   : > { %v5005_v45 = vand.u32 4294901760, %v5004_v38  ;;  %5505 = vmatpush.msrb.mxu0 %v12291_v39  ;;  %5571 = vmatpush.msrb.mxu1 %v12286_v6  ;;  %v5341_v39 = vld [vmem:[#allocation2 + $0x690] sm:$0xff] }
 0x5fc   : > { %5144 = vmatmul.f32.gmra.mxu2 %v5004_v38 }
 0x5fd   : > { %v5006_v18 = vsub.f32 %v5004_v38, %v5005_v45  ;;  %5508 = vmatpush.msrb.mxu0 %v12294_v32  ;;  %v12351_v38 = vand.u32 4294901760, %v5325_v35  ;;  %5573 = vmatpush.msrb.mxu1 %v12288_v63 }
 0x5fe   : > { %5185 = vmatmul.f32.gmra.mxu3 %v5005_v45 }
 0x5ff   : > { %v5007_v11 = vand.u32 4294901760, %v5006_v18  ;;  %5511 = vmatpush.msrb.mxu0 %v12297_v23  ;;  %v5431_v18 = vsub.f32 %v12307_v44, %v5430_v27  ;;  %5575 = vmatpush.msrb.mxu1 %v12309_v14 }
 0x601   : > { %5514 = vmatpush.msrb.mxu0 %v12301_v20  ;;  %v5432_v49 = vand.u32 4294901760, %v5431_v18  ;;  %v5339_v20 = vld [vmem:[#allocation2 + $0x680] sm:$0xff] }
 0x602   : > { %5008 = vmatmul.f32.gmra.mxu0 %v5007_v11  ;;  %5279 = vmatmul.f32.vlgmr.msra.gmra.mxu1 %v4995_v62 }
 0x603   : > { %5517 = vmatpush.msrb.mxu0 %v12304_v46 }
 0x605   : > { %5520 = vmatpush.msrb.mxu0 %v12307_v44 }
 0x607   : > { %5523 = vmatpush.msrb.mxu0 %v12320_v52 }
 0x60a   : > { %5242 = vmatmul.f32.vlgmr.msra.gmra.mxu0 %v4995_v62  ;;  %5283 = vmatmul.f32.gmra.mxu1 %v5003_v55  ;;  %v5408_v62 = vand.u32 4294901760, %v5407_v28 }
 0x60c   : > { %5409 = vmatpush.msra.mxu3 %v5408_v62 }
 0x60e   : > { %5415 = vmatpush.msra.mxu3 %v5414_v22 }
 0x612   : > { %5246 = vmatmul.f32.gmra.mxu0 %v5003_v55  ;;  %v12346_v55 = vand.u32 4294901760, %v5327_v9 }
 0x614   : > { %5364 = vmatpush.msra.mxu2 %v12346_v55  ;;  %5577 = vmatpush.msrb.mxu1 %v12346_v55 }
 0x616   : > { %5366 = vmatpush.msra.mxu2 %v12349_v34  ;;  %5579 = vmatpush.msrb.mxu1 %v12349_v34 }
 0x618   : > { %5368 = vmatpush.msra.mxu2 %v12351_v38  ;;  %5581 = vmatpush.msrb.mxu1 %v12351_v38 }
 0x66f   : > { %v5090_v50 = vpop.f32.mrf.mxu1 }
 0x677   : > { %v5001_v8 = vpop.f32.mrf.mxu0  ;;  %v5094_v58 = vpop.f32.mrf.mxu1 }
 0x678   : > { %v5002_v42 = vadd.f32 %v8888_v31, %v5001_v8  ;;  %v5140_v51 = vpop.f32.mrf.mxu2  ;;  %v12362_v8 = vsub.f32 %v5326_v56, %v12349_v34 }
 0x679   : > { %v5180_v1 = vpop.f32.mrf.mxu3 }
 0x67a   : > { %v5091_v54 = vadd.f32 %v5090_v50, %v5002_v42  ;;  %v5420_v50 = vand.u32 4294901760, %v5419_v24  ;;  %v12366_v42 = vsub.f32 %v5325_v35, %v12351_v38 }
 0x67c   : > { %v5141_v60 = vadd.f32 %v5140_v51, %v5091_v54  ;;  %v5448_v54 = vand.u32 4294901760, %v12362_v8  ;;  %5421 = vmatpush.msra.mxu3 %v5420_v50 }
 0x67e   : > { %v5181_v19 = vadd.f32 %v5180_v1, %v5141_v60  ;;  %5427 = vmatpush.msra.mxu3 %v5426_v43  ;;  %v5438_v60 = vand.u32 4294901760, %v5437_v4  ;;  %v5449_v1 = vsub.f32 %v12362_v8, %v5448_v54  ;;  %v5322_v43 = vld [vmem:[#allocation2 + $0x5f8] sm:$0xff] }
 0x67f   : > { %v5009_v47 = vpop.f32.mrf.mxu0  ;;  %v5280_v5 = vpop.f32.mrf.mxu1 }
 0x680   : > { %v5010_v2 = vadd.f32 %v8888_v31, %v5009_v47  ;;  %v5145_v29 = vpop.f32.mrf.mxu2  ;;  %v12359_v31 = vsub.f32 %v5327_v9, %v12346_v55  ;;  %v5454_v47 = vand.u32 4294901760, %v12366_v42  ;;  %5433 = vmatpush.msra.mxu3 %v5432_v49  ;;  %v5450_v35 = vand.u32 4294901760, %v5449_v1  ;;  %v5321_v49 = vld [vmem:[#allocation2 + $0x5f0] sm:$0xff]  ;;  %v5320_v1 = vld [vmem:[#allocation2 + $0x5e8] sm:$0xff] }
 0x682   : > { %v5095_v57 = vadd.f32 %v5094_v58, %v5010_v2  ;;  %v5186_v58 = vpop.f32.mrf.mxu3  ;;  %v5442_v30 = vand.u32 4294901760, %v12359_v31  ;;  %5526 = vmatpush.msrb.mxu0 %v12359_v31  ;;  %v5455_v9 = vsub.f32 %v12366_v42, %v5454_v47  ;;  %5439 = vmatpush.msra.mxu3 %v5438_v60  ;;  %v12441_v60 = vand.u32 4294901760, %v5321_v49 }
 0x684   : > { %v5146_v45 = vadd.f32 %v5145_v29, %v5095_v57  ;;  %v5443_v17 = vsub.f32 %v12359_v31, %v5442_v30  ;;  %5529 = vmatpush.msrb.mxu0 %v12362_v8  ;;  %v5456_v62 = vand.u32 4294901760, %v5455_v9  ;;  %v12455_v9 = vand.u32 4294901760, %v5320_v1 }
 0x686   : > { %v5187_v51 = vadd.f32 %v5186_v58, %v5146_v45  ;;  %v5444_v57 = vand.u32 4294901760, %v5443_v17  ;;  %5532 = vmatpush.msrb.mxu0 %v12366_v42  ;;  %v5324_v45 = vld [vmem:[#allocation2 + $0x608] sm:$0xff] }
 0x687   : > { %v5243_v33 = vpop.f32.mrf.mxu0  ;;  %v5284_v10 = vpop.f32.mrf.mxu1  ;;  %v12416_v18 = vand.u32 4294901760, %v5324_v45  ;;  %v5336_v42 = vld [vmem:[#allocation2 + $0x668] sm:$0xff] }
 0x688   : > { %v5244_v12 = vadd.f32 %v5243_v33, %v5181_v19  ;;  %5445 = vmatpush.msra.mxu3 %v5444_v57  ;;  %v12451_v57 = vsub.f32 %v5321_v49, %v12441_v60 }
 0x689   : > { %v12419_v50 = vsub.f32 %v5324_v45, %v12416_v18  ;;  %5370 = vmatpush.msra.mxu2 %v12416_v18  ;;  %5583 = vmatpush.msrb.mxu1 %v12416_v18 }
 0x68a   : > { %v5281_v11 = vadd.f32 %v5280_v5, %v5244_v12  ;;  %5451 = vmatpush.msra.mxu3 %v5450_v35 }
 0x68b   : > { %v5460_v4 = vand.u32 4294901760, %v12419_v50  ;;  %5535 = vmatpush.msrb.mxu0 %v12419_v50 }
 0x68c   : > { %v5287_v3 = vmul.f32 %v5281_v11, %v10059_v26  ;;  %5457 = vmatpush.msra.mxu3 %v5456_v62  ;;  %v5323_v11 = vld [vmem:[#allocation2 + $0x600] sm:$0xff]  ;;  %v5478_v62 = vand.u32 4294901760, %v12451_v57 }
 0x68d   : > { %v12421_v58 = vand.u32 4294901760, %v5323_v11  ;;  %v5461_v17 = vsub.f32 %v12419_v50, %v5460_v4 }
 0x68e   : > { %v5291_v28 = vrot.slane %v5287_v3, 7  ;;  %v12429_v3 = vand.u32 4294901760, %v5322_v43 }
 0x68f   : > { %v5247_v0 = vpop.f32.mrf.mxu0  ;;  %5372 = vmatpush.msra.mxu2 %v12421_v58  ;;  %5585 = vmatpush.msrb.mxu1 %v12421_v58 }
 0x690   : > { %v5248_v2 = vadd.f32 %v5247_v0, %v5187_v51  ;;  %v12401_v19 = vsel %vm298_vm0, 0.0, %v5291_v28  ;;  %v12427_v51 = vsub.f32 %v5323_v11, %v12421_v58 }
 0x691   : > { %v5301_v40 = vrot.slane %v12401_v19, 1  ;;  %5374 = vmatpush.msra.mxu2 %v12429_v3  ;;  %5587 = vmatpush.msrb.mxu1 %v12429_v3 }
 0x692   : > { %v5285_v15 = vadd.f32 %v5284_v10, %v5248_v2  ;;  %v5466_v0 = vand.u32 4294901760, %v12427_v51  ;;  %v12439_v2 = vsub.f32 %v5322_v43, %v12429_v3  ;;  %5538 = vmatpush.msrb.mxu0 %v12427_v51  ;;  %v5462_v10 = vand.u32 4294901760, %v5461_v17 }
 0x693   : > { %5376 = vmatpush.msra.mxu2 %v12441_v60  ;;  %5589 = vmatpush.msrb.mxu1 %v12441_v60 }
 0x694   : > { %v5288_v56 = vmul.f32 %v5285_v15, %v10068_v25  ;;  %v5472_v15 = vand.u32 4294901760, %v12439_v2  ;;  %5541 = vmatpush.msrb.mxu0 %v12439_v2  ;;  %5463 = vmatpush.msra.mxu3 %v5462_v10 }
 0x695   : > { %5378 = vmatpush.msra.mxu2 %v12455_v9  ;;  %5591 = vmatpush.msrb.mxu1 %v12455_v9 }
 0x696   : > { %v5292_v61 = vrot.slane %v5288_v56, 7  ;;  %v5319_v56 = vld [vmem:[#allocation2 + $0x5e0] sm:$0xff]  ;;  %5544 = vmatpush.msrb.mxu0 %v12451_v57 }
 0x698   : > { %v12404_v24 = vsel %vm298_vm0, %v5291_v28, %v5292_v61  ;;  %v12407_v5 = vsel %vm298_vm0, %v5292_v61, 0.0  ;;  %v5467_v28 = vsub.f32 %v12427_v51, %v5466_v0  ;;  %v5473_v61 = vsub.f32 %v12439_v2, %v5472_v15 }
 0x699   : > { %v5302_v33 = vrot.slane %v12404_v24, 1  ;;  %v5304_v22 = vrot.slane %v12407_v5, 1 }
 0x69a   : > { %v5468_v35 = vand.u32 4294901760, %v5467_v28 }
 0x69b   : > { %v5305_v29 = vsel %vm309_vm1, %v5302_v33, %v5304_v22  ;;  %v5303_v12 = vsel %vm309_vm1, %v5301_v40, %v5302_v33  ;;  %v12462_v33 = vand.u32 4294901760, %v5319_v56  ;;  %v12466_v22 = vsub.f32 %v5320_v1, %v12455_v9 }
 0x69c   : > { %5308 = vrot.lane.b32.xlu2 %v5305_v29, %s9005_s20  ;;  %5306 = vrot.lane.b32.xlu1 %v5303_v12, %s9005_s20  ;;  %v5474_v40 = vand.u32 4294901760, %v5473_v61  ;;  %v5479_v29 = vsub.f32 %v12451_v57, %v5478_v62 }
 0x69d   : > { %5469 = vmatpush.msra.mxu3 %v5468_v35  ;;  %v12474_v12 = vsub.f32 %v5319_v56, %v12462_v33  ;;  %v5484_v45 = vand.u32 4294901760, %v12466_v22  ;;  %5380 = vmatpush.msra.mxu2 %v12462_v33 }
 0x69e   : > { %5547 = vmatpush.msrb.mxu0 %v12466_v22  ;;  %v5480_v11 = vand.u32 4294901760, %v5479_v29  ;;  %5593 = vmatpush.msrb.mxu1 %v12462_v33  ;;  %v5313_v29 = vrot.slane %v12404_v24, 2 }
 0x69f   : > { %5475 = vmatpush.msra.mxu3 %v5474_v40  ;;  %v5490_v43 = vand.u32 4294901760, %v12474_v12  ;;  %5610 = vmatpush.msrb.mxu2 %v5400_v48  ;;  %v5485_v49 = vsub.f32 %v12466_v22, %v5484_v45 }
 0x6a0   : > { %5550 = vmatpush.msrb.mxu0 %v12474_v12 }
 0x6a1   : > { %5481 = vmatpush.msra.mxu3 %v5480_v11  ;;  %v5491_v17 = vsub.f32 %v12474_v12, %v5490_v43  ;;  %5614 = vmatpush.msrb.mxu2 %v5406_v37  ;;  %v5486_v1 = vand.u32 4294901760, %v5485_v49  ;;  %v5338_v37 = vld [vmem:[#allocation2 + $0x678] sm:$0xff]  ;;  %v5312_v12 = vrot.slane %v12401_v19, 2 }
 0x6a2   : > { %v12553_v52 = vand.u32 4294901760, %v5338_v37 }
 0x6a3   : > { %v5492_v10 = vand.u32 4294901760, %v5491_v17  ;;  %5618 = vmatpush.msrb.mxu2 %v5412_v53  ;;  %5487 = vmatpush.msra.mxu3 %v5486_v1  ;;  %v5314_v11 = vsel %vm1126_vm2, %v5312_v12, %v5313_v29  ;;  %v5315_v17 = vrot.slane %v12407_v5, 2 }
 0x6a4   : > { %v12570_v8 = vsub.f32 %v5338_v37, %v12553_v52  ;;  %v5345_v49 = vsel %vm3526_vm3, %v5314_v11, 0 }
 0x6a5   : > { %5622 = vmatpush.msrb.mxu2 %v5418_v59  ;;  %5493 = vmatpush.msra.mxu3 %v5492_v10 }
 0x6a6   : > { %v5796_v50 = vand.u32 4294901760, %v12570_v8 }
 0x6a7   : > { %5681 = vmatpush.msrb.mxu3 %v12278_v16  ;;  %5626 = vmatpush.msrb.mxu2 %v5424_v41  ;;  %v5342_v16 = vld [vmem:[#allocation2 + $0x698] sm:$0xff] }
 0x6a8   : > { %v5797_v28 = vsub.f32 %v12570_v8, %v5796_v50 }
 0x6a9   : > { %5683 = vmatpush.msrb.mxu3 %v12280_v36  ;;  %5630 = vmatpush.msrb.mxu2 %v5430_v27  ;;  %v12511_v36 = vand.u32 4294901760, %v5342_v16 }
 0x6ab   : > { %5685 = vmatpush.msrb.mxu3 %v12282_v21  ;;  %5634 = vmatpush.msrb.mxu2 %v5436_v13  ;;  %v12518_v21 = vsub.f32 %v5342_v16, %v12511_v36  ;;  %v5337_v13 = vld [vmem:[#allocation2 + $0x670] sm:$0xff]  ;;  %v12627_v16 = vand.u32 4294901760, %v5345_v49 }
 0x6ac   : > { %5730 = vmatpush.msra.mxu0 %v12511_v36  ;;  %v12565_v31 = vand.u32 4294901760, %v5337_v13 }
 0x6ad   : > { %5687 = vmatpush.msrb.mxu3 %v12284_v7  ;;  %5638 = vmatpush.msrb.mxu2 %v5442_v30  ;;  %v12520_v7 = vand.u32 4294901760, %v5341_v39  ;;  %v5746_v5 = vsub.f32 %v5345_v49, %v12627_v16  ;;  %v6033_v49 = vld [vmem:[#allocation2 + $0x6f0] sm:$0xff] }
 0x6af   : > { %5689 = vmatpush.msrb.mxu3 %v12286_v6  ;;  %5642 = vmatpush.msrb.mxu2 %v5448_v54  ;;  %v5340_v6 = vld [vmem:[#allocation2 + $0x688] sm:$0xff]  ;;  %v12530_v23 = vsub.f32 %v5341_v39, %v12520_v7  ;;  %v12575_v54 = vand.u32 4294901760, %v5336_v42 }
 0x6b0   : > { %5732 = vmatpush.msra.mxu0 %v12520_v7  ;;  %v12527_v32 = vand.u32 4294901760, %v5340_v6 }
 0x6b1   : > { %5691 = vmatpush.msrb.mxu3 %v12288_v63  ;;  %5646 = vmatpush.msrb.mxu2 %v5454_v47  ;;  %v5772_v63 = vand.u32 4294901760, %v12518_v21  ;;  %v5778_v44 = vand.u32 4294901760, %v12530_v23  ;;  %v12578_v47 = vsub.f32 %v5337_v13, %v12565_v31  ;;  %v12592_v2 = vsub.f32 %v5336_v42, %v12575_v54 }
 0x6b2   : > { %5734 = vmatpush.msra.mxu0 %v12527_v32  ;;  %v12543_v48 = vsub.f32 %v5340_v6, %v12527_v32 }
 0x6b3   : > { %5693 = vmatpush.msrb.mxu3 %v12309_v14  ;;  %5650 = vmatpush.msrb.mxu2 %v5460_v4  ;;  %v5773_v46 = vsub.f32 %v12518_v21, %v5772_v63  ;;  %v12540_v14 = vand.u32 4294901760, %v5339_v20  ;;  %v5779_v59 = vsub.f32 %v12530_v23, %v5778_v44  ;;  %v5335_v4 = vld [vmem:[#allocation2 + $0x660] sm:$0xff]  ;;  %v5802_v51 = vand.u32 4294901760, %v12578_v47 }
 0x6b4   : > { %v5784_v41 = vand.u32 4294901760, %v12543_v48  ;;  %v5808_v57 = vand.u32 4294901760, %v12592_v2 }
 0x6b5   : > { %5695 = vmatpush.msrb.mxu3 %v12346_v55  ;;  %5654 = vmatpush.msrb.mxu2 %v5466_v0  ;;  %v5774_v53 = vand.u32 4294901760, %v5773_v46  ;;  %v12557_v27 = vsub.f32 %v5339_v20, %v12540_v14  ;;  %v5780_v55 = vand.u32 4294901760, %v5779_v59  ;;  %v12589_v0 = vand.u32 4294901760, %v5335_v4 }
 0x6b6   : > { %5736 = vmatpush.msra.mxu0 %v12540_v14  ;;  %v5809_v61 = vsub.f32 %v12592_v2, %v5808_v57  ;;  %v5316_v20 = vsel %vm1126_vm2, %v5313_v29, %v5315_v17  ;;  %v6036_v29 = vld [vmem:[#allocation2 + $0x708] sm:$0xff] }
 0x6b7   : > { %5697 = vmatpush.msrb.mxu3 %v12349_v34  ;;  %5658 = vmatpush.msrb.mxu2 %v5472_v15  ;;  %v5785_v34 = vsub.f32 %v12543_v48, %v5784_v41  ;;  %v5803_v15 = vsub.f32 %v12578_v47, %v5802_v51  ;;  %v12604_v56 = vsub.f32 %v5335_v4, %v12589_v0  ;;  %v5347_v46 = vsel %vm3526_vm3, %v5316_v20, 0 }
 0x6b8   : > { %5775 = vmatpush.msra.mxu1 %v5774_v53  ;;  %5738 = vmatpush.msra.mxu0 %v12553_v52  ;;  %v5810_v22 = vand.u32 4294901760, %v5809_v61  ;;  %v5753_v59 = vand.u32 4294901760, %v5347_v46  ;;  %v12683_v11 = vand.u32 4294901760, %v6036_v29 }
 0x6b9   : > { %5699 = vmatpush.msrb.mxu3 %v12351_v38  ;;  %5662 = vmatpush.msrb.mxu2 %v5478_v62  ;;  %v5790_v38 = vand.u32 4294901760, %v12557_v27  ;;  %v5786_v30 = vand.u32 4294901760, %v5785_v34  ;;  %v5804_v35 = vand.u32 4294901760, %v5803_v15  ;;  %v5814_v62 = vand.u32 4294901760, %v12604_v56 }
 0x6ba   : > { %5781 = vmatpush.msra.mxu1 %v5780_v55  ;;  %5740 = vmatpush.msra.mxu0 %v12565_v31  ;;  %v8889_v55 = vld [vmem:[#allocation4 + $0x6] ss:$0 sm:$0xff]  ;;  %v12698_v20 = vsub.f32 %v6036_v29, %v12683_v11 }
 0x6bb   : > { %5701 = vmatpush.msrb.mxu3 %v12416_v18  ;;  %5666 = vmatpush.msrb.mxu2 %v5484_v45  ;;  %v5791_v18 = vsub.f32 %v12557_v27, %v5790_v38  ;;  %v5815_v40 = vsub.f32 %v12604_v56, %v5814_v62 }
 0x6bc   : > { %5787 = vmatpush.msra.mxu1 %v5786_v30  ;;  %5742 = vmatpush.msra.mxu0 %v12575_v54 }
 0x6bd   : > { %5703 = vmatpush.msrb.mxu3 %v12421_v58  ;;  %5670 = vmatpush.msrb.mxu2 %v5490_v43  ;;  %v5792_v58 = vand.u32 4294901760, %v5791_v18 }
 0x6be   : > { %5744 = vmatpush.msra.mxu0 %v12589_v0 }
 0x6bf   : > { %5705 = vmatpush.msrb.mxu3 %v12429_v3  ;;  %5793 = vmatpush.msra.mxu1 %v5792_v58  ;;  %v5798_v3 = vand.u32 4294901760, %v5797_v28 }
 0x6c1   : > { %5707 = vmatpush.msrb.mxu3 %v12441_v60  ;;  %5799 = vmatpush.msra.mxu1 %v5798_v3  ;;  %v5816_v60 = vand.u32 4294901760, %v5815_v40  ;;  %v6038_v40 = vld [vmem:[#allocation2 + $0x718] sm:$0xff] }
 0x6c2   : > { %v12679_v12 = vand.u32 4294901760, %v6038_v40 }
 0x6c3   : > { %5709 = vmatpush.msrb.mxu3 %v12455_v9  ;;  %5805 = vmatpush.msra.mxu1 %v5804_v35 }
 0x6c5   : > { %5711 = vmatpush.msrb.mxu3 %v12462_v33  ;;  %5811 = vmatpush.msra.mxu1 %v5810_v22 }
 0x6c7   : > { %5817 = vmatpush.msra.mxu1 %v5816_v60  ;;  %v6037_v60 = vld [vmem:[#allocation2 + $0x710] sm:$0xff] }
 0x6f6   : > { %v5309_v45 = vpop.permute.xlu2 %5308 }
 0x6f7   : > { %v5318_v9 = vsel %vm3526_vm3, %v12404_v24, %v5309_v45  ;;  %v12681_v45 = vand.u32 4294901760, %v6037_v60 }
 0x6f8   : > { %v12625_v1 = vand.u32 4294901760, %v5318_v9 }
 0x6fa   : > { %v5390_v6 = vsub.f32 %v5318_v9, %v12625_v1  ;;  %v6035_v9 = vld [vmem:[#allocation2 + $0x700] sm:$0xff] }
 0x6fb   : > { %v12685_v17 = vand.u32 4294901760, %v6035_v9 }
 0x6fc   : > { %v5391_v53 = vand.u32 4294901760, %v5390_v6 }
 0x70e   : > { %v5307_v43 = vpop.permute.xlu1 %5306 }
 0x70f   : > { %v5317_v33 = vsel %vm3526_vm3, %v12401_v19, %v5307_v43  ;;  %v6034_v43 = vld [vmem:[#allocation2 + $0x6f8] sm:$0xff] }
 0x710   : > { %v5381_v10 = vand.u32 4294901760, %v5317_v33 }
 0x712   : > { %v5382_v39 = vsub.f32 %v5317_v33, %v5381_v10  ;;  %5495 = vmatmul.f32.vlgmr.msra.gmra.mxu3 %v5381_v10 }
 0x713   : > { %5879 = vmatpush.msra.mxu3 %v12511_v36 }
 0x714   : > { %v5383_v24 = vand.u32 4294901760, %v5382_v39  ;;  %5553 = vmatmul.f32.vlgmr.msrb.gmra.mxu0 %v5382_v39 }
 0x715   : > { %5881 = vmatpush.msra.mxu3 %v12520_v7  ;;  %5918 = vmatpush.msrb.mxu0 %v5772_v63  ;;  %v5747_v63 = vand.u32 4294901760, %v5746_v5 }
 0x716   : > { %v5384_v19 = vsub.f32 %v5382_v39, %v5383_v24  ;;  %5597 = vmatmul.f32.vlgmr.msrb.gmra.mxu1 %v5383_v24  ;;  %v12695_v24 = vsub.f32 %v6037_v60, %v12681_v45 }
 0x717   : > { %5883 = vmatpush.msra.mxu3 %v12527_v32  ;;  %5922 = vmatpush.msrb.mxu0 %v5778_v44  ;;  %v5392_v44 = vsub.f32 %v5390_v6, %v5391_v53 }
 0x718   : > { %v5385_v37 = vand.u32 4294901760, %v5384_v19  ;;  %5965 = vmatpush.msrb.mxu1 %v12511_v36  ;;  %v5748_v36 = vsub.f32 %v5746_v5, %v5747_v63 }
 0x719   : > { %5885 = vmatpush.msra.mxu3 %v12540_v14  ;;  %5926 = vmatpush.msrb.mxu0 %v5784_v41  ;;  %v5754_v41 = vsub.f32 %v5347_v46, %v5753_v59  ;;  %v12702_v46 = vsub.f32 %v6035_v9, %v12685_v17 }
 0x71a   : > { %5386 = vmatmul.f32.vlgmr.msra.gmra.mxu2 %v5385_v37  ;;  %5499 = vmatmul.f32.gmra.mxu3 %v12625_v1 }
 0x71b   : > { %5967 = vmatpush.msrb.mxu1 %v12520_v7  ;;  %5837 = vmatpush.msra.mxu2 %v12518_v21  ;;  %v5393_v21 = vand.u32 4294901760, %v5392_v44  ;;  %v5749_v7 = vand.u32 4294901760, %v5748_v36  ;;  %v6110_v36 = vand.u32 4294901760, %v12695_v24 }
 0x71c   : > { %5558 = vmatmul.f32.gmra.mxu0 %v5390_v6  ;;  %5887 = vmatpush.msra.mxu3 %v12553_v52  ;;  %v12692_v6 = vsub.f32 %v6038_v40, %v12679_v12 }
 0x71d   : > { %5930 = vmatpush.msrb.mxu0 %v5790_v38  ;;  %5969 = vmatpush.msrb.mxu1 %v12527_v32  ;;  %v5755_v32 = vand.u32 4294901760, %v5754_v41 }
 0x71e   : > { %5603 = vmatmul.f32.gmra.mxu1 %v5391_v53  ;;  %5840 = vmatpush.msra.mxu2 %v12530_v23  ;;  %v6104_v44 = vand.u32 4294901760, %v12692_v6 }
 0x71f   : > { %5889 = vmatpush.msra.mxu3 %v12565_v31  ;;  %5934 = vmatpush.msrb.mxu0 %v5796_v50  ;;  %v5756_v23 = vsub.f32 %v5754_v41, %v5755_v32 }
 0x720   : > { %5971 = vmatpush.msrb.mxu1 %v12540_v14  ;;  %5843 = vmatpush.msra.mxu2 %v12543_v48 }
 0x721   : > { %5891 = vmatpush.msra.mxu3 %v12575_v54  ;;  %5938 = vmatpush.msrb.mxu0 %v5802_v51  ;;  %v5757_v14 = vand.u32 4294901760, %v5756_v23 }
 0x722   : > { %5394 = vmatmul.f32.gmra.mxu2 %v5393_v21  ;;  %5713 = vmatmul.f32.vlgmr.msrb.gmra.mxu3 %v5381_v10 }
 0x723   : > { %5973 = vmatpush.msrb.mxu1 %v12553_v52  ;;  %5846 = vmatpush.msra.mxu2 %v12557_v27 }
 0x724   : > { %5750 = vmatmul.f32.vlgmr.msra.gmra.mxu0 %v5749_v7  ;;  %5893 = vmatpush.msra.mxu3 %v12589_v0 }
 0x725   : > { %5942 = vmatpush.msrb.mxu0 %v5808_v57  ;;  %5975 = vmatpush.msrb.mxu1 %v12565_v31 }
 0x726   : > { %5819 = vmatmul.f32.vlgmr.msra.gmra.mxu1 %v12627_v16  ;;  %5849 = vmatpush.msra.mxu2 %v12570_v8 }
 0x727   : > { %5946 = vmatpush.msrb.mxu0 %v5814_v62  ;;  %5977 = vmatpush.msrb.mxu1 %v12575_v54 }
 0x728   : > { %5852 = vmatpush.msra.mxu2 %v12578_v47 }
 0x729   : > { %5979 = vmatpush.msrb.mxu1 %v12589_v0  ;;  %6209 = vmatpush.msra.mxu0 %v12692_v6 }
 0x72a   : > { %5672 = vmatmul.f32.vlgmr.msrb.gmra.mxu2 %v5381_v10  ;;  %5717 = vmatmul.f32.gmra.mxu3 %v12625_v1  ;;  %v12689_v10 = vand.u32 4294901760, %v6033_v49 }
 0x72b   : > { %5855 = vmatpush.msra.mxu2 %v12592_v2  ;;  %6267 = vmatpush.msra.mxu1 %v12679_v12 }
 0x72c   : > { %5758 = vmatmul.f32.gmra.mxu0 %v5757_v14  ;;  %v12708_v53 = vsub.f32 %v6033_v49, %v12689_v10 }
 0x72d   : > { %5858 = vmatpush.msra.mxu2 %v12604_v56  ;;  %6269 = vmatpush.msra.mxu1 %v12681_v45 }
 0x72e   : > { %5823 = vmatmul.f32.gmra.mxu1 %v5753_v59  ;;  %6212 = vmatpush.msra.mxu0 %v12695_v24 }
 0x72f   : > { %6054 = vmatpush.msrb.mxu2 %v12679_v12  ;;  %6271 = vmatpush.msra.mxu1 %v12683_v11 }
 0x730   : > { %6215 = vmatpush.msra.mxu0 %v12698_v20 }
 0x731   : > { %6056 = vmatpush.msrb.mxu2 %v12681_v45  ;;  %6273 = vmatpush.msra.mxu1 %v12685_v17 }
 0x732   : > { %5676 = vmatmul.f32.gmra.mxu2 %v12625_v1  ;;  %5897 = vmatmul.f32.vlgmr.msra.gmra.mxu3 %v5747_v63  ;;  %v12687_v1 = vand.u32 4294901760, %v6034_v43 }
 0x733   : > { %6058 = vmatpush.msrb.mxu2 %v12683_v11  ;;  %6218 = vmatpush.msra.mxu0 %v12702_v46 }
 0x734   : > { %5948 = vmatmul.f32.vlgmr.msrb.gmra.mxu0 %v12627_v16  ;;  %v12705_v37 = vsub.f32 %v6034_v43, %v12687_v1  ;;  %6275 = vmatpush.msra.mxu1 %v12687_v1 }
 0x735   : > { %6060 = vmatpush.msrb.mxu2 %v12685_v17 }
 0x736   : > { %5981 = vmatmul.f32.vlgmr.msrb.gmra.mxu1 %v12627_v16  ;;  %v6032_v16 = vld [vmem:[#allocation2 + $0x6e8] sm:$0xff]  ;;  %v6128_v23 = vand.u32 4294901760, %v12705_v37  ;;  %6221 = vmatpush.msra.mxu0 %v12705_v37 }
 0x737   : > { %v12710_v63 = vand.u32 4294901760, %v6032_v16  ;;  %6062 = vmatpush.msrb.mxu2 %v12687_v1  ;;  %6277 = vmatpush.msra.mxu1 %v12689_v10 }
 0x738   : > { %6224 = vmatpush.msra.mxu0 %v12708_v53 }
 0x739   : > { %v12721_v14 = vsub.f32 %v6032_v16, %v12710_v63  ;;  %6064 = vmatpush.msrb.mxu2 %v12689_v10  ;;  %6279 = vmatpush.msra.mxu1 %v12710_v63 }
 0x73a   : > { %5861 = vmatmul.f32.vlgmr.msra.gmra.mxu2 %v5746_v5  ;;  %5903 = vmatmul.f32.gmra.mxu3 %v5755_v32  ;;  %v6122_v32 = vand.u32 4294901760, %v12702_v46 }
 0x73b   : > { %6066 = vmatpush.msrb.mxu2 %v12710_v63  ;;  %6227 = vmatpush.msra.mxu0 %v12721_v14 }
 0x73c   : > { %5952 = vmatmul.f32.gmra.mxu0 %v5753_v59 }
 0x73e   : > { %5985 = vmatmul.f32.gmra.mxu1 %v5753_v59 }
 0x742   : > { %5866 = vmatmul.f32.gmra.mxu2 %v5754_v41  ;;  %v6116_v41 = vand.u32 4294901760, %v12698_v20 }
 0x791   : > { %v5554_v52 = vpop.f32.mrf.mxu0 }
 0x793   : > { %v5598_v27 = vpop.f32.mrf.mxu1 }
 0x795   : > { %v5496_v48 = vpop.f32.mrf.mxu3 }
 0x799   : > { %v5559_v31 = vpop.f32.mrf.mxu0 }
 0x79b   : > { %v5604_v8 = vpop.f32.mrf.mxu1 }
 0x79d   : > { %v5387_v13 = vpop.f32.mrf.mxu2  ;;  %v5500_v34 = vpop.f32.mrf.mxu3 }
 0x79e   : > { %v5388_v38 = vadd.f32 %v8889_v55, %v5387_v13  ;;  %v6117_v13 = vsub.f32 %v12698_v20, %v6116_v41 }
 0x7a0   : > { %v5497_v30 = vadd.f32 %v5496_v48, %v5388_v38  ;;  %v6031_v38 = vld [vmem:[#allocation2 + $0x6e0] sm:$0xff] }
 0x7a1   : > { %v5751_v50 = vpop.f32.mrf.mxu0 }
 0x7a2   : > { %v5555_v18 = vadd.f32 %v5554_v52, %v5497_v30  ;;  %v6105_v52 = vsub.f32 %v12692_v6, %v6104_v44 }
 0x7a3   : > { %v5820_v4 = vpop.f32.mrf.mxu1 }
 0x7a4   : > { %v5599_v2 = vadd.f32 %v5598_v27, %v5555_v18  ;;  %v6111_v27 = vsub.f32 %v12695_v24, %v6110_v36  ;;  %v6028_v18 = vld [vmem:[#allocation2 + $0x6c8] sm:$0xff] }
 0x7a5   : > { %v5395_v42 = vpop.f32.mrf.mxu2  ;;  %v5714_v47 = vpop.f32.mrf.mxu3 }
 0x7a6   : > { %v5396_v54 = vadd.f32 %v8889_v55, %v5395_v42  ;;  %v6029_v42 = vld [vmem:[#allocation2 + $0x6d0] sm:$0xff] }
 0x7a8   : > { %v5501_v51 = vadd.f32 %v5500_v34, %v5396_v54  ;;  %v6123_v34 = vsub.f32 %v12702_v46, %v6122_v32  ;;  %v6106_v54 = vand.u32 4294901760, %v6105_v52  ;;  %v6043_v46 = vld [vmem:[#allocation2 + $0x740] sm:$0xff] }
 0x7a9   : > { %v5759_v56 = vpop.f32.mrf.mxu0 }
 0x7aa   : > { %v5560_v28 = vadd.f32 %v5559_v31, %v5501_v51  ;;  %v6134_v31 = vand.u32 4294901760, %v12708_v53  ;;  %v6118_v51 = vand.u32 4294901760, %v6117_v13  ;;  %6107 = vmatpush.msrb.mxu3 %v6106_v54 }
 0x7ab   : > { %v5824_v61 = vpop.f32.mrf.mxu1 }
 0x7ac   : > { %v5605_v3 = vadd.f32 %v5604_v8, %v5560_v28  ;;  %v6030_v8 = vld [vmem:[#allocation2 + $0x6d8] sm:$0xff]  ;;  %v12747_v28 = vand.u32 4294901760, %v6031_v38 }
 0x7ad   : > { %v5673_v0 = vpop.f32.mrf.mxu2  ;;  %v5718_v15 = vpop.f32.mrf.mxu3 }
 0x7ae   : > { %v5674_v58 = vadd.f32 %v5673_v0, %v5599_v2  ;;  %v6129_v0 = vsub.f32 %v12705_v37, %v6128_v23  ;;  %v6140_v2 = vand.u32 4294901760, %v12721_v14  ;;  %v12764_v29 = vsub.f32 %v6031_v38, %v12747_v28  ;;  %6068 = vmatpush.msrb.mxu2 %v12747_v28  ;;  %6281 = vmatpush.msra.mxu1 %v12747_v28 }
 0x7b0   : > { %v5715_v57 = vadd.f32 %v5714_v47, %v5674_v58  ;;  %v6112_v47 = vand.u32 4294901760, %v6111_v27  ;;  %v6130_v49 = vand.u32 4294901760, %v6129_v0  ;;  %6230 = vmatpush.msra.mxu0 %v12764_v29 }
 0x7b1   : > { %v5949_v21 = vpop.f32.mrf.mxu0 }
 0x7b2   : > { %v5752_v22 = vadd.f32 %v5751_v50, %v5715_v57  ;;  %v6027_v50 = vld [vmem:[#allocation2 + $0x6c0] sm:$0xff]  ;;  %v12752_v57 = vand.u32 4294901760, %v6029_v42  ;;  %6113 = vmatpush.msrb.mxu3 %v6112_v47 }
 0x7b3   : > { %v5982_v55 = vpop.f32.mrf.mxu1 }
 0x7b4   : > { %v5821_v39 = vadd.f32 %v5820_v4, %v5752_v22  ;;  %v6026_v22 = vld [vmem:[#allocation2 + $0x6b8] sm:$0xff]  ;;  %v12774_v16 = vsub.f32 %v6029_v42, %v12752_v57  ;;  %6119 = vmatpush.msrb.mxu3 %v6118_v51 }
 0x7b5   : > { %v5677_v35 = vpop.f32.mrf.mxu2  ;;  %v5898_v19 = vpop.f32.mrf.mxu3 }
 0x7b6   : > { %v5678_v62 = vadd.f32 %v5677_v35, %v5605_v3  ;;  %v6124_v3 = vand.u32 4294901760, %v6123_v34  ;;  %v6135_v35 = vsub.f32 %v12708_v53, %v6134_v31  ;;  %v6158_v34 = vand.u32 4294901760, %v12774_v16 }
 0x7b8   : > { %v5719_v33 = vadd.f32 %v5718_v15, %v5678_v62  ;;  %v12750_v15 = vand.u32 4294901760, %v6030_v8  ;;  %v12759_v62 = vand.u32 4294901760, %v6027_v50  ;;  %6125 = vmatpush.msrb.mxu3 %v6124_v3  ;;  %v6136_v13 = vand.u32 4294901760, %v6135_v35 }
 0x7b9   : > { %v6159_v3 = vsub.f32 %v12774_v16, %v6158_v34 }
 0x7ba   : > { %v5760_v7 = vadd.f32 %v5759_v56, %v5719_v33  ;;  %v12767_v9 = vsub.f32 %v6030_v8, %v12750_v15  ;;  %v6141_v33 = vsub.f32 %v12721_v14, %v6140_v2  ;;  %v12787_v52 = vsub.f32 %v6027_v50, %v12759_v62  ;;  %v6025_v8 = vld [vmem:[#allocation2 + $0x6b0] sm:$0xff]  ;;  %6131 = vmatpush.msrb.mxu3 %v6130_v49  ;;  %v6023_v50 = vld [vmem:[#allocation2 + $0x6a0] sm:$0xff] }
 0x7bb   : > { %v5986_v38 = vpop.f32.mrf.mxu1  ;;  %6070 = vmatpush.msrb.mxu2 %v12750_v15  ;;  %v12812_v35 = vand.u32 4294901760, %v6025_v8  ;;  %6283 = vmatpush.msra.mxu1 %v12750_v15 }
 0x7bc   : > { %v5825_v4 = vadd.f32 %v5824_v61, %v5760_v7  ;;  %v12757_v61 = vand.u32 4294901760, %v6028_v18  ;;  %v6170_v0 = vand.u32 4294901760, %v12787_v52  ;;  %6137 = vmatpush.msrb.mxu3 %v6136_v13  ;;  %6233 = vmatpush.msra.mxu0 %v12767_v9  ;;  %v6160_v13 = vand.u32 4294901760, %v6159_v3 }
 0x7bd   : > { %v5862_v5 = vpop.f32.mrf.mxu2  ;;  %v5904_v43 = vpop.f32.mrf.mxu3  ;;  %6072 = vmatpush.msrb.mxu2 %v12752_v57  ;;  %6285 = vmatpush.msra.mxu1 %v12752_v57 }
 0x7be   : > { %v5863_v59 = vadd.f32 %v5862_v5, %v5821_v39  ;;  %v6152_v5 = vand.u32 4294901760, %v12767_v9  ;;  %6236 = vmatpush.msra.mxu0 %v12774_v16 }
 0x7bf   : > { %6074 = vmatpush.msrb.mxu2 %v12757_v61  ;;  %6287 = vmatpush.msra.mxu1 %v12757_v61 }
 0x7c0   : > { %v5899_v48 = vadd.f32 %v5898_v19, %v5863_v59  ;;  %v6146_v19 = vand.u32 4294901760, %v12764_v29  ;;  %v12780_v59 = vand.u32 4294901760, %v6026_v22  ;;  %v6153_v54 = vsub.f32 %v12767_v9, %v6152_v5 }
 0x7c1   : > { %6076 = vmatpush.msrb.mxu2 %v12759_v62  ;;  %6289 = vmatpush.msra.mxu1 %v12759_v62 }
 0x7c2   : > { %v5950_v30 = vadd.f32 %v5949_v21, %v5899_v48  ;;  %v5953_v21 = vpop.f32.mrf.mxu0  ;;  %v12784_v48 = vsub.f32 %v6028_v18, %v12757_v61  ;;  %v12802_v47 = vsub.f32 %v6026_v22, %v12780_v59  ;;  %v6024_v18 = vld [vmem:[#allocation2 + $0x6a8] sm:$0xff] }
 0x7c3   : > { %v12814_v22 = vand.u32 4294901760, %v6024_v18  ;;  %6078 = vmatpush.msrb.mxu2 %v12780_v59  ;;  %6291 = vmatpush.msra.mxu1 %v12780_v59 }
 0x7c4   : > { %v5983_v58 = vadd.f32 %v5982_v55, %v5950_v30  ;;  %v6147_v55 = vsub.f32 %v12764_v29, %v6146_v19  ;;  %v6142_v30 = vand.u32 4294901760, %v6141_v33  ;;  %v6164_v51 = vand.u32 4294901760, %v12784_v48  ;;  %6239 = vmatpush.msra.mxu0 %v12784_v48  ;;  %v6040_v29 = vld [vmem:[#allocation2 + $0x728] sm:$0xff] }
 0x7c5   : > { %v5867_v56 = vpop.f32.mrf.mxu2  ;;  %v6176_v49 = vand.u32 4294901760, %v12802_v47  ;;  %v12823_v33 = vsub.f32 %v6025_v8, %v12812_v35  ;;  %6080 = vmatpush.msrb.mxu2 %v12812_v35  ;;  %6293 = vmatpush.msra.mxu1 %v12812_v35 }
 0x7c6   : > { %v5989_v40 = vmax.f32 %v5983_v58, 0.0  ;;  %v5868_v60 = vadd.f32 %v5867_v56, %v5825_v4  ;;  %v6148_v56 = vand.u32 4294901760, %v6147_v55  ;;  %6143 = vmatpush.msrb.mxu3 %v6142_v30  ;;  %v6171_v55 = vsub.f32 %v12787_v52, %v6170_v0  ;;  %6242 = vmatpush.msra.mxu0 %v12787_v52 }
 0x7c7   : > { %6082 = vmatpush.msrb.mxu2 %v12814_v22  ;;  %6295 = vmatpush.msra.mxu1 %v12814_v22 }
 0x7c8   : > { %v5905_v39 = vadd.f32 %v5904_v43, %v5868_v60  ;;  %v5991_v7 = vmul.f32 %v5989_v40, %v10059_v26  ;;  %v12816_v40 = vand.u32 4294901760, %v6023_v50  ;;  %v6154_v43 = vand.u32 4294901760, %v6153_v54  ;;  %6149 = vmatpush.msrb.mxu3 %v6148_v56  ;;  %6245 = vmatpush.msra.mxu0 %v12802_v47 }
 0x7c9   : > { %v6172_v3 = vand.u32 4294901760, %v6171_v55 }
 0x7ca   : > { %v5954_v27 = vadd.f32 %v5953_v21, %v5905_v39  ;;  %v5995_v4 = vrot.slane %v5991_v7, 7  ;;  %v6165_v21 = vsub.f32 %v12784_v48, %v6164_v51  ;;  %v12833_v7 = vsub.f32 %v6024_v18, %v12814_v22  ;;  %6155 = vmatpush.msrb.mxu3 %v6154_v43  ;;  %6248 = vmatpush.msra.mxu0 %v12823_v33  ;;  %v6039_v48 = vld [vmem:[#allocation2 + $0x720] sm:$0xff] }
 0x7cb   : > { %v12843_v8 = vsub.f32 %v6023_v50, %v12816_v40  ;;  %v6177_v18 = vsub.f32 %v12802_v47, %v6176_v49  ;;  %6084 = vmatpush.msrb.mxu2 %v12816_v40  ;;  %6297 = vmatpush.msra.mxu1 %v12816_v40  ;;  %v12989_v47 = vand.u32 4294901760, %v6039_v48 }
 0x7cc   : > { %v5987_v42 = vadd.f32 %v5986_v38, %v5954_v27  ;;  %v12827_v39 = vsel %vm298_vm0, 0.0, %v5995_v4  ;;  %v6182_v38 = vand.u32 4294901760, %v12823_v33  ;;  %v6166_v56 = vand.u32 4294901760, %v6165_v21  ;;  %6161 = vmatpush.msrb.mxu3 %v6160_v13  ;;  %6251 = vmatpush.msra.mxu0 %v12833_v7 }
 0x7cd   : > { %v6005_v54 = vrot.slane %v12827_v39, 1  ;;  %v6194_v21 = vand.u32 4294901760, %v12843_v8  ;;  %v6178_v13 = vand.u32 4294901760, %v6177_v18  ;;  %6314 = vmatpush.msra.mxu2 %v6104_v44 }
 0x7ce   : > { %v5990_v58 = vmax.f32 %v5987_v42, 0.0  ;;  %6167 = vmatpush.msrb.mxu3 %v6166_v56  ;;  %6254 = vmatpush.msra.mxu0 %v12843_v8 }
 0x7cf   : > { %6318 = vmatpush.msra.mxu2 %v6110_v36  ;;  %v6042_v36 = vld [vmem:[#allocation2 + $0x738] sm:$0xff] }
 0x7d0   : > { %v5992_v60 = vmul.f32 %v5990_v58, %v10068_v25  ;;  %6173 = vmatpush.msrb.mxu3 %v6172_v3  ;;  %v12959_v14 = vand.u32 4294901760, %v6042_v36 }
 0x7d1   : > { %6322 = vmatpush.msra.mxu2 %v6116_v41 }
 0x7d2   : > { %v5996_v27 = vrot.slane %v5992_v60, 7  ;;  %6179 = vmatpush.msrb.mxu3 %v6178_v13 }
 0x7d3   : > { %6326 = vmatpush.msra.mxu2 %v6122_v32 }
 0x7d4   : > { %v12848_v42 = vsel %vm298_vm0, %v5995_v4, %v5996_v27  ;;  %v12851_v30 = vsel %vm298_vm0, %v5996_v27, 0.0  ;;  %v6188_v4 = vand.u32 4294901760, %v12833_v7  ;;  %v6183_v27 = vsub.f32 %v12823_v33, %v6182_v38 }
 0x7d5   : > { %v6006_v50 = vrot.slane %v12848_v42, 1  ;;  %v6008_v58 = vrot.slane %v12851_v30, 1  ;;  %6330 = vmatpush.msra.mxu2 %v6128_v23  ;;  %v6017_v3 = vrot.slane %v12848_v42, 2 }
 0x7d6   : > { %v6189_v55 = vsub.f32 %v12833_v7, %v6188_v4 }
 0x7d7   : > { %v6009_v60 = vsel %vm309_vm1, %v6006_v50, %v6008_v58  ;;  %v6007_v43 = vsel %vm309_vm1, %v6005_v54, %v6006_v50  ;;  %v6184_v54 = vand.u32 4294901760, %v6183_v27  ;;  %v6195_v50 = vsub.f32 %v12843_v8, %v6194_v21  ;;  %6334 = vmatpush.msra.mxu2 %v6134_v31 }
 0x7d8   : > { %6012 = vrot.lane.b32.xlu1 %v6009_v60, %s9005_s20  ;;  %6010 = vrot.lane.b32.xlu0 %v6007_v43, %s9005_s20  ;;  %v6190_v18 = vand.u32 4294901760, %v6189_v55  ;;  %v6016_v60 = vrot.slane %v12827_v39, 2 }
 0x7d9   : > { %6185 = vmatpush.msrb.mxu3 %v6184_v54  ;;  %v6196_v58 = vand.u32 4294901760, %v6195_v50  ;;  %6338 = vmatpush.msra.mxu2 %v6140_v2  ;;  %v6041_v2 = vld [vmem:[#allocation2 + $0x730] sm:$0xff]  ;;  %v6019_v50 = vrot.slane %v12851_v30, 2 }
 0x7da   : > { %v6018_v43 = vsel %vm1126_vm2, %v6016_v60, %v6017_v3  ;;  %v6729_v60 = vld [vmem:[#allocation2 + $0x7a0] sm:$0xff] }
 0x7db   : > { %6191 = vmatpush.msrb.mxu3 %v6190_v18  ;;  %6342 = vmatpush.msra.mxu2 %v6146_v19  ;;  %v12976_v19 = vand.u32 4294901760, %v6040_v29  ;;  %v6049_v13 = vsel %vm3526_vm3, %v6018_v43, 0 }
 0x7dd   : > { %6197 = vmatpush.msrb.mxu3 %v6196_v58  ;;  %6346 = vmatpush.msra.mxu2 %v6152_v5 }
 0x7df   : > { %6385 = vmatpush.msra.mxu3 %v12679_v12  ;;  %6350 = vmatpush.msra.mxu2 %v6158_v34  ;;  %v6046_v12 = vld [vmem:[#allocation2 + $0x758] sm:$0xff] }
 0x7e1   : > { %6387 = vmatpush.msra.mxu3 %v12681_v45  ;;  %6354 = vmatpush.msra.mxu2 %v6164_v51  ;;  %v12929_v45 = vand.u32 4294901760, %v6046_v12  ;;  %v12992_v51 = vsub.f32 %v6040_v29, %v12976_v19 }
 0x7e3   : > { %6389 = vmatpush.msra.mxu3 %v12683_v11  ;;  %6358 = vmatpush.msra.mxu2 %v6170_v0  ;;  %v6045_v11 = vld [vmem:[#allocation2 + $0x750] sm:$0xff] }
 0x7e4   : > { %6434 = vmatpush.msrb.mxu0 %v12929_v45 }
 0x7e5   : > { %6391 = vmatpush.msra.mxu3 %v12685_v17  ;;  %6362 = vmatpush.msra.mxu2 %v6176_v49  ;;  %v12933_v17 = vsub.f32 %v6046_v12, %v12929_v45  ;;  %v13000_v49 = vsub.f32 %v6039_v48, %v12989_v47  ;;  %v13022_v12 = vand.u32 4294901760, %v6049_v13 }
 0x7e7   : > { %6393 = vmatpush.msra.mxu3 %v12687_v1  ;;  %6366 = vmatpush.msra.mxu2 %v6182_v38  ;;  %v12935_v1 = vand.u32 4294901760, %v6045_v11  ;;  %v6476_v6 = vand.u32 4294901760, %v12933_v17  ;;  %v6518_v38 = vand.u32 4294901760, %v13000_v49 }
 0x7e9   : > { %6395 = vmatpush.msra.mxu3 %v12689_v10  ;;  %6370 = vmatpush.msra.mxu2 %v6188_v4  ;;  %v6044_v10 = vld [vmem:[#allocation2 + $0x748] sm:$0xff]  ;;  %v12942_v20 = vsub.f32 %v6045_v11, %v12935_v1  ;;  %v6477_v37 = vsub.f32 %v12933_v17, %v6476_v6  ;;  %v6519_v56 = vsub.f32 %v13000_v49, %v6518_v38 }
 0x7ea   : > { %6436 = vmatpush.msrb.mxu0 %v12935_v1  ;;  %v12939_v24 = vand.u32 4294901760, %v6044_v10 }
 0x7eb   : > { %6397 = vmatpush.msra.mxu3 %v12710_v63  ;;  %6374 = vmatpush.msra.mxu2 %v6194_v21  ;;  %v6482_v53 = vand.u32 4294901760, %v12942_v20  ;;  %v12949_v63 = vand.u32 4294901760, %v6043_v46  ;;  %v6478_v41 = vand.u32 4294901760, %v6477_v37  ;;  %v6520_v4 = vand.u32 4294901760, %v6519_v56 }
 0x7ec   : > { %6438 = vmatpush.msrb.mxu0 %v12939_v24  ;;  %v12952_v44 = vsub.f32 %v6044_v10, %v12939_v24 }
 0x7ed   : > { %6399 = vmatpush.msra.mxu3 %v12747_v28  ;;  %v6483_v32 = vsub.f32 %v12942_v20, %v6482_v53  ;;  %v12962_v31 = vsub.f32 %v6043_v46, %v12949_v63  ;;  %6479 = vmatpush.msrb.mxu1 %v6478_v41  ;;  %v13032_v46 = vsub.f32 %v6049_v13, %v13022_v12 }
 0x7ee   : > { %6440 = vmatpush.msrb.mxu0 %v12949_v63  ;;  %v6488_v23 = vand.u32 4294901760, %v12952_v44 }
 0x7ef   : > { %6401 = vmatpush.msra.mxu3 %v12750_v15  ;;  %v6484_v28 = vand.u32 4294901760, %v6483_v32  ;;  %v6451_v32 = vand.u32 4294901760, %v13032_v46 }
 0x7f0   : > { %v6489_v15 = vsub.f32 %v12952_v44, %v6488_v23  ;;  %6442 = vmatpush.msrb.mxu0 %v12959_v14 }
 0x7f1   : > { %6403 = vmatpush.msra.mxu3 %v12752_v57  ;;  %v12968_v57 = vand.u32 4294901760, %v6041_v2  ;;  %6485 = vmatpush.msrb.mxu1 %v6484_v28 }
 0x7f2   : > { %v6490_v9 = vand.u32 4294901760, %v6489_v15  ;;  %v6735_v15 = vld [vmem:[#allocation2 + $0x7d0] sm:$0xff] }
 0x7f3   : > { %6405 = vmatpush.msra.mxu3 %v12757_v61  ;;  %v12971_v61 = vsub.f32 %v6042_v36, %v12959_v14  ;;  %6444 = vmatpush.msrb.mxu0 %v12968_v57  ;;  %v12979_v5 = vsub.f32 %v6041_v2, %v12968_v57  ;;  %v13071_v29 = vand.u32 4294901760, %v6735_v15 }
 0x7f4   : > { %6491 = vmatpush.msrb.mxu1 %v6490_v9 }
 0x7f5   : > { %6407 = vmatpush.msra.mxu3 %v12759_v62  ;;  %v6494_v62 = vand.u32 4294901760, %v12962_v31  ;;  %v6500_v16 = vand.u32 4294901760, %v12971_v61  ;;  %6446 = vmatpush.msrb.mxu0 %v12976_v19  ;;  %v6506_v34 = vand.u32 4294901760, %v12979_v5 }
 0x7f7   : > { %6409 = vmatpush.msra.mxu3 %v12780_v59  ;;  %v6495_v59 = vsub.f32 %v12962_v31, %v6494_v62  ;;  %v6501_v52 = vsub.f32 %v12971_v61, %v6500_v16  ;;  %6448 = vmatpush.msrb.mxu0 %v12989_v47 }
 0x7f9   : > { %6411 = vmatpush.msra.mxu3 %v12812_v35  ;;  %v6496_v0 = vand.u32 4294901760, %v6495_v59  ;;  %v6502_v35 = vand.u32 4294901760, %v6501_v52 }
 0x7fb   : > { %6413 = vmatpush.msra.mxu3 %v12814_v22  ;;  %v6507_v22 = vsub.f32 %v12979_v5, %v6506_v34  ;;  %6497 = vmatpush.msrb.mxu1 %v6496_v0  ;;  %v6732_v0 = vld [vmem:[#allocation2 + $0x7b8] sm:$0xff] }
 0x7fd   : > { %6415 = vmatpush.msra.mxu3 %v12816_v40  ;;  %v6512_v40 = vand.u32 4294901760, %v12992_v51  ;;  %v6508_v33 = vand.u32 4294901760, %v6507_v22  ;;  %6503 = vmatpush.msrb.mxu1 %v6502_v35  ;;  %v13139_v22 = vand.u32 4294901760, %v6732_v0 }
 0x7ff   : > { %v6513_v7 = vsub.f32 %v12992_v51, %v6512_v40  ;;  %6509 = vmatpush.msrb.mxu1 %v6508_v33  ;;  %v13145_v33 = vsub.f32 %v6732_v0, %v13139_v22 }
 0x801   : > { %v6514_v8 = vand.u32 4294901760, %v6513_v7  ;;  %v6846_v56 = vand.u32 4294901760, %v13145_v33 }
 0x803   : > { %6515 = vmatpush.msrb.mxu1 %v6514_v8 }
 0x805   : > { %6521 = vmatpush.msrb.mxu1 %v6520_v4 }
 0x84a   : > { %v6013_v27 = vpop.permute.xlu1 %6012  ;;  %v6011_v21 = vpop.permute.xlu0 %6010 }
 0x84b   : > { %v6022_v55 = vsel %vm3526_vm3, %v12848_v42, %v6013_v27  ;;  %v6021_v54 = vsel %vm3526_vm3, %v12827_v39, %v6011_v21  ;;  %v6020_v39 = vsel %vm1126_vm2, %v6017_v3, %v6019_v50  ;;  %v6847_v27 = vsub.f32 %v13145_v33, %v6846_v56 }
 0x84c   : > { %v13018_v18 = vand.u32 4294901760, %v6022_v55  ;;  %v13020_v58 = vand.u32 4294901760, %v6021_v54  ;;  %v6051_v37 = vsel %vm3526_vm3, %v6020_v39, 0 }
 0x84d   : > { %v13042_v2 = vand.u32 4294901760, %v6051_v37  ;;  %v6848_v50 = vand.u32 4294901760, %v6847_v27 }
 0x84e   : > { %v6086_v11 = vsub.f32 %v6021_v54, %v13020_v58  ;;  %6199 = vmatmul.f32.vlgmr.msrb.gmra.mxu3 %v13020_v58  ;;  %v6094_v10 = vsub.f32 %v6022_v55, %v13018_v18  ;;  %v13173_v55 = vand.u32 4294901760, %v6729_v60  ;;  %v6728_v54 = vld [vmem:[#allocation2 + $0x798] sm:$0xff] }
 0x84f   : > { %6669 = vmatpush.msrb.mxu3 %v12929_v45  ;;  %v13054_v28 = vsub.f32 %v6051_v37, %v13042_v2 }
 0x850   : > { %v6087_v42 = vand.u32 4294901760, %v6086_v11  ;;  %6257 = vmatmul.f32.vlgmr.msra.gmra.mxu0 %v6086_v11  ;;  %v6095_v41 = vand.u32 4294901760, %v6094_v10 }
 0x851   : > { %6541 = vmatpush.msra.mxu0 %v12933_v17  ;;  %6671 = vmatpush.msrb.mxu3 %v12935_v1 }
 0x852   : > { %v6088_v30 = vsub.f32 %v6086_v11, %v6087_v42  ;;  %6301 = vmatmul.f32.vlgmr.msra.gmra.mxu1 %v6087_v42  ;;  %v13184_v11 = vsub.f32 %v6729_v60, %v13173_v55 }
 0x853   : > { %6544 = vmatpush.msra.mxu0 %v12942_v20  ;;  %6583 = vmatpush.msra.mxu1 %v12929_v45  ;;  %v6096_v45 = vsub.f32 %v6094_v10, %v6095_v41  ;;  %v6734_v20 = vld [vmem:[#allocation2 + $0x7c8] sm:$0xff] }
 0x854   : > { %v6089_v36 = vand.u32 4294901760, %v6088_v30  ;;  %6673 = vmatpush.msrb.mxu3 %v12939_v24  ;;  %v6864_v37 = vand.u32 4294901760, %v13184_v11 }
 0x855   : > { %6547 = vmatpush.msra.mxu0 %v12952_v44  ;;  %6585 = vmatpush.msra.mxu1 %v12935_v1  ;;  %v6452_v1 = vsub.f32 %v13032_v46, %v6451_v32 }
 0x856   : > { %6090 = vmatmul.f32.vlgmr.msrb.gmra.mxu2 %v6089_v36  ;;  %6203 = vmatmul.f32.gmra.mxu3 %v13018_v18  ;;  %v6726_v36 = vld [vmem:[#allocation2 + $0x788] sm:$0xff] }
 0x857   : > { %6675 = vmatpush.msrb.mxu3 %v12949_v63  ;;  %6550 = vmatpush.msra.mxu0 %v12962_v31  ;;  %v6453_v17 = vand.u32 4294901760, %v6452_v1  ;;  %v6865_v1 = vsub.f32 %v13184_v11, %v6864_v37 }
 0x858   : > { %6262 = vmatmul.f32.gmra.mxu0 %v6094_v10  ;;  %6587 = vmatpush.msra.mxu1 %v12939_v24  ;;  %v6097_v24 = vand.u32 4294901760, %v6096_v45  ;;  %v6727_v10 = vld [vmem:[#allocation2 + $0x790] sm:$0xff]  ;;  %v13203_v45 = vand.u32 4294901760, %v6726_v36 }
 0x859   : > { %6622 = vmatpush.msrb.mxu2 %v6476_v6  ;;  %6677 = vmatpush.msrb.mxu3 %v12959_v14  ;;  %v6459_v6 = vand.u32 4294901760, %v13054_v28 }
 0x85a   : > { %6307 = vmatmul.f32.gmra.mxu1 %v6095_v41  ;;  %6553 = vmatpush.msra.mxu0 %v12971_v61 }
 0x85b   : > { %6589 = vmatpush.msra.mxu1 %v12949_v63  ;;  %6626 = vmatpush.msrb.mxu2 %v6482_v53  ;;  %v6736_v63 = vld [vmem:[#allocation2 + $0x7d8] sm:$0xff]  ;;  %v6460_v59 = vsub.f32 %v13054_v28, %v6459_v6 }
 0x85c   : > { %6679 = vmatpush.msrb.mxu3 %v12968_v57  ;;  %6556 = vmatpush.msra.mxu0 %v12979_v5  ;;  %v13069_v53 = vand.u32 4294901760, %v6736_v63 }
 0x85d   : > { %6591 = vmatpush.msra.mxu1 %v12959_v14  ;;  %6630 = vmatpush.msrb.mxu2 %v6488_v23  ;;  %v13073_v14 = vand.u32 4294901760, %v6734_v20  ;;  %v13083_v23 = vsub.f32 %v6735_v15, %v13071_v29  ;;  %v6461_v48 = vand.u32 4294901760, %v6460_v59  ;;  %v6866_v15 = vand.u32 4294901760, %v6865_v1 }
 0x85e   : > { %6098 = vmatmul.f32.gmra.mxu2 %v6097_v24  ;;  %6417 = vmatmul.f32.vlgmr.msra.gmra.mxu3 %v13020_v58  ;;  %v13080_v44 = vsub.f32 %v6736_v63, %v13069_v53 }
 0x85f   : > { %6681 = vmatpush.msrb.mxu3 %v12976_v19  ;;  %6559 = vmatpush.msra.mxu0 %v12992_v51  ;;  %v13086_v9 = vsub.f32 %v6734_v20, %v13073_v14  ;;  %v6724_v20 = vld [vmem:[#allocation2 + $0x778] sm:$0xff] }
 0x860   : > { %6454 = vmatmul.f32.vlgmr.msrb.gmra.mxu0 %v6453_v17  ;;  %6593 = vmatpush.msra.mxu1 %v12968_v57  ;;  %v6822_v31 = vand.u32 4294901760, %v13080_v44  ;;  %v6828_v57 = vand.u32 4294901760, %v13083_v23 }
 0x861   : > { %6634 = vmatpush.msrb.mxu2 %v6494_v62  ;;  %6683 = vmatpush.msrb.mxu3 %v12989_v47  ;;  %v6834_v62 = vand.u32 4294901760, %v13086_v9 }
 0x862   : > { %6523 = vmatmul.f32.vlgmr.msrb.gmra.mxu1 %v13022_v12  ;;  %6562 = vmatpush.msra.mxu0 %v13000_v49  ;;  %v6823_v61 = vsub.f32 %v13080_v44, %v6822_v31 }
 0x863   : > { %6595 = vmatpush.msra.mxu1 %v12976_v19  ;;  %6638 = vmatpush.msrb.mxu2 %v6500_v16  ;;  %v6829_v16 = vsub.f32 %v13083_v23, %v6828_v57  ;;  %v6835_v19 = vsub.f32 %v13086_v9, %v6834_v62 }
 0x864   : > { %6985 = vmatpush.msra.mxu3 %v13069_v53  ;;  %6772 = vmatpush.msrb.mxu0 %v13069_v53  ;;  %v6824_v5 = vand.u32 4294901760, %v6823_v61 }
 0x865   : > { %6597 = vmatpush.msra.mxu1 %v12989_v47  ;;  %6642 = vmatpush.msrb.mxu2 %v6506_v34  ;;  %v6830_v52 = vand.u32 4294901760, %v6829_v16  ;;  %v6836_v34 = vand.u32 4294901760, %v6835_v19  ;;  %v6733_v47 = vld [vmem:[#allocation2 + $0x7c0] sm:$0xff] }
 0x866   : > { %6376 = vmatmul.f32.vlgmr.msra.gmra.mxu2 %v13020_v58  ;;  %6421 = vmatmul.f32.gmra.mxu3 %v13018_v18  ;;  %v13134_v51 = vand.u32 4294901760, %v6733_v47 }
 0x867   : > { %6646 = vmatpush.msrb.mxu2 %v6512_v40  ;;  %6987 = vmatpush.msra.mxu3 %v13071_v29  ;;  %v6731_v40 = vld [vmem:[#allocation2 + $0x7b0] sm:$0xff] }
 0x868   : > { %6462 = vmatmul.f32.gmra.mxu0 %v6461_v48  ;;  %6825 = vmatpush.msrb.mxu1 %v6824_v5  ;;  %v13137_v35 = vsub.f32 %v6733_v47, %v13134_v51  ;;  %v13148_v7 = vand.u32 4294901760, %v6731_v40  ;;  %v13232_v48 = vand.u32 4294901760, %v6724_v20  ;;  %v6723_v5 = vld [vmem:[#allocation2 + $0x770] sm:$0xff] }
 0x869   : > { %6650 = vmatpush.msrb.mxu2 %v6518_v38  ;;  %6989 = vmatpush.msra.mxu3 %v13073_v14  ;;  %v6730_v38 = vld [vmem:[#allocation2 + $0x7a8] sm:$0xff]  ;;  %v13238_v0 = vand.u32 4294901760, %v6723_v5 }
 0x86a   : > { %6527 = vmatmul.f32.gmra.mxu1 %v13042_v2  ;;  %6774 = vmatpush.msrb.mxu0 %v13071_v29  ;;  %v6840_v49 = vand.u32 4294901760, %v13137_v35  ;;  %v13157_v4 = vsub.f32 %v6731_v40, %v13148_v7  ;;  %v13160_v3 = vand.u32 4294901760, %v6730_v38  ;;  %v13243_v40 = vsub.f32 %v6724_v20, %v13232_v48 }
 0x86b   : > { %6927 = vmatpush.msra.mxu2 %v13080_v44  ;;  %6831 = vmatpush.msrb.mxu1 %v6830_v52 }
 0x86c   : > { %6776 = vmatpush.msrb.mxu0 %v13073_v14  ;;  %6991 = vmatpush.msra.mxu3 %v13134_v51  ;;  %v6841_v8 = vsub.f32 %v13137_v35, %v6840_v49  ;;  %v6852_v21 = vand.u32 4294901760, %v13157_v4  ;;  %v13169_v13 = vsub.f32 %v6730_v38, %v13160_v3  ;;  %v6722_v38 = vld [vmem:[#allocation2 + $0x768] sm:$0xff] }
 0x86d   : > { %6930 = vmatpush.msra.mxu2 %v13083_v23  ;;  %6837 = vmatpush.msrb.mxu1 %v6836_v34  ;;  %v13252_v27 = vand.u32 4294901760, %v6722_v38 }
 0x86e   : > { %6380 = vmatmul.f32.gmra.mxu2 %v13018_v18  ;;  %6685 = vmatmul.f32.vlgmr.msrb.gmra.mxu3 %v13022_v12  ;;  %v6842_v43 = vand.u32 4294901760, %v6841_v8  ;;  %v6853_v18 = vsub.f32 %v13157_v4, %v6852_v21  ;;  %v6858_v58 = vand.u32 4294901760, %v13169_v13 }
 0x86f   : > { %6933 = vmatpush.msra.mxu2 %v13086_v9  ;;  %6778 = vmatpush.msrb.mxu0 %v13134_v51 }
 0x870   : > { %6565 = vmatmul.f32.vlgmr.msra.gmra.mxu0 %v13032_v46  ;;  %6993 = vmatpush.msra.mxu3 %v13139_v22  ;;  %v6854_v42 = vand.u32 4294901760, %v6853_v18  ;;  %v6859_v39 = vsub.f32 %v13169_v13, %v6858_v58  ;;  %v13194_v46 = vand.u32 4294901760, %v6727_v10 }
 0x871   : > { %6936 = vmatpush.msra.mxu2 %v13137_v35  ;;  %6780 = vmatpush.msrb.mxu0 %v13139_v22 }
 0x872   : > { %6601 = vmatmul.f32.vlgmr.msra.gmra.mxu1 %v6451_v32  ;;  %6995 = vmatpush.msra.mxu3 %v13148_v7  ;;  %v6860_v41 = vand.u32 4294901760, %v6859_v39 }
 0x873   : > { %6939 = vmatpush.msra.mxu2 %v13145_v33  ;;  %6782 = vmatpush.msrb.mxu0 %v13148_v7 }
 0x874   : > { %6997 = vmatpush.msra.mxu3 %v13160_v3  ;;  %6843 = vmatpush.msrb.mxu1 %v6842_v43  ;;  %v13250_v43 = vsub.f32 %v6723_v5, %v13238_v0 }
 0x875   : > { %6942 = vmatpush.msra.mxu2 %v13157_v4  ;;  %6784 = vmatpush.msrb.mxu0 %v13160_v3  ;;  %v6745_v4 = vld [vmem:[#allocation2 + $0x820] sm:$0xff] }
 0x876   : > { %6652 = vmatmul.f32.vlgmr.msrb.gmra.mxu2 %v13022_v12  ;;  %6689 = vmatmul.f32.gmra.mxu3 %v13042_v2  ;;  %v13181_v12 = vand.u32 4294901760, %v6728_v54 }
 0x877   : > { %6945 = vmatpush.msra.mxu2 %v13169_v13  ;;  %6999 = vmatpush.msra.mxu3 %v13173_v55 }
 0x878   : > { %6570 = vmatmul.f32.gmra.mxu0 %v13054_v28  ;;  %6849 = vmatpush.msrb.mxu1 %v6848_v50  ;;  %v13192_v30 = vsub.f32 %v6728_v54, %v13181_v12  ;;  %v6725_v28 = vld [vmem:[#allocation2 + $0x780] sm:$0xff]  ;;  %v6894_v54 = vand.u32 4294901760, %v13243_v40 }
 0x879   : > { %6786 = vmatpush.msrb.mxu0 %v13173_v55  ;;  %6948 = vmatpush.msra.mxu2 %v13184_v11  ;;  %v13218_v63 = vand.u32 4294901760, %v6725_v28  ;;  %v6721_v50 = vld [vmem:[#allocation2 + $0x760] sm:$0xff]  ;;  %v6743_v11 = vld [vmem:[#allocation2 + $0x810] sm:$0xff] }
 0x87a   : > { %6607 = vmatmul.f32.gmra.mxu1 %v6459_v6  ;;  %7001 = vmatpush.msra.mxu3 %v13181_v12  ;;  %v6870_v32 = vand.u32 4294901760, %v13192_v30  ;;  %v13216_v6 = vsub.f32 %v6726_v36, %v13203_v45  ;;  %v13262_v39 = vand.u32 4294901760, %v6721_v50  ;;  %v6895_v36 = vsub.f32 %v13243_v40, %v6894_v54 }
 0x87b   : > { %6855 = vmatpush.msrb.mxu1 %v6854_v42  ;;  %6788 = vmatpush.msrb.mxu0 %v13181_v12  ;;  %v13228_v19 = vsub.f32 %v6725_v28, %v13218_v63  ;;  %v13260_v42 = vsub.f32 %v6722_v38, %v13252_v27  ;;  %v6751_v38 = vld [vmem:[#allocation2 + $0x850] sm:$0xff] }
 0x87c   : > { %6951 = vmatpush.msra.mxu2 %v13192_v30  ;;  %7003 = vmatpush.msra.mxu3 %v13194_v46  ;;  %v6871_v24 = vsub.f32 %v13192_v30, %v6870_v32  ;;  %v6882_v16 = vand.u32 4294901760, %v13216_v6  ;;  %v13275_v28 = vsub.f32 %v6721_v50, %v13262_v39  ;;  %v6741_v30 = vld [vmem:[#allocation2 + $0x800] sm:$0xff] }
 0x87d   : > { %6861 = vmatpush.msrb.mxu1 %v6860_v41  ;;  %6790 = vmatpush.msrb.mxu0 %v13194_v46  ;;  %v6888_v47 = vand.u32 4294901760, %v13228_v19  ;;  %v6906_v1 = vand.u32 4294901760, %v13260_v42 }
 0x87e   : > { %6656 = vmatmul.f32.gmra.mxu2 %v13042_v2  ;;  %v13201_v2 = vsub.f32 %v6727_v10, %v13194_v46  ;;  %7005 = vmatpush.msra.mxu3 %v13203_v45  ;;  %v6872_v59 = vand.u32 4294901760, %v6871_v24  ;;  %v6883_v34 = vsub.f32 %v13216_v6, %v6882_v16  ;;  %v6900_v10 = vand.u32 4294901760, %v13250_v43 }
 0x87f   : > { %6792 = vmatpush.msrb.mxu0 %v13203_v45  ;;  %6867 = vmatpush.msrb.mxu1 %v6866_v15  ;;  %v6889_v60 = vsub.f32 %v13228_v19, %v6888_v47  ;;  %v6896_v24 = vand.u32 4294901760, %v6895_v36  ;;  %v6907_v20 = vsub.f32 %v13260_v42, %v6906_v1 }
 0x880   : > { %v6876_v17 = vand.u32 4294901760, %v13201_v2  ;;  %6954 = vmatpush.msra.mxu2 %v13201_v2  ;;  %7007 = vmatpush.msra.mxu3 %v13218_v63  ;;  %v6884_v8 = vand.u32 4294901760, %v6883_v34  ;;  %v6901_v41 = vsub.f32 %v13250_v43, %v6900_v10 }
 0x881   : > { %6794 = vmatpush.msrb.mxu0 %v13218_v63  ;;  %6873 = vmatpush.msrb.mxu1 %v6872_v59  ;;  %v6890_v18 = vand.u32 4294901760, %v6889_v60  ;;  %v6912_v59 = vand.u32 4294901760, %v13275_v28  ;;  %v13298_v60 = vand.u32 4294901760, %v6751_v38 }
 0x882   : > { %v6877_v61 = vsub.f32 %v13201_v2, %v6876_v17  ;;  %6957 = vmatpush.msra.mxu2 %v13216_v6  ;;  %7009 = vmatpush.msra.mxu3 %v13232_v48  ;;  %v6902_v15 = vand.u32 4294901760, %v6901_v41  ;;  %v6749_v41 = vld [vmem:[#allocation2 + $0x840] sm:$0xff]  ;;  %v13428_v2 = vand.u32 4294901760, %v6741_v30  ;;  %v6739_v6 = vld [vmem:[#allocation2 + $0x7f0] sm:$0xff] }
 0x883   : > { %6796 = vmatpush.msrb.mxu0 %v13232_v48  ;;  %v6913_v34 = vsub.f32 %v13275_v28, %v6912_v59 }
 0x884   : > { %v6878_v52 = vand.u32 4294901760, %v6877_v61  ;;  %6960 = vmatpush.msra.mxu2 %v13228_v19  ;;  %7011 = vmatpush.msra.mxu3 %v13238_v0  ;;  %v6752_v61 = vld [vmem:[#allocation2 + $0x858] sm:$0xff] }
 0x885   : > { %6798 = vmatpush.msrb.mxu0 %v13238_v0  ;;  %v13287_v5 = vand.u32 4294901760, %v6752_v61  ;;  %v6914_v50 = vand.u32 4294901760, %v6913_v34 }
 0x886   : > { %6879 = vmatpush.msrb.mxu1 %v6878_v52  ;;  %6963 = vmatpush.msra.mxu2 %v13243_v40  ;;  %v6908_v52 = vand.u32 4294901760, %v6907_v20  ;;  %v6748_v20 = vld [vmem:[#allocation2 + $0x838] sm:$0xff]  ;;  %v6737_v40 = vld [vmem:[#allocation2 + $0x7e0] sm:$0xff] }
 0x887   : > { %7013 = vmatpush.msra.mxu3 %v13252_v27  ;;  %6800 = vmatpush.msrb.mxu0 %v13252_v27 }
 0x888   : > { %6885 = vmatpush.msrb.mxu1 %v6884_v8  ;;  %6966 = vmatpush.msra.mxu2 %v13250_v43  ;;  %v13296_v8 = vsub.f32 %v6752_v61, %v13287_v5 }
 0x889   : > { %7015 = vmatpush.msra.mxu3 %v13262_v39  ;;  %6802 = vmatpush.msrb.mxu0 %v13262_v39 }
 0x88a   : > { %6891 = vmatpush.msrb.mxu1 %v6890_v18  ;;  %6969 = vmatpush.msra.mxu2 %v13260_v42  ;;  %v6750_v18 = vld [vmem:[#allocation2 + $0x848] sm:$0xff]  ;;  %v7194_v36 = vand.u32 4294901760, %v13296_v8 }
 0x88b   : > { %7032 = vmatpush.msra.mxu0 %v6822_v31  ;;  %v13304_v44 = vand.u32 4294901760, %v6750_v18  ;;  %v13307_v31 = vsub.f32 %v6751_v38, %v13298_v60 }
 0x88c   : > { %6897 = vmatpush.msrb.mxu1 %v6896_v24  ;;  %6972 = vmatpush.msra.mxu2 %v13275_v28  ;;  %v7195_v23 = vsub.f32 %v13296_v8, %v7194_v36  ;;  %v13316_v24 = vand.u32 4294901760, %v6749_v41 }
 0x88d   : > { %7036 = vmatpush.msra.mxu0 %v6828_v57  ;;  %v14551_v57 = vand.u32 4294901760, %v13307_v31 }
 0x88e   : > { %6903 = vmatpush.msrb.mxu1 %v6902_v15  ;;  %7144 = vmatpush.msrb.mxu2 %v13287_v5  ;;  %v13319_v15 = vsub.f32 %v6750_v18, %v13304_v44  ;;  %v7196_v9 = vand.u32 4294901760, %v7195_v23  ;;  %v13333_v34 = vsub.f32 %v6749_v41, %v13316_v24  ;;  %v6746_v18 = vld [vmem:[#allocation2 + $0x828] sm:$0xff] }
 0x88f   : > { %7040 = vmatpush.msra.mxu0 %v6834_v62  ;;  %v7201_v62 = vsub.f32 %v13307_v31, %v14551_v57  ;;  %v13354_v23 = vand.u32 4294901760, %v6746_v18 }
 0x890   : > { %6909 = vmatpush.msrb.mxu1 %v6908_v52  ;;  %7146 = vmatpush.msrb.mxu2 %v13298_v60  ;;  %v14550_v61 = vand.u32 4294901760, %v13319_v15  ;;  %v13329_v52 = vand.u32 4294901760, %v6748_v20 }
 0x891   : > { %7044 = vmatpush.msra.mxu0 %v6840_v49  ;;  %7197 = vmatpush.msrb.mxu3 %v7196_v9  ;;  %v7202_v35 = vand.u32 4294901760, %v7201_v62 }
 0x892   : > { %6915 = vmatpush.msrb.mxu1 %v6914_v50  ;;  %7148 = vmatpush.msrb.mxu2 %v13304_v44  ;;  %v7207_v49 = vsub.f32 %v13319_v15, %v14550_v61  ;;  %v13344_v50 = vsub.f32 %v6748_v20, %v13329_v52 }
 0x893   : > { %7048 = vmatpush.msra.mxu0 %v6846_v56  ;;  %7203 = vmatpush.msrb.mxu3 %v7202_v35 }
 0x894   : > { %7103 = vmatpush.msra.mxu1 %v13069_v53  ;;  %7150 = vmatpush.msrb.mxu2 %v13316_v24  ;;  %v6747_v53 = vld [vmem:[#allocation2 + $0x830] sm:$0xff]  ;;  %v7208_v56 = vand.u32 4294901760, %v7207_v49  ;;  %v14544_v41 = vand.u32 4294901760, %v13344_v50 }
 0x895   : > { %v13341_v38 = vand.u32 4294901760, %v6747_v53  ;;  %7052 = vmatpush.msra.mxu0 %v6852_v21 }
 0x896   : > { %7105 = vmatpush.msra.mxu1 %v13071_v29  ;;  %7152 = vmatpush.msrb.mxu2 %v13329_v52  ;;  %v14547_v29 = vand.u32 4294901760, %v13333_v34  ;;  %v7219_v9 = vsub.f32 %v13344_v50, %v14544_v41 }
 0x897   : > { %v13357_v20 = vsub.f32 %v6747_v53, %v13341_v38  ;;  %7056 = vmatpush.msra.mxu0 %v6858_v58  ;;  %7209 = vmatpush.msrb.mxu3 %v7208_v56  ;;  %v13375_v53 = vsub.f32 %v6746_v18, %v13354_v23  ;;  %v6744_v58 = vld [vmem:[#allocation2 + $0x818] sm:$0xff] }
 0x898   : > { %7107 = vmatpush.msra.mxu1 %v13073_v14  ;;  %7154 = vmatpush.msrb.mxu2 %v13341_v38  ;;  %v7213_v14 = vsub.f32 %v13333_v34, %v14547_v29  ;;  %v7220_v49 = vand.u32 4294901760, %v7219_v9  ;;  %v13387_v18 = vand.u32 4294901760, %v6744_v58  ;;  %v13397_v9 = vand.u32 4294901760, %v6743_v11 }
 0x899   : > { %v14545_v62 = vand.u32 4294901760, %v13357_v20  ;;  %7060 = vmatpush.msra.mxu0 %v6864_v37  ;;  %v14546_v41 = vand.u32 4294901760, %v13375_v53 }
 0x89a   : > { %7109 = vmatpush.msra.mxu1 %v13134_v51  ;;  %7156 = vmatpush.msrb.mxu2 %v13354_v23  ;;  %v13372_v51 = vand.u32 4294901760, %v6745_v4  ;;  %v7214_v13 = vand.u32 4294901760, %v7213_v14 }
 0x89b   : > { %v7225_v56 = vsub.f32 %v13357_v20, %v14545_v62  ;;  %v7231_v14 = vsub.f32 %v13375_v53, %v14546_v41  ;;  %v13400_v62 = vsub.f32 %v6744_v58, %v13387_v18  ;;  %7064 = vmatpush.msra.mxu0 %v6870_v32  ;;  %v13413_v58 = vsub.f32 %v6743_v11, %v13397_v9 }
 0x89c   : > { %7111 = vmatpush.msra.mxu1 %v13139_v22  ;;  %7158 = vmatpush.msrb.mxu2 %v13372_v51  ;;  %v13391_v22 = vsub.f32 %v6745_v4, %v13372_v51  ;;  %v6742_v4 = vld [vmem:[#allocation2 + $0x808] sm:$0xff] }
 0x89d   : > { %7215 = vmatpush.msrb.mxu3 %v7214_v13  ;;  %v7226_v37 = vand.u32 4294901760, %v7225_v56  ;;  %v7232_v56 = vand.u32 4294901760, %v7231_v14  ;;  %v14549_v41 = vand.u32 4294901760, %v13400_v62  ;;  %v13410_v29 = vand.u32 4294901760, %v6742_v4  ;;  %7068 = vmatpush.msra.mxu0 %v6876_v17  ;;  %v8890_v17 = vld [vmem:[#allocation4 + $0x7] ss:$0 sm:$0xff] }
 0x89e   : > { %7113 = vmatpush.msra.mxu1 %v13148_v7  ;;  %7160 = vmatpush.msrb.mxu2 %v13387_v18  ;;  %v14548_v7 = vand.u32 4294901760, %v13391_v22  ;;  %v14553_v11 = vand.u32 4294901760, %v13413_v58  ;;  %v6740_v14 = vld [vmem:[#allocation2 + $0x7f8] sm:$0xff] }
 0x89f   : > { %7221 = vmatpush.msrb.mxu3 %v7220_v49  ;;  %v7243_v49 = vsub.f32 %v13400_v62, %v14549_v41  ;;  %7072 = vmatpush.msra.mxu0 %v6882_v16  ;;  %v13441_v57 = vand.u32 4294901760, %v6740_v14 }
 0x8a0   : > { %7115 = vmatpush.msra.mxu1 %v13160_v3  ;;  %7162 = vmatpush.msrb.mxu2 %v13397_v9  ;;  %v7237_v3 = vsub.f32 %v13391_v22, %v14548_v7  ;;  %v7249_v61 = vsub.f32 %v13413_v58, %v14553_v11 }
 0x8a1   : > { %7227 = vmatpush.msrb.mxu3 %v7226_v37  ;;  %v7244_v41 = vand.u32 4294901760, %v7243_v49  ;;  %7076 = vmatpush.msra.mxu0 %v6888_v47  ;;  %v13453_v49 = vand.u32 4294901760, %v6739_v6  ;;  %v13456_v19 = vsub.f32 %v6740_v14, %v13441_v57 }
 0x8a2   : > { %7117 = vmatpush.msra.mxu1 %v13173_v55  ;;  %7164 = vmatpush.msrb.mxu2 %v13410_v29  ;;  %v13431_v55 = vsub.f32 %v6742_v4, %v13410_v29  ;;  %v7238_v37 = vand.u32 4294901760, %v7237_v3 }
 0x8a3   : > { %7233 = vmatpush.msrb.mxu3 %v7232_v56  ;;  %v7250_v56 = vand.u32 4294901760, %v7249_v61  ;;  %7080 = vmatpush.msra.mxu0 %v6894_v54  ;;  %v6738_v61 = vld [vmem:[#allocation2 + $0x7e8] sm:$0xff]  ;;  %v13467_v14 = vsub.f32 %v6739_v6, %v13453_v49 }
 0x8a4   : > { %7119 = vmatpush.msra.mxu1 %v13181_v12  ;;  %7166 = vmatpush.msrb.mxu2 %v13428_v2  ;;  %v14552_v4 = vand.u32 4294901760, %v13431_v55  ;;  %v13447_v12 = vsub.f32 %v6741_v30, %v13428_v2  ;;  %v13464_v11 = vand.u32 4294901760, %v6738_v61 }
 0x8a5   : > { %7239 = vmatpush.msrb.mxu3 %v7238_v37  ;;  %7084 = vmatpush.msra.mxu0 %v6900_v10 }
 0x8a6   : > { %7121 = vmatpush.msra.mxu1 %v13194_v46  ;;  %v7255_v3 = vsub.f32 %v13431_v55, %v14552_v4  ;;  %7168 = vmatpush.msrb.mxu2 %v13441_v57  ;;  %v7260_v47 = vand.u32 4294901760, %v13447_v12  ;;  %v14554_v4 = vand.u32 4294901760, %v13456_v19  ;;  %v13483_v43 = vsub.f32 %v6738_v61, %v13464_v11 }
 0x8a7   : > { %7245 = vmatpush.msrb.mxu3 %v7244_v41  ;;  %v7272_v41 = vand.u32 4294901760, %v13467_v14  ;;  %7088 = vmatpush.msra.mxu0 %v6906_v1 }
 0x8a8   : > { %7123 = vmatpush.msra.mxu1 %v13203_v45  ;;  %v7256_v37 = vand.u32 4294901760, %v7255_v3  ;;  %7170 = vmatpush.msrb.mxu2 %v13453_v49  ;;  %v7261_v45 = vsub.f32 %v13447_v12, %v7260_v47  ;;  %v7267_v54 = vsub.f32 %v13456_v19, %v14554_v4  ;;  %v14556_v61 = vand.u32 4294901760, %v13483_v43 }
 0x8a9   : > { %7251 = vmatpush.msrb.mxu3 %v7250_v56  ;;  %v7273_v4 = vsub.f32 %v13467_v14, %v7272_v41  ;;  %7092 = vmatpush.msra.mxu0 %v6912_v59 }
 0x8aa   : > { %7125 = vmatpush.msra.mxu1 %v13218_v63  ;;  %7172 = vmatpush.msrb.mxu2 %v13464_v11  ;;  %v7262_v10 = vand.u32 4294901760, %v7261_v45  ;;  %v7268_v3 = vand.u32 4294901760, %v7267_v54  ;;  %v7279_v1 = vsub.f32 %v13483_v43, %v14556_v61 }
 0x8ab   : > { %7257 = vmatpush.msrb.mxu3 %v7256_v37 }
 0x8ac   : > { %7127 = vmatpush.msra.mxu1 %v13232_v48  ;;  %v7274_v48 = vand.u32 4294901760, %v7273_v4 }
 0x8ad   : > { %7263 = vmatpush.msrb.mxu3 %v7262_v10 }
 0x8ae   : > { %7129 = vmatpush.msra.mxu1 %v13238_v0 }
 0x8af   : > { %7269 = vmatpush.msrb.mxu3 %v7268_v3 }
 0x8b0   : > { %7131 = vmatpush.msra.mxu1 %v13252_v27 }
 0x8b1   : > { %7275 = vmatpush.msrb.mxu3 %v7274_v48 }
 0x8b2   : > { %7133 = vmatpush.msra.mxu1 %v13262_v39 }
 0x8cd   : > { %v13350_v33 = vpop.f32.mrf.mxu0 }
 0x8cf   : > { %v13365_v21 = vpop.f32.mrf.mxu1 }
 0x8d1   : > { %v13380_v35 = vpop.f32.mrf.mxu3 }
 0x8d5   : > { %v13406_v13 = vpop.f32.mrf.mxu0 }
 0x8d7   : > { %v13421_v32 = vpop.f32.mrf.mxu1 }
 0x8d9   : > { %v6091_v7 = vpop.f32.mrf.mxu2  ;;  %v6204_v16 = vpop.f32.mrf.mxu3 }
 0x8da   : > { %v6092_v46 = vadd.f32 %v8890_v17, %v6091_v7  ;;  %v13480_v7 = vand.u32 4294901760, %v6737_v40 }
 0x8dc   : > { %v6201_v63 = vadd.f32 %v13380_v35, %v6092_v46  ;;  %7174 = vmatpush.msrb.mxu2 %v13480_v7  ;;  %v13495_v42 = vsub.f32 %v6737_v40, %v13480_v7  ;;  %v7280_v40 = vand.u32 4294901760, %v7279_v1 }
 0x8dd   : > { %v6455_v30 = vpop.f32.mrf.mxu0 }
 0x8de   : > { %v14555_v35 = vand.u32 4294901760, %v13495_v42  ;;  %v6259_v37 = vadd.f32 %v13350_v33, %v6201_v63  ;;  %7281 = vmatpush.msrb.mxu3 %v7280_v40 }
 0x8df   : > { %v6524_v6 = vpop.f32.mrf.mxu1 }
 0x8e0   : > { %v7285_v0 = vsub.f32 %v13495_v42, %v14555_v35  ;;  %v6303_v54 = vadd.f32 %v13365_v21, %v6259_v37 }
 0x8e1   : > { %v6099_v56 = vpop.f32.mrf.mxu2  ;;  %v6418_v45 = vpop.f32.mrf.mxu3 }
 0x8e2   : > { %v6100_v46 = vadd.f32 %v8890_v17, %v6099_v56  ;;  %v7286_v59 = vand.u32 4294901760, %v7285_v0 }
 0x8e4   : > { %v6205_v4 = vadd.f32 %v6204_v16, %v6100_v46  ;;  %7287 = vmatpush.msrb.mxu3 %v7286_v59 }
 0x8e5   : > { %v6463_v28 = vpop.f32.mrf.mxu0 }
 0x8e6   : > { %v6264_v10 = vadd.f32 %v13406_v13, %v6205_v4 }
 0x8e7   : > { %v6528_v27 = vpop.f32.mrf.mxu1 }
 0x8e8   : > { %v6309_v35 = vadd.f32 %v13421_v32, %v6264_v10 }
 0x8e9   : > { %v6377_v17 = vpop.f32.mrf.mxu2  ;;  %v6422_v3 = vpop.f32.mrf.mxu3 }
 0x8ea   : > { %v6378_v33 = vadd.f32 %v6377_v17, %v6303_v54 }
 0x8ec   : > { %v6419_v63 = vadd.f32 %v6418_v45, %v6378_v33 }
 0x8ed   : > { %v6566_v39 = vpop.f32.mrf.mxu0 }
 0x8ee   : > { %v6456_v56 = vadd.f32 %v6455_v30, %v6419_v63 }
 0x8ef   : > { %v6602_v46 = vpop.f32.mrf.mxu1 }
 0x8f0   : > { %v6525_v1 = vadd.f32 %v6524_v6, %v6456_v56 }
 0x8f1   : > { %v6381_v48 = vpop.f32.mrf.mxu2  ;;  %v6686_v54 = vpop.f32.mrf.mxu3 }
 0x8f2   : > { %v6382_v61 = vadd.f32 %v6381_v48, %v6309_v35  ;;  %v6567_v0 = vadd.f32 %v6566_v39, %v6525_v1 }
 0x8f4   : > { %v6423_v16 = vadd.f32 %v6422_v3, %v6382_v61  ;;  %v6603_v37 = vadd.f32 %v6602_v46, %v6567_v0 }
 0x8f5   : > { %v6571_v45 = vpop.f32.mrf.mxu0 }
 0x8f6   : > { %v6464_v21 = vadd.f32 %v6463_v28, %v6423_v16  ;;  %v14652_v16 = vand.u32 4294901760, %v13307_v31 }
 0x8f7   : > { %v6608_v6 = vpop.f32.mrf.mxu1 }
 0x8f8   : > { %v6529_v40 = vadd.f32 %v6528_v27, %v6464_v21 }
 0x8f9   : > { %v6653_v59 = vpop.f32.mrf.mxu2  ;;  %v6690_v27 = vpop.f32.mrf.mxu3 }
 0x8fa   : > { %v6654_v17 = vadd.f32 %v6653_v59, %v6603_v37  ;;  %v6572_v33 = vadd.f32 %v6571_v45, %v6529_v40 }
 0x8fc   : > { %v6687_v13 = vadd.f32 %v6686_v54, %v6654_v17  ;;  %v6609_v4 = vadd.f32 %v6608_v6, %v6572_v33  ;;  %v14654_v33 = vand.u32 4294901760, %v13333_v34 }
 0x8fe   : > { %v6693_v30 = vmul.f32 %v6687_v13, %v10059_v26 }
 0x900   : > { %v6697_v32 = vrot.slane %v6693_v30, 7  ;;  %v14655_v30 = vand.u32 4294901760, %v13344_v50 }
 0x901   : > { %v6657_v63 = vpop.f32.mrf.mxu2 }
 0x902   : > { %v13515_v35 = vsel %vm298_vm0, 0.0, %v6697_v32  ;;  %v6658_v61 = vadd.f32 %v6657_v63, %v6609_v4 }
 0x903   : > { %v13518_v28 = vand.u32 4294901760, %v13515_v35  ;;  %v6707_v46 = vrot.slane %v13515_v35, 1 }
 0x904   : > { %v6691_v10 = vadd.f32 %v6690_v27, %v6658_v61  ;;  %v6768_v61 = vld [vmem:[#allocation2 + $0x8d8] sm:$0xff] }
 0x905   : > { %v6804_v56 = vsub.f32 %v13515_v35, %v13518_v28  ;;  %6917 = vmatmul.f32.vlgmr.msrb.gmra.mxu1 %v13518_v28 }
 0x906   : > { %v6694_v3 = vmul.f32 %v6691_v10, %v10068_v25  ;;  %7357 = vmatpush.msrb.mxu1 %v13287_v5  ;;  %v14658_v10 = vand.u32 4294901760, %v13391_v22 }
 0x907   : > { %6975 = vmatmul.f32.vlgmr.msra.gmra.mxu2 %v6804_v56  ;;  %v6805_v1 = vand.u32 4294901760, %v6804_v56 }
 0x908   : > { %v6698_v39 = vrot.slane %v6694_v3, 7  ;;  %7359 = vmatpush.msrb.mxu1 %v13298_v60  ;;  %7404 = vmatpush.msra.mxu2 %v7194_v36  ;;  %v14653_v36 = vand.u32 4294901760, %v13319_v15 }
 0x909   : > { %7019 = vmatmul.f32.vlgmr.msra.gmra.mxu3 %v6805_v1  ;;  %v6806_v48 = vsub.f32 %v6804_v56, %v6805_v1 }
 0x90a   : > { %v13529_v0 = vsel %vm298_vm0, %v6697_v32, %v6698_v39  ;;  %7361 = vmatpush.msrb.mxu1 %v13304_v44  ;;  %7408 = vmatpush.msra.mxu2 %v14652_v16  ;;  %v13536_v21 = vsel %vm298_vm0, %v6698_v39, 0.0  ;;  %v14660_v39 = vand.u32 4294901760, %v13413_v58 }
 0x90b   : > { %v6708_v37 = vrot.slane %v13529_v0, 1  ;;  %7475 = vmatpush.msra.mxu3 %v13287_v5  ;;  %v6807_v40 = vand.u32 4294901760, %v6806_v48  ;;  %v13544_v54 = vand.u32 4294901760, %v13529_v0  ;;  %v6710_v17 = vrot.slane %v13536_v21, 1  ;;  %v6764_v48 = vld [vmem:[#allocation2 + $0x8b8] sm:$0xff] }
 0x90c   : > { %7363 = vmatpush.msrb.mxu1 %v13316_v24  ;;  %7412 = vmatpush.msra.mxu2 %v14653_v36  ;;  %v6763_v36 = vld [vmem:[#allocation2 + $0x8b0] sm:$0xff] }
 0x90d   : > { %7477 = vmatpush.msra.mxu3 %v13298_v60  ;;  %v6709_v59 = vsel %vm309_vm1, %v6707_v46, %v6708_v37  ;;  %6808 = vmatmul.f32.vlgmr.msrb.gmra.mxu0 %v6807_v40  ;;  %v6812_v5 = vsub.f32 %v13529_v0, %v13544_v54  ;;  %v6711_v4 = vsel %vm309_vm1, %v6708_v37, %v6710_v17 }
 0x90e   : > { %6921 = vmatmul.f32.gmra.mxu1 %v13544_v54  ;;  %v13552_v45 = vand.u32 4294901760, %v6709_v59  ;;  %7299 = vmatpush.msrb.mxu0 %v13296_v8  ;;  %v13577_v63 = vand.u32 4294901760, %v6711_v4 }
 0x90f   : > { %7365 = vmatpush.msrb.mxu1 %v13329_v52  ;;  %7416 = vmatpush.msra.mxu2 %v14654_v33  ;;  %v6813_v60 = vand.u32 4294901760, %v6812_v5  ;;  %v6761_v33 = vld [vmem:[#allocation2 + $0x8a0] sm:$0xff] }
 0x910   : > { %7479 = vmatpush.msra.mxu3 %v13304_v44  ;;  %v13560_v13 = vsub.f32 %v6709_v59, %v13552_v45  ;;  %6980 = vmatmul.f32.gmra.mxu2 %v6812_v5  ;;  %v6762_v59 = vld [vmem:[#allocation2 + $0x8a8] sm:$0xff] }
 0x911   : > { %7302 = vmatpush.msrb.mxu0 %v13307_v31  ;;  %7367 = vmatpush.msrb.mxu1 %v13341_v38  ;;  %v6814_v8 = vsub.f32 %v6812_v5, %v6813_v60  ;;  %v14656_v31 = vand.u32 4294901760, %v13357_v20  ;;  %v13650_v5 = vand.u32 4294901760, %v6763_v36 }
 0x912   : > { %7420 = vmatpush.msra.mxu2 %v14655_v30  ;;  %v7177_v6 = vand.u32 4294901760, %v13560_v13  ;;  %7481 = vmatpush.msra.mxu3 %v13316_v24  ;;  %v14657_v24 = vand.u32 4294901760, %v13375_v53 }
 0x913   : > { %7305 = vmatpush.msrb.mxu0 %v13319_v15  ;;  %7025 = vmatmul.f32.gmra.mxu3 %v6813_v60  ;;  %v6815_v44 = vand.u32 4294901760, %v6814_v8  ;;  %v13585_v15 = vand.u32 4294901760, %v6768_v61  ;;  %v13662_v60 = vand.u32 4294901760, %v6762_v59 }
 0x914   : > { %7369 = vmatpush.msrb.mxu1 %v13354_v23  ;;  %7424 = vmatpush.msra.mxu2 %v14656_v31  ;;  %v7178_v32 = vsub.f32 %v13560_v13, %v7177_v6 }
 0x915   : > { %7483 = vmatpush.msra.mxu3 %v13329_v52  ;;  %7308 = vmatpush.msrb.mxu0 %v13333_v34  ;;  %v6767_v52 = vld [vmem:[#allocation2 + $0x8d0] sm:$0xff]  ;;  %v13590_v34 = vsub.f32 %v6711_v4, %v13577_v63  ;;  %v13603_v3 = vsub.f32 %v6768_v61, %v13585_v15  ;;  %v13674_v4 = vsub.f32 %v6763_v36, %v13650_v5 }
 0x916   : > { %7371 = vmatpush.msrb.mxu1 %v13372_v51  ;;  %7428 = vmatpush.msra.mxu2 %v14657_v24  ;;  %v7179_v27 = vand.u32 4294901760, %v7178_v32  ;;  %v13597_v56 = vand.u32 4294901760, %v6767_v52  ;;  %v13685_v32 = vsub.f32 %v6762_v59, %v13662_v60  ;;  %v6759_v61 = vld [vmem:[#allocation2 + $0x890] sm:$0xff] }
 0x917   : > { %7485 = vmatpush.msra.mxu3 %v13341_v38  ;;  %6816 = vmatmul.f32.gmra.mxu0 %v6815_v44  ;;  %v6766_v38 = vld [vmem:[#allocation2 + $0x8c8] sm:$0xff]  ;;  %v7566_v16 = vand.u32 4294901760, %v13603_v3  ;;  %v13676_v44 = vand.u32 4294901760, %v6761_v33  ;;  %v6755_v59 = vld [vmem:[#allocation2 + $0x870] sm:$0xff] }
 0x918   : > { %7135 = vmatmul.f32.vlgmr.msra.gmra.mxu1 %v13518_v28  ;;  %7311 = vmatpush.msrb.mxu0 %v13344_v50  ;;  %v14659_v50 = vand.u32 4294901760, %v13400_v62  ;;  %v13607_v1 = vand.u32 4294901760, %v6766_v38 }
 0x919   : > { %7373 = vmatpush.msrb.mxu1 %v13387_v18  ;;  %7432 = vmatpush.msra.mxu2 %v14658_v10  ;;  %v6758_v10 = vld [vmem:[#allocation2 + $0x888] sm:$0xff] }
 0x91a   : > { %7487 = vmatpush.msra.mxu3 %v13354_v23  ;;  %7314 = vmatpush.msrb.mxu0 %v13357_v20  ;;  %v7185_v23 = vand.u32 4294901760, %v13590_v34  ;;  %v6765_v20 = vld [vmem:[#allocation2 + $0x8c0] sm:$0xff]  ;;  %v13629_v37 = vsub.f32 %v6766_v38, %v13607_v1 }
 0x91b   : > { %7375 = vmatpush.msrb.mxu1 %v13397_v9  ;;  %7436 = vmatpush.msra.mxu2 %v14659_v50  ;;  %v13620_v46 = vand.u32 4294901760, %v6765_v20  ;;  %v6757_v50 = vld [vmem:[#allocation2 + $0x880] sm:$0xff] }
 0x91c   : > { %7489 = vmatpush.msra.mxu3 %v13372_v51  ;;  %7180 = vmatmul.f32.vlgmr.msrb.gmra.mxu2 %v7179_v27  ;;  %v13615_v51 = vsub.f32 %v6767_v52, %v13597_v56  ;;  %v7578_v17 = vand.u32 4294901760, %v13629_v37  ;;  %v7596_v52 = vand.u32 4294901760, %v13674_v4  ;;  %v13698_v27 = vsub.f32 %v6761_v33, %v13676_v44 }
 0x91d   : > { %7289 = vmatmul.f32.vlgmr.msrb.gmra.mxu3 %v13552_v45  ;;  %7317 = vmatpush.msrb.mxu0 %v13375_v53  ;;  %v14661_v53 = vand.u32 4294901760, %v13431_v55  ;;  %v13645_v40 = vsub.f32 %v6765_v20, %v13620_v46  ;;  %v13727_v36 = vand.u32 4294901760, %v6757_v50 }
 0x91e   : > { %7377 = vmatpush.msrb.mxu1 %v13410_v29  ;;  %7440 = vmatpush.msra.mxu2 %v14660_v39  ;;  %v7579_v8 = vsub.f32 %v13629_v37, %v7578_v17 }
 0x91f   : > { %7491 = vmatpush.msra.mxu3 %v13387_v18  ;;  %7320 = vmatpush.msrb.mxu0 %v13391_v22  ;;  %v7186_v18 = vsub.f32 %v13590_v34, %v7185_v23  ;;  %v13633_v22 = vand.u32 4294901760, %v6764_v48 }
 0x920   : > { %7379 = vmatpush.msrb.mxu1 %v13428_v2  ;;  %7444 = vmatpush.msra.mxu2 %v14661_v53  ;;  %v7608_v53 = vand.u32 4294901760, %v13698_v27 }
 0x921   : > { %7493 = vmatpush.msra.mxu3 %v13397_v9  ;;  %7094 = vmatmul.f32.vlgmr.msra.gmra.mxu0 %v13518_v28  ;;  %v7572_v9 = vand.u32 4294901760, %v13615_v51  ;;  %v7567_v28 = vsub.f32 %v13603_v3, %v7566_v16 }
 0x922   : > { %7139 = vmatmul.f32.gmra.mxu1 %v13544_v54  ;;  %7323 = vmatpush.msrb.mxu0 %v13400_v62  ;;  %v7187_v62 = vand.u32 4294901760, %v7186_v18  ;;  %v6756_v18 = vld [vmem:[#allocation2 + $0x878] sm:$0xff] }
 0x923   : > { %7381 = vmatpush.msrb.mxu1 %v13441_v57  ;;  %7448 = vmatpush.msra.mxu2 %v7260_v47  ;;  %v14662_v47 = vand.u32 4294901760, %v13456_v19  ;;  %v7568_v30 = vand.u32 4294901760, %v7567_v28  ;;  %v13739_v33 = vand.u32 4294901760, %v6756_v18 }
 0x924   : > { %7495 = vmatpush.msra.mxu3 %v13410_v29  ;;  %7326 = vmatpush.msrb.mxu0 %v13413_v58  ;;  %v13656_v29 = vsub.f32 %v6764_v48, %v13633_v22  ;;  %v7573_v58 = vsub.f32 %v13615_v51, %v7572_v9  ;;  %v7597_v48 = vsub.f32 %v13674_v4, %v7596_v52 }
 0x925   : > { %7383 = vmatpush.msrb.mxu1 %v13453_v49  ;;  %7452 = vmatpush.msra.mxu2 %v14662_v47 }
 0x926   : > { %7497 = vmatpush.msra.mxu3 %v13428_v2  ;;  %7188 = vmatmul.f32.gmra.mxu2 %v7187_v62  ;;  %v7584_v2 = vand.u32 4294901760, %v13645_v40  ;;  %v7590_v31 = vand.u32 4294901760, %v13656_v29 }
 0x927   : > { %7293 = vmatmul.f32.gmra.mxu3 %v13577_v63  ;;  %7329 = vmatpush.msrb.mxu0 %v13431_v55  ;;  %v6760_v55 = vld [vmem:[#allocation2 + $0x898] sm:$0xff] }
 0x928   : > { %7385 = vmatpush.msrb.mxu1 %v13464_v11  ;;  %7456 = vmatpush.msra.mxu2 %v7272_v41  ;;  %v14663_v41 = vand.u32 4294901760, %v13483_v43  ;;  %v13691_v24 = vand.u32 4294901760, %v6760_v55  ;;  %v7591_v38 = vsub.f32 %v13656_v29, %v7590_v31 }
 0x929   : > { %7499 = vmatpush.msra.mxu3 %v13441_v57  ;;  %7332 = vmatpush.msrb.mxu0 %v13447_v12  ;;  %v7574_v57 = vand.u32 4294901760, %v7573_v58  ;;  %v7585_v12 = vsub.f32 %v13645_v40, %v7584_v2  ;;  %v6754_v58 = vld [vmem:[#allocation2 + $0x868] sm:$0xff] }
 0x92a   : > { %7387 = vmatpush.msrb.mxu1 %v13480_v7  ;;  %7460 = vmatpush.msra.mxu2 %v14663_v41  ;;  %v13713_v39 = vsub.f32 %v6760_v55, %v13691_v24  ;;  %v13751_v55 = vand.u32 4294901760, %v6755_v59  ;;  %v6753_v41 = vld [vmem:[#allocation2 + $0x860] sm:$0xff] }
 0x92b   : > { %7501 = vmatpush.msra.mxu3 %v13453_v49  ;;  %7098 = vmatmul.f32.gmra.mxu0 %v13544_v54  ;;  %v7580_v49 = vand.u32 4294901760, %v7579_v8  ;;  %v14664_v54 = vand.u32 4294901760, %v13495_v42  ;;  %v7586_v20 = vand.u32 4294901760, %v7585_v12  ;;  %v13749_v8 = vsub.f32 %v6757_v50, %v13727_v36 }
 0x92c   : > { %7569 = vmatpush.msra.mxu1 %v7568_v30  ;;  %7335 = vmatpush.msrb.mxu0 %v13456_v19  ;;  %v13706_v19 = vand.u32 4294901760, %v6759_v61  ;;  %v7614_v62 = vand.u32 4294901760, %v13713_v39  ;;  %v13763_v12 = vsub.f32 %v6756_v18, %v13739_v33 }
 0x92d   : > { %7391 = vmatmul.f32.vlgmr.msrb.gmra.mxu1 %v7177_v6  ;;  %7464 = vmatpush.msra.mxu2 %v14664_v54  ;;  %v7602_v6 = vand.u32 4294901760, %v13685_v32  ;;  %v13775_v54 = vsub.f32 %v6755_v59, %v13751_v55 }
 0x92e   : > { %7503 = vmatpush.msra.mxu3 %v13464_v11  ;;  %7575 = vmatpush.msra.mxu1 %v7574_v57  ;;  %v13715_v11 = vand.u32 4294901760, %v6758_v10  ;;  %v7615_v57 = vsub.f32 %v13713_v39, %v7614_v62 }
 0x92f   : > { %7671 = vmatpush.msrb.mxu2 %v13603_v3  ;;  %7338 = vmatpush.msrb.mxu0 %v13467_v14  ;;  %v7592_v14 = vand.u32 4294901760, %v7591_v38  ;;  %v7603_v28 = vsub.f32 %v13685_v32, %v7602_v6  ;;  %v13777_v38 = vand.u32 4294901760, %v6753_v41  ;;  %v7644_v59 = vand.u32 4294901760, %v13775_v54  ;;  %v7922_v3 = vld [vmem:[#allocation2 + $0x958] sm:$0xff] }
 0x930   : > { %7505 = vmatpush.msra.mxu3 %v13480_v7  ;;  %7466 = vmatmul.f32.vlgmr.msra.gmra.mxu2 %v13552_v45  ;;  %v13725_v7 = vsub.f32 %v6759_v61, %v13706_v19  ;;  %v13737_v47 = vsub.f32 %v6758_v10, %v13715_v11  ;;  %v7616_v50 = vand.u32 4294901760, %v7615_v57 }
 0x931   : > { %7581 = vmatpush.msra.mxu1 %v7580_v49  ;;  %7674 = vmatpush.msrb.mxu2 %v13615_v51  ;;  %v13765_v49 = vand.u32 4294901760, %v6754_v58  ;;  %v7645_v57 = vsub.f32 %v13775_v54, %v7644_v59  ;;  %v13906_v51 = vand.u32 4294901760, %v7922_v3 }
 0x932   : > { %7729 = vmatpush.msrb.mxu3 %v13585_v15  ;;  %7341 = vmatpush.msrb.mxu0 %v13483_v43  ;;  %v7598_v43 = vand.u32 4294901760, %v7597_v48  ;;  %v7620_v30 = vand.u32 4294901760, %v13725_v7  ;;  %v7626_v61 = vand.u32 4294901760, %v13737_v47  ;;  %v7638_v48 = vand.u32 4294901760, %v13763_v12 }
 0x933   : > { %7507 = vmatmul.f32.vlgmr.msra.gmra.mxu3 %v13552_v45  ;;  %7587 = vmatpush.msra.mxu1 %v7586_v20  ;;  %v7609_v45 = vsub.f32 %v13698_v27, %v7608_v53  ;;  %v13787_v18 = vsub.f32 %v6754_v58, %v13765_v49 }
 0x934   : > { %7677 = vmatpush.msrb.mxu2 %v13629_v37  ;;  %7731 = vmatpush.msrb.mxu3 %v13597_v56  ;;  %v7627_v20 = vsub.f32 %v13737_v47, %v7626_v61  ;;  %v7639_v58 = vsub.f32 %v13763_v12, %v7638_v48 }
 0x935   : > { %7344 = vmatpush.msrb.mxu0 %v13495_v42  ;;  %7593 = vmatpush.msra.mxu1 %v7592_v14  ;;  %v7604_v42 = vand.u32 4294901760, %v7603_v28  ;;  %v7610_v10 = vand.u32 4294901760, %v7609_v45  ;;  %v6715_v45 = vrot.slane %v13529_v0, 2 }
 0x936   : > { %7680 = vmatpush.msrb.mxu2 %v13645_v40  ;;  %7733 = vmatpush.msrb.mxu3 %v13607_v1  ;;  %v7920_v40 = vld [vmem:[#allocation2 + $0x948] sm:$0xff] }
 0x937   : > { %7516 = vmatpush.msra.mxu0 %v13585_v15  ;;  %7397 = vmatmul.f32.gmra.mxu1 %v7185_v23  ;;  %v7632_v23 = vand.u32 4294901760, %v13749_v8 }
 0x938   : > { %7347 = vmatmul.f32.vlgmr.msrb.gmra.mxu0 %v13560_v13  ;;  %7599 = vmatpush.msra.mxu1 %v7598_v43  ;;  %v7621_v13 = vsub.f32 %v13725_v7, %v7620_v30  ;;  %v13797_v43 = vsub.f32 %v6753_v41, %v13777_v38  ;;  %v6714_v41 = vrot.slane %v13515_v35, 2 }
 0x939   : > { %7518 = vmatpush.msra.mxu0 %v13597_v56  ;;  %7683 = vmatpush.msrb.mxu2 %v13656_v29  ;;  %v7633_v28 = vsub.f32 %v13749_v8, %v7632_v23  ;;  %v13924_v29 = vand.u32 4294901760, %v7920_v40 }
 0x93a   : > { %7735 = vmatpush.msrb.mxu3 %v13620_v46  ;;  %7470 = vmatmul.f32.gmra.mxu2 %v13577_v63  ;;  %v7622_v14 = vand.u32 4294901760, %v7621_v13  ;;  %v7640_v13 = vand.u32 4294901760, %v7639_v58 }
 0x93b   : > { %7520 = vmatpush.msra.mxu0 %v13607_v1  ;;  %7605 = vmatpush.msra.mxu1 %v7604_v42  ;;  %v7650_v42 = vand.u32 4294901760, %v13787_v18  ;;  %v7634_v0 = vand.u32 4294901760, %v7633_v28  ;;  %v6717_v28 = vrot.slane %v13536_v21, 2 }
 0x93c   : > { %7686 = vmatpush.msrb.mxu2 %v13674_v4  ;;  %7737 = vmatpush.msrb.mxu3 %v13633_v22 }
 0x93d   : > { %7522 = vmatpush.msra.mxu0 %v13620_v46  ;;  %7511 = vmatmul.f32.gmra.mxu3 %v13577_v63  ;;  %v7628_v63 = vand.u32 4294901760, %v7627_v20  ;;  %v7651_v35 = vsub.f32 %v13787_v18, %v7650_v42  ;;  %v6718_v21 = vsel %vm1126_vm2, %v6715_v45, %v6717_v28 }
 0x93e   : > { %7611 = vmatpush.msra.mxu1 %v7610_v10  ;;  %7689 = vmatpush.msrb.mxu2 %v13685_v32  ;;  %v7656_v10 = vand.u32 4294901760, %v13797_v43  ;;  %v7918_v32 = vld [vmem:[#allocation2 + $0x938] sm:$0xff] }
 0x93f   : > { %7739 = vmatpush.msrb.mxu3 %v13650_v5  ;;  %7524 = vmatpush.msra.mxu0 %v13633_v22 }
 0x940   : > { %7617 = vmatpush.msra.mxu1 %v7616_v50  ;;  %7692 = vmatpush.msrb.mxu2 %v13698_v27  ;;  %v7646_v50 = vand.u32 4294901760, %v7645_v57  ;;  %v7657_v20 = vsub.f32 %v13797_v43, %v7656_v10  ;;  %v7555_v57 = vand.u32 4294901760, %v6718_v21 }
 0x941   : > { %7741 = vmatpush.msrb.mxu3 %v13662_v60  ;;  %7352 = vmatmul.f32.gmra.mxu0 %v13590_v34  ;;  %v6716_v34 = vsel %vm1126_vm2, %v6714_v41, %v6715_v45 }
 0x942   : > { %7623 = vmatpush.msra.mxu1 %v7622_v14  ;;  %7526 = vmatpush.msra.mxu0 %v13650_v5  ;;  %v13830_v14 = vand.u32 4294901760, %v6716_v34  ;;  %v7658_v58 = vand.u32 4294901760, %v7657_v20 }
 0x943   : > { %7695 = vmatpush.msrb.mxu2 %v13713_v39  ;;  %7743 = vmatpush.msrb.mxu3 %v13676_v44  ;;  %v7917_v39 = vld [vmem:[#allocation2 + $0x930] sm:$0xff] }
 0x944   : > { %7629 = vmatpush.msra.mxu1 %v7628_v63  ;;  %7528 = vmatpush.msra.mxu0 %v13662_v60  ;;  %v7652_v63 = vand.u32 4294901760, %v7651_v35  ;;  %v7548_v41 = vsub.f32 %v6716_v34, %v13830_v14 }
 0x945   : > { %7698 = vmatpush.msrb.mxu2 %v13725_v7  ;;  %7745 = vmatpush.msrb.mxu3 %v13691_v24  ;;  %v13955_v7 = vand.u32 4294901760, %v7917_v39 }
 0x946   : > { %7635 = vmatpush.msra.mxu1 %v7634_v0  ;;  %7530 = vmatpush.msra.mxu0 %v13676_v44  ;;  %v7549_v0 = vand.u32 4294901760, %v7548_v41 }
 0x947   : > { %7701 = vmatpush.msrb.mxu2 %v13737_v47  ;;  %7747 = vmatpush.msrb.mxu3 %v13706_v19 }
 0x948   : > { %7641 = vmatpush.msra.mxu1 %v7640_v13  ;;  %7532 = vmatpush.msra.mxu0 %v13691_v24  ;;  %v7550_v45 = vsub.f32 %v7548_v41, %v7549_v0  ;;  %v7556_v13 = vsub.f32 %v6718_v21, %v7555_v57 }
 0x949   : > { %7704 = vmatpush.msrb.mxu2 %v13749_v8  ;;  %7749 = vmatpush.msrb.mxu3 %v13715_v11 }
 0x94a   : > { %7647 = vmatpush.msra.mxu1 %v7646_v50  ;;  %7534 = vmatpush.msra.mxu0 %v13706_v19  ;;  %v7557_v35 = vand.u32 4294901760, %v7556_v13 }
 0x94b   : > { %7707 = vmatpush.msrb.mxu2 %v13763_v12  ;;  %7751 = vmatpush.msrb.mxu3 %v13727_v36 }
 0x94c   : > { %7653 = vmatpush.msra.mxu1 %v7652_v63  ;;  %7536 = vmatpush.msra.mxu0 %v13715_v11 }
 0x94d   : > { %7710 = vmatpush.msrb.mxu2 %v13775_v54  ;;  %7753 = vmatpush.msrb.mxu3 %v13739_v33  ;;  %v7915_v54 = vld [vmem:[#allocation2 + $0x920] sm:$0xff] }
 0x94e   : > { %7659 = vmatpush.msra.mxu1 %v7658_v58  ;;  %7538 = vmatpush.msra.mxu0 %v13727_v36  ;;  %v7913_v58 = vld [vmem:[#allocation2 + $0x910] sm:$0xff] }
 0x94f   : > { %7713 = vmatpush.msrb.mxu2 %v13787_v18  ;;  %7755 = vmatpush.msrb.mxu3 %v13751_v55  ;;  %v13985_v18 = vand.u32 4294901760, %v7915_v54 }
 0x950   : > { %7661 = vmatmul.f32.vlgmr.msra.gmra.mxu1 %v13830_v14  ;;  %7540 = vmatpush.msra.mxu0 %v13739_v33 }
 0x951   : > { %7847 = vmatpush.msrb.mxu1 %v13585_v15  ;;  %7716 = vmatpush.msrb.mxu2 %v13797_v43  ;;  %v7551_v15 = vand.u32 4294901760, %v7550_v45  ;;  %v14018_v45 = vand.u32 4294901760, %v7913_v58 }
 0x952   : > { %7757 = vmatpush.msrb.mxu3 %v13765_v49  ;;  %7719 = vmatmul.f32.vlgmr.msrb.gmra.mxu2 %v7548_v41 }
 0x953   : > { %7849 = vmatpush.msrb.mxu1 %v13597_v56  ;;  %7542 = vmatpush.msra.mxu0 %v13751_v55  ;;  %v7558_v56 = vsub.f32 %v7556_v13, %v7557_v35 }
 0x954   : > { %7759 = vmatpush.msrb.mxu3 %v13777_v38  ;;  %7951 = vmatpush.msra.mxu2 %v13906_v51 }
 0x955   : > { %7763 = vmatmul.f32.vlgmr.msrb.gmra.mxu3 %v7549_v0  ;;  %7851 = vmatpush.msrb.mxu1 %v13607_v1  ;;  %v7559_v1 = vand.u32 4294901760, %v7558_v56 }
 0x956   : > { %7544 = vmatpush.msra.mxu0 %v13765_v49 }
 0x957   : > { %7853 = vmatpush.msrb.mxu1 %v13620_v46  ;;  %v7921_v46 = vld [vmem:[#allocation2 + $0x950] sm:$0xff] }
 0x958   : > { %7546 = vmatpush.msra.mxu0 %v13777_v38  ;;  %7665 = vmatmul.f32.gmra.mxu1 %v7555_v57 }
 0x959   : > { %7552 = vmatmul.f32.vlgmr.msra.gmra.mxu0 %v7551_v15  ;;  %7855 = vmatpush.msrb.mxu1 %v13633_v22  ;;  %v13913_v22 = vsub.f32 %v7922_v3, %v13906_v51 }
 0x95a   : > { %7776 = vmatpush.msrb.mxu0 %v7566_v16  ;;  %7724 = vmatmul.f32.gmra.mxu2 %v7556_v13  ;;  %v7912_v13 = vld [vmem:[#allocation2 + $0x908] sm:$0xff] }
 0x95b   : > { %7857 = vmatpush.msrb.mxu1 %v13650_v5 }
 0x95c   : > { %7780 = vmatpush.msrb.mxu0 %v7572_v9  ;;  %v13915_v9 = vand.u32 4294901760, %v7921_v46 }
 0x95d   : > { %7769 = vmatmul.f32.gmra.mxu3 %v7557_v35  ;;  %7859 = vmatpush.msrb.mxu1 %v13662_v60  ;;  %v7919_v60 = vld [vmem:[#allocation2 + $0x940] sm:$0xff] }
 0x95e   : > { %7784 = vmatpush.msrb.mxu0 %v7578_v17  ;;  %v8001_v17 = vand.u32 4294901760, %v13913_v22  ;;  %v13921_v5 = vsub.f32 %v7921_v46, %v13915_v9  ;;  %7953 = vmatpush.msra.mxu2 %v13915_v9 }
 0x95f   : > { %7861 = vmatpush.msrb.mxu1 %v13676_v44  ;;  %v13933_v44 = vsub.f32 %v7920_v40, %v13924_v29  ;;  %v14033_v40 = vsub.f32 %v7913_v58, %v14018_v45 }
 0x960   : > { %7788 = vmatpush.msrb.mxu0 %v7584_v2  ;;  %v8002_v2 = vsub.f32 %v13913_v22, %v8001_v17  ;;  %v8007_v4 = vand.u32 4294901760, %v13921_v5  ;;  %7955 = vmatpush.msra.mxu2 %v13924_v29 }
 0x961   : > { %7560 = vmatmul.f32.gmra.mxu0 %v7559_v1  ;;  %7863 = vmatpush.msrb.mxu1 %v13691_v24  ;;  %v8013_v27 = vand.u32 4294901760, %v13933_v44  ;;  %v14025_v1 = vand.u32 4294901760, %v7912_v13 }
 0x962   : > { %7792 = vmatpush.msrb.mxu0 %v7590_v31  ;;  %v13937_v31 = vand.u32 4294901760, %v7919_v60  ;;  %v8003_v24 = vand.u32 4294901760, %v8002_v2 }
 0x963   : > { %7865 = vmatpush.msrb.mxu1 %v13706_v19 }
 0x964   : > { %7796 = vmatpush.msrb.mxu0 %v7596_v52  ;;  %v8008_v52 = vsub.f32 %v13921_v5, %v8007_v4  ;;  %v13946_v19 = vsub.f32 %v7919_v60, %v13937_v31  ;;  %7957 = vmatpush.msra.mxu2 %v13937_v31 }
 0x965   : > { %7867 = vmatpush.msrb.mxu1 %v13715_v11  ;;  %8004 = vmatpush.msra.mxu3 %v8003_v24  ;;  %v14041_v24 = vsub.f32 %v7912_v13, %v14025_v1  ;;  %v7908_v13 = vld [vmem:[#allocation2 + $0x8e8] sm:$0xff] }
 0x966   : > { %7800 = vmatpush.msrb.mxu0 %v7602_v6  ;;  %v13948_v6 = vand.u32 4294901760, %v7918_v32  ;;  %v8009_v11 = vand.u32 4294901760, %v8008_v52 }
 0x967   : > { %7869 = vmatpush.msrb.mxu1 %v13727_v36 }
 0x968   : > { %7804 = vmatpush.msrb.mxu0 %v7608_v53  ;;  %v8014_v53 = vsub.f32 %v13933_v44, %v8013_v27  ;;  %v13961_v47 = vsub.f32 %v7918_v32, %v13948_v6  ;;  %8010 = vmatpush.msra.mxu3 %v8009_v11  ;;  %v14562_v11 = vand.u32 4294901760, %v14033_v40 }
 0x969   : > { %7871 = vmatpush.msrb.mxu1 %v13739_v33  ;;  %v7916_v33 = vld [vmem:[#allocation2 + $0x928] sm:$0xff]  ;;  %7959 = vmatpush.msra.mxu2 %v13948_v6 }
 0x96a   : > { %7808 = vmatpush.msrb.mxu0 %v7614_v62  ;;  %v8019_v62 = vand.u32 4294901760, %v13946_v19  ;;  %v13972_v12 = vand.u32 4294901760, %v7916_v33 }
 0x96b   : > { %7873 = vmatpush.msrb.mxu1 %v13751_v55  ;;  %v8015_v55 = vand.u32 4294901760, %v8014_v53  ;;  %7961 = vmatpush.msra.mxu2 %v13955_v7  ;;  %v7910_v53 = vld [vmem:[#allocation2 + $0x8f8] sm:$0xff] }
 0x96c   : > { %7812 = vmatpush.msrb.mxu0 %v7620_v30 }
 0x96d   : > { %7875 = vmatpush.msrb.mxu1 %v13765_v49  ;;  %v8020_v49 = vsub.f32 %v13946_v19, %v8019_v62  ;;  %8016 = vmatpush.msra.mxu3 %v8015_v55  ;;  %v14560_v55 = vand.u32 4294901760, %v14041_v24 }
 0x96e   : > { %7816 = vmatpush.msrb.mxu0 %v7626_v61  ;;  %v13970_v61 = vsub.f32 %v7917_v39, %v13955_v7  ;;  %7963 = vmatpush.msra.mxu2 %v13972_v12 }
 0x96f   : > { %7877 = vmatpush.msrb.mxu1 %v13777_v38 }
 0x970   : > { %7820 = vmatpush.msrb.mxu0 %v7632_v23  ;;  %7879 = vmatmul.f32.vlgmr.msrb.gmra.mxu1 %v13830_v14  ;;  %v8025_v23 = vand.u32 4294901760, %v13961_v47  ;;  %v8031_v38 = vand.u32 4294901760, %v13970_v61 }
 0x971   : > { %8164 = vmatpush.msra.mxu1 %v13906_v51  ;;  %7965 = vmatpush.msra.mxu2 %v13985_v18 }
 0x972   : > { %7824 = vmatpush.msrb.mxu0 %v7638_v48  ;;  %v13983_v48 = vsub.f32 %v7916_v33, %v13972_v12  ;;  %v8026_v43 = vsub.f32 %v13961_v47, %v8025_v23  ;;  %v8032_v50 = vsub.f32 %v13970_v61, %v8031_v38 }
 0x973   : > { %8166 = vmatpush.msra.mxu1 %v13915_v9 }
 0x974   : > { %7828 = vmatpush.msrb.mxu0 %v7644_v59  ;;  %v8021_v59 = vand.u32 4294901760, %v8020_v49  ;;  %v8037_v20 = vand.u32 4294901760, %v13983_v48  ;;  %v8027_v28 = vand.u32 4294901760, %v8026_v43  ;;  %v8033_v41 = vand.u32 4294901760, %v8032_v50 }
 0x975   : > { %8168 = vmatpush.msra.mxu1 %v13924_v29  ;;  %v8056_v43 = vsub.f32 %v14033_v40, %v14562_v11  ;;  %v8062_v50 = vsub.f32 %v14041_v24, %v14560_v55 }
 0x976   : > { %7832 = vmatpush.msrb.mxu0 %v7650_v42  ;;  %v7914_v42 = vld [vmem:[#allocation2 + $0x918] sm:$0xff]  ;;  %8022 = vmatpush.msra.mxu3 %v8021_v59  ;;  %v8038_v21 = vsub.f32 %v13983_v48, %v8037_v20 }
 0x977   : > { %8170 = vmatpush.msra.mxu1 %v13937_v31  ;;  %v14006_v63 = vand.u32 4294901760, %v7914_v42 }
 0x978   : > { %7836 = vmatpush.msrb.mxu0 %v7656_v10  ;;  %7883 = vmatmul.f32.gmra.mxu1 %v7555_v57  ;;  %v13993_v10 = vld [vmem:[#allocation4 + $0x8] ss:$0 sm:$0xff]  ;;  %v8039_v35 = vand.u32 4294901760, %v8038_v21 }
 0x979   : > { %7838 = vmatmul.f32.vlgmr.msrb.gmra.mxu0 %v13830_v14  ;;  %8172 = vmatpush.msra.mxu1 %v13948_v6  ;;  %v14002_v14 = vsub.f32 %v7915_v54, %v13985_v18  ;;  %v14057_v54 = vand.u32 4294901760, %v7910_v53 }
 0x97a   : > { %8106 = vmatpush.msra.mxu0 %v13913_v22  ;;  %8028 = vmatpush.msra.mxu3 %v8027_v28 }
 0x97b   : > { %8174 = vmatpush.msra.mxu1 %v13955_v7  ;;  %v14564_v0 = vand.u32 4294901760, %v14002_v14  ;;  %7967 = vmatpush.msra.mxu2 %v14006_v63  ;;  %v14072_v58 = vsub.f32 %v7910_v53, %v14057_v54 }
 0x97c   : > { %8109 = vmatpush.msra.mxu0 %v13921_v5  ;;  %8034 = vmatpush.msra.mxu3 %v8033_v41  ;;  %v8057_v41 = vand.u32 4294901760, %v8056_v43 }
 0x97d   : > { %8176 = vmatpush.msra.mxu1 %v13972_v12  ;;  %v8044_v56 = vsub.f32 %v14002_v14, %v14564_v0  ;;  %7969 = vmatpush.msra.mxu2 %v14018_v45  ;;  %v7936_v0 = vld [vmem:[#allocation2 + $0x9c8] sm:$0xff] }
 0x97e   : > { %8112 = vmatpush.msra.mxu0 %v13933_v44  ;;  %8040 = vmatpush.msra.mxu3 %v8039_v35  ;;  %v8063_v35 = vand.u32 4294901760, %v8062_v50 }
 0x97f   : > { %8178 = vmatpush.msra.mxu1 %v13985_v18  ;;  %v8045_v32 = vand.u32 4294901760, %v8044_v56  ;;  %7971 = vmatpush.msra.mxu2 %v14025_v1 }
 0x980   : > { %8115 = vmatpush.msra.mxu0 %v13946_v19 }
 0x981   : > { %7842 = vmatmul.f32.gmra.mxu0 %v7555_v57  ;;  %v14015_v57 = vsub.f32 %v7914_v42, %v14006_v63  ;;  %8180 = vmatpush.msra.mxu1 %v14006_v63 }
 0x982   : > { %v13908_v16 = vpop.f32.mrf.mxu1  ;;  %8118 = vmatpush.msra.mxu0 %v13961_v47  ;;  %8046 = vmatpush.msra.mxu3 %v8045_v32  ;;  %v7932_v47 = vld [vmem:[#allocation2 + $0x9a8] sm:$0xff] }
 0x983   : > { %v14563_v46 = vand.u32 4294901760, %v14015_v57  ;;  %8182 = vmatpush.msra.mxu1 %v14018_v45 }
 0x984   : > { %8121 = vmatpush.msra.mxu0 %v13970_v61 }
 0x985   : > { %v8050_v39 = vsub.f32 %v14015_v57, %v14563_v46  ;;  %8184 = vmatpush.msra.mxu1 %v14025_v1 }
 0x986   : > { %8124 = vmatpush.msra.mxu0 %v13983_v48  ;;  %v7930_v48 = vld [vmem:[#allocation2 + $0x998] sm:$0xff] }
 0x987   : > { %v8051_v59 = vand.u32 4294901760, %v8050_v39  ;;  %v14090_v39 = vand.u32 4294901760, %v7908_v13 }
 0x988   : > { %8127 = vmatpush.msra.mxu0 %v14002_v14 }
 0x989   : > { %8052 = vmatpush.msra.mxu3 %v8051_v59 }
 0x98a   : > { %v13910_v37 = vpop.f32.mrf.mxu0  ;;  %v13965_v30 = vpop.f32.mrf.mxu2  ;;  %8130 = vmatpush.msra.mxu0 %v14015_v57 }
 0x98b   : > { %v13957_v36 = vpop.f32.mrf.mxu1  ;;  %v6810_v15 = vadd.f32 %v13993_v10, %v13910_v37  ;;  %v7911_v37 = vld [vmem:[#allocation2 + $0x900] sm:$0xff]  ;;  %8058 = vmatpush.msra.mxu3 %v8057_v41  ;;  %v14105_v41 = vsub.f32 %v7908_v13, %v14090_v39 }
 0x98c   : > { %v13995_v34 = vpop.f32.mrf.mxu3  ;;  %v14043_v52 = vand.u32 4294901760, %v7911_v37  ;;  %8133 = vmatpush.msra.mxu0 %v14033_v40 }
 0x98d   : > { %v6919_v33 = vadd.f32 %v13908_v16, %v6810_v15  ;;  %v7909_v16 = vld [vmem:[#allocation2 + $0x8f0] sm:$0xff]  ;;  %8064 = vmatpush.msra.mxu3 %v8063_v35  ;;  %v14561_v35 = vand.u32 4294901760, %v14105_v41 }
 0x98e   : > { %v14055_v49 = vsub.f32 %v7911_v37, %v14043_v52  ;;  %8136 = vmatpush.msra.mxu0 %v14041_v24  ;;  %8186 = vmatpush.msra.mxu1 %v14043_v52  ;;  %v14077_v21 = vand.u32 4294901760, %v7909_v16  ;;  %v14557_v37 = vand.u32 4294901760, %v14072_v58 }
 0x98f   : > { %7973 = vmatpush.msra.mxu2 %v14043_v52  ;;  %v6977_v15 = vadd.f32 %v13965_v30, %v6919_v33  ;;  %v7907_v30 = vld [vmem:[#allocation2 + $0x8e0] sm:$0xff] }
 0x990   : > { %v14558_v28 = vand.u32 4294901760, %v14055_v49  ;;  %8139 = vmatpush.msra.mxu0 %v14055_v49  ;;  %8188 = vmatpush.msra.mxu1 %v14057_v54  ;;  %v14087_v32 = vsub.f32 %v7909_v16, %v14077_v21  ;;  %v8074_v59 = vsub.f32 %v14072_v58, %v14557_v37  ;;  %v14097_v43 = vand.u32 4294901760, %v7907_v30 }
 0x991   : > { %7975 = vmatpush.msra.mxu2 %v14057_v54 }
 0x992   : > { %v8068_v56 = vsub.f32 %v14055_v49, %v14558_v28  ;;  %8142 = vmatpush.msra.mxu0 %v14072_v58  ;;  %8190 = vmatpush.msra.mxu1 %v14077_v21  ;;  %v14559_v50 = vand.u32 4294901760, %v14087_v32  ;;  %v8075_v37 = vand.u32 4294901760, %v8074_v59  ;;  %v14110_v28 = vsub.f32 %v7907_v30, %v14097_v43  ;;  %v7938_v59 = vld [vmem:[#allocation2 + $0x9d8] sm:$0xff] }
 0x993   : > { %v14036_v60 = vpop.f32.mrf.mxu2  ;;  %7977 = vmatpush.msra.mxu2 %v14077_v21  ;;  %v14128_v55 = vand.u32 4294901760, %v7938_v59 }
 0x994   : > { %v13967_v8 = vpop.f32.mrf.mxu0  ;;  %v8069_v33 = vand.u32 4294901760, %v8068_v56  ;;  %8145 = vmatpush.msra.mxu0 %v14087_v32  ;;  %8192 = vmatpush.msra.mxu1 %v14090_v39  ;;  %v8080_v13 = vsub.f32 %v14087_v32, %v14559_v50  ;;  %v8091_v30 = vand.u32 4294901760, %v14110_v28  ;;  %v8086_v50 = vsub.f32 %v14105_v41, %v14561_v35 }
 0x995   : > { %v14029_v3 = vpop.f32.mrf.mxu1  ;;  %v6818_v53 = vadd.f32 %v13993_v10, %v13967_v8  ;;  %v7021_v8 = vadd.f32 %v13995_v34, %v6977_v15  ;;  %7979 = vmatpush.msra.mxu2 %v14090_v39 }
 0x996   : > { %v14065_v42 = vpop.f32.mrf.mxu3  ;;  %8070 = vmatpush.msra.mxu3 %v8069_v33  ;;  %8148 = vmatpush.msra.mxu0 %v14105_v41  ;;  %v8081_v33 = vand.u32 4294901760, %v8080_v13 }
 0x997   : > { %v6923_v34 = vadd.f32 %v13957_v36, %v6818_v53  ;;  %8194 = vmatpush.msra.mxu1 %v14097_v43  ;;  %7981 = vmatpush.msra.mxu2 %v14097_v43  ;;  %v7937_v53 = vld [vmem:[#allocation2 + $0x9d0] sm:$0xff] }
 0x998   : > { %8076 = vmatpush.msra.mxu3 %v8075_v37  ;;  %8151 = vmatpush.msra.mxu0 %v14110_v28  ;;  %v8087_v37 = vand.u32 4294901760, %v8086_v50  ;;  %v14139_v13 = vand.u32 4294901760, %v7937_v53 }
 0x999   : > { %8211 = vmatpush.msrb.mxu2 %v8001_v17  ;;  %v6982_v35 = vadd.f32 %v14036_v60, %v6923_v34  ;;  %v14147_v17 = vand.u32 4294901760, %v7936_v0 }
 0x99a   : > { %8082 = vmatpush.msra.mxu3 %v8081_v33  ;;  %8323 = vmatpush.msrb.mxu0 %v14128_v55  ;;  %v14150_v50 = vsub.f32 %v7937_v53, %v14139_v13 }
 0x99b   : > { %8215 = vmatpush.msrb.mxu2 %v8007_v4  ;;  %v14164_v34 = vsub.f32 %v7936_v0, %v14147_v17 }
 0x99c   : > { %8088 = vmatpush.msra.mxu3 %v8087_v37  ;;  %8325 = vmatpush.msrb.mxu0 %v14139_v13  ;;  %v8379_v4 = vand.u32 4294901760, %v14150_v50 }
 0x99d   : > { %8219 = vmatpush.msrb.mxu2 %v8013_v27  ;;  %v8385_v0 = vand.u32 4294901760, %v14164_v34 }
 0x99e   : > { %v14038_v2 = vpop.f32.mrf.mxu0  ;;  %8327 = vmatpush.msrb.mxu0 %v14147_v17  ;;  %v8380_v53 = vsub.f32 %v14150_v50, %v8379_v4 }
 0x99f   : > { %v14101_v16 = vpop.f32.mrf.mxu1  ;;  %v7181_v10 = vpop.f32.mrf.mxu2  ;;  %v7096_v15 = vadd.f32 %v14038_v2, %v7021_v8  ;;  %v8092_v2 = vsub.f32 %v14110_v28, %v8091_v30  ;;  %v14137_v8 = vsub.f32 %v7938_v59, %v14128_v55  ;;  %v7935_v59 = vld [vmem:[#allocation2 + $0x9c0] sm:$0xff]  ;;  %8223 = vmatpush.msrb.mxu2 %v8019_v62  ;;  %v8386_v62 = vsub.f32 %v14164_v34, %v8385_v0 }
 0x9a0   : > { %v7290_v36 = vpop.f32.mrf.mxu3  ;;  %v14161_v60 = vand.u32 4294901760, %v7935_v59  ;;  %v8381_v19 = vand.u32 4294901760, %v8380_v53 }
 0x9a1   : > { %v7137_v11 = vadd.f32 %v14029_v3, %v7096_v15  ;;  %v8093_v46 = vand.u32 4294901760, %v8092_v2  ;;  %v8373_v22 = vand.u32 4294901760, %v14137_v8  ;;  %v7027_v15 = vadd.f32 %v14065_v42, %v6982_v35  ;;  %v7933_v42 = vld [vmem:[#allocation2 + $0x9b0] sm:$0xff]  ;;  %8227 = vmatpush.msrb.mxu2 %v8025_v23 }
 0x9a2   : > { %8329 = vmatpush.msrb.mxu0 %v14161_v60 }
 0x9a3   : > { %8094 = vmatpush.msra.mxu3 %v8093_v46  ;;  %v8374_v5 = vsub.f32 %v14137_v8, %v8373_v22  ;;  %v7182_v44 = vadd.f32 %v7181_v10, %v7137_v11  ;;  %v7934_v46 = vld [vmem:[#allocation2 + $0x9b8] sm:$0xff]  ;;  %v14187_v10 = vand.u32 4294901760, %v7933_v42  ;;  %8231 = vmatpush.msrb.mxu2 %v8031_v38  ;;  %v7931_v38 = vld [vmem:[#allocation2 + $0x9a0] sm:$0xff] }
 0x9a4   : > { %v14175_v37 = vand.u32 4294901760, %v7934_v46 }
 0x9a5   : > { %8282 = vmatpush.msrb.mxu3 %v13906_v51  ;;  %v8375_v2 = vand.u32 4294901760, %v8374_v5  ;;  %v14179_v51 = vsub.f32 %v7935_v59, %v14161_v60  ;;  %v7291_v23 = vadd.f32 %v7290_v36, %v7182_v44  ;;  %v8387_v59 = vand.u32 4294901760, %v8386_v62  ;;  %8235 = vmatpush.msrb.mxu2 %v8037_v20 }
 0x9a6   : > { %8331 = vmatpush.msrb.mxu0 %v14175_v37  ;;  %v14206_v61 = vsub.f32 %v7933_v42, %v14187_v10  ;;  %v14665_v20 = vand.u32 4294901760, %v14002_v14  ;;  %v14227_v62 = vand.u32 4294901760, %v7930_v48 }
 0x9a7   : > { %8284 = vmatpush.msrb.mxu3 %v13915_v9  ;;  %8376 = vmatpush.msrb.mxu1 %v8375_v2  ;;  %v8391_v35 = vand.u32 4294901760, %v14179_v51 }
 0x9a8   : > { %v7099_v56 = vpop.f32.mrf.mxu0  ;;  %8333 = vmatpush.msrb.mxu0 %v14187_v10  ;;  %v14566_v53 = vand.u32 4294901760, %v14206_v61  ;;  %8239 = vmatpush.msrb.mxu2 %v14665_v20  ;;  %v7928_v20 = vld [vmem:[#allocation2 + $0x988] sm:$0xff] }
 0x9a9   : > { %v7189_v27 = vpop.f32.mrf.mxu2  ;;  %v7100_v11 = vadd.f32 %v7099_v56, %v7027_v15  ;;  %v14190_v56 = vsub.f32 %v7934_v46, %v14175_v37  ;;  %8286 = vmatpush.msrb.mxu3 %v13924_v29  ;;  %8382 = vmatpush.msrb.mxu1 %v8381_v19  ;;  %v14198_v15 = vand.u32 4294901760, %v7932_v47  ;;  %v8392_v29 = vsub.f32 %v14179_v51, %v8391_v35 }
 0x9aa   : > { %v14154_v3 = vpop.f32.mrf.mxu1  ;;  %v7294_v9 = vpop.f32.mrf.mxu3 }
 0x9ab   : > { %v14567_v5 = vand.u32 4294901760, %v14190_v56  ;;  %v7141_v46 = vadd.f32 %v14101_v16, %v7100_v11  ;;  %8288 = vmatpush.msrb.mxu3 %v13937_v31  ;;  %8388 = vmatpush.msrb.mxu1 %v8387_v59  ;;  %v14214_v16 = vand.u32 4294901760, %v7931_v38  ;;  %v14217_v31 = vsub.f32 %v7932_v47, %v14198_v15  ;;  %v7929_v59 = vld [vmem:[#allocation2 + $0x990] sm:$0xff] }
 0x9ac   : > { %8335 = vmatpush.msrb.mxu0 %v14198_v15  ;;  %v8393_v2 = vand.u32 4294901760, %v8392_v29 }
 0x9ad   : > { %v8398_v36 = vsub.f32 %v14190_v56, %v14567_v5  ;;  %8290 = vmatpush.msrb.mxu3 %v13948_v6  ;;  %v14565_v19 = vand.u32 4294901760, %v14217_v31  ;;  %v7190_v47 = vadd.f32 %v7189_v27, %v7141_v46  ;;  %v8404_v6 = vsub.f32 %v14206_v61, %v14566_v53 }
 0x9ae   : > { %8337 = vmatpush.msrb.mxu0 %v14214_v16  ;;  %8394 = vmatpush.msrb.mxu1 %v8393_v2  ;;  %v14234_v14 = vsub.f32 %v7931_v38, %v14214_v16  ;;  %v14240_v27 = vand.u32 4294901760, %v7929_v59  ;;  %v14243_v46 = vsub.f32 %v7930_v48, %v14227_v62  ;;  %v14252_v5 = vand.u32 4294901760, %v7928_v20 }
 0x9af   : > { %v8399_v42 = vand.u32 4294901760, %v8398_v36  ;;  %8292 = vmatpush.msrb.mxu3 %v13955_v7  ;;  %v8410_v29 = vsub.f32 %v14217_v31, %v14565_v19  ;;  %v14666_v7 = vand.u32 4294901760, %v14015_v57  ;;  %v8405_v38 = vand.u32 4294901760, %v8404_v6 }
 0x9b0   : > { %8339 = vmatpush.msrb.mxu0 %v14227_v62  ;;  %v14569_v2 = vand.u32 4294901760, %v14234_v14  ;;  %v14568_v53 = vand.u32 4294901760, %v14243_v46  ;;  %v14667_v48 = vand.u32 4294901760, %v14033_v40  ;;  %v7295_v57 = vadd.f32 %v7294_v9, %v7190_v47 }
 0x9b1   : > { %8243 = vmatpush.msrb.mxu2 %v14666_v7  ;;  %8294 = vmatpush.msrb.mxu3 %v13972_v12  ;;  %v8411_v19 = vand.u32 4294901760, %v8410_v29  ;;  %v14270_v9 = vsub.f32 %v7928_v20, %v14252_v5 }
 0x9b2   : > { %8400 = vmatpush.msrb.mxu1 %v8399_v42  ;;  %8341 = vmatpush.msrb.mxu0 %v14240_v27  ;;  %v8416_v12 = vsub.f32 %v14234_v14, %v14569_v2  ;;  %v8422_v42 = vsub.f32 %v14243_v46, %v14568_v53 }
 0x9b3   : > { %8247 = vmatpush.msrb.mxu2 %v14667_v48  ;;  %8296 = vmatpush.msrb.mxu3 %v13985_v18  ;;  %v14668_v18 = vand.u32 4294901760, %v14041_v24  ;;  %v14570_v2 = vand.u32 4294901760, %v14270_v9  ;;  %v14669_v24 = vand.u32 4294901760, %v14055_v49 }
 0x9b4   : > { %v14223_v11 = vpop.f32.mrf.mxu1  ;;  %8406 = vmatpush.msrb.mxu1 %v8405_v38  ;;  %8343 = vmatpush.msrb.mxu0 %v14252_v5  ;;  %v7926_v38 = vld [vmem:[#allocation2 + $0x978] sm:$0xff]  ;;  %v8423_v53 = vand.u32 4294901760, %v8422_v42 }
 0x9b5   : > { %v7348_v33 = vpop.f32.mrf.mxu0  ;;  %8251 = vmatpush.msrb.mxu2 %v14668_v18  ;;  %8298 = vmatpush.msrb.mxu3 %v14006_v63  ;;  %v14278_v20 = vand.u32 4294901760, %v7926_v38 }
 0x9b6   : > { %v7349_v44 = vadd.f32 %v7348_v33, %v7291_v23  ;;  %v7467_v33 = vpop.f32.mrf.mxu2  ;;  %v7508_v7 = vpop.f32.mrf.mxu3  ;;  %8412 = vmatpush.msrb.mxu1 %v8411_v19 }
 0x9b7   : > { %8255 = vmatpush.msrb.mxu2 %v14669_v24  ;;  %8300 = vmatpush.msrb.mxu3 %v14018_v45  ;;  %v14670_v45 = vand.u32 4294901760, %v14072_v58  ;;  %v7924_v24 = vld [vmem:[#allocation2 + $0x968] sm:$0xff] }
 0x9b8   : > { %v7393_v36 = vadd.f32 %v14154_v3, %v7349_v44  ;;  %v14261_v3 = vsub.f32 %v7929_v59, %v14240_v27  ;;  %v7927_v44 = vld [vmem:[#allocation2 + $0x980] sm:$0xff]  ;;  %v8417_v59 = vand.u32 4294901760, %v8416_v12 }
 0x9b9   : > { %v14267_v40 = vand.u32 4294901760, %v7927_v44  ;;  %8259 = vmatpush.msrb.mxu2 %v14670_v45  ;;  %8302 = vmatpush.msrb.mxu3 %v14025_v1 }
 0x9ba   : > { %v7468_v47 = vadd.f32 %v7467_v33, %v7393_v36  ;;  %v14571_v29 = vand.u32 4294901760, %v14261_v3  ;;  %8418 = vmatpush.msrb.mxu1 %v8417_v59  ;;  %v8434_v36 = vsub.f32 %v14270_v9, %v14570_v2 }
 0x9bb   : > { %8345 = vmatpush.msrb.mxu0 %v14267_v40  ;;  %v14287_v19 = vsub.f32 %v7927_v44, %v14267_v40  ;;  %8304 = vmatpush.msrb.mxu3 %v14043_v52  ;;  %v14672_v52 = vand.u32 4294901760, %v14105_v41 }
 0x9bc   : > { %v8428_v63 = vsub.f32 %v14261_v3, %v14571_v29  ;;  %v7509_v12 = vadd.f32 %v7508_v7, %v7468_v47  ;;  %8424 = vmatpush.msrb.mxu1 %v8423_v53  ;;  %v8435_v2 = vand.u32 4294901760, %v8434_v36  ;;  %v14305_v29 = vand.u32 4294901760, %v7924_v24  ;;  %v7923_v53 = vld [vmem:[#allocation2 + $0x960] sm:$0xff] }
 0x9bd   : > { %8347 = vmatpush.msrb.mxu0 %v14278_v20  ;;  %v8439_v59 = vand.u32 4294901760, %v14287_v19  ;;  %8306 = vmatpush.msrb.mxu3 %v14057_v54 }
 0x9be   : > { %v7353_v23 = vpop.f32.mrf.mxu0  ;;  %v7471_v44 = vpop.f32.mrf.mxu2  ;;  %v8429_v18 = vand.u32 4294901760, %v8428_v63  ;;  %v14321_v63 = vand.u32 4294901760, %v7923_v53 }
 0x9bf   : > { %v7354_v6 = vadd.f32 %v7353_v23, %v7295_v57  ;;  %v7925_v23 = vld [vmem:[#allocation2 + $0x970] sm:$0xff]  ;;  %v14296_v57 = vsub.f32 %v7926_v38, %v14278_v20  ;;  %v8440_v1 = vsub.f32 %v14287_v19, %v8439_v59  ;;  %8308 = vmatpush.msrb.mxu3 %v14077_v21 }
 0x9c0   : > { %v14293_v49 = vand.u32 4294901760, %v7925_v23  ;;  %8430 = vmatpush.msrb.mxu1 %v8429_v18 }
 0x9c1   : > { %v7399_v42 = vadd.f32 %v14223_v11, %v7354_v6  ;;  %v14575_v38 = vand.u32 4294901760, %v14296_v57  ;;  %v14671_v11 = vand.u32 4294901760, %v14087_v32  ;;  %v14324_v32 = vsub.f32 %v7924_v24, %v14305_v29  ;;  %8310 = vmatpush.msrb.mxu3 %v14090_v39 }
 0x9c2   : > { %8349 = vmatpush.msrb.mxu0 %v14293_v49  ;;  %v14308_v58 = vsub.f32 %v7925_v23, %v14293_v49  ;;  %v7512_v23 = vpop.f32.mrf.mxu3  ;;  %8436 = vmatpush.msrb.mxu1 %v8435_v2  ;;  %v8441_v36 = vand.u32 4294901760, %v8440_v1  ;;  %v14335_v24 = vsub.f32 %v7923_v53, %v14321_v63 }
 0x9c3   : > { %8263 = vmatpush.msrb.mxu2 %v14671_v11  ;;  %v8446_v47 = vsub.f32 %v14296_v57, %v14575_v38  ;;  %v14572_v18 = vand.u32 4294901760, %v14324_v32  ;;  %8312 = vmatpush.msrb.mxu3 %v14097_v43 }
 0x9c4   : > { %8351 = vmatpush.msrb.mxu0 %v14305_v29  ;;  %v14573_v6 = vand.u32 4294901760, %v14308_v58  ;;  %8442 = vmatpush.msrb.mxu1 %v8441_v36 }
 0x9c5   : > { %8267 = vmatpush.msrb.mxu2 %v14672_v52  ;;  %v8447_v45 = vand.u32 4294901760, %v8446_v47 }
 0x9c6   : > { %8353 = vmatpush.msrb.mxu0 %v14321_v63 }
 0x9c7   : > { %8271 = vmatpush.msrb.mxu2 %v8091_v30  ;;  %8448 = vmatpush.msrb.mxu1 %v8447_v45 }
 0x9cd   : > { %v7662_v48 = vpop.f32.mrf.mxu1 }
 0x9d5   : > { %v7666_v54 = vpop.f32.mrf.mxu1  ;;  %v7720_v11 = vpop.f32.mrf.mxu2 }
 0x9d6   : > { %v7553_v33 = vpop.f32.mrf.mxu0 }
 0x9d7   : > { %v7554_v7 = vadd.f32 %v7553_v33, %v7509_v12  ;;  %v7472_v33 = vadd.f32 %v7471_v44, %v7399_v42  ;;  %v8452_v12 = vsub.f32 %v14308_v58, %v14573_v6  ;;  %v8458_v42 = vsub.f32 %v14324_v32, %v14572_v18 }
 0x9d8   : > { %v14574_v44 = vand.u32 4294901760, %v14335_v24  ;;  %v7764_v47 = vpop.f32.mrf.mxu3 }
 0x9d9   : > { %v7663_v41 = vadd.f32 %v7662_v48, %v7554_v7  ;;  %v8453_v2 = vand.u32 4294901760, %v8452_v12  ;;  %v7513_v53 = vadd.f32 %v7512_v23, %v7472_v33  ;;  %v8459_v28 = vand.u32 4294901760, %v8458_v42 }
 0x9da   : > { %v8464_v21 = vsub.f32 %v14335_v24, %v14574_v44 }
 0x9db   : > { %8454 = vmatpush.msrb.mxu1 %v8453_v2  ;;  %v7721_v30 = vadd.f32 %v7720_v11, %v7663_v41 }
 0x9dc   : > { %v8465_v7 = vand.u32 4294901760, %v8464_v21 }
 0x9dd   : > { %8460 = vmatpush.msrb.mxu1 %v8459_v28  ;;  %v7765_v52 = vadd.f32 %v7764_v47, %v7721_v30  ;;  %v7725_v33 = vpop.f32.mrf.mxu2 }
 0x9de   : > { %v7561_v1 = vpop.f32.mrf.mxu0 }
 0x9df   : > { %v7562_v48 = vadd.f32 %v7561_v1, %v7513_v53  ;;  %8466 = vmatpush.msrb.mxu1 %v8465_v7 }
 0x9e0   : > { %v7770_v6 = vpop.f32.mrf.mxu3 }
 0x9e1   : > { %v7667_v36 = vadd.f32 %v7666_v54, %v7562_v48 }
 0x9e3   : > { %v7726_v23 = vadd.f32 %v7725_v33, %v7667_v36 }
 0x9e5   : > { %v7771_v44 = vadd.f32 %v7770_v6, %v7726_v23 }
 0x9ed   : > { %v7880_v12 = vpop.f32.mrf.mxu1 }
 0x9f5   : > { %v7884_v2 = vpop.f32.mrf.mxu1 }
 0x9f6   : > { %v7839_v39 = vpop.f32.mrf.mxu0 }
 0x9f7   : > { %v7840_v45 = vadd.f32 %v7839_v39, %v7765_v52 }
 0x9f9   : > { %v7881_v42 = vadd.f32 %v7880_v12, %v7840_v45 }
 0x9fb   : > { %v7887_v18 = vmax.f32 %v7881_v42, 0.0 }
 0x9fd   : > { %v7889_v43 = vmul.f32 %v7887_v18, %v10059_v26 }
 0x9fe   : > { %v7843_v38 = vpop.f32.mrf.mxu0 }
 0x9ff   : > { %v7844_v41 = vadd.f32 %v7843_v38, %v7771_v44  ;;  %v7893_v1 = vrot.slane %v7889_v43, 7 }
 0xa01   : > { %v7885_v11 = vadd.f32 %v7884_v2, %v7844_v41  ;;  %v7898_v54 = vsel %vm298_vm0, 0.0, %v7893_v1 }
 0xa02   : > { %v7902_v7 = vrot.slane %v7898_v54, 1 }
 0xa03   : > { %v7888_v53 = vmax.f32 %v7885_v11, 0.0 }
 0xa05   : > { %v7890_v28 = vmul.f32 %v7888_v53, %v10068_v25 }
 0xa07   : > { %v7894_v21 = vrot.slane %v7890_v28, 7 }
 0xa09   : > { %v7895_v30 = vsel %vm298_vm0, %v7893_v1, %v7894_v21  ;;  %v7899_v48 = vsel %vm298_vm0, %v7894_v21, 0.0 }
 0xa0a   : > { %v7903_v47 = vrot.slane %v7895_v30, 1  ;;  %v7905_v6 = vrot.slane %v7899_v48, 1 }
 0xa0c   : > { %v7904_v52 = vsel %vm309_vm1, %v7902_v7, %v7903_v47  ;;  %v7906_v38 = vsel %vm309_vm1, %v7903_v47, %v7905_v6  ;;  %v7944_v41 = vrot.slane %v7905_v6, 1 }
 0xa0d   : > { %v7941_v18 = vrot.slane %v7904_v52, 1  ;;  %v14356_v44 = vand.u32 4294901760, %v7904_v52  ;;  %v7942_v36 = vrot.slane %v7906_v38, 1  ;;  %v14361_v45 = vand.u32 4294901760, %v7906_v38 }
 0xa0f   : > { %8096 = vmatmul.f32.vlgmr.msra.gmra.mxu3 %v14356_v44  ;;  %v7983_v12 = vsub.f32 %v7904_v52, %v14356_v44  ;;  %v7943_v39 = vsel %vm309_vm1, %v7941_v18, %v7942_v36  ;;  %v7991_v43 = vsub.f32 %v7906_v38, %v14361_v45 }
 0xa10   : > { %8536 = vmatpush.msra.mxu3 %v14128_v55  ;;  %v14367_v23 = vand.u32 4294901760, %v7943_v39 }
 0xa11   : > { %8154 = vmatmul.f32.vlgmr.msra.gmra.mxu0 %v7983_v12  ;;  %v7984_v33 = vand.u32 4294901760, %v7983_v12  ;;  %v7992_v11 = vand.u32 4294901760, %v7991_v43 }
 0xa12   : > { %8538 = vmatpush.msra.mxu3 %v14139_v13  ;;  %8583 = vmatpush.msra.mxu0 %v8373_v22  ;;  %v14378_v22 = vsub.f32 %v7943_v39, %v14367_v23 }
 0xa13   : > { %8198 = vmatmul.f32.vlgmr.msra.gmra.mxu1 %v7984_v33  ;;  %v7985_v42 = vsub.f32 %v7983_v12, %v7984_v33 }
 0xa14   : > { %8540 = vmatpush.msra.mxu3 %v14147_v17  ;;  %8587 = vmatpush.msra.mxu0 %v8379_v4  ;;  %v8356_v4 = vand.u32 4294901760, %v14378_v22 }
 0xa15   : > { %8654 = vmatpush.msra.mxu1 %v14128_v55  ;;  %v7986_v2 = vand.u32 4294901760, %v7985_v42  ;;  %v7945_v55 = vsel %vm309_vm1, %v7942_v36, %v7944_v41 }
 0xa16   : > { %8542 = vmatpush.msra.mxu3 %v14161_v60  ;;  %8591 = vmatpush.msra.mxu0 %v8385_v0  ;;  %v14673_v0 = vand.u32 4294901760, %v14190_v56 }
 0xa17   : > { %8656 = vmatpush.msra.mxu1 %v14139_v13  ;;  %7987 = vmatmul.f32.vlgmr.msra.gmra.mxu2 %v7986_v2  ;;  %v7993_v13 = vsub.f32 %v7991_v43, %v7992_v11 }
 0xa18   : > { %8100 = vmatmul.f32.gmra.mxu3 %v14361_v45  ;;  %8478 = vmatpush.msra.mxu2 %v14137_v8  ;;  %v14394_v8 = vand.u32 4294901760, %v7945_v55 }
 0xa19   : > { %8544 = vmatpush.msra.mxu3 %v14175_v37  ;;  %8595 = vmatpush.msra.mxu0 %v8391_v35  ;;  %v7994_v35 = vand.u32 4294901760, %v7993_v13 }
 0xa1a   : > { %8658 = vmatpush.msra.mxu1 %v14147_v17  ;;  %8159 = vmatmul.f32.gmra.mxu0 %v7991_v43  ;;  %v14674_v17 = vand.u32 4294901760, %v14206_v61 }
 0xa1b   : > { %8481 = vmatpush.msra.mxu2 %v14150_v50  ;;  %8546 = vmatpush.msra.mxu3 %v14187_v10  ;;  %v8357_v50 = vsub.f32 %v14378_v22, %v8356_v4 }
 0xa1c   : > { %8599 = vmatpush.msra.mxu0 %v14673_v0  ;;  %8660 = vmatpush.msra.mxu1 %v14161_v60  ;;  %v14675_v60 = vand.u32 4294901760, %v14217_v31 }
 0xa1d   : > { %8204 = vmatmul.f32.gmra.mxu1 %v7992_v11  ;;  %8484 = vmatpush.msra.mxu2 %v14164_v34  ;;  %v8363_v34 = vsub.f32 %v7945_v55, %v14394_v8  ;;  %v8358_v1 = vand.u32 4294901760, %v8357_v50 }
 0xa1e   : > { %8548 = vmatpush.msra.mxu3 %v14198_v15  ;;  %8603 = vmatpush.msra.mxu0 %v14674_v17 }
 0xa1f   : > { %8662 = vmatpush.msra.mxu1 %v14175_v37  ;;  %8487 = vmatpush.msra.mxu2 %v14179_v51  ;;  %v14676_v37 = vand.u32 4294901760, %v14234_v14  ;;  %v8364_v51 = vand.u32 4294901760, %v8363_v34 }
 0xa20   : > { %8550 = vmatpush.msra.mxu3 %v14214_v16  ;;  %8607 = vmatpush.msra.mxu0 %v14675_v60 }
 0xa21   : > { %8664 = vmatpush.msra.mxu1 %v14187_v10  ;;  %7995 = vmatmul.f32.gmra.mxu2 %v7994_v35  ;;  %v14677_v10 = vand.u32 4294901760, %v14243_v46 }
 0xa22   : > { %8314 = vmatmul.f32.vlgmr.msrb.gmra.mxu3 %v14356_v44  ;;  %8490 = vmatpush.msra.mxu2 %v14190_v56  ;;  %v14678_v56 = vand.u32 4294901760, %v14261_v3 }
 0xa23   : > { %8552 = vmatpush.msra.mxu3 %v14227_v62  ;;  %8611 = vmatpush.msra.mxu0 %v14676_v37 }
 0xa24   : > { %8666 = vmatpush.msra.mxu1 %v14198_v15  ;;  %8359 = vmatmul.f32.vlgmr.msrb.gmra.mxu0 %v8358_v1  ;;  %v8365_v15 = vsub.f32 %v8363_v34, %v8364_v51 }
 0xa25   : > { %8493 = vmatpush.msra.mxu2 %v14206_v61  ;;  %8554 = vmatpush.msra.mxu3 %v14240_v27  ;;  %v14679_v61 = vand.u32 4294901760, %v14270_v9 }
 0xa26   : > { %8615 = vmatpush.msra.mxu0 %v14677_v10  ;;  %8668 = vmatpush.msra.mxu1 %v14214_v16  ;;  %v8366_v16 = vand.u32 4294901760, %v8365_v15 }
 0xa27   : > { %8468 = vmatmul.f32.vlgmr.msrb.gmra.mxu1 %v14367_v23  ;;  %8496 = vmatpush.msra.mxu2 %v14217_v31  ;;  %v14680_v31 = vand.u32 4294901760, %v14296_v57 }
 0xa28   : > { %8556 = vmatpush.msra.mxu3 %v14252_v5  ;;  %8619 = vmatpush.msra.mxu0 %v14678_v56 }
 0xa29   : > { %8670 = vmatpush.msra.mxu1 %v14227_v62  ;;  %8499 = vmatpush.msra.mxu2 %v14234_v14  ;;  %v14681_v62 = vand.u32 4294901760, %v14308_v58  ;;  %v14683_v14 = vand.u32 4294901760, %v14335_v24 }
 0xa2a   : > { %8558 = vmatpush.msra.mxu3 %v14267_v40  ;;  %8623 = vmatpush.msra.mxu0 %v14679_v61 }
 0xa2b   : > { %8672 = vmatpush.msra.mxu1 %v14240_v27  ;;  %8273 = vmatmul.f32.vlgmr.msrb.gmra.mxu2 %v14356_v44 }
 0xa2c   : > { %8318 = vmatmul.f32.gmra.mxu3 %v14361_v45  ;;  %8502 = vmatpush.msra.mxu2 %v14243_v46 }
 0xa2d   : > { %8560 = vmatpush.msra.mxu3 %v14278_v20  ;;  %8627 = vmatpush.msra.mxu0 %v8439_v59 }
 0xa2e   : > { %8674 = vmatpush.msra.mxu1 %v14252_v5  ;;  %8367 = vmatmul.f32.gmra.mxu0 %v8366_v16  ;;  %v14682_v5 = vand.u32 4294901760, %v14324_v32 }
 0xa2f   : > { %8505 = vmatpush.msra.mxu2 %v14261_v3  ;;  %8562 = vmatpush.msra.mxu3 %v14293_v49 }
 0xa30   : > { %8631 = vmatpush.msra.mxu0 %v14680_v31  ;;  %8676 = vmatpush.msra.mxu1 %v14267_v40 }
 0xa31   : > { %8472 = vmatmul.f32.gmra.mxu1 %v14394_v8  ;;  %8508 = vmatpush.msra.mxu2 %v14270_v9  ;;  %v8892_v9 = vld [vmem:[#allocation4 + $0x9] ss:$0 sm:$0xff] }
 0xa32   : > { %8564 = vmatpush.msra.mxu3 %v14305_v29  ;;  %8635 = vmatpush.msra.mxu0 %v14681_v62 }
 0xa33   : > { %8678 = vmatpush.msra.mxu1 %v14278_v20  ;;  %8511 = vmatpush.msra.mxu2 %v14287_v19 }
 0xa34   : > { %8566 = vmatpush.msra.mxu3 %v14321_v63  ;;  %8639 = vmatpush.msra.mxu0 %v14682_v5 }
 0xa35   : > { %8680 = vmatpush.msra.mxu1 %v14293_v49  ;;  %8277 = vmatmul.f32.gmra.mxu2 %v14361_v45 }
 0xa36   : > { %8570 = vmatmul.f32.vlgmr.msra.gmra.mxu3 %v8356_v4  ;;  %8514 = vmatpush.msra.mxu2 %v14296_v57 }
 0xa37   : > { %8643 = vmatpush.msra.mxu0 %v14683_v14  ;;  %8682 = vmatpush.msra.mxu1 %v14305_v29 }
 0xa38   : > { %8645 = vmatmul.f32.vlgmr.msra.gmra.mxu0 %v14367_v23  ;;  %8517 = vmatpush.msra.mxu2 %v14308_v58 }
 0xa39   : > { %8684 = vmatpush.msra.mxu1 %v14321_v63 }
 0xa3a   : > { %8686 = vmatmul.f32.vlgmr.msra.gmra.mxu1 %v14367_v23  ;;  %8520 = vmatpush.msra.mxu2 %v14324_v32 }
 0xa3c   : > { %8523 = vmatpush.msra.mxu2 %v14335_v24 }
 0xa3d   : > { %8526 = vmatmul.f32.vlgmr.msra.gmra.mxu2 %v14378_v22 }
 0xa3e   : > { %8576 = vmatmul.f32.gmra.mxu3 %v8364_v51 }
 0xa40   : > { %8649 = vmatmul.f32.gmra.mxu0 %v14394_v8 }
 0xa42   : > { %8690 = vmatmul.f32.gmra.mxu1 %v14394_v8 }
 0xa45   : > { %8531 = vmatmul.f32.gmra.mxu2 %v8363_v34 }
 0xa8e   : > { %v8155_v46 = vpop.f32.mrf.mxu0 }
 0xa90   : > { %v8199_v40 = vpop.f32.mrf.mxu1 }
 0xa92   : > { %v8097_v27 = vpop.f32.mrf.mxu3 }
 0xa97   : > { %v8160_v20 = vpop.f32.mrf.mxu0 }
 0xa9a   : > { %v7988_v3 = vpop.f32.mrf.mxu2  ;;  %v8205_v57 = vpop.f32.mrf.mxu1 }
 0xa9b   : > { %v8101_v29 = vpop.f32.mrf.mxu3  ;;  %v7989_v49 = vadd.f32 %v8892_v9, %v7988_v3 }
 0xa9d   : > { %v8098_v59 = vadd.f32 %v8097_v27, %v7989_v49 }
 0xa9f   : > { %v8156_v32 = vadd.f32 %v8155_v46, %v8098_v59 }
 0xaa1   : > { %v8360_v24 = vpop.f32.mrf.mxu0  ;;  %v8200_v21 = vadd.f32 %v8199_v40, %v8156_v32 }
 0xaa4   : > { %v7996_v19 = vpop.f32.mrf.mxu2  ;;  %v8469_v28 = vpop.f32.mrf.mxu1 }
 0xaa5   : > { %v8315_v58 = vpop.f32.mrf.mxu3  ;;  %v7997_v63 = vadd.f32 %v8892_v9, %v7996_v19 }
 0xaa7   : > { %v8102_v54 = vadd.f32 %v8101_v29, %v7997_v63 }
 0xaa9   : > { %v8161_v48 = vadd.f32 %v8160_v20, %v8102_v54 }
 0xaab   : > { %v8368_v6 = vpop.f32.mrf.mxu0  ;;  %v8206_v38 = vadd.f32 %v8205_v57, %v8161_v48 }
 0xaae   : > { %v8274_v53 = vpop.f32.mrf.mxu2  ;;  %v8473_v18 = vpop.f32.mrf.mxu1 }
 0xaaf   : > { %v8275_v30 = vadd.f32 %v8274_v53, %v8200_v21  ;;  %v8319_v7 = vpop.f32.mrf.mxu3 }
 0xab1   : > { %v8316_v47 = vadd.f32 %v8315_v58, %v8275_v30 }
 0xab3   : > { %v8361_v36 = vadd.f32 %v8360_v24, %v8316_v47 }
 0xab5   : > { %v8470_v39 = vadd.f32 %v8469_v28, %v8361_v36  ;;  %v8646_v42 = vpop.f32.mrf.mxu0 }
 0xab7   : > { %v8687_v2 = vpop.f32.mrf.mxu1 }
 0xab8   : > { %v8278_v52 = vpop.f32.mrf.mxu2 }
 0xab9   : > { %v8279_v44 = vadd.f32 %v8278_v52, %v8206_v38  ;;  %v8571_v45 = vpop.f32.mrf.mxu3 }
 0xabb   : > { %v8320_v12 = vadd.f32 %v8319_v7, %v8279_v44 }
 0xabd   : > { %v8369_v41 = vadd.f32 %v8368_v6, %v8320_v12  ;;  %v8650_v50 = vpop.f32.mrf.mxu0 }
 0xabf   : > { %v8474_v55 = vadd.f32 %v8473_v18, %v8369_v41  ;;  %v8691_v60 = vpop.f32.mrf.mxu1 }
 0xac0   : > { %v8527_v33 = vpop.f32.mrf.mxu2 }
 0xac1   : > { %v8528_v23 = vadd.f32 %v8527_v33, %v8470_v39  ;;  %v8577_v8 = vpop.f32.mrf.mxu3 }
 0xac3   : > { %v8572_v43 = vadd.f32 %v8571_v45, %v8528_v23 }
 0xac5   : > { %v8647_v22 = vadd.f32 %v8646_v42, %v8572_v43 }
 0xac7   : > { %v8688_v11 = vadd.f32 %v8687_v2, %v8647_v22 }
 0xac8   : > { %v8532_v4 = vpop.f32.mrf.mxu2 }
 0xac9   : > { %v8694_v13 = vmul.f32 %v8688_v11, %v10059_v26  ;;  %v8533_v0 = vadd.f32 %v8532_v4, %v8474_v55 }
 0xacb   : > { %8696 = vst [vmem:[%s284_s27] sm:$0xff] %v8694_v13  ;;  %v8578_v17 = vadd.f32 %v8577_v8, %v8533_v0 }
 0xacd   : > { %v8651_v35 = vadd.f32 %v8650_v50, %v8578_v17 }
 0xacf   : > { %v8692_v34 = vadd.f32 %v8691_v60, %v8651_v35 }
 0xad1   : > { %v8695_v1 = vmul.f32 %v8692_v34, %v10068_v25 }
 0xad3   : > { %8697 = vst [vmem:[%s284_s27 + $0x8] sm:$0xff] %v8695_v1 }
 0xad4 PF: > { %s18_s18 = sadd.s32 1, %s8997_s18  }
 0xad5   : > { %p15_p7 = scmp.ge.s32.totalorder %s18_s18, 4  }
 0xad7   :  { %17 = sbr.rel (!%p15_p7) target bundleno = 2 (0x2), region = 91 }
 0xadc   :  { %8737 = vsyncpa [#allocation3], 1 }
 0xadd   :  { %8739 = vsyncpa [#allocation3 + $0x1], 1 }
 0xade   :  { %8740 = vsyncpa [#allocation5], 1 }

</bundles_post_ra>
